<compile_context>
chip_gen: v5e
topology: v5e:2x2
jax: 0.10.0
libtpu: 0.0.40
codegen_flags: <defaults>
</compile_context>

<pallas_src>
import jax
import jax.numpy as jnp
from jax.experimental import pallas as pl
from jax.experimental.pallas import tpu as pltpu


# ----------------------------------------------------------------------------
# Kernel helpers
# ----------------------------------------------------------------------------
def _zero_border(pad_ref):
    """Zero the 1-pixel spatial border of a (Hp, Wp, C) VMEM scratch."""
    hp, wp, c = pad_ref.shape
    pad_ref[0:1, :, :] = jnp.zeros((1, wp, c), pad_ref.dtype)
    pad_ref[hp - 1:hp, :, :] = jnp.zeros((1, wp, c), pad_ref.dtype)
    pad_ref[:, 0:1, :] = jnp.zeros((hp, 1, c), pad_ref.dtype)
    pad_ref[:, wp - 1:wp, :] = jnp.zeros((hp, 1, c), pad_ref.dtype)


def _conv3x3_taps(xpad, h, w):
    """im2col for a 3x3 'same' conv: (Hp, Wp, C) -> (H*W, 9*C), tap-major K."""
    c = xpad.shape[-1]
    taps = [xpad[ky:ky + h, kx:kx + w, :].reshape(h * w, c)
            for ky in range(3) for kx in range(3)]
    # TODO(synk): the kx = +/-1 shifts could use pltpu.roll (XLU slot has
    # slack) instead of unaligned sublane slices once shapes justify it.
    return jnp.concatenate(taps, axis=-1)


# ----------------------------------------------------------------------------
# Fused Pallas kernel: pad -> cv1 (conv+BN+SiLU) -> cv2 (conv+BN+SiLU) -> +x
# ----------------------------------------------------------------------------
def _make_bottleneck_kernel(add):
    def kernel(x_ref, w1_ref, s1_ref, b1_ref, w2_ref, s2_ref, b2_ref,
               o_ref, xp_ref, yp_ref):
        # x_ref : (1, H, W, C1)  f32   unpadded NHWC input block (one image)
        # w1_ref: (9*C1, C_)     bf16  cv1 weights, tap-major along K
        # s1/b1 : (1, C_)        f32   eval-mode folded BN scale / bias (cv1)
        # w2_ref: (9*C_, C2)     bf16  cv2 weights
        # s2/b2 : (1, C2)        f32
        # o_ref : (1, H, W, C2)  f32   output block
        # xp_ref: (H+2, W+2, C1) bf16  VMEM scratch: zero-padded input
        # yp_ref: (H+2, W+2, C_) bf16  VMEM scratch: zero-padded intermediate
        h, w, _ = x_ref.shape[1], x_ref.shape[2], x_ref.shape[3]
        c_mid = yp_ref.shape[2]
        c2 = o_ref.shape[3]

        x = x_ref[0]                                   # (H, W, C1) f32

        # In-kernel 'same' padding: zero border (cheap), fill interior once,
        # casting the activations to bf16 exactly once.
        _zero_border(xp_ref)
        xp_ref[1:1 + h, 1:1 + w, :] = x.astype(jnp.bfloat16)

        # --- cv1: ONE (HW, 9*C1) x (9*C1, C_) bf16 MXU matmul + BN + SiLU ----
        p1 = _conv3x3_taps(xp_ref[...], h, w)          # (HW, 9*C1) bf16
        y = jnp.dot(p1, w1_ref[...], preferred_element_type=jnp.float32)
        y = y * s1_ref[...] + b1_ref[...]              # folded BN (eval), f32
        y = y * jax.nn.sigmoid(y)                      # SiLU, f32

        # Intermediate never leaves VMEM; stored padded + bf16 for cv2's taps.
        _zero_border(yp_ref)
        yp_ref[1:1 + h, 1:1 + w, :] = y.reshape(h, w, c_mid).astype(jnp.bfloat16)

        # --- cv2: ONE (HW, 9*C_) x (9*C_, C2) bf16 MXU matmul + BN + SiLU ----
        p2 = _conv3x3_taps(yp_ref[...], h, w)          # (HW, 9*C_) bf16
        z = jnp.dot(p2, w2_ref[...], preferred_element_type=jnp.float32)
        z = z * s2_ref[...] + b2_ref[...]
        z = z * jax.nn.sigmoid(z)
        z = z.reshape(h, w, c2)

        if add:
            # Residual in (H, W, C) space straight from the aligned unpadded
            # f32 input block (c1 == c2 here): no offset slice, no relayout.
            z = z + x
        o_ref[0] = z.astype(o_ref.dtype)

    return kernel


# ----------------------------------------------------------------------------
# Wrapper
# ----------------------------------------------------------------------------
def bottleneck_forward(x_nchw, params, shortcut=True):
    """Bottleneck.forward: x + cv2(cv1(x)) if (shortcut and c1 == c2)."""
    n, c1, h, w = x_nchw.shape
    c_mid = params["w1"].shape[-1]
    c2 = params["w2"].shape[-1]
    add = bool(shortcut) and (c1 == c2)     # faithful to the PyTorch module
    hp, wp = h + 2, w + 2

    # NCHW (torch contract) -> NHWC for the conv pipeline (see TODO at top).
    x = jnp.transpose(x_nchw, (0, 2, 3, 1)).astype(jnp.float32)

    # Weights: HWIO -> (9*Cin, Cout), tap-major K (matches in-kernel im2col).
    w1m = params["w1"].reshape(9 * c1, c_mid).astype(jnp.bfloat16)
    w2m = params["w2"].reshape(9 * c_mid, c2).astype(jnp.bfloat16)
    s1 = params["s1"].reshape(1, c_mid).astype(jnp.float32)
    b1 = params["b1"].reshape(1, c_mid).astype(jnp.float32)
    s2 = params["s2"].reshape(1, c2).astype(jnp.float32)
    b2 = params["b2"].reshape(1, c2).astype(jnp.float32)

    out = pl.pallas_call(
        _make_bottleneck_kernel(add),
        out_shape=jax.ShapeDtypeStruct((n, h, w, c2), jnp.float32),
        grid=(n,),
        in_specs=[
            pl.BlockSpec((1, h, w, c1), lambda i: (i, 0, 0, 0)),
            pl.BlockSpec((9 * c1, c_mid), lambda i: (0, 0)),
            pl.BlockSpec((1, c_mid), lambda i: (0, 0)),
            pl.BlockSpec((1, c_mid), lambda i: (0, 0)),
            pl.BlockSpec((9 * c_mid, c2), lambda i: (0, 0)),
            pl.BlockSpec((1, c2), lambda i: (0, 0)),
            pl.BlockSpec((1, c2), lambda i: (0, 0)),
        ],
        out_specs=pl.BlockSpec((1, h, w, c2), lambda i: (i, 0, 0, 0)),
        scratch_shapes=[pltpu.VMEM((hp, wp, c1), jnp.bfloat16),
                        pltpu.VMEM((hp, wp, c_mid), jnp.bfloat16)],
        compiler_params=pltpu.CompilerParams(
            dimension_semantics=("parallel",),
            # Tiny tiles here; raise toward ~96 MiB on v5e/v6e (128 MiB VMEM)
            # and keep <= ~48 MiB on v7x (64 MiB VMEM) for large feature maps.
            vmem_limit_bytes=32 * 1024 * 1024),
    )(x, w1m, s1, b1, w2m, s2, b2)

    return jnp.transpose(out, (0, 3, 1, 2))             # NHWC -> NCHW


# ----------------------------------------------------------------------------
# Pure-JAX reference with the SAME numerical contract as the kernel:
# bf16 matmul operands, f32 accumulation (default single-pass MXU precision),
# f32 BN/SiLU/residual.
# ----------------------------------------------------------------------------
def _ref_conv_block(x_nhwc, w_hwio, scale, bias):
    y = jax.lax.conv_general_dilated(
        x_nhwc.astype(jnp.bfloat16), w_hwio.astype(jnp.bfloat16),
        window_strides=(1, 1), padding="SAME",
        dimension_numbers=("NHWC", "HWIO", "NHWC"),
        preferred_element_type=jnp.float32)
    y = y * scale + bias
    return y * jax.nn.sigmoid(y)


def bottleneck_ref(x_nchw, params, shortcut=True):
    c1 = x_nchw.shape[1]
    c2 = params["w2"].shape[-1]
    x = jnp.transpose(x_nchw, (0, 2, 3, 1))
    y = _ref_conv_block(x, params["w1"], params["s1"], params["b1"])
    z = _ref_conv_block(y, params["w2"], params["s2"], params["b2"])
    if shortcut and c1 == c2:
        z = x + z
    return jnp.transpose(z, (0, 3, 1, 2))


# ----------------------------------------------------------------------------
def _fold_bn(gamma, beta, mean, var, eps=1e-5):
    scale = gamma / jnp.sqrt(var + eps)
    return scale, beta - mean * scale


def make_params(key, c1, c2, e=0.5):
    c_ = int(c2 * e)
    ks = jax.random.split(key, 10)
    # Conv weights in HWIO layout.
    w1 = 0.1 * jax.random.normal(ks[0], (3, 3, c1, c_), jnp.float32)
    w2 = 0.1 * jax.random.normal(ks[1], (3, 3, c_, c2), jnp.float32)
    # BatchNorm params (eval-mode running stats), deterministic, non-trivial.
    g1 = jax.random.uniform(ks[2], (c_,), minval=0.5, maxval=1.5)
    b1 = 0.1 * jax.random.normal(ks[3], (c_,))
    m1 = 0.1 * jax.random.normal(ks[4], (c_,))
    v1 = jax.random.uniform(ks[5], (c_,), minval=0.5, maxval=1.5)
    g2 = jax.random.uniform(ks[6], (c2,), minval=0.5, maxval=1.5)
    b2 = 0.1 * jax.random.normal(ks[7], (c2,))
    m2 = 0.1 * jax.random.normal(ks[8], (c2,))
    v2 = jax.random.uniform(ks[9], (c2,), minval=0.5, maxval=1.5)
    s1, bias1 = _fold_bn(g1, b1, m1, v1)
    s2, bias2 = _fold_bn(g2, b2, m2, v2)
    return {"w1": w1, "s1": s1, "b1": bias1,
            "w2": w2, "s2": s2, "b2": bias2}


if __name__ == "__main__":
    key = jax.random.PRNGKey(0)
    k_x, k_p = jax.random.split(key)

    N, C1, C2, H, W = 2, 8, 8, 16, 16        # c1 == c2 -> shortcut add active
    x = jax.random.normal(k_x, (N, C1, H, W), jnp.float32)   # NCHW like torch
    params = make_params(k_p, C1, C2)

    out = jax.block_until_ready(bottleneck_forward(x, params))
    ref = jax.block_until_ready(bottleneck_ref(x, params))

    assert out.shape == (N, C2, H, W), out.shape
    err = float(jnp.max(jnp.abs(out - ref)))
    assert jnp.allclose(out, ref, rtol=1e-2, atol=1e-2), err

    print("KERNEL_OK")
</pallas_src>

<mosaic_0001>
module attributes {stable_mosaic.version = 11 : i64} {
  func.func @kernel(%arg0: i32, %arg1: memref<1x16x16x8xf32, #tpu.memory_space<vmem>>, %arg2: memref<72x4xbf16, #tpu.memory_space<vmem>>, %arg3: memref<1x4xf32, #tpu.memory_space<vmem>>, %arg4: memref<1x4xf32, #tpu.memory_space<vmem>>, %arg5: memref<36x8xbf16, #tpu.memory_space<vmem>>, %arg6: memref<1x8xf32, #tpu.memory_space<vmem>>, %arg7: memref<1x8xf32, #tpu.memory_space<vmem>>, %arg8: memref<1x16x16x8xf32, #tpu.memory_space<vmem>>, %arg9: memref<18x18x8xbf16, #tpu.memory_space<vmem>>, %arg10: memref<18x18x4xbf16, #tpu.memory_space<vmem>>) attributes {dimension_semantics = [#tpu.dimension_semantics<parallel>], iteration_bounds = array<i64: 2>, scalar_prefetch = 0 : i64, scratch_operands = 2 : i64, tpu.core_type = #tpu.core_type<tc>, window_params = [{transform_indices = @transform_0, window_bounds = array<i64: 1, 16, 16, 8>}, {pipeline_mode = #tpu.pipeline_mode<synchronous>, transform_indices = @transform_1, window_bounds = array<i64: 72, 4>}, {pipeline_mode = #tpu.pipeline_mode<synchronous>, transform_indices = @transform_2, window_bounds = array<i64: 1, 4>}, {pipeline_mode = #tpu.pipeline_mode<synchronous>, transform_indices = @transform_3, window_bounds = array<i64: 1, 4>}, {pipeline_mode = #tpu.pipeline_mode<synchronous>, transform_indices = @transform_4, window_bounds = array<i64: 36, 8>}, {pipeline_mode = #tpu.pipeline_mode<synchronous>, transform_indices = @transform_5, window_bounds = array<i64: 1, 8>}, {pipeline_mode = #tpu.pipeline_mode<synchronous>, transform_indices = @transform_6, window_bounds = array<i64: 1, 8>}, {transform_indices = @transform_7, window_bounds = array<i64: 1, 16, 16, 8>}]} {
    %c0 = arith.constant 0 : index
    %c0_0 = arith.constant 0 : index
    %c0_1 = arith.constant 0 : index
    %c0_2 = arith.constant 0 : index
    %0 = vector.load %arg1[%c0, %c0_0, %c0_1, %c0_2] : memref<1x16x16x8xf32, #tpu.memory_space<vmem>>, vector<1x16x16x8xf32>
    %1 = vector.shape_cast %0 : vector<1x16x16x8xf32> to vector<16x16x8xf32>
    %cst = arith.constant 0.000000e+00 : bf16
    %2 = vector.broadcast %cst : bf16 to vector<1x18x8xbf16>
    %c0_3 = arith.constant 0 : index
    %c0_4 = arith.constant 0 : index
    %c0_5 = arith.constant 0 : index
    %3 = vector.load %arg9[%c0_3, %c0_4, %c0_5] : memref<18x18x8xbf16, #tpu.memory_space<vmem>>, vector<1x18x8xbf16>
    tpu.vector_store %arg9[%c0_3, %c0_4, %c0_5], %2 {strides = array<i32>} : memref<18x18x8xbf16, #tpu.memory_space<vmem>>, vector<1x18x8xbf16>,
    %cst_6 = arith.constant 0.000000e+00 : bf16
    %4 = vector.broadcast %cst_6 : bf16 to vector<1x18x8xbf16>
    %c17 = arith.constant 17 : index
    %c0_7 = arith.constant 0 : index
    %c0_8 = arith.constant 0 : index
    %5 = vector.load %arg9[%c17, %c0_7, %c0_8] : memref<18x18x8xbf16, #tpu.memory_space<vmem>>, vector<1x18x8xbf16>
    tpu.vector_store %arg9[%c17, %c0_7, %c0_8], %4 {strides = array<i32>} : memref<18x18x8xbf16, #tpu.memory_space<vmem>>, vector<1x18x8xbf16>,
    %cst_9 = arith.constant 0.000000e+00 : bf16
    %6 = vector.broadcast %cst_9 : bf16 to vector<18x1x8xbf16>
    %c0_10 = arith.constant 0 : index
    %c0_11 = arith.constant 0 : index
    %c0_12 = arith.constant 0 : index
    %7 = vector.load %arg9[%c0_10, %c0_11, %c0_12] : memref<18x18x8xbf16, #tpu.memory_space<vmem>>, vector<18x1x8xbf16>
    tpu.vector_store %arg9[%c0_10, %c0_11, %c0_12], %6 {strides = array<i32>} : memref<18x18x8xbf16, #tpu.memory_space<vmem>>, vector<18x1x8xbf16>,
    %cst_13 = arith.constant 0.000000e+00 : bf16
    %8 = vector.broadcast %cst_13 : bf16 to vector<18x1x8xbf16>
    %c0_14 = arith.constant 0 : index
    %c17_15 = arith.constant 17 : index
    %c0_16 = arith.constant 0 : index
    %9 = vector.load %arg9[%c0_14, %c17_15, %c0_16] : memref<18x18x8xbf16, #tpu.memory_space<vmem>>, vector<18x1x8xbf16>
    tpu.vector_store %arg9[%c0_14, %c17_15, %c0_16], %8 {strides = array<i32>} : memref<18x18x8xbf16, #tpu.memory_space<vmem>>, vector<18x1x8xbf16>,
    %10 = arith.truncf %1 : vector<16x16x8xf32> to vector<16x16x8xbf16>
    %c1 = arith.constant 1 : index
    %c1_17 = arith.constant 1 : index
    %c0_18 = arith.constant 0 : index
    %11 = vector.load %arg9[%c1, %c1_17, %c0_18] : memref<18x18x8xbf16, #tpu.memory_space<vmem>>, vector<16x16x8xbf16>
    tpu.vector_store %arg9[%c1, %c1_17, %c0_18], %10 {strides = array<i32>} : memref<18x18x8xbf16, #tpu.memory_space<vmem>>, vector<16x16x8xbf16>,
    %c0_19 = arith.constant 0 : index
    %c0_20 = arith.constant 0 : index
    %c0_21 = arith.constant 0 : index
    %12 = vector.load %arg9[%c0_19, %c0_20, %c0_21] : memref<18x18x8xbf16, #tpu.memory_space<vmem>>, vector<18x18x8xbf16>
    %13 = vector.extract_strided_slice %12 {offsets = [0, 0, 0], sizes = [16, 16, 8], strides = [1, 1, 1]} : vector<18x18x8xbf16> to vector<16x16x8xbf16>
    %14 = vector.shape_cast %13 : vector<16x16x8xbf16> to vector<256x8xbf16>
    %15 = vector.extract_strided_slice %12 {offsets = [0, 1, 0], sizes = [16, 16, 8], strides = [1, 1, 1]} : vector<18x18x8xbf16> to vector<16x16x8xbf16>
    %16 = vector.shape_cast %15 : vector<16x16x8xbf16> to vector<256x8xbf16>
    %17 = vector.extract_strided_slice %12 {offsets = [0, 2, 0], sizes = [16, 16, 8], strides = [1, 1, 1]} : vector<18x18x8xbf16> to vector<16x16x8xbf16>
    %18 = vector.shape_cast %17 : vector<16x16x8xbf16> to vector<256x8xbf16>
    %19 = vector.extract_strided_slice %12 {offsets = [1, 0, 0], sizes = [16, 16, 8], strides = [1, 1, 1]} : vector<18x18x8xbf16> to vector<16x16x8xbf16>
    %20 = vector.shape_cast %19 : vector<16x16x8xbf16> to vector<256x8xbf16>
    %21 = vector.extract_strided_slice %12 {offsets = [1, 1, 0], sizes = [16, 16, 8], strides = [1, 1, 1]} : vector<18x18x8xbf16> to vector<16x16x8xbf16>
    %22 = vector.shape_cast %21 : vector<16x16x8xbf16> to vector<256x8xbf16>
    %23 = vector.extract_strided_slice %12 {offsets = [1, 2, 0], sizes = [16, 16, 8], strides = [1, 1, 1]} : vector<18x18x8xbf16> to vector<16x16x8xbf16>
    %24 = vector.shape_cast %23 : vector<16x16x8xbf16> to vector<256x8xbf16>
    %25 = vector.extract_strided_slice %12 {offsets = [2, 0, 0], sizes = [16, 16, 8], strides = [1, 1, 1]} : vector<18x18x8xbf16> to vector<16x16x8xbf16>
    %26 = vector.shape_cast %25 : vector<16x16x8xbf16> to vector<256x8xbf16>
    %27 = vector.extract_strided_slice %12 {offsets = [2, 1, 0], sizes = [16, 16, 8], strides = [1, 1, 1]} : vector<18x18x8xbf16> to vector<16x16x8xbf16>
    %28 = vector.shape_cast %27 : vector<16x16x8xbf16> to vector<256x8xbf16>
    %29 = vector.extract_strided_slice %12 {offsets = [2, 2, 0], sizes = [16, 16, 8], strides = [1, 1, 1]} : vector<18x18x8xbf16> to vector<16x16x8xbf16>
    %30 = vector.shape_cast %29 : vector<16x16x8xbf16> to vector<256x8xbf16>
    %31 = tpu.concatenate %14, %16, %18, %20, %22, %24, %26, %28, %30 in 1 : vector<256x8xbf16>, vector<256x8xbf16>, vector<256x8xbf16>, vector<256x8xbf16>, vector<256x8xbf16>, vector<256x8xbf16>, vector<256x8xbf16>, vector<256x8xbf16>, vector<256x8xbf16> -> vector<256x72xbf16>
    %c0_22 = arith.constant 0 : index
    %c0_23 = arith.constant 0 : index
    %32 = vector.load %arg2[%c0_22, %c0_23] : memref<72x4xbf16, #tpu.memory_space<vmem>>, vector<72x4xbf16>
    %cst_24 = arith.constant dense<0.000000e+00> : vector<256x4xf32>
    %33 = tpu.matmul %31, %32, %cst_24 {dimension_numbers = #tpu.dot_dimension_numbers<[1], [0], [0], [1], [0, 0, 1, 1], [], []>} : vector<256x72xbf16>, vector<72x4xbf16>, vector<256x4xf32> -> vector<256x4xf32>
    %c0_25 = arith.constant 0 : index
    %c0_26 = arith.constant 0 : index
    %34 = vector.load %arg3[%c0_25, %c0_26] : memref<1x4xf32, #tpu.memory_space<vmem>>, vector<1x4xf32>
    %35 = vector.broadcast %34 : vector<1x4xf32> to vector<256x4xf32>
    %36 = arith.mulf %33, %35 : vector<256x4xf32>
    %c0_27 = arith.constant 0 : index
    %c0_28 = arith.constant 0 : index
    %37 = vector.load %arg4[%c0_27, %c0_28] : memref<1x4xf32, #tpu.memory_space<vmem>>, vector<1x4xf32>
    %38 = vector.broadcast %37 : vector<1x4xf32> to vector<256x4xf32>
    %39 = arith.addf %36, %38 : vector<256x4xf32>
    %40 = arith.negf %39 : vector<256x4xf32>
    %41 = math.exp %40 : vector<256x4xf32>
    %cst_29 = arith.constant 1.000000e+00 : f32
    %42 = vector.broadcast %cst_29 : f32 to vector<256x4xf32>
    %43 = arith.addf %42, %41 : vector<256x4xf32>
    %44 = arith.divf %42, %43 : vector<256x4xf32>
    %45 = arith.mulf %39, %44 : vector<256x4xf32>
    %cst_30 = arith.constant 0.000000e+00 : bf16
    %46 = vector.broadcast %cst_30 : bf16 to vector<1x18x4xbf16>
    %c0_31 = arith.constant 0 : index
    %c0_32 = arith.constant 0 : index
    %c0_33 = arith.constant 0 : index
    %47 = vector.load %arg10[%c0_31, %c0_32, %c0_33] : memref<18x18x4xbf16, #tpu.memory_space<vmem>>, vector<1x18x4xbf16>
    tpu.vector_store %arg10[%c0_31, %c0_32, %c0_33], %46 {strides = array<i32>} : memref<18x18x4xbf16, #tpu.memory_space<vmem>>, vector<1x18x4xbf16>,
    %cst_34 = arith.constant 0.000000e+00 : bf16
    %48 = vector.broadcast %cst_34 : bf16 to vector<1x18x4xbf16>
    %c17_35 = arith.constant 17 : index
    %c0_36 = arith.constant 0 : index
    %c0_37 = arith.constant 0 : index
    %49 = vector.load %arg10[%c17_35, %c0_36, %c0_37] : memref<18x18x4xbf16, #tpu.memory_space<vmem>>, vector<1x18x4xbf16>
    tpu.vector_store %arg10[%c17_35, %c0_36, %c0_37], %48 {strides = array<i32>} : memref<18x18x4xbf16, #tpu.memory_space<vmem>>, vector<1x18x4xbf16>,
    %cst_38 = arith.constant 0.000000e+00 : bf16
    %50 = vector.broadcast %cst_38 : bf16 to vector<18x1x4xbf16>
    %c0_39 = arith.constant 0 : index
    %c0_40 = arith.constant 0 : index
    %c0_41 = arith.constant 0 : index
    %51 = vector.load %arg10[%c0_39, %c0_40, %c0_41] : memref<18x18x4xbf16, #tpu.memory_space<vmem>>, vector<18x1x4xbf16>
    tpu.vector_store %arg10[%c0_39, %c0_40, %c0_41], %50 {strides = array<i32>} : memref<18x18x4xbf16, #tpu.memory_space<vmem>>, vector<18x1x4xbf16>,
    %cst_42 = arith.constant 0.000000e+00 : bf16
    %52 = vector.broadcast %cst_42 : bf16 to vector<18x1x4xbf16>
    %c0_43 = arith.constant 0 : index
    %c17_44 = arith.constant 17 : index
    %c0_45 = arith.constant 0 : index
    %53 = vector.load %arg10[%c0_43, %c17_44, %c0_45] : memref<18x18x4xbf16, #tpu.memory_space<vmem>>, vector<18x1x4xbf16>
    tpu.vector_store %arg10[%c0_43, %c17_44, %c0_45], %52 {strides = array<i32>} : memref<18x18x4xbf16, #tpu.memory_space<vmem>>, vector<18x1x4xbf16>,
    %54 = vector.shape_cast %45 : vector<256x4xf32> to vector<16x16x4xf32>
    %55 = arith.truncf %54 : vector<16x16x4xf32> to vector<16x16x4xbf16>
    %c1_46 = arith.constant 1 : index
    %c1_47 = arith.constant 1 : index
    %c0_48 = arith.constant 0 : index
    %56 = vector.load %arg10[%c1_46, %c1_47, %c0_48] : memref<18x18x4xbf16, #tpu.memory_space<vmem>>, vector<16x16x4xbf16>
    tpu.vector_store %arg10[%c1_46, %c1_47, %c0_48], %55 {strides = array<i32>} : memref<18x18x4xbf16, #tpu.memory_space<vmem>>, vector<16x16x4xbf16>,
    %c0_49 = arith.constant 0 : index
    %c0_50 = arith.constant 0 : index
    %c0_51 = arith.constant 0 : index
    %57 = vector.load %arg10[%c0_49, %c0_50, %c0_51] : memref<18x18x4xbf16, #tpu.memory_space<vmem>>, vector<18x18x4xbf16>
    %58 = vector.extract_strided_slice %57 {offsets = [0, 0, 0], sizes = [16, 16, 4], strides = [1, 1, 1]} : vector<18x18x4xbf16> to vector<16x16x4xbf16>
    %59 = vector.shape_cast %58 : vector<16x16x4xbf16> to vector<256x4xbf16>
    %60 = vector.extract_strided_slice %57 {offsets = [0, 1, 0], sizes = [16, 16, 4], strides = [1, 1, 1]} : vector<18x18x4xbf16> to vector<16x16x4xbf16>
    %61 = vector.shape_cast %60 : vector<16x16x4xbf16> to vector<256x4xbf16>
    %62 = vector.extract_strided_slice %57 {offsets = [0, 2, 0], sizes = [16, 16, 4], strides = [1, 1, 1]} : vector<18x18x4xbf16> to vector<16x16x4xbf16>
    %63 = vector.shape_cast %62 : vector<16x16x4xbf16> to vector<256x4xbf16>
    %64 = vector.extract_strided_slice %57 {offsets = [1, 0, 0], sizes = [16, 16, 4], strides = [1, 1, 1]} : vector<18x18x4xbf16> to vector<16x16x4xbf16>
    %65 = vector.shape_cast %64 : vector<16x16x4xbf16> to vector<256x4xbf16>
    %66 = vector.extract_strided_slice %57 {offsets = [1, 1, 0], sizes = [16, 16, 4], strides = [1, 1, 1]} : vector<18x18x4xbf16> to vector<16x16x4xbf16>
    %67 = vector.shape_cast %66 : vector<16x16x4xbf16> to vector<256x4xbf16>
    %68 = vector.extract_strided_slice %57 {offsets = [1, 2, 0], sizes = [16, 16, 4], strides = [1, 1, 1]} : vector<18x18x4xbf16> to vector<16x16x4xbf16>
    %69 = vector.shape_cast %68 : vector<16x16x4xbf16> to vector<256x4xbf16>
    %70 = vector.extract_strided_slice %57 {offsets = [2, 0, 0], sizes = [16, 16, 4], strides = [1, 1, 1]} : vector<18x18x4xbf16> to vector<16x16x4xbf16>
    %71 = vector.shape_cast %70 : vector<16x16x4xbf16> to vector<256x4xbf16>
    %72 = vector.extract_strided_slice %57 {offsets = [2, 1, 0], sizes = [16, 16, 4], strides = [1, 1, 1]} : vector<18x18x4xbf16> to vector<16x16x4xbf16>
    %73 = vector.shape_cast %72 : vector<16x16x4xbf16> to vector<256x4xbf16>
    %74 = vector.extract_strided_slice %57 {offsets = [2, 2, 0], sizes = [16, 16, 4], strides = [1, 1, 1]} : vector<18x18x4xbf16> to vector<16x16x4xbf16>
    %75 = vector.shape_cast %74 : vector<16x16x4xbf16> to vector<256x4xbf16>
    %76 = tpu.concatenate %59, %61, %63, %65, %67, %69, %71, %73, %75 in 1 : vector<256x4xbf16>, vector<256x4xbf16>, vector<256x4xbf16>, vector<256x4xbf16>, vector<256x4xbf16>, vector<256x4xbf16>, vector<256x4xbf16>, vector<256x4xbf16>, vector<256x4xbf16> -> vector<256x36xbf16>
    %c0_52 = arith.constant 0 : index
    %c0_53 = arith.constant 0 : index
    %77 = vector.load %arg5[%c0_52, %c0_53] : memref<36x8xbf16, #tpu.memory_space<vmem>>, vector<36x8xbf16>
    %cst_54 = arith.constant dense<0.000000e+00> : vector<256x8xf32>
    %78 = tpu.matmul %76, %77, %cst_54 {dimension_numbers = #tpu.dot_dimension_numbers<[1], [0], [0], [1], [0, 0, 1, 1], [], []>} : vector<256x36xbf16>, vector<36x8xbf16>, vector<256x8xf32> -> vector<256x8xf32>
    %c0_55 = arith.constant 0 : index
    %c0_56 = arith.constant 0 : index
    %79 = vector.load %arg6[%c0_55, %c0_56] : memref<1x8xf32, #tpu.memory_space<vmem>>, vector<1x8xf32>
    %80 = vector.broadcast %79 : vector<1x8xf32> to vector<256x8xf32>
    %81 = arith.mulf %78, %80 : vector<256x8xf32>
    %c0_57 = arith.constant 0 : index
    %c0_58 = arith.constant 0 : index
    %82 = vector.load %arg7[%c0_57, %c0_58] : memref<1x8xf32, #tpu.memory_space<vmem>>, vector<1x8xf32>
    %83 = vector.broadcast %82 : vector<1x8xf32> to vector<256x8xf32>
    %84 = arith.addf %81, %83 : vector<256x8xf32>
    %85 = arith.negf %84 : vector<256x8xf32>
    %86 = math.exp %85 : vector<256x8xf32>
    %cst_59 = arith.constant 1.000000e+00 : f32
    %87 = vector.broadcast %cst_59 : f32 to vector<256x8xf32>
    %88 = arith.addf %87, %86 : vector<256x8xf32>
    %89 = arith.divf %87, %88 : vector<256x8xf32>
    %90 = arith.mulf %84, %89 : vector<256x8xf32>
    %91 = vector.shape_cast %90 : vector<256x8xf32> to vector<16x16x8xf32>
    %92 = arith.addf %91, %1 : vector<16x16x8xf32>
    %c0_60 = arith.constant 0 : index
    %c0_61 = arith.constant 0 : index
    %c0_62 = arith.constant 0 : index
    %c0_63 = arith.constant 0 : index
    %93 = vector.load %arg8[%c0_60, %c0_61, %c0_62, %c0_63] : memref<1x16x16x8xf32, #tpu.memory_space<vmem>>, vector<1x16x16x8xf32>
    %94 = vector.shape_cast %93 : vector<1x16x16x8xf32> to vector<16x16x8xf32>
    %95 = vector.shape_cast %92 : vector<16x16x8xf32> to vector<1x16x16x8xf32>
    tpu.vector_store %arg8[%c0_60, %c0_61, %c0_62, %c0_63], %95 {strides = array<i32>} : memref<1x16x16x8xf32, #tpu.memory_space<vmem>>, vector<1x16x16x8xf32>,
    return
  }
  func.func @transform_0(%arg0: i32) -> (i32, i32, i32, i32) {
    %c0_i32 = arith.constant 0 : i32
    %c0_i32_0 = arith.constant 0 : i32
    %c0_i32_1 = arith.constant 0 : i32
    %c0_i32_2 = arith.constant 0 : i32
    return %arg0, %c0_i32, %c0_i32_0, %c0_i32_1 : i32, i32, i32, i32
  }
  func.func @transform_1(%arg0: i32) -> (i32, i32) {
    %c0_i32 = arith.constant 0 : i32
    %c0_i32_0 = arith.constant 0 : i32
    %c0_i32_1 = arith.constant 0 : i32
    return %c0_i32, %c0_i32_0 : i32, i32
  }
  func.func @transform_2(%arg0: i32) -> (i32, i32) {
    %c0_i32 = arith.constant 0 : i32
    %c0_i32_0 = arith.constant 0 : i32
    %c0_i32_1 = arith.constant 0 : i32
    return %c0_i32, %c0_i32_0 : i32, i32
  }
  func.func @transform_3(%arg0: i32) -> (i32, i32) {
    %c0_i32 = arith.constant 0 : i32
    %c0_i32_0 = arith.constant 0 : i32
    %c0_i32_1 = arith.constant 0 : i32
    return %c0_i32, %c0_i32_0 : i32, i32
  }
  func.func @transform_4(%arg0: i32) -> (i32, i32) {
    %c0_i32 = arith.constant 0 : i32
    %c0_i32_0 = arith.constant 0 : i32
    %c0_i32_1 = arith.constant 0 : i32
    return %c0_i32, %c0_i32_0 : i32, i32
  }
  func.func @transform_5(%arg0: i32) -> (i32, i32) {
    %c0_i32 = arith.constant 0 : i32
    %c0_i32_0 = arith.constant 0 : i32
    %c0_i32_1 = arith.constant 0 : i32
    return %c0_i32, %c0_i32_0 : i32, i32
  }
  func.func @transform_6(%arg0: i32) -> (i32, i32) {
    %c0_i32 = arith.constant 0 : i32
    %c0_i32_0 = arith.constant 0 : i32
    %c0_i32_1 = arith.constant 0 : i32
    return %c0_i32, %c0_i32_0 : i32, i32
  }
  func.func @transform_7(%arg0: i32) -> (i32, i32, i32, i32) {
    %c0_i32 = arith.constant 0 : i32
    %c0_i32_0 = arith.constant 0 : i32
    %c0_i32_1 = arith.constant 0 : i32
    %c0_i32_2 = arith.constant 0 : i32
    return %arg0, %c0_i32, %c0_i32_0, %c0_i32_1 : i32, i32, i32, i32
  }
}

</mosaic_0001>

<bundles_post_ra>
// kernel: tpu_custom_call.1
= control target key start
LH: loop header
LB: loop body
LE: loop exit
PB: predicated region body
PF: predicated region fallthrough
CT: control target
= control target key end

     0   :  { %s6842_s24 = smov 0   ;;  %s10565_s0 = inlined_call_operand.vmem [shape: f32[2,16,16,8], index: 0, kind: input, shape index: {}]   ;;  %s10566_s1 = inlined_call_operand.vmem [shape: bf16[72,4], index: 1, kind: input, shape index: {}]   ;;  %s10567_s2 = inlined_call_operand.vmem [shape: f32[1,4], index: 2, kind: input, shape index: {}]   ;;  %s10568_s3 = inlined_call_operand.vmem [shape: f32[1,4], index: 3, kind: input, shape index: {}]   ;;  %s10569_s4 = inlined_call_operand.vmem [shape: bf16[36,8], index: 4, kind: input, shape index: {}]   ;;  %s10570_s5 = inlined_call_operand.vmem [shape: f32[1,8], index: 5, kind: input, shape index: {}]   ;;  %s10571_s6 = inlined_call_operand.vmem [shape: f32[1,8], index: 6, kind: input, shape index: {}]   ;;  %s10572_s7 = inlined_call_operand.vmem [shape: f32[2,16,16,8], index: 7, kind: output, shape index: {}]  }
   0x1 LB: > { %s6071_s25 = sadd.s32 4294967295, %s6787_s24   ;;  %p6075_p0 = scmp.ge.s32.totalorder %s6787_s24, 1  ;;  %s6787_s24 = sphi %s6842_s24, %s17_s24  }
   0x2   : > { %p237_p1 = scmp.lt.s32.totalorder %s6787_s24, 3 }
   0x4   : > { %p238_p2 = pnand %p6075_p0, %p237_p1 }
   0x6   : > { %241 = sbr.rel (%p238_p2) target bundleno = 1394 (0x572), region = 48 }
   0xb   : > { %vm312_vm0 = vcmask 60416   ;;  %vm315_vm1 = vcmask 57344   ;;  %vm322_vm2 = vsmask.f32 256  ;;  %v10573_v0 = vmov 0   ;;  %p269_p3 = scmp.lt.s32.totalorder %s6071_s25, 1 }
   0xc   : > { %313 = vst.msk [vmem:[#allocation2] sm:$0xf] %vm312_vm0, %v10573_v0  ;;  %vm378_vm3 = vsmask.f32 7938  ;;  %vm6856_vm4 = vmand %vm315_vm1, %vm322_vm2  ;;  %v10620_v2 = vmov 0  ;;  %vm10612_vm6 = vcmask 27648  }
   0xd   : > { %314 = vst.msk [vmem:[#allocation2 + $0x4] sm:$0xf] %vm312_vm0, %v10573_v0  ;;  %vm6864_vm5 = vmand %vm315_vm1, %vm378_vm3  ;;  %v336_v3 = vld [vmem:[#allocation2 + $0x30] sm:$0x1]  ;;  %v392_v4 = vld [vmem:[#allocation2 + $0x38] sm:$0x1] }
   0xe   : > { %316 = vst.msk [vmem:[#allocation2 + $0x8] sm:$0x1] %vm315_vm1, %v10573_v0  ;;  %v10621_v2 = vsel %vm6864_vm5, 4294967295, %v10620_v2  ;;  %s10910_s25 = smov (!%p269_p3, %s6071_s25), 1  ;;  %v337_v5 = vsel %vm6856_vm4, 0, %v336_v3  ;;  %v393_v7 = vsel %vm6864_vm5, 0, %v392_v4  ;;  %vm6928_vm11 = vmand %vm312_vm0, %vm378_vm3 }
   0xf   : > { %10622 = vst [vmem:[#allocation4_spill] sm:$0xff] %v10621_v2  ;;  %v330_v6 = vld [vmem:[#allocation2 + $0x18] sm:$0x1]  ;;  %s6382_s26 = sshll.u32 %s10910_s25, 8  ;;  %v386_v8 = vld [vmem:[#allocation2 + $0x20] sm:$0x1] }
  0x10   : > { %318 = vst.msk [vmem:[#allocation2 + $0xcc] sm:$0xf] %vm312_vm0, %v10573_v0  ;;  %s6888_s29 = scalar_lea.vmem %s10565_s0, %s6382_s26  ;;  %vm466_vm7 = vsmask.f32 4368  ;;  %v331_v9 = vsel %vm6856_vm4, 0, %v330_v6  ;;  %v387_v10 = vsel %vm6864_vm5, 0, %v386_v8 }
  0x11   : > { %319 = vst.msk [vmem:[#allocation2 + $0xd0] sm:$0xf] %vm312_vm0, %v10573_v0  ;;  %v286_v12 = vld [vmem:[%s6888_s29 + $0x30] sm:$0xff]  ;;  %v287_v13 = vld [vmem:[%s6888_s29 + $0x38] sm:$0xff]  ;;  %v327_v19 = vld [vmem:[#allocation2 + $0xc] sm:$0x1] }
  0x12   : > { %320 = vst.msk [vmem:[#allocation2 + $0xd4] sm:$0x1] %vm315_vm1, %v10573_v0  ;;  %v440_v16 = vpack.c.bf16 %v286_v12, %v286_v12  ;;  %v441_v17 = vpack.c.bf16 %v287_v13, %v287_v13  ;;  %v282_v18 = vld [vmem:[%s6888_s29 + $0x10] sm:$0xff]  ;;  %vm957_vm8 = vsmask.f32 3328  ;;  %v283_v31 = vld [vmem:[%s6888_s29 + $0x18] sm:$0xff]  ;;  %vm6914_vm10 = vmor %vm322_vm2, %vm466_vm7 }
  0x13   : > { %3148 = vst.msk [vmem:[#allocation3] sm:$0xf] %vm10612_vm6, %v10573_v0  ;;  %v324_v11 = vld [vmem:[#allocation2] sm:$0x1]  ;;  %vm958_vm9 = vsmask.f32 7440  ;;  %v436_v23 = vpack.c.bf16 %v282_v18, %v282_v18  ;;  %v437_v34 = vpack.c.bf16 %v283_v31, %v283_v31 }
  0x14   : > { %3149 = vst.msk [vmem:[#allocation3 + $0x4] sm:$0xf] %vm10612_vm6, %v10573_v0  ;;  %v325_v14 = vsel %vm6856_vm4, 0, %v324_v11  ;;  %v904_v15 = vld [vmem:[#allocation2 + $0x4] sm:$0xf]  ;;  %v520_v25 = vshrl.u32 %v440_v16, 16  ;;  %vm6937_vm12 = vmor %vm957_vm8, %vm958_vm9 }
  0x15   : > { %3153 = vst.msk [vmem:[#allocation3 + $0xcc] sm:$0xf] %vm10612_vm6, %v10573_v0  ;;  %v380_v20 = vld [vmem:[#allocation2 + $0x8] sm:$0x1]  ;;  %v970_v21 = vshll.u32 %v904_v15, 16  ;;  %v974_v22 = vshrl.u32 %v904_v15, 16 }
  0x16   : > { %326 = vst [vmem:[#allocation2] sm:$0x1] %v325_v14  ;;  %v381_v24 = vsel %vm6864_vm5, 0, %v380_v20  ;;  %v523_v26 = vshll.u32 %v440_v16, 16  ;;  %v528_v27 = vshrl.u32 %v441_v17, 16  ;;  %v531_v30 = vshll.u32 %v441_v17, 16 }
  0x17   : > { %3154 = vst.msk [vmem:[#allocation3 + $0xd0] sm:$0xf] %vm10612_vm6, %v10573_v0  ;;  %v6907_v28 = vrot.slane %v970_v21, 5  ;;  %v976_v29 = vrot.slane %v974_v22, 4  ;;  %v522_v32 = vrot.slane %v520_v25, 7  ;;  %v486_v35 = vshrl.u32 %v436_v23, 16 }
  0x18   : > { %382 = vst [vmem:[#allocation2 + $0x8] sm:$0x1] %v381_v24  ;;  %v530_v33 = vrot.slane %v528_v27, 7  ;;  %v280_v36 = vld [vmem:[%s6888_s29] sm:$0xff]  ;;  %v10623_v38 = vmov 0  ;;  %v489_v39 = vshll.u32 %v436_v23, 16 }
  0x19   : > { %338 = vst [vmem:[#allocation2 + $0x30] sm:$0x1] %v337_v5  ;;  %v977_v37 = vor.u32 %v976_v29, %v6907_v28  ;;  %v10624_v38 = vsel %vm6914_vm10, 4294967295, %v10623_v38  ;;  %v281_v40 = vld [vmem:[%s6888_s29 + $0x8] sm:$0xff]  ;;  %v328_v41 = vsel %vm6856_vm4, 0, %v327_v19  ;;  %v434_v42 = vpack.c.bf16 %v280_v36, %v280_v36  ;;  %v288_v43 = vld [vmem:[%s6888_s29 + $0x40] sm:$0xff] }
  0x1a   : > { %394 = vst [vmem:[#allocation2 + $0x38] sm:$0x1] %v393_v7  ;;  %v526_v44 = vrot.slane %v522_v32, 4  ;;  %v533_v45 = vor.u32 %v531_v30, %v530_v33  ;;  %v535_v46 = vrot.slane %v530_v33, 4  ;;  %v383_v47 = vld [vmem:[#allocation2 + $0x14] sm:$0x1]  ;;  %v525_v53 = vor.u32 %v523_v26, %v522_v32 }
  0x1b   : > { %10625 = vst [vmem:[#allocation5_spill] sm:$0xff] %v10624_v38  ;;  %v978_v48 = vrot.slane %v977_v37, 4  ;;  %v488_v49 = vrot.slane %v486_v35, 7  ;;  %v494_v50 = vshrl.u32 %v437_v34, 16  ;;  %v497_v51 = vshll.u32 %v437_v34, 16  ;;  %v289_v23 = vld [vmem:[%s6888_s29 + $0x48] sm:$0xff] }
  0x1c   : > { %332 = vst [vmem:[#allocation2 + $0x18] sm:$0x1] %v331_v9  ;;  %v534_v54 = vsel %vm6914_vm10, %v526_v44, %v533_v45  ;;  %v384_v55 = vsel %vm6864_vm5, 0, %v383_v47  ;;  %v469_v56 = vshrl.u32 %v434_v42, 16  ;;  %v435_v61 = vpack.c.bf16 %v281_v40, %v281_v40  ;;  %v339_v17 = vld [vmem:[#allocation2 + $0x3c] sm:$0x1] }
  0x1d   : > { %388 = vst [vmem:[#allocation2 + $0x20] sm:$0x1] %v387_v10  ;;  %v903_v52 = vld [vmem:[#allocation2] sm:$0xf]  ;;  %v492_v60 = vrot.slane %v488_v49, 4  ;;  %v491_v63 = vor.u32 %v489_v39, %v488_v49  ;;  %v496_v3 = vrot.slane %v494_v50, 7  ;;  %v6933_v5 = vpack.c.bf16 %v288_v43, %v288_v43 }
  0x1e   : > { %329 = vst [vmem:[#allocation2 + $0xc] sm:$0x1] %v328_v41  ;;  %v961_v58 = vshrl.u32 %v903_v52, 16  ;;  %v964_v59 = vshll.u32 %v903_v52, 16  ;;  %v471_v4 = vrot.slane %v469_v56, 7  ;;  %v472_v10 = vshll.u32 %v434_v42, 16 }
  0x1f   : > { %815 = vst.msk [vmem:[#allocation2 + $0x34] sm:$0xf] %vm312_vm0, %v534_v54  ;;  %v905_v62 = vld [vmem:[#allocation2 + $0x8] sm:$0x1]  ;;  %v499_v14 = vor.u32 %v497_v51, %v496_v3  ;;  %v501_v15 = vrot.slane %v496_v3, 4  ;;  %v477_v27 = vshrl.u32 %v435_v61, 16 }
  0x20   : > { %385 = vst [vmem:[#allocation2 + $0x14] sm:$0x1] %v384_v55  ;;  %v963_v6 = vrot.slane %v961_v58, 4  ;;  %v966_v7 = vrot.slane %v964_v59, 5  ;;  %v980_v8 = vshll.u32 %v905_v62, 16  ;;  %v475_v16 = vrot.slane %v471_v4, 4 }
  0x21   : > { %v812_v9 = vld [vmem:[#allocation2 + $0x30] sm:$0xf]  ;;  %v816_v13 = vld [vmem:[#allocation2 + $0x38] sm:$0x1]  ;;  %v474_v22 = vor.u32 %v472_v10, %v471_v4  ;;  %v500_v24 = vsel %vm6914_vm10, %v492_v60, %v499_v14  ;;  %v480_v29 = vshll.u32 %v435_v61, 16  ;;  %v340_v34 = vsel %vm6856_vm4, 0, %v339_v17 }
  0x22   : > { %v813_v12 = vsel %vm6928_vm11, %v525_v53, %v812_v9  ;;  %v967_v18 = vor.u32 %v966_v7, %v963_v6  ;;  %v982_v19 = vrot.slane %v980_v8, 5  ;;  %v817_v20 = vsel %vm6856_vm4, %v535_v46, %v816_v13  ;;  %801 = vst.msk [vmem:[#allocation2 + $0x1c] sm:$0xf] %vm312_vm0, %v500_v24  ;;  %v284_v41 = vld [vmem:[%s6888_s29 + $0x20] sm:$0xff]  ;;  %v285_v61 = vld [vmem:[%s6888_s29 + $0x28] sm:$0xff]  ;;  %s6790_s30 = smov 8  }
  0x23   : > { %814 = vst [vmem:[#allocation2 + $0x30] sm:$0xf] %v813_v12  ;;  %v798_v21 = vld [vmem:[#allocation2 + $0x18] sm:$0xf]  ;;  %v479_v37 = vrot.slane %v477_v27, 7  ;;  %v537_v40 = vshrl.u32 %v6933_v5, 16  ;;  %v6964_v46 = vpack.c.bf16 %v289_v23, %v289_v23  ;;  %v6978_v6 = vpack.c.bf16 %v284_v41, %v284_v41 }
  0x24   : > { %818 = vst [vmem:[#allocation2 + $0x38] sm:$0x1] %v817_v20  ;;  %v799_v25 = vsel %vm6928_vm11, %v491_v63, %v798_v21  ;;  %v802_v26 = vld [vmem:[#allocation2 + $0x20] sm:$0x1]  ;;  %v968_v30 = vrot.slane %v967_v18, 4  ;;  %v983_v31 = vsel %vm6937_vm12, %v978_v48, %v982_v19  ;;  %v540_v54 = vshll.u32 %v6933_v5, 16 }
  0x25   : > { %800 = vst [vmem:[#allocation2 + $0x18] sm:$0xf] %v799_v25  ;;  %v803_v32 = vsel %vm6856_vm4, %v501_v15, %v802_v26  ;;  %v791_v33 = vld [vmem:[#allocation2 + $0xc] sm:$0xf]  ;;  %v1624_v35 = vunpack.c.l.b16 %v983_v31  ;;  %v482_v48 = vor.u32 %v480_v29, %v479_v37  ;;  %v484_v49 = vrot.slane %v479_v37, 4  ;;  %s6791_s8 = smov 16  }
  0x26   : > { %v916_v36 = vld [vmem:[#allocation2 + $0x34] sm:$0xf]  ;;  %v792_v39 = vsel %vm6928_vm11, %v474_v22, %v791_v33  ;;  %v973_v42 = vsel %vm6937_vm12, %v968_v30, %v6907_v28  ;;  %804 = vst [vmem:[#allocation2 + $0x20] sm:$0x1] %v803_v32  ;;  %v395_v50 = vld [vmem:[#allocation2 + $0x44] sm:$0x1]  ;;  %v6985_v10 = vpack.c.bf16 %v285_v61, %v285_v61 }
  0x27   : > { %v1066_v43 = vshll.u32 %v916_v36, 16  ;;  %v1070_v44 = vshrl.u32 %v916_v36, 16  ;;  %v795_v45 = vld [vmem:[#allocation2 + $0x14] sm:$0x1]  ;;  %v1623_v47 = vunpack.c.l.b16 %v973_v42  ;;  %793 = vst [vmem:[#allocation2 + $0xc] sm:$0xf] %v792_v39  ;;  %v483_v58 = vsel %vm6914_vm10, %v475_v16, %v482_v48 }
  0x28   : > { %v6966_v51 = vrot.slane %v537_v40, 7  ;;  %341 = vst [vmem:[#allocation2 + $0x3c] sm:$0x1] %v340_v34  ;;  %v396_v28 = vsel %vm6864_vm5, 0, %v395_v50  ;;  %v796_v59 = vsel %vm6856_vm4, %v484_v49, %v795_v45  ;;  %v545_v9 = vshrl.u32 %v6964_v46, 16  ;;  %s6792_s9 = smov 24  }
  0x29   : > { %v1068_v52 = vrot.slane %v1066_v43, 5  ;;  %v1072_v53 = vrot.slane %v1070_v44, 4  ;;  %v1655_v55 = vpack.c.b16 %v1624_v35, %v1623_v47  ;;  %397 = vst [vmem:[#allocation2 + $0x44] sm:$0x1] %v396_v28  ;;  %v910_v15 = vld [vmem:[#allocation2 + $0x1c] sm:$0xf] }
  0x2a   : > { %v915_v56 = vld [vmem:[#allocation2 + $0x30] sm:$0xf]  ;;  %v543_v60 = vrot.slane %v6966_v51, 4  ;;  %794 = vst.msk [vmem:[#allocation2 + $0x10] sm:$0xf] %vm312_vm0, %v483_v58  ;;  %v6982_v8 = vor.u32 %v540_v54, %v6966_v51  ;;  %v1018_v20 = vshll.u32 %v910_v15, 16 }
  0x2b   : > { %v917_v62 = vld [vmem:[#allocation2 + $0x38] sm:$0x1]  ;;  %v1057_v63 = vshrl.u32 %v915_v56, 16  ;;  %v1060_v3 = vshll.u32 %v915_v56, 16  ;;  %v1073_v4 = vor.u32 %v1072_v53, %v1068_v52  ;;  %1671 = vrot.lane.b32.xlu0 %v1655_v55, %s6790_s30  ;;  %797 = vst [vmem:[#allocation2 + $0x14] sm:$0x1] %v796_v59 }
  0x2c   : > { %v1076_v5 = vshll.u32 %v917_v62, 16  ;;  %v909_v7 = vld [vmem:[#allocation2 + $0x18] sm:$0xf]  ;;  %v1022_v21 = vshrl.u32 %v910_v15, 16  ;;  %v547_v26 = vrot.slane %v545_v9, 7  ;;  %v1020_v30 = vrot.slane %v1018_v20, 5 }
  0x2d   : > { %v1059_v12 = vrot.slane %v1057_v63, 4  ;;  %v1062_v13 = vrot.slane %v1060_v3, 5  ;;  %v1074_v14 = vrot.slane %v1073_v4, 4  ;;  %v1009_v16 = vshrl.u32 %v909_v7, 16  ;;  %v911_v18 = vld [vmem:[#allocation2 + $0x20] sm:$0x1] }
  0x2e   : > { %v1078_v17 = vrot.slane %v1076_v5, 5  ;;  %v1012_v19 = vshll.u32 %v909_v7, 16  ;;  %v1028_v24 = vshll.u32 %v911_v18, 16  ;;  %v906_v25 = vld [vmem:[#allocation2 + $0xc] sm:$0xf]  ;;  %v1024_v31 = vrot.slane %v1022_v21, 4 }
  0x2f   : > { %v1063_v22 = vor.u32 %v1062_v13, %v1059_v12  ;;  %v1011_v23 = vrot.slane %v1009_v16, 4  ;;  %v985_v35 = vshrl.u32 %v906_v25, 16  ;;  %v988_v40 = vshll.u32 %v906_v25, 16  ;;  %v819_v58 = vld [vmem:[#allocation2 + $0x3c] sm:$0xf]  ;;  %s6793_s10 = smov 32  }
  0x30   : > { %v1079_v27 = vsel %vm6937_vm12, %v1074_v14, %v1078_v17  ;;  %v1014_v29 = vrot.slane %v1012_v19, 5  ;;  %v1030_v34 = vrot.slane %v1028_v24, 5  ;;  %v1025_v37 = vor.u32 %v1024_v31, %v1020_v30  ;;  %v333_v62 = vld [vmem:[#allocation2 + $0x24] sm:$0x1]  ;;  %v389_v63 = vld [vmem:[#allocation2 + $0x2c] sm:$0x1] }
  0x31   : > { %v1064_v32 = vrot.slane %v1063_v22, 4  ;;  %v1632_v33 = vunpack.c.l.b16 %v1079_v27  ;;  %v907_v39 = vld [vmem:[#allocation2 + $0x10] sm:$0xf]  ;;  %v548_v41 = vshll.u32 %v6964_v46, 16  ;;  %v987_v44 = vrot.slane %v985_v35, 4  ;;  %s6794_s11 = smov 48  }
  0x32   : > { %v1015_v36 = vor.u32 %v1014_v29, %v1011_v23  ;;  %v908_v43 = vld [vmem:[#allocation2 + $0x14] sm:$0x1]  ;;  %v994_v45 = vshll.u32 %v907_v39, 16  ;;  %v998_v47 = vshrl.u32 %v907_v39, 16  ;;  %v1026_v50 = vrot.slane %v1025_v37, 4  ;;  %s6795_s12 = smov 40  }
  0x33   : > { %v1069_v42 = vsel %vm6937_vm12, %v1064_v32, %v1068_v52  ;;  %v990_v53 = vrot.slane %v988_v40, 5  ;;  %v1004_v55 = vshll.u32 %v908_v43, 16  ;;  %v550_v56 = vor.u32 %v548_v41, %v547_v26  ;;  %v823_v9 = vld [vmem:[#allocation2 + $0x44] sm:$0x1]  ;;  %v342_v12 = vld [vmem:[#allocation2 + $0x48] sm:$0x1] }
  0x34   : > { %v1631_v48 = vunpack.c.l.b16 %v1069_v42  ;;  %v1016_v49 = vrot.slane %v1015_v36, 4  ;;  %v996_v28 = vrot.slane %v994_v45, 5  ;;  %v1000_v54 = vrot.slane %v998_v47, 4  ;;  %v290_v17 = vld [vmem:[%s6888_s29 + $0x50] sm:$0xff]  ;;  %v348_v19 = vld [vmem:[#allocation2 + $0x60] sm:$0x1] }
  0x35   : > { %v1031_v52 = vsel %vm6937_vm12, %v1026_v50, %v1030_v34  ;;  %v991_v61 = vor.u32 %v990_v53, %v987_v44  ;;  %v1006_v7 = vrot.slane %v1004_v55, 5  ;;  %v551_v14 = vsel %vm6914_vm10, %v543_v60, %v550_v56  ;;  %v398_v18 = vld [vmem:[#allocation2 + $0x50] sm:$0x1]  ;;  %v291_v60 = vld [vmem:[%s6888_s29 + $0x58] sm:$0xff]  ;;  %v7015_v23 = vld [vmem:[#allocation2 + $0x68] sm:$0x1] }
  0x36   : > { %v6992_v59 = vpack.c.b16 %v1632_v33, %v1631_v48  ;;  %v1021_v46 = vsel %vm6937_vm12, %v1016_v49, %v1020_v30  ;;  %v1628_v4 = vunpack.c.l.b16 %v1031_v52  ;;  %v1001_v5 = vor.u32 %v1000_v54, %v996_v28  ;;  %822 = vst.msk [vmem:[#allocation2 + $0x40] sm:$0xf] %vm312_vm0, %v551_v14  ;;  %v294_v32 = vld [vmem:[%s6888_s29 + $0x70] sm:$0xff]  ;;  %v295_v36 = vld [vmem:[%s6888_s29 + $0x78] sm:$0xff]  ;;  %v293_v53 = vld [vmem:[%s6888_s29 + $0x68] sm:$0xff]  ;;  %s6796_s13 = smov 64  }
  0x37   : > { %v1627_v3 = vunpack.c.l.b16 %v1021_v46  ;;  %v992_v13 = vrot.slane %v991_v61, 4  ;;  %v552_v15 = vrot.slane %v547_v26, 4  ;;  %v820_v16 = vsel %vm6928_vm11, %v6982_v8, %v819_v58  ;;  %s6797_s14 = smov 56   ;;  %s6799_s15 = smov 12  }
  0x38   : > { %10630 = vst [vmem:[#allocation6_spill] sm:$0xff] %v6992_v59  ;;  %1679 = vrot.lane.b32.xlu2 %v6992_v59, %s6790_s30  ;;  %v1002_v21 = vrot.slane %v1001_v5, 4  ;;  %v334_v22 = vsel %vm6856_vm4, 0, %v333_v62  ;;  %v390_v51 = vsel %vm6864_vm5, 0, %v389_v63  ;;  %v503_v25 = vshrl.u32 %v6978_v6, 16  ;;  %s6800_s16 = smov 20  }
  0x39   : > { %v7008_v20 = vpack.c.b16 %v1628_v4, %v1627_v3  ;;  %821 = vst [vmem:[#allocation2 + $0x3c] sm:$0xf] %v820_v16  ;;  %v997_v8 = vsel %vm6937_vm12, %v992_v13, %v996_v28  ;;  %v824_v24 = vsel %vm6856_vm4, %v552_v15, %v823_v9  ;;  %v506_v26 = vshll.u32 %v6978_v6, 16  ;;  %s6801_s21 = smov 28  }
  0x3a   : > { %v1007_v27 = vsel %vm6937_vm12, %v1002_v21, %v1006_v7  ;;  %v1625_v29 = vunpack.c.l.b16 %v997_v8  ;;  %825 = vst [vmem:[#allocation2 + $0x44] sm:$0x1] %v824_v24  ;;  %v511_v30 = vshrl.u32 %v6985_v10, 16  ;;  %v514_v31 = vshll.u32 %v6985_v10, 16  ;;  %v292_v10 = vld [vmem:[%s6888_s29 + $0x60] sm:$0xff] }
  0x3b   : > { %10631 = vst [vmem:[#allocation7_spill] sm:$0xff] %v7008_v20  ;;  %1675 = vrot.lane.b32.xlu1 %v7008_v20, %s6790_s30  ;;  %v1626_v33 = vunpack.c.l.b16 %v1007_v27  ;;  %v505_v34 = vrot.slane %v503_v25, 7  ;;  %v343_v6 = vsel %vm6856_vm4, 0, %v342_v12  ;;  %v399_v35 = vsel %vm6864_vm5, 0, %v398_v18 }
  0x3c   : > { %335 = vst [vmem:[#allocation2 + $0x24] sm:$0x1] %v334_v22  ;;  %v513_v37 = vrot.slane %v511_v30, 7  ;;  %v444_v39 = vpack.c.bf16 %v290_v17, %v290_v17  ;;  %v445_v40 = vpack.c.bf16 %v291_v60, %v291_v60  ;;  %v349_v41 = vsel %vm6856_vm4, 0, %v348_v19  ;;  %v345_v17 = vld [vmem:[#allocation2 + $0x54] sm:$0x1] }
  0x3d   : > { %391 = vst [vmem:[#allocation2 + $0x2c] sm:$0x1] %v390_v51  ;;  %v7039_v42 = vpack.c.b16 %v1626_v33, %v1625_v29  ;;  %v508_v43 = vor.u32 %v506_v26, %v505_v34  ;;  %v509_v44 = vrot.slane %v505_v34, 4  ;;  %v405_v45 = vsel %vm6864_vm5, 0, %v7015_v23  ;;  %v919_v46 = vld [vmem:[#allocation2 + $0x40] sm:$0xf] }
  0x3e   : > { %344 = vst [vmem:[#allocation2 + $0x48] sm:$0x1] %v343_v6  ;;  %v516_v47 = vor.u32 %v514_v31, %v513_v37  ;;  %v518_v48 = vrot.slane %v513_v37, 4  ;;  %v554_v49 = vshrl.u32 %v444_v39, 16  ;;  %v557_v50 = vshll.u32 %v444_v39, 16 }
  0x3f   : > { %10632 = vst [vmem:[#allocation8_spill] sm:$0xff] %v7039_v42  ;;  %1673 = vrot.lane.b32.xlu0 %v7039_v42, %s6790_s30  ;;  %v562_v54 = vshrl.u32 %v445_v40, 16  ;;  %v565_v55 = vshll.u32 %v445_v40, 16  ;;  %v448_v56 = vpack.c.bf16 %v294_v32, %v294_v32  ;;  %v449_v58 = vpack.c.bf16 %v295_v36, %v295_v36 }
  0x40   : > { %400 = vst [vmem:[#allocation2 + $0x50] sm:$0x1] %v399_v35  ;;  %v918_v28 = vld [vmem:[#allocation2 + $0x3c] sm:$0xf]  ;;  %v517_v62 = vsel %vm6914_vm10, %v509_v44, %v516_v47  ;;  %v556_v63 = vrot.slane %v554_v49, 7  ;;  %v1090_v4 = vshll.u32 %v919_v46, 16  ;;  %v7050_v7 = vpack.c.bf16 %v292_v10, %v292_v10 }
  0x41   : > { %350 = vst [vmem:[#allocation2 + $0x60] sm:$0x1] %v349_v41  ;;  %v1081_v52 = vshrl.u32 %v918_v28, 16  ;;  %v1084_v61 = vshll.u32 %v918_v28, 16  ;;  %v920_v3 = vld [vmem:[#allocation2 + $0x44] sm:$0x1]  ;;  %v7052_v9 = vpack.c.bf16 %v293_v53, %v293_v53 }
  0x42   : > { %v1094_v5 = vshrl.u32 %v919_v46, 16  ;;  %808 = vst.msk [vmem:[#allocation2 + $0x28] sm:$0xf] %vm312_vm0, %v517_v62  ;;  %v1100_v14 = vshll.u32 %v920_v3, 16  ;;  %v559_v16 = vor.u32 %v557_v50, %v556_v63  ;;  %v1092_v18 = vrot.slane %v1090_v4, 5  ;;  %v297_v46 = vld [vmem:[%s6888_s29 + $0x88] sm:$0xff] }
  0x43   : > { %v1083_v12 = vrot.slane %v1081_v52, 4  ;;  %v1086_v13 = vrot.slane %v1084_v61, 5  ;;  %v805_v15 = vld [vmem:[#allocation2 + $0x24] sm:$0xf]  ;;  %v560_v51 = vrot.slane %v556_v63, 4  ;;  %v564_v24 = vrot.slane %v562_v54, 7 }
  0x44   : > { %v1096_v19 = vrot.slane %v1094_v5, 4  ;;  %v806_v21 = vsel %vm6928_vm11, %v508_v43, %v805_v15  ;;  %v809_v22 = vld [vmem:[#allocation2 + $0x2c] sm:$0x1]  ;;  %v1102_v23 = vrot.slane %v1100_v14, 5  ;;  %v588_v30 = vshrl.u32 %v448_v56, 16  ;;  %v300_v15 = vld [vmem:[%s6888_s29 + $0xa0] sm:$0xff] }
  0x45   : > { %v1087_v60 = vor.u32 %v1086_v13, %v1083_v12  ;;  %807 = vst [vmem:[#allocation2 + $0x24] sm:$0xf] %v806_v21  ;;  %v810_v8 = vsel %vm6856_vm4, %v518_v48, %v809_v22  ;;  %v826_v25 = vld [vmem:[#allocation2 + $0x48] sm:$0xf]  ;;  %v591_v31 = vshll.u32 %v448_v56, 16  ;;  %v567_v33 = vor.u32 %v565_v55, %v564_v24 }
  0x46   : > { %v1097_v26 = vor.u32 %v1096_v19, %v1092_v18  ;;  %811 = vst [vmem:[#allocation2 + $0x2c] sm:$0x1] %v810_v8  ;;  %v827_v27 = vsel %vm6928_vm11, %v559_v16, %v826_v25  ;;  %v569_v34 = vrot.slane %v564_v24, 4  ;;  %v596_v6 = vshrl.u32 %v449_v58, 16 }
  0x47   : > { %v830_v29 = vld [vmem:[#allocation2 + $0x50] sm:$0x1]  ;;  %v1088_v32 = vrot.slane %v1087_v60, 4  ;;  %828 = vst [vmem:[#allocation2 + $0x48] sm:$0xf] %v827_v27  ;;  %v590_v36 = vrot.slane %v588_v30, 7  ;;  %v568_v10 = vsel %vm6914_vm10, %v560_v51, %v567_v33  ;;  %v7103_v27 = vpack.c.bf16 %v297_v46, %v297_v46 }
  0x48   : > { %v1098_v35 = vrot.slane %v1097_v26, 4  ;;  %406 = vst [vmem:[#allocation2 + $0x68] sm:$0x1] %v405_v45  ;;  %v599_v37 = vshll.u32 %v449_v58, 16  ;;  %v346_v39 = vsel %vm6856_vm4, 0, %v345_v17  ;;  %v831_v43 = vsel %vm6856_vm4, %v569_v34, %v830_v29  ;;  %v296_v58 = vld [vmem:[%s6888_s29 + $0x80] sm:$0xff] }
  0x49   : > { %v1093_v40 = vsel %vm6937_vm12, %v1088_v32, %v1092_v18  ;;  %v7064_v41 = vld [vmem:[#allocation2 + $0x28] sm:$0xf]  ;;  %v598_v44 = vrot.slane %v596_v6, 7  ;;  %v401_v45 = vld [vmem:[#allocation2 + $0x5c] sm:$0x1]  ;;  %v593_v28 = vor.u32 %v591_v31, %v590_v36  ;;  %v594_v54 = vrot.slane %v590_v36, 4 }
  0x4a   : > { %v1103_v47 = vsel %vm6937_vm12, %v1098_v35, %v1102_v23  ;;  %v1633_v48 = vunpack.c.l.b16 %v1093_v40  ;;  %v1042_v49 = vshll.u32 %v7064_v41, 16  ;;  %v1046_v50 = vshrl.u32 %v7064_v41, 16  ;;  %829 = vst.msk [vmem:[#allocation2 + $0x4c] sm:$0xf] %vm312_vm0, %v568_v10  ;;  %v840_v56 = vld [vmem:[#allocation2 + $0x60] sm:$0xf] }
  0x4b   : > { %v1634_v53 = vunpack.c.l.b16 %v1103_v47  ;;  %832 = vst [vmem:[#allocation2 + $0x50] sm:$0x1] %v831_v43  ;;  %v601_v55 = vor.u32 %v599_v37, %v598_v44  ;;  %v603_v63 = vrot.slane %v598_v44, 4  ;;  %v402_v3 = vsel %vm6864_vm5, 0, %v401_v45 }
  0x4c   : > { %v7077_v52 = vld [vmem:[#allocation2 + $0x24] sm:$0xf]  ;;  %v1044_v61 = vrot.slane %v1042_v49, 5  ;;  %v1048_v62 = vrot.slane %v1046_v50, 4  ;;  %347 = vst [vmem:[#allocation2 + $0x54] sm:$0x1] %v346_v39  ;;  %v841_v19 = vsel %vm6928_vm11, %v593_v28, %v840_v56  ;;  %v7101_v26 = vpack.c.bf16 %v296_v58, %v296_v58 }
  0x4d   : > { %v7081_v4 = vpack.c.b16 %v1634_v53, %v1633_v48  ;;  %v7083_v5 = vld [vmem:[#allocation2 + $0x2c] sm:$0x1]  ;;  %v1033_v12 = vshrl.u32 %v7077_v52, 16  ;;  %v1036_v13 = vshll.u32 %v7077_v52, 16  ;;  %v602_v14 = vsel %vm6914_vm10, %v594_v54, %v601_v55  ;;  %842 = vst [vmem:[#allocation2 + $0x60] sm:$0xf] %v841_v19 }
  0x4e   : > { %v1049_v16 = vor.u32 %v1048_v62, %v1044_v61  ;;  %v1052_v17 = vshll.u32 %v7083_v5, 16  ;;  %v7091_v18 = vld [vmem:[#allocation2 + $0x48] sm:$0xf]  ;;  %843 = vst.msk [vmem:[#allocation2 + $0x64] sm:$0xf] %vm312_vm0, %v602_v14  ;;  %v571_v21 = vshrl.u32 %v7050_v7, 16  ;;  %v7115_v37 = vpack.c.bf16 %v300_v15, %v300_v15 }
  0x4f   : > { %10633 = vst [vmem:[#allocation9_spill] sm:$0xff] %v7081_v4  ;;  %1681 = vrot.lane.b32.xlu2 %v7081_v4, %s6790_s30  ;;  %v1035_v22 = vrot.slane %v1033_v12, 4  ;;  %v1038_v51 = vrot.slane %v1036_v13, 5  ;;  %v1105_v60 = vshrl.u32 %v7091_v18, 16  ;;  %v1108_v23 = vshll.u32 %v7091_v18, 16 }
  0x50   : > { %v1050_v8 = vrot.slane %v1049_v16, 4  ;;  %v1054_v24 = vrot.slane %v1052_v17, 5  ;;  %v844_v25 = vld [vmem:[#allocation2 + $0x68] sm:$0x1]  ;;  %403 = vst [vmem:[#allocation2 + $0x5c] sm:$0x1] %v402_v3 }
  0x51   : > { %v1039_v29 = vor.u32 %v1038_v51, %v1035_v22  ;;  %v7105_v30 = vld [vmem:[#allocation2 + $0x4c] sm:$0xf]  ;;  %v1107_v31 = vrot.slane %v1105_v60, 4  ;;  %v1110_v32 = vrot.slane %v1108_v23, 5  ;;  %v845_v33 = vsel %vm6856_vm4, %v603_v63, %v844_v25 }
  0x52   : > { %v1055_v34 = vsel %vm6937_vm12, %v1050_v8, %v1054_v24  ;;  %v7111_v6 = vld [vmem:[#allocation2 + $0x50] sm:$0x1]  ;;  %v1114_v35 = vshll.u32 %v7105_v30, 16  ;;  %v1118_v36 = vshrl.u32 %v7105_v30, 16  ;;  %846 = vst [vmem:[#allocation2 + $0x68] sm:$0x1] %v845_v33 }
  0x53   : > { %v1040_v39 = vrot.slane %v1039_v29, 4  ;;  %v1630_v40 = vunpack.c.l.b16 %v1055_v34  ;;  %v1111_v10 = vor.u32 %v1110_v32, %v1107_v31  ;;  %v1124_v43 = vshll.u32 %v7111_v6, 16  ;;  %v833_v16 = vld [vmem:[#allocation2 + $0x54] sm:$0xf]  ;;  %v351_v17 = vld [vmem:[#allocation2 + $0x6c] sm:$0x1] }
  0x54   : > { %v1116_v44 = vrot.slane %v1114_v35, 5  ;;  %v1120_v45 = vrot.slane %v1118_v36, 4  ;;  %v573_v47 = vrot.slane %v571_v21, 7  ;;  %v574_v48 = vshll.u32 %v7050_v7, 16  ;;  %v7124_v58 = vld [vmem:[#allocation2 + $0x60] sm:$0xf] }
  0x55   : > { %v1045_v49 = vsel %vm6937_vm12, %v1040_v39, %v1044_v61  ;;  %v1112_v50 = vrot.slane %v1111_v10, 4  ;;  %v1126_v53 = vrot.slane %v1124_v43, 5  ;;  %v7121_v28 = vld [vmem:[#allocation2 + $0x64] sm:$0xf]  ;;  %v579_v54 = vshrl.u32 %v7052_v9, 16 }
  0x56   : > { %v1629_v55 = vunpack.c.l.b16 %v1045_v49  ;;  %v1121_v56 = vor.u32 %v1120_v45, %v1116_v44  ;;  %v1162_v46 = vshll.u32 %v7121_v28, 16  ;;  %v1166_v62 = vshrl.u32 %v7121_v28, 16  ;;  %v407_v29 = vld [vmem:[#allocation2 + $0x74] sm:$0x1]  ;;  %v357_v36 = vld [vmem:[#allocation2 + $0x84] sm:$0x1] }
  0x57   : > { %v1117_v7 = vsel %vm6937_vm12, %v1112_v50, %v1116_v44  ;;  %v1153_v63 = vshrl.u32 %v7124_v58, 16  ;;  %v1156_v61 = vshll.u32 %v7124_v58, 16  ;;  %v576_v3 = vor.u32 %v574_v48, %v573_v47  ;;  %v837_v35 = vld [vmem:[#allocation2 + $0x5c] sm:$0x1]  ;;  %v301_v48 = vld [vmem:[%s6888_s29 + $0xa8] sm:$0xff] }
  0x58   : > { %v7132_v12 = vpack.c.b16 %v1630_v40, %v1629_v55  ;;  %v1122_v13 = vrot.slane %v1121_v56, 4  ;;  %v1635_v14 = vunpack.c.l.b16 %v1117_v7  ;;  %v1164_v15 = vrot.slane %v1162_v46, 5  ;;  %v413_v55 = vld [vmem:[#allocation2 + $0x8c] sm:$0x1] }
  0x59   : > { %v7134_v19 = vld [vmem:[#allocation2 + $0x68] sm:$0x1]  ;;  %v1155_v21 = vrot.slane %v1153_v63, 4  ;;  %v1158_v22 = vrot.slane %v1156_v61, 5  ;;  %v1168_v51 = vrot.slane %v1166_v62, 4  ;;  %v577_v60 = vrot.slane %v573_v47, 4 }
  0x5a   : > { %10634 = vst [vmem:[#allocation10_spill] sm:$0xff] %v7132_v12  ;;  %1677 = vrot.lane.b32.xlu1 %v7132_v12, %s6790_s30  ;;  %v1127_v23 = vsel %vm6937_vm12, %v1122_v13, %v1126_v53  ;;  %v1172_v8 = vshll.u32 %v7134_v19, 16  ;;  %v581_v24 = vrot.slane %v579_v54, 7  ;;  %v582_v25 = vshll.u32 %v7052_v9, 16  ;;  %v354_v13 = vld [vmem:[#allocation2 + $0x78] sm:$0x1] }
  0x5b   : > { %v1636_v31 = vunpack.c.l.b16 %v1127_v23  ;;  %v1159_v32 = vor.u32 %v1158_v22, %v1155_v21  ;;  %v1169_v33 = vor.u32 %v1168_v51, %v1164_v15  ;;  %v834_v34 = vsel %vm6928_vm11, %v576_v3, %v833_v16  ;;  %v299_v23 = vld [vmem:[%s6888_s29 + $0x98] sm:$0xff] }
  0x5c   : > { %v1174_v39 = vrot.slane %v1172_v8, 5  ;;  %v584_v40 = vor.u32 %v582_v25, %v581_v24  ;;  %v586_v10 = vrot.slane %v581_v24, 4  ;;  %835 = vst [vmem:[#allocation2 + $0x54] sm:$0xf] %v834_v34  ;;  %v352_v43 = vsel %vm6856_vm4, 0, %v351_v17 }
  0x5d   : > { %v7146_v44 = vpack.c.b16 %v1636_v31, %v1635_v14  ;;  %v1160_v9 = vrot.slane %v1159_v32, 4  ;;  %v1170_v45 = vrot.slane %v1169_v33, 4  ;;  %353 = vst [vmem:[#allocation2 + $0x6c] sm:$0x1] %v352_v43  ;;  %v408_v47 = vsel %vm6864_vm5, 0, %v407_v29  ;;  %v302_v32 = vld [vmem:[%s6888_s29 + $0xb0] sm:$0xff] }
  0x5e   : > { %v585_v49 = vsel %vm6914_vm10, %v577_v60, %v584_v40  ;;  %v838_v50 = vsel %vm6856_vm4, %v586_v10, %v837_v35  ;;  %409 = vst [vmem:[#allocation2 + $0x74] sm:$0x1] %v408_v47  ;;  %v605_v53 = vshrl.u32 %v7101_v26, 16  ;;  %v608_v54 = vshll.u32 %v7101_v26, 16  ;;  %v298_v60 = vld [vmem:[%s6888_s29 + $0x90] sm:$0xff]  ;;  %v303_v47 = vld [vmem:[%s6888_s29 + $0xb8] sm:$0xff] }
  0x5f   : > { %10635 = vst [vmem:[#allocation11_spill] sm:$0xff] %v7146_v44  ;;  %1683 = vrot.lane.b32.xlu0 %v7146_v44, %s6790_s30  ;;  %v1165_v56 = vsel %vm6937_vm12, %v1160_v9, %v1164_v15  ;;  %v1175_v46 = vsel %vm6937_vm12, %v1170_v45, %v1174_v39  ;;  %v613_v62 = vshrl.u32 %v7103_v27, 16  ;;  %v616_v7 = vshll.u32 %v7103_v27, 16  ;;  %v410_v39 = vld [vmem:[#allocation2 + $0x80] sm:$0x1] }
  0x60   : > { %836 = vst.msk [vmem:[#allocation2 + $0x58] sm:$0xf] %vm312_vm0, %v585_v49  ;;  %v1639_v63 = vunpack.c.l.b16 %v1165_v56  ;;  %v1640_v61 = vunpack.c.l.b16 %v1175_v46  ;;  %v607_v26 = vrot.slane %v605_v53, 7  ;;  %v358_v3 = vsel %vm6856_vm4, 0, %v357_v36 }
  0x61   : > { %839 = vst [vmem:[#allocation2 + $0x5c] sm:$0x1] %v838_v50  ;;  %v615_v14 = vrot.slane %v613_v62, 7  ;;  %v414_v15 = vsel %vm6864_vm5, 0, %v413_v55  ;;  %v455_v16 = vpack.c.bf16 %v301_v48, %v301_v48  ;;  %v639_v17 = vshrl.u32 %v7115_v37, 16 }
  0x62   : > { %359 = vst [vmem:[#allocation2 + $0x84] sm:$0x1] %v358_v3  ;;  %v7171_v27 = vpack.c.b16 %v1640_v61, %v1639_v63  ;;  %v610_v21 = vor.u32 %v608_v54, %v607_v26  ;;  %v611_v22 = vrot.slane %v607_v26, 4  ;;  %v642_v51 = vshll.u32 %v7115_v37, 16 }
  0x63   : > { %415 = vst [vmem:[#allocation2 + $0x8c] sm:$0x1] %v414_v15  ;;  %v7176_v8 = vld [vmem:[#allocation2 + $0x54] sm:$0xf]  ;;  %v618_v24 = vor.u32 %v616_v7, %v615_v14  ;;  %v620_v25 = vrot.slane %v615_v14, 4  ;;  %v641_v29 = vrot.slane %v639_v17, 7  ;;  %v452_v54 = vpack.c.bf16 %v298_v60, %v298_v60 }
  0x64   : > { %10636 = vst [vmem:[#allocation12_spill] sm:$0xff] %v7171_v27  ;;  %v647_v31 = vshrl.u32 %v455_v16, 16  ;;  %1687 = vrot.lane.b32.xlu2 %v7171_v27, %s6790_s30  ;;  %v1129_v33 = vshrl.u32 %v7176_v8, 16  ;;  %v1132_v34 = vshll.u32 %v7176_v8, 16  ;;  %v847_v35 = vld [vmem:[#allocation2 + $0x6c] sm:$0xf]  ;;  %v7199_v62 = vpack.c.bf16 %v299_v23, %v299_v23 }
  0x65   : > { %v650_v36 = vshll.u32 %v455_v16, 16  ;;  %v355_v37 = vsel %vm6856_vm4, 0, %v354_v13  ;;  %v619_v40 = vsel %vm6914_vm10, %v611_v22, %v618_v24  ;;  %v848_v10 = vsel %vm6928_vm11, %v610_v21, %v847_v35  ;;  %v851_v43 = vld [vmem:[#allocation2 + $0x74] sm:$0x1] }
  0x66   : > { %v644_v9 = vor.u32 %v642_v51, %v641_v29  ;;  %v645_v45 = vrot.slane %v641_v29, 4  ;;  %356 = vst [vmem:[#allocation2 + $0x78] sm:$0x1] %v355_v37  ;;  %v1131_v49 = vrot.slane %v1129_v33, 4  ;;  %v1134_v50 = vrot.slane %v1132_v34, 5  ;;  %v306_v22 = vld [vmem:[%s6888_s29 + $0xd0] sm:$0xff] }
  0x67   : > { %v7190_v48 = vld [vmem:[#allocation2 + $0x58] sm:$0xf]  ;;  %849 = vst [vmem:[#allocation2 + $0x6c] sm:$0xf] %v848_v10  ;;  %v852_v53 = vsel %vm6856_vm4, %v620_v25, %v851_v43  ;;  %v7201_v7 = vpack.c.bf16 %v302_v32, %v302_v32  ;;  %v649_v26 = vrot.slane %v647_v31, 7  ;;  %v7204_v13 = vpack.c.bf16 %v303_v47, %v303_v47  ;;  %v304_v34 = vld [vmem:[%s6888_s29 + $0xc0] sm:$0xff] }
  0x68   : > { %v7194_v55 = vld [vmem:[#allocation2 + $0x5c] sm:$0x1]  ;;  %v1138_v56 = vshll.u32 %v7190_v48, 16  ;;  %v1142_v46 = vshrl.u32 %v7190_v48, 16  ;;  %850 = vst.msk [vmem:[#allocation2 + $0x70] sm:$0xf] %vm312_vm0, %v619_v40  ;;  %v1135_v63 = vor.u32 %v1134_v50, %v1131_v49  ;;  %v7224_v47 = vpack.c.bf16 %v306_v22, %v306_v22 }
  0x69   : > { %v1148_v61 = vshll.u32 %v7194_v55, 16  ;;  %853 = vst [vmem:[#allocation2 + $0x74] sm:$0x1] %v852_v53  ;;  %v861_v3 = vld [vmem:[#allocation2 + $0x84] sm:$0xf]  ;;  %v411_v21 = vsel %vm6864_vm5, 0, %v410_v39  ;;  %v652_v23 = vor.u32 %v650_v36, %v649_v26 }
  0x6a   : > { %v1140_v14 = vrot.slane %v1138_v56, 5  ;;  %v1144_v15 = vrot.slane %v1142_v46, 4  ;;  %v862_v16 = vsel %vm6928_vm11, %v644_v9, %v861_v3  ;;  %v865_v17 = vld [vmem:[#allocation2 + $0x8c] sm:$0x1]  ;;  %v1136_v51 = vrot.slane %v1135_v63, 4  ;;  %v307_v25 = vld [vmem:[%s6888_s29 + $0xd8] sm:$0xff] }
  0x6b   : > { %v1150_v60 = vrot.slane %v1148_v61, 5  ;;  %v654_v24 = vrot.slane %v649_v26, 4  ;;  %863 = vst [vmem:[#allocation2 + $0x84] sm:$0xf] %v862_v16  ;;  %v622_v31 = vshrl.u32 %v452_v54, 16  ;;  %v625_v32 = vshll.u32 %v452_v54, 16 }
  0x6c   : > { %v1145_v29 = vor.u32 %v1144_v15, %v1140_v14  ;;  %412 = vst [vmem:[#allocation2 + $0x80] sm:$0x1] %v411_v21  ;;  %v630_v33 = vshrl.u32 %v7199_v62, 16  ;;  %v1141_v35 = vsel %vm6937_vm12, %v1136_v51, %v1140_v14  ;;  %v653_v37 = vsel %vm6914_vm10, %v645_v45, %v652_v23  ;;  %v360_v26 = vld [vmem:[#allocation2 + $0x90] sm:$0x1] }
  0x6d   : > { %v866_v39 = vsel %vm6856_vm4, %v654_v24, %v865_v17  ;;  %v633_v36 = vshll.u32 %v7199_v62, 16  ;;  %v1637_v10 = vunpack.c.l.b16 %v1141_v35  ;;  %864 = vst.msk [vmem:[#allocation2 + $0x88] sm:$0xf] %vm312_vm0, %v653_v37  ;;  %v624_v9 = vrot.slane %v622_v31, 7  ;;  %v854_v17 = vld [vmem:[#allocation2 + $0x78] sm:$0xf] }
  0x6e   : > { %v1146_v40 = vrot.slane %v1145_v29, 4  ;;  %v7221_v43 = vld [vmem:[#allocation2 + $0x6c] sm:$0xf]  ;;  %867 = vst [vmem:[#allocation2 + $0x8c] sm:$0x1] %v866_v39  ;;  %v7230_v53 = vpack.c.bf16 %v307_v25, %v307_v25  ;;  %v7232_v54 = vpack.c.bf16 %v304_v34, %v304_v34  ;;  %vm1392_vm13 = vcmask 1042432  }
  0x6f   : > { %v7226_v49 = vld [vmem:[#allocation2 + $0x70] sm:$0xf]  ;;  %v1177_v50 = vshrl.u32 %v7221_v43, 16  ;;  %v1180_v45 = vshll.u32 %v7221_v43, 16  ;;  %v627_v61 = vor.u32 %v625_v32, %v624_v9  ;;  %v628_v23 = vrot.slane %v624_v9, 4 }
  0x70   : > { %v1151_v56 = vsel %vm6937_vm12, %v1146_v40, %v1150_v60  ;;  %v7236_v46 = vld [vmem:[#allocation2 + $0x74] sm:$0x1]  ;;  %v1186_v62 = vshll.u32 %v7226_v49, 16  ;;  %v1190_v63 = vshrl.u32 %v7226_v49, 16  ;;  %v632_v60 = vrot.slane %v630_v33, 7 }
  0x71   : > { %v1638_v3 = vunpack.c.l.b16 %v1151_v56  ;;  %v1179_v14 = vrot.slane %v1177_v50, 4  ;;  %v1182_v15 = vrot.slane %v1180_v45, 5  ;;  %v1196_v16 = vshll.u32 %v7236_v46, 16  ;;  %v416_v40 = vld [vmem:[#allocation2 + $0x98] sm:$0x1] }
  0x72   : > { %v1188_v21 = vrot.slane %v1186_v62, 5  ;;  %v1192_v22 = vrot.slane %v1190_v63, 4  ;;  %v7241_v51 = vld [vmem:[#allocation2 + $0x84] sm:$0xf]  ;;  %v635_v35 = vor.u32 %v633_v36, %v632_v60  ;;  %v637_v37 = vrot.slane %v632_v60, 4 }
  0x73   : > { %v7243_v24 = vpack.c.b16 %v1638_v3, %v1637_v10  ;;  %v1183_v25 = vor.u32 %v1182_v15, %v1179_v14  ;;  %v1198_v29 = vrot.slane %v1196_v16, 5  ;;  %v1225_v31 = vshrl.u32 %v7241_v51, 16  ;;  %v858_v39 = vld [vmem:[#allocation2 + $0x80] sm:$0x1] }
  0x74   : > { %v1193_v32 = vor.u32 %v1192_v22, %v1188_v21  ;;  %v1228_v34 = vshll.u32 %v7241_v51, 16  ;;  %v7249_v45 = vld [vmem:[#allocation2 + $0x88] sm:$0xf]  ;;  %v855_v10 = vsel %vm6928_vm11, %v627_v61, %v854_v17  ;;  %v361_v9 = vsel %vm6856_vm4, 0, %v360_v26 }
  0x75   : > { %10637 = vst [vmem:[#allocation13_spill] sm:$0xff] %v7243_v24  ;;  %1685 = vrot.lane.b32.xlu1 %v7243_v24, %s6790_s30  ;;  %v1184_v50 = vrot.slane %v1183_v25, 4  ;;  %v1227_v33 = vrot.slane %v1225_v31, 4  ;;  %v7255_v62 = vld [vmem:[#allocation2 + $0x8c] sm:$0x1]  ;;  %v1234_v63 = vshll.u32 %v7249_v45, 16  ;;  %v636_v16 = vsel %vm6914_vm10, %v628_v23, %v635_v35 }
  0x76   : > { %v1194_v56 = vrot.slane %v1193_v32, 4  ;;  %v1230_v36 = vrot.slane %v1228_v34, 5  ;;  %v1238_v3 = vshrl.u32 %v7249_v45, 16  ;;  %v1244_v15 = vshll.u32 %v7255_v62, 16  ;;  %856 = vst [vmem:[#allocation2 + $0x78] sm:$0xf] %v855_v10 }
  0x77   : > { %v1189_v14 = vsel %vm6937_vm12, %v1184_v50, %v1188_v21  ;;  %v859_v61 = vsel %vm6856_vm4, %v637_v37, %v858_v39  ;;  %v366_v26 = vld [vmem:[#allocation2 + $0xa8] sm:$0x1]  ;;  %v1236_v25 = vrot.slane %v1234_v63, 5  ;;  %857 = vst.msk [vmem:[#allocation2 + $0x7c] sm:$0xf] %vm312_vm0, %v636_v16  ;;  %v417_v23 = vsel %vm6864_vm5, 0, %v416_v40 }
  0x78   : > { %v1199_v17 = vsel %vm6937_vm12, %v1194_v56, %v1198_v29  ;;  %v1641_v22 = vunpack.c.l.b16 %v1189_v14  ;;  %v1231_v60 = vor.u32 %v1230_v36, %v1227_v33  ;;  %v422_v31 = vld [vmem:[#allocation2 + $0xb0] sm:$0x1]  ;;  %v1240_v32 = vrot.slane %v1238_v3, 4  ;;  %860 = vst [vmem:[#allocation2 + $0x80] sm:$0x1] %v859_v61 }
  0x79   : > { %v1642_v21 = vunpack.c.l.b16 %v1199_v17  ;;  %v1246_v34 = vrot.slane %v1244_v15, 5  ;;  %362 = vst [vmem:[#allocation2 + $0x90] sm:$0x1] %v361_v9  ;;  %v656_v37 = vshrl.u32 %v7201_v7, 16  ;;  %v659_v39 = vshll.u32 %v7201_v7, 16 }
  0x7a   : > { %v1232_v35 = vrot.slane %v1231_v60, 4  ;;  %v664_v29 = vshrl.u32 %v7204_v13, 16  ;;  %v1241_v33 = vor.u32 %v1240_v32, %v1236_v25  ;;  %418 = vst [vmem:[#allocation2 + $0x98] sm:$0x1] %v417_v23  ;;  %v667_v10 = vshll.u32 %v7204_v13, 16 }
  0x7b   : > { %v7274_v50 = vpack.c.b16 %v1642_v21, %v1641_v22  ;;  %v367_v56 = vsel %vm6856_vm4, 0, %v366_v26  ;;  %v658_v36 = vrot.slane %v656_v37, 7  ;;  %v423_v7 = vsel %vm6864_vm5, 0, %v422_v31 }
  0x7c   : > { %v1237_v40 = vsel %vm6937_vm12, %v1232_v35, %v1236_v25  ;;  %v666_v9 = vrot.slane %v664_v29, 7  ;;  %368 = vst [vmem:[#allocation2 + $0xa8] sm:$0x1] %v367_v56  ;;  %v1242_v63 = vrot.slane %v1241_v33, 4  ;;  %v690_v13 = vshrl.u32 %v7224_v47, 16 }
  0x7d   : > { %10638 = vst [vmem:[#allocation14_spill] sm:$0xff] %v7274_v50  ;;  %1689 = vrot.lane.b32.xlu0 %v7274_v50, %s6790_s30  ;;  %v1645_v3 = vunpack.c.l.b16 %v1237_v40  ;;  %v693_v14 = vshll.u32 %v7224_v47, 16  ;;  %v7287_v15 = vld [vmem:[#allocation2 + $0x78] sm:$0xf]  ;;  %v661_v16 = vor.u32 %v659_v39, %v658_v36  ;;  %v662_v61 = vrot.slane %v658_v36, 4  ;;  %v305_v36 = vld [vmem:[%s6888_s29 + $0xc8] sm:$0xff] }
  0x7e   : > { %424 = vst [vmem:[#allocation2 + $0xb0] sm:$0x1] %v423_v7  ;;  %v669_v26 = vor.u32 %v667_v10, %v666_v9  ;;  %v671_v17 = vrot.slane %v666_v9, 4  ;;  %v1247_v22 = vsel %vm6937_vm12, %v1242_v63, %v1246_v34  ;;  %v7291_v60 = vld [vmem:[#allocation2 + $0x7c] sm:$0xf]  ;;  %v1201_v25 = vshrl.u32 %v7287_v15, 16 }
  0x7f   : > { %v1204_v31 = vshll.u32 %v7287_v15, 16  ;;  %v7295_v21 = vrot.slane %v690_v13, 7  ;;  %v1646_v32 = vunpack.c.l.b16 %v1247_v22  ;;  %v7297_v47 = vld [vmem:[#allocation2 + $0x80] sm:$0x1]  ;;  %v1210_v23 = vshll.u32 %v7291_v60, 16 }
  0x80   : > { %v1214_v35 = vshrl.u32 %v7291_v60, 16  ;;  %v670_v37 = vsel %vm6914_vm10, %v662_v61, %v669_v26  ;;  %v363_v34 = vld [vmem:[#allocation2 + $0x9c] sm:$0x1]  ;;  %v419_v39 = vld [vmem:[#allocation2 + $0xa4] sm:$0x1]  ;;  %v1203_v29 = vrot.slane %v1201_v25, 4 }
  0x81   : > { %v1206_v33 = vrot.slane %v1204_v31, 5  ;;  %v1220_v10 = vshll.u32 %v7297_v47, 16  ;;  %v868_v56 = vld [vmem:[#allocation2 + $0x90] sm:$0xf]  ;;  %v695_v40 = vor.u32 %v693_v14, %v7295_v21  ;;  %v7306_v9 = vpack.c.b16 %v1646_v32, %v1645_v3  ;;  %871 = vst.msk [vmem:[#allocation2 + $0x94] sm:$0xf] %vm312_vm0, %v670_v37 }
  0x82   : > { %v1212_v7 = vrot.slane %v1210_v23, 5  ;;  %v1216_v63 = vrot.slane %v1214_v35, 4  ;;  %v869_v13 = vsel %vm6928_vm11, %v661_v16, %v868_v56  ;;  %v872_v61 = vld [vmem:[#allocation2 + $0x98] sm:$0x1]  ;;  %v369_v26 = vld [vmem:[#allocation2 + $0xb4] sm:$0x1] }
  0x83   : > { %10639 = vst [vmem:[#allocation15_spill] sm:$0xff] %v7306_v9  ;;  %v1207_v22 = vor.u32 %v1206_v33, %v1203_v29  ;;  %v1222_v25 = vrot.slane %v1220_v10, 5  ;;  %v873_v31 = vsel %vm6856_vm4, %v671_v17, %v872_v61  ;;  %v696_v14 = vrot.slane %v7295_v21, 4  ;;  %v882_v0 = vld [vmem:[#allocation2 + $0xa8] sm:$0xf]  ;;  %1693 = vrot.lane.b32.xlu2 %v7306_v9, %s6790_s30 }
  0x84   : > { %870 = vst [vmem:[#allocation2 + $0x90] sm:$0xf] %v869_v13  ;;  %v1217_v3 = vor.u32 %v1216_v63, %v1212_v7  ;;  %v698_v16 = vshrl.u32 %v7230_v53, 16  ;;  %v701_v32 = vshll.u32 %v7230_v53, 16  ;;  %v883_v23 = vsel %vm6928_vm11, %v695_v40, %v882_v0  ;;  %v425_v35 = vld [vmem:[#allocation2 + $0xbc] sm:$0x1] }
  0x85   : > { %874 = vst [vmem:[#allocation2 + $0x98] sm:$0x1] %v873_v31  ;;  %v1208_v37 = vrot.slane %v1207_v22, 4  ;;  %v886_v29 = vld [vmem:[#allocation2 + $0xb0] sm:$0x1]  ;;  %v364_v17 = vsel %vm6856_vm4, 0, %v363_v34  ;;  %v459_v33 = vpack.c.bf16 %v305_v36, %v305_v36 }
  0x86   : > { %884 = vst [vmem:[#allocation2 + $0xa8] sm:$0xf] %v883_v23  ;;  %v420_v21 = vsel %vm6864_vm5, 0, %v419_v39  ;;  %v1218_v10 = vrot.slane %v1217_v3, 4  ;;  %v700_v56 = vrot.slane %v698_v16, 7  ;;  %v673_v63 = vshrl.u32 %v7232_v54, 16 }
  0x87   : > { %365 = vst [vmem:[#allocation2 + $0x9c] sm:$0x1] %v364_v17  ;;  %v676_v53 = vshll.u32 %v7232_v54, 16  ;;  %v1213_v0 = vsel %vm6937_vm12, %v1208_v37, %v1212_v7  ;;  %v681_v40 = vshrl.u32 %v459_v33, 16  ;;  %v684_v13 = vshll.u32 %v459_v33, 16  ;;  %v308_v17 = vld [vmem:[%s6888_s29 + $0xe0] sm:$0xff] }
  0x88   : > { %421 = vst [vmem:[#allocation2 + $0xa4] sm:$0x1] %v420_v21  ;;  %v370_v34 = vsel %vm6856_vm4, 0, %v369_v26  ;;  %v1223_v39 = vsel %vm6937_vm12, %v1218_v10, %v1222_v25  ;;  %v1643_v36 = vunpack.c.l.b16 %v1213_v0  ;;  %v703_v61 = vor.u32 %v701_v32, %v700_v56  ;;  %v7332_v3 = vld [vmem:[#allocation2 + $0x94] sm:$0xf] }
  0x89   : > { %v705_v22 = vrot.slane %v700_v56, 4  ;;  %371 = vst [vmem:[#allocation2 + $0xb4] sm:$0x1] %v370_v34  ;;  %v1644_v31 = vunpack.c.l.b16 %v1223_v39  ;;  %v675_v54 = vrot.slane %v673_v63, 7  ;;  %v683_v16 = vrot.slane %v681_v40, 7 }
  0x8a   : > { %v426_v7 = vsel %vm6864_vm5, 0, %v425_v35  ;;  %v1258_v26 = vshll.u32 %v7332_v3, 16  ;;  %v1262_v37 = vshrl.u32 %v7332_v3, 16  ;;  %v704_v25 = vsel %vm6914_vm10, %v696_v14, %v703_v61 }
  0x8b   : > { %v7336_v23 = vld [vmem:[#allocation2 + $0x90] sm:$0xf]  ;;  %v887_v32 = vsel %vm6856_vm4, %v705_v22, %v886_v29  ;;  %427 = vst [vmem:[#allocation2 + $0xbc] sm:$0x1] %v426_v7  ;;  %v7345_v21 = vpack.c.b16 %v1644_v31, %v1643_v36  ;;  %v678_v56 = vor.u32 %v676_v53, %v675_v54  ;;  %v679_v29 = vrot.slane %v675_v54, 4 }
  0x8c   : > { %v7347_v33 = vld [vmem:[#allocation2 + $0x98] sm:$0x1]  ;;  %v1249_v35 = vshrl.u32 %v7336_v23, 16  ;;  %v1252_v10 = vshll.u32 %v7336_v23, 16  ;;  %885 = vst.msk [vmem:[#allocation2 + $0xac] sm:$0xf] %vm312_vm0, %v704_v25  ;;  %v686_v36 = vor.u32 %v684_v13, %v683_v16 }
  0x8d   : > { %10640 = vst [vmem:[#allocation16_spill] sm:$0xff] %v7345_v21  ;;  %v1260_v63 = vrot.slane %v1258_v26, 5  ;;  %v1264_v0 = vrot.slane %v1262_v37, 4  ;;  %v1268_v14 = vshll.u32 %v7347_v33, 16  ;;  %1691 = vrot.lane.b32.xlu1 %v7345_v21, %s6790_s30  ;;  %v7355_v39 = vld [vmem:[#allocation2 + $0xa8] sm:$0xf] }
  0x8e   : > { %888 = vst [vmem:[#allocation2 + $0xb0] sm:$0x1] %v887_v32  ;;  %v1251_v40 = vrot.slane %v1249_v35, 4  ;;  %v1254_v34 = vrot.slane %v1252_v10, 5  ;;  %v688_v61 = vrot.slane %v683_v16, 4  ;;  %v1297_v53 = vshrl.u32 %v7355_v39, 16 }
  0x8f   : > { %v1265_v22 = vor.u32 %v1264_v0, %v1260_v63  ;;  %v1270_v31 = vrot.slane %v1268_v14, 5  ;;  %v1300_v7 = vshll.u32 %v7355_v39, 16  ;;  %v875_v26 = vld [vmem:[#allocation2 + $0x9c] sm:$0xf]  ;;  %v309_v37 = vld [vmem:[%s6888_s29 + $0xe8] sm:$0xff]  ;;  %v687_v54 = vsel %vm6914_vm10, %v679_v29, %v686_v36 }
  0x90   : > { %v1255_v25 = vor.u32 %v1254_v34, %v1251_v40  ;;  %v876_v32 = vsel %vm6928_vm11, %v678_v56, %v875_v26  ;;  %v879_v35 = vld [vmem:[#allocation2 + $0xa4] sm:$0x1]  ;;  %v462_v10 = vpack.c.bf16 %v308_v17, %v308_v17  ;;  %v1299_v13 = vrot.slane %v1297_v53, 4  ;;  %878 = vst.msk [vmem:[#allocation2 + $0xa0] sm:$0xf] %vm312_vm0, %v687_v54 }
  0x91   : > { %v1266_v2 = vrot.slane %v1265_v22, 4  ;;  %v1302_v16 = vrot.slane %v1300_v7, 5  ;;  %877 = vst [vmem:[#allocation2 + $0x9c] sm:$0xf] %v876_v32  ;;  %v880_v0 = vsel %vm6856_vm4, %v688_v61, %v879_v35  ;;  %v463_v9 = vpack.c.bf16 %v309_v37, %v309_v37 }
  0x92   : > { %v1256_v14 = vrot.slane %v1255_v25, 4  ;;  %v707_v40 = vshrl.u32 %v462_v10, 16  ;;  %881 = vst [vmem:[#allocation2 + $0xa4] sm:$0x1] %v880_v0  ;;  %v710_v17 = vshll.u32 %v462_v10, 16  ;;  %vm1393_vm14 = vcmask 1046532  }
  0x93   : > { %v1271_v29 = vsel %vm6937_vm12, %v1266_v2, %v1270_v31  ;;  %v7369_v34 = vld [vmem:[#allocation2 + $0xac] sm:$0xf]  ;;  %v1303_v56 = vor.u32 %v1302_v16, %v1299_v13  ;;  %v715_v32 = vshrl.u32 %v463_v9, 16  ;;  %v718_v35 = vshll.u32 %v463_v9, 16  ;;  %v889_v10 = vld [vmem:[#allocation2 + $0xb4] sm:$0xf]  ;;  %vm7407_vm15 = vmor %vm1392_vm13, %vm1393_vm14 }
  0x94   : > { %v1261_v36 = vsel %vm6937_vm12, %v1256_v14, %v1260_v63  ;;  %v1648_v22 = vunpack.c.l.b16 %v1271_v29  ;;  %v1306_v61 = vshll.u32 %v7369_v34, 16  ;;  %v1310_v7 = vshrl.u32 %v7369_v34, 16 }
  0x95   : > { %v7373_v53 = vld [vmem:[#allocation2 + $0xb0] sm:$0x1]  ;;  %v1647_v26 = vunpack.c.l.b16 %v1261_v36  ;;  %v1304_v37 = vrot.slane %v1303_v56, 4  ;;  %v709_v2 = vrot.slane %v707_v40, 7  ;;  %v717_v56 = vrot.slane %v715_v32, 7 }
  0x96   : > { %v1316_v25 = vshll.u32 %v7373_v53, 16  ;;  %v1308_v31 = vrot.slane %v1306_v61, 5  ;;  %v1312_v54 = vrot.slane %v1310_v7, 4  ;;  %v893_v61 = vld [vmem:[#allocation2 + $0xbc] sm:$0x1]  ;;  %vm10616_vm1 = vcmask 64512  }
  0x97   : > { %v7378_v13 = vpack.c.b16 %v1648_v22, %v1647_v26  ;;  %v712_v16 = vor.u32 %v710_v17, %v709_v2  ;;  %v713_v0 = vrot.slane %v709_v2, 4  ;;  %v7386_v36 = vld [vmem:[#allocation2 + $0xa0] sm:$0xf]  ;;  %v720_v2 = vor.u32 %v718_v35, %v717_v56 }
  0x98   : > { %v1318_v63 = vrot.slane %v1316_v25, 5  ;;  %v1309_v14 = vsel %vm6937_vm12, %v1304_v37, %v1308_v31  ;;  %v1313_v29 = vor.u32 %v1312_v54, %v1308_v31  ;;  %v7382_v21 = vld [vmem:[#allocation2 + $0x9c] sm:$0xf]  ;;  %v1282_v37 = vshll.u32 %v7386_v36, 16 }
  0x99   : > { %10641 = vst [vmem:[#allocation17_spill] sm:$0xff] %v7378_v13  ;;  %1695 = vrot.lane.b32.xlu0 %v7378_v13, %s6790_s30  ;;  %v1651_v40 = vunpack.c.l.b16 %v1309_v14  ;;  %v1273_v9 = vshrl.u32 %v7382_v21, 16  ;;  %v1276_v22 = vshll.u32 %v7382_v21, 16  ;;  %v890_v17 = vsel %vm6928_vm11, %v712_v16, %v889_v10  ;;  %v7392_v26 = vld [vmem:[#allocation2 + $0xa4] sm:$0x1] }
  0x9a   : > { %v1314_v7 = vrot.slane %v1313_v29, 4  ;;  %v1286_v25 = vshrl.u32 %v7386_v36, 16  ;;  %v1292_v32 = vshll.u32 %v7392_v26, 16  ;;  %v722_v14 = vrot.slane %v717_v56, 4  ;;  %891 = vst [vmem:[#allocation2 + $0xb4] sm:$0xf] %v890_v17 }
  0x9b   : > { %v1275_v31 = vrot.slane %v1273_v9, 4  ;;  %v1278_v54 = vrot.slane %v1276_v22, 5  ;;  %v1284_v24 = vrot.slane %v1282_v37, 5  ;;  %v721_v16 = vsel %vm6914_vm10, %v713_v0, %v720_v2  ;;  %v6715_v56 = vld [vmem:[#allocation2] sm:$0xf] }
  0x9c   : > { %v1319_v13 = vsel %vm6937_vm12, %v1314_v7, %v1318_v63  ;;  %v1288_v10 = vrot.slane %v1286_v25, 4  ;;  %v1294_v50 = vrot.slane %v1292_v32, 5  ;;  %892 = vst.msk [vmem:[#allocation2 + $0xb8] sm:$0xf] %vm312_vm0, %v721_v16  ;;  %v894_v35 = vsel %vm6856_vm4, %v722_v14, %v893_v61  ;;  %v6716_v17 = vld [vmem:[#allocation2 + $0x4] sm:$0xf] }
  0x9d   : > { %v1652_v29 = vunpack.c.l.b16 %v1319_v13  ;;  %v1279_v27 = vor.u32 %v1278_v54, %v1275_v31  ;;  %895 = vst [vmem:[#allocation2 + $0xbc] sm:$0x1] %v894_v35  ;;  %v6080_v22 = vrot.slane %v6715_v56, 9  ;;  %v1397_v63 = vrot.slane %v6716_v17, 5  ;;  %v6717_v0 = vld [vmem:[#allocation2 + $0xc] sm:$0xf] }
  0x9e   : > { %v1289_v9 = vor.u32 %v1288_v10, %v1284_v24  ;;  %v6081_v25 = vrot.slane %v6717_v0, 9  ;;  %v6718_v61 = vld [vmem:[#allocation2 + $0x8] sm:$0x1]  ;;  %v6719_v32 = vld [vmem:[#allocation2 + $0x10] sm:$0xf]  ;;  %vm10614_vm7 = vcmask 195584  }
  0x9f   : > { %v7404_v7 = vpack.c.b16 %v1652_v29, %v1651_v40  ;;  %v1280_v37 = vrot.slane %v1279_v27, 4  ;;  %v1399_v31 = vrot.slane %v1397_v63, 4  ;;  %v1400_v54 = vrot.slane %v6718_v61, 5 }
  0xa0   : > { %v1290_v2 = vrot.slane %v1289_v9, 4  ;;  %v1404_v14 = vrot.slane %v6719_v32, 5  ;;  %v1398_v27 = vsel %vm7407_vm15, %v6080_v22, %v1397_v63  ;;  %v6720_v9 = vld [vmem:[#allocation2 + $0x14] sm:$0x1]  ;;  %vm10615_vm8 = vcmask 130048  }
  0xa1   : > { %10642 = vst [vmem:[#allocation18_spill] sm:$0xff] %v7404_v7  ;;  %1699 = vrot.lane.b32.xlu2 %v7404_v7, %s6790_s30  ;;  %v1285_v40 = vsel %vm6937_vm12, %v1280_v37, %v1284_v24  ;;  %v7419_v29 = vld [vmem:[#allocation2 + $0xb4] sm:$0xf]  ;;  %v1407_v56 = vrot.slane %v6720_v9, 5  ;;  %v6721_v24 = vld [vmem:[#allocation2 + $0x18] sm:$0xf]  ;;  %v1703_v44 = vunpack.c.l.b16 %v1398_v27 }
  0xa2   : > { %v1295_v10 = vsel %vm6937_vm12, %v1290_v2, %v1294_v50  ;;  %v1649_v16 = vunpack.c.l.b16 %v1285_v40  ;;  %v1405_v35 = vsel %vm7407_vm15, %v6081_v25, %v1404_v14  ;;  %v1321_v0 = vshrl.u32 %v7419_v29, 16  ;;  %v6722_v2 = vld [vmem:[#allocation2 + $0x1c] sm:$0xf] }
  0xa3   : > { %v1650_v17 = vunpack.c.l.b16 %v1295_v10  ;;  %v1324_v61 = vshll.u32 %v7419_v29, 16  ;;  %v6082_v37 = vrot.slane %v6721_v24, 9  ;;  %v7425_v32 = vld [vmem:[#allocation2 + $0xb8] sm:$0xf]  ;;  %v1401_v50 = vsel %vm7407_vm15, %v1399_v31, %v1400_v54 }
  0xa4   : > { %v1406_v22 = vrot.slane %v1404_v14, 4  ;;  %v1705_v63 = vunpack.c.l.b16 %v1405_v35  ;;  %v1411_v40 = vrot.slane %v6722_v2, 5  ;;  %v7431_v25 = vld [vmem:[#allocation2 + $0xbc] sm:$0x1]  ;;  %v1323_v10 = vrot.slane %v1321_v0, 4 }
  0xa5   : > { %v7429_v7 = vpack.c.b16 %v1650_v17, %v1649_v16  ;;  %v1326_v9 = vrot.slane %v1324_v61, 5  ;;  %v1330_v59 = vshll.u32 %v7425_v32, 16  ;;  %v1334_v4 = vshrl.u32 %v7425_v32, 16  ;;  %v6723_v2 = vld [vmem:[#allocation2 + $0x20] sm:$0x1] }
  0xa6   : > { %v1340_v24 = vshll.u32 %v7431_v25, 16  ;;  %v1408_v31 = vsel %vm7407_vm15, %v1406_v22, %v1407_v56  ;;  %v1704_v16 = vunpack.c.l.b16 %v1401_v50  ;;  %v1412_v0 = vsel %vm7407_vm15, %v6082_v37, %v1411_v40  ;;  %v6724_v50 = vld [vmem:[#allocation2 + $0x30] sm:$0xf] }
  0xa7   : > { %10645 = vst [vmem:[#allocation19_spill] sm:$0xff] %v7429_v7  ;;  %1697 = vrot.lane.b32.xlu1 %v7429_v7, %s6790_s30  ;;  %v1327_v54 = vor.u32 %v1326_v9, %v1323_v10  ;;  %v1332_v14 = vrot.slane %v1330_v59, 5  ;;  %v1706_v35 = vunpack.c.l.b16 %v1408_v31  ;;  %v1336_v17 = vrot.slane %v1334_v4, 4 }
  0xa8   : > { %v1413_v61 = vrot.slane %v1411_v40, 4  ;;  %v1414_v42 = vrot.slane %v6723_v2, 5  ;;  %v6083_v27 = vrot.slane %v7077_v52, 9  ;;  %v1418_v56 = vrot.slane %v7064_v41, 5 }
  0xa9   : > { %v1328_v20 = vrot.slane %v1327_v54, 4  ;;  %v7442_v12 = vpack.c.b16 %v1706_v35, %v1705_v63  ;;  %v1337_v22 = vor.u32 %v1336_v17, %v1332_v14  ;;  %v1342_v7 = vrot.slane %v1340_v24, 5  ;;  %v6726_v54 = vld [vmem:[#allocation2 + $0x38] sm:$0x1] }
  0xaa   : > { %v1421_v59 = vrot.slane %v7083_v5, 5  ;;  %v6084_v10 = vrot.slane %v6724_v50, 9  ;;  %v1735_v37 = vpack.c.b16 %v1704_v16, %v1703_v44  ;;  %v1419_v63 = vsel %vm7407_vm15, %v6083_v27, %v1418_v56  ;;  %v6725_v5 = vld [vmem:[#allocation2 + $0x34] sm:$0xf]  ;;  %v6729_v50 = vld [vmem:[#allocation2 + $0x44] sm:$0x1] }
  0xab   : > { %v1333_v4 = vsel %vm6937_vm12, %v1328_v20, %v1332_v14  ;;  %1753 = vrot.lane.b32.xlu2 %v7442_v12, %s6791_s8  ;;  %v1420_v52 = vrot.slane %v1418_v56, 4  ;;  %v1338_v40 = vrot.slane %v1337_v22, 4  ;;  %v1415_v41 = vsel %vm7407_vm15, %v1413_v61, %v1414_v42  ;;  %v6728_v56 = vld [vmem:[#allocation2 + $0x40] sm:$0xf] }
  0xac   : > { %v1707_v9 = vunpack.c.l.b16 %v1412_v0  ;;  %v1425_v24 = vrot.slane %v6725_v5, 5  ;;  %v1653_v31 = vunpack.c.l.b16 %v1333_v4  ;;  %v1709_v44 = vunpack.c.l.b16 %v1419_v63  ;;  %v6727_v0 = vld [vmem:[#allocation2 + $0x3c] sm:$0xf] }
  0xad   : > { %v1422_v20 = vsel %vm7407_vm15, %v1420_v52, %v1421_v59  ;;  %v1428_v14 = vrot.slane %v6726_v54, 5  ;;  %v1343_v16 = vsel %vm6937_vm12, %v1338_v40, %v1342_v7  ;;  %v6085_v61 = vrot.slane %v6727_v0, 9 }
  0xae   : > { %v1710_v35 = vunpack.c.l.b16 %v1422_v20  ;;  %v1426_v17 = vsel %vm7407_vm15, %v6084_v10, %v1425_v24  ;;  %v1427_v2 = vrot.slane %v1425_v24, 4  ;;  %v1654_v27 = vunpack.c.l.b16 %v1343_v16 }
  0xaf   : > { %1751 = vrot.lane.b32.xlu1 %v1735_v37, %s6791_s8  ;;  %v1711_v42 = vunpack.c.l.b16 %v1426_v17  ;;  %v1432_v22 = vrot.slane %v6728_v56, 5  ;;  %v1435_v4 = vrot.slane %v6729_v50, 5  ;;  %v6086_v7 = vrot.slane %v7091_v18, 9 }
  0xb0   : > { %v1429_v59 = vsel %vm7407_vm15, %v1427_v2, %v1428_v14  ;;  %v1439_v63 = vrot.slane %v7105_v30, 5  ;;  %v7466_v52 = vpack.c.b16 %v1654_v27, %v1653_v31  ;;  %v1708_v10 = vunpack.c.l.b16 %v1415_v41 }
  0xb1   : > { %v1712_v40 = vunpack.c.l.b16 %v1429_v59  ;;  %v1434_v5 = vrot.slane %v1432_v22, 4  ;;  %v7468_v37 = vpack.c.b16 %v1710_v35, %v1709_v44  ;;  %v1442_v20 = vrot.slane %v7111_v6, 5 }
  0xb2   : > { %v1441_v24 = vrot.slane %v1439_v63, 4  ;;  %1701 = vrot.lane.b32.xlu0 %v7466_v52, %s6790_s30  ;;  %v1433_v18 = vsel %vm7407_vm15, %v6085_v61, %v1432_v22  ;;  %v1440_v30 = vsel %vm7407_vm15, %v6086_v7, %v1439_v63  ;;  %v6087_v41 = vrot.slane %v7176_v8, 9 }
  0xb3   : > { %v7473_v54 = vpack.c.b16 %v1712_v40, %v1711_v42  ;;  %v1436_v31 = vsel %vm7407_vm15, %v1434_v5, %v1435_v4  ;;  %v1446_v6 = vrot.slane %v7190_v48, 5  ;;  %v1449_v14 = vrot.slane %v7194_v55, 5 }
  0xb4   : > { %v1443_v44 = vsel %vm7407_vm15, %v1441_v24, %v1442_v20  ;;  %v7486_v16 = vpack.c.b16 %v1708_v10, %v1707_v9  ;;  %v1713_v35 = vunpack.c.l.b16 %v1433_v18  ;;  %v1453_v2 = vrot.slane %v7121_v28, 5 }
  0xb5   : > { %1759 = vrot.lane.b32.xlu2 %v7473_v54, %s6791_s8  ;;  %v1447_v17 = vsel %vm7407_vm15, %v6087_v41, %v1446_v6  ;;  %v1448_v8 = vrot.slane %v1446_v6, 4  ;;  %v1714_v27 = vunpack.c.l.b16 %v1436_v31  ;;  %v1715_v42 = vunpack.c.l.b16 %v1440_v30 }
  0xb6   : > { %v1716_v48 = vunpack.c.l.b16 %v1443_v44  ;;  %v1717_v0 = vunpack.c.l.b16 %v1447_v17  ;;  %v6089_v9 = vrot.slane %v7221_v43, 9  ;;  %v1460_v61 = vrot.slane %v7226_v49, 5 }
  0xb7   : > { %1757 = vrot.lane.b32.xlu1 %v7468_v37, %s6791_s8  ;;  %v1450_v55 = vsel %vm7407_vm15, %v1448_v8, %v1449_v14  ;;  %v1463_v56 = vrot.slane %v7236_v46, 5  ;;  %v6088_v59 = vrot.slane %v7124_v58, 9  ;;  %v6090_v28 = vrot.slane %v7287_v15, 9 }
  0xb8   : > { %v1718_v22 = vunpack.c.l.b16 %v1450_v55  ;;  %v1467_v50 = vrot.slane %v7291_v60, 5  ;;  %v1455_v4 = vrot.slane %v1453_v2, 4  ;;  %v1456_v7 = vrot.slane %v7134_v19, 5 }
  0xb9   : > { %v1462_v63 = vrot.slane %v1460_v61, 4  ;;  %v1470_v10 = vrot.slane %v7297_v47, 5  ;;  %v7507_v43 = vpack.c.b16 %v1716_v48, %v1715_v42  ;;  %v1461_v15 = vsel %vm7407_vm15, %v6089_v9, %v1460_v61 }
  0xba   : > { %1755 = vrot.lane.b32.xlu0 %v7486_v16, %s6791_s8  ;;  %v7509_v49 = vpack.c.b16 %v1718_v22, %v1717_v0  ;;  %v1468_v58 = vsel %vm7407_vm15, %v6090_v28, %v1467_v50  ;;  %v1469_v46 = vrot.slane %v1467_v50, 4  ;;  %v7517_v60 = vpack.c.b16 %v1714_v27, %v1713_v35 }
  0xbb   : > { %v1464_v19 = vsel %vm7407_vm15, %v1462_v63, %v1463_v56  ;;  %v1723_v40 = vunpack.c.l.b16 %v1468_v58  ;;  %v1454_v5 = vsel %vm7407_vm15, %v6088_v59, %v1453_v2  ;;  %v1457_v24 = vsel %vm7407_vm15, %v1455_v4, %v1456_v7 }
  0xbc   : > { %v1471_v47 = vsel %vm7407_vm15, %v1469_v46, %v1470_v10  ;;  %v1481_v18 = vrot.slane %v7332_v3, 5  ;;  %v1721_v30 = vunpack.c.l.b16 %v1461_v15  ;;  %v1722_v41 = vunpack.c.l.b16 %v1464_v19 }
  0xbd   : > { %1765 = vrot.lane.b32.xlu2 %v7509_v49, %s6791_s8  ;;  %v1724_v20 = vunpack.c.l.b16 %v1471_v47  ;;  %v1474_v31 = vrot.slane %v7249_v45, 5  ;;  %v6093_v44 = vrot.slane %v7382_v21, 9  ;;  %v6092_v6 = vrot.slane %v7336_v23, 9 }
  0xbe   : > { %v1483_v14 = vrot.slane %v1481_v18, 4  ;;  %v1484_v35 = vrot.slane %v7347_v33, 5  ;;  %v1488_v8 = vrot.slane %v7386_v36, 5  ;;  %v1491_v3 = vrot.slane %v7392_v26, 5 }
  0xbf   : > { %1763 = vrot.lane.b32.xlu1 %v7507_v43, %s6791_s8  ;;  %v7534_v17 = vpack.c.b16 %v1724_v20, %v1723_v40  ;;  %v1719_v2 = vunpack.c.l.b16 %v1454_v5  ;;  %v1720_v27 = vunpack.c.l.b16 %v1457_v24  ;;  %v6091_v42 = vrot.slane %v7241_v51, 9  ;;  %v7588_v5 = vld [vmem:[#allocation2 + $0xc] sm:$0xff] }
  0xc0   : > { %v1477_v48 = vrot.slane %v7255_v62, 5  ;;  %v7542_v45 = vpack.c.b16 %v1722_v41, %v1721_v30  ;;  %v1476_v23 = vrot.slane %v1474_v31, 4  ;;  %v1489_v21 = vsel %vm7407_vm15, %v6093_v44, %v1488_v8  ;;  %v7594_v30 = vpop.permute.xlu2 %1679  ;;  %v372_v41 = vld [vmem:[#allocation2 + $0xc0] sm:$0x1]  ;;  %v311_v44 = vld [vmem:[%s6888_s29 + $0xf8] sm:$0xff] }
  0xc1   : > { %v1490_v33 = vrot.slane %v1488_v8, 4  ;;  %v1482_v36 = vsel %vm7407_vm15, %v6092_v6, %v1481_v18  ;;  %v1485_v26 = vsel %vm7407_vm15, %v1483_v14, %v1484_v35  ;;  %v1729_v62 = vunpack.c.l.b16 %v1489_v21  ;;  %10646 = vst [vmem:[#allocation20_spill] sm:$0xff] %v7594_v30 }
  0xc2   : > { %1761 = vrot.lane.b32.xlu0 %v7517_v60, %s6791_s8  ;;  %v7554_v0 = vpack.c.b16 %v1720_v27, %v1719_v2  ;;  %v1502_v9 = vrot.slane %v7425_v32, 5  ;;  %v1475_v61 = vsel %vm7407_vm15, %v6091_v42, %v1474_v31  ;;  %v1478_v56 = vsel %vm7407_vm15, %v1476_v23, %v1477_v48  ;;  %v310_v31 = vld [vmem:[%s6888_s29 + $0xf0] sm:$0xff]  ;;  %v7610_v42 = vld [vmem:[#allocation2 + $0x24] sm:$0xff] }
  0xc3   : > { %v1492_v51 = vsel %vm7407_vm15, %v1490_v33, %v1491_v3  ;;  %v1727_v22 = vunpack.c.l.b16 %v1482_v36  ;;  %v1728_v59 = vunpack.c.l.b16 %v1485_v26  ;;  %v1495_v28 = vrot.slane %v7369_v34, 5  ;;  %v7606_v3 = vld [vmem:[#allocation2 + $0x30] sm:$0xff] }
  0xc4   : > { %v1730_v55 = vunpack.c.l.b16 %v1492_v51  ;;  %v6095_v50 = vrot.slane %v7419_v29, 9  ;;  %v1504_v4 = vrot.slane %v1502_v9, 4  ;;  %v1505_v7 = vrot.slane %v7431_v25, 5  ;;  %10647 = vst [vmem:[#allocation21_spill] sm:$0xff] %v7606_v3 }
  0xc5   : > { %1771 = vrot.lane.b32.xlu2 %v7534_v17, %s6791_s8  ;;  %v1725_v32 = vunpack.c.l.b16 %v1475_v61  ;;  %v1726_v10 = vunpack.c.l.b16 %v1478_v56  ;;  %v7570_v58 = vpack.c.b16 %v1728_v59, %v1727_v22  ;;  %v6094_v46 = vrot.slane %v7355_v39, 9  ;;  %v7627_v22 = vld [vmem:[#allocation2 + $0x54] sm:$0xff]  ;;  %v7632_v59 = vld [vmem:[#allocation2 + $0x48] sm:$0xff] }
  0xc6   : > { %v7566_v63 = vpack.c.b16 %v1730_v55, %v1729_v62  ;;  %v1497_v15 = vrot.slane %v1495_v28, 4  ;;  %v1498_v19 = vrot.slane %v7373_v53, 5  ;;  %v1503_v34 = vsel %vm7407_vm15, %v6095_v50, %v1502_v9  ;;  %v7619_v9 = vld [vmem:[#allocation2 + $0x18] sm:$0xff]  ;;  %10649 = vst [vmem:[#allocation23_spill] sm:$0xff] %v7632_v59 }
  0xc7   : > { %1769 = vrot.lane.b32.xlu1 %v7542_v45, %s6791_s8  ;;  %v1506_v29 = vsel %vm7407_vm15, %v1504_v4, %v1505_v7  ;;  %v7580_v25 = vpack.c.b16 %v1726_v10, %v1725_v32  ;;  %v1733_v39 = vunpack.c.l.b16 %v1503_v34  ;;  %v1496_v53 = vsel %vm7407_vm15, %v6094_v46, %v1495_v28  ;;  %v7636_v28 = vld [vmem:[#allocation2 + $0x3c] sm:$0xff]  ;;  %v7646_v4 = vld [vmem:[#allocation2 + $0x6c] sm:$0xff]  ;;  %v7658_v46 = vpop.permute.xlu1 %1675  ;;  %v7668_v34 = vld [vmem:[#allocation2 + $0x84] sm:$0xff] }
  0xc8   : > { %v1734_v47 = vunpack.c.l.b16 %v1506_v29  ;;  %v1499_v40 = vsel %vm7407_vm15, %v1497_v15, %v1498_v19  ;;  %v1731_v24 = vunpack.c.l.b16 %v1496_v53  ;;  %v373_v6 = vsel %vm6856_vm4, 0, %v372_v41  ;;  %v7616_v36 = vpop.permute.xlu2 %1681  ;;  %10650 = vst [vmem:[#allocation24_spill] sm:$0xff] %v7636_v28  ;;  %v7642_v50 = vld [vmem:[#allocation2 + $0x78] sm:$0xff]  ;;  %v7650_v7 = vld [vmem:[#allocation2 + $0x60] sm:$0xff]  ;;  %v7662_v15 = vpop.permute.xlu0 %1671  ;;  %v7664_v19 = vld [vmem:[#allocation2 + $0x90] sm:$0xff] }
  0xc9   : > { %v1732_v20 = vunpack.c.l.b16 %v1499_v40  ;;  %374 = vst [vmem:[#allocation2 + $0xc0] sm:$0x1] %v373_v6  ;;  %v464_v35 = vpack.c.bf16 %v310_v31, %v310_v31  ;;  %v465_v8 = vpack.c.bf16 %v311_v44, %v311_v44  ;;  %v7654_v32 = vld [vmem:[#allocation2 + $0x9c] sm:$0xff]  ;;  %v10658_v6 = vld [vmem:[#allocation7_spill] sm:$0xff]  ;;  %vm10613_vm9 = vcmask 261120  }
  0xca   : > { %1767 = vrot.lane.b32.xlu0 %v7554_v0, %s6791_s8  ;;  %v7592_v18 = vpack.c.b16 %v1734_v47, %v1733_v39  ;;  %10648 = vst [vmem:[#allocation22_spill] sm:$0xff] %v7616_v36  ;;  %v7676_v39 = vld [vmem:[#allocation2 + $0xb4] sm:$0xff]  ;;  %vm2174_vm13 = vcmask 392192   ;;  %vm2207_vm14 = vcmask 457728   ;;  %vm10617_vm6 = vcmask 588800  }
  0xcb   : > { %v7602_v14 = vpack.c.b16 %v1732_v20, %v1731_v24  ;;  %v724_v2 = vshrl.u32 %v464_v35, 16  ;;  %v732_v27 = vshrl.u32 %v465_v8, 16  ;;  %v727_v23 = vshll.u32 %v464_v35, 16  ;;  %10651 = vst [vmem:[#allocation25_spill] sm:$0xff] %v7654_v32  ;;  %v7686_v24 = vld [vmem:[#allocation2 + $0xa8] sm:$0xff]  ;;  %v10655_v20 = vld [vmem:[#allocation10_spill] sm:$0xff] }
  0xcc   : > { %v735_v33 = vshll.u32 %v465_v8, 16  ;;  %10652 = vst [vmem:[#allocation26_spill] sm:$0xff] %v7664_v19  ;;  %v10659_v35 = vld [vmem:[#allocation8_spill] sm:$0xff]  ;;  %v10660_v8 = vld [vmem:[#allocation11_spill] sm:$0xff] }
  0xcd   : > { %1777 = vrot.lane.b32.xlu2 %v7566_v63, %s6791_s8  ;;  %v726_v48 = vrot.slane %v724_v2, 7  ;;  %v7612_v21 = vrot.slane %v732_v27, 7  ;;  %10654 = vst [vmem:[#allocation28_spill] sm:$0xff] %v7686_v24  ;;  %v10661_v2 = vld [vmem:[#allocation9_spill] sm:$0xff] }
  0xcf   : > { %1775 = vrot.lane.b32.xlu1 %v7570_v58, %s6791_s8  ;;  %v729_v26 = vor.u32 %v727_v23, %v726_v48  ;;  %v730_v51 = vrot.slane %v726_v48, 4  ;;  %v737_v62 = vor.u32 %v735_v33, %v7612_v21  ;;  %v7680_v53 = vpop.permute.xlu1 %1677  ;;  %v10663_v33 = vld [vmem:[#allocation6_spill] sm:$0xff] }
  0xd0   : > { %v896_v55 = vld [vmem:[#allocation2 + $0xc0] sm:$0xf]  ;;  %v7640_v57 = vpop.permute.xlu2 %1687  ;;  %v7682_v40 = vpop.permute.xlu0 %1673 }
  0xd1   : > { %v897_v61 = vsel %vm6928_vm11, %v729_v26, %v896_v55  ;;  %v738_v56 = vsel %vm6914_vm10, %v730_v51, %v737_v62  ;;  %v10664_v26 = vld [vmem:[#allocation14_spill] sm:$0xff]  ;;  %v10665_v51 = vld [vmem:[#allocation12_spill] sm:$0xff]  ;;  %vm2141_vm11 = vcmask 326656  }
  0xd2   : > { %1773 = vrot.lane.b32.xlu0 %v7580_v25, %s6791_s8  ;;  %898 = vst [vmem:[#allocation2 + $0xc0] sm:$0xf] %v897_v61  ;;  %v10668_v61 = vld [vmem:[#allocation13_spill] sm:$0xff] }
  0xd3   : > { %899 = vst.msk [vmem:[#allocation2 + $0xc4] sm:$0xf] %vm312_vm0, %v738_v56  ;;  %vm2342_vm0 = vcmask 1043456  }
  0xd5   : > { %1786 = vrot.lane.b32.xlu2 %v7588_v5, %s6792_s9 }
  0xd7   : > { %1781 = vrot.lane.b32.xlu1 %v7592_v18, %s6791_s8 }
  0xd8   : > { %v7698_v44 = vpop.permute.xlu0 %1683 }
  0xd9   : > { %10657 = vst [vmem:[#allocation29_spill] sm:$0xff] %v7698_v44 }
  0xda   : > { %1779 = vrot.lane.b32.xlu0 %v7602_v14, %s6791_s8  ;;  %v7672_v29 = vld [vmem:[#allocation2 + $0xc0] sm:$0xff] }
  0xdd   : > { %1792 = vrot.lane.b32.xlu2 %v7606_v3, %s6792_s9  ;;  %v7656_v10 = vpop.permute.xlu2 %1693 }
  0xdf   : > { %1790 = vrot.lane.b32.xlu1 %v7610_v42, %s6792_s9 }
  0xe2   : > { %1788 = vrot.lane.b32.xlu0 %v7619_v9, %s6792_s9 }
  0xe5   : > { %1798 = vrot.lane.b32.xlu2 %v7627_v22, %s6792_s9 }
  0xe7   : > { %1796 = vrot.lane.b32.xlu1 %v7632_v59, %s6792_s9  ;;  %v7694_v41 = vpop.permute.xlu1 %1685 }
  0xe8   : > { %10656 = vst [vmem:[#allocation10_spill] sm:$0xff] %v7694_v41 }
  0xea   : > { %1794 = vrot.lane.b32.xlu0 %v7636_v28, %s6792_s9 }
  0xed   : > { %1804 = vrot.lane.b32.xlu2 %v7642_v50, %s6792_s9 }
  0xef   : > { %1802 = vrot.lane.b32.xlu1 %v7646_v4, %s6792_s9  ;;  %v7712_v23 = vpop.permute.xlu0 %1689 }
  0xf2   : > { %1800 = vrot.lane.b32.xlu0 %v7650_v7, %s6792_s9 }
  0xf5   : > { %1810 = vrot.lane.b32.xlu2 %v7654_v32, %s6792_s9 }
  0xf7   : > { %1808 = vrot.lane.b32.xlu1 %v7664_v19, %s6792_s9 }
  0xfa   : > { %1806 = vrot.lane.b32.xlu0 %v7668_v34, %s6792_s9 }
  0xfb   : > { %v7678_v47 = vpop.permute.xlu2 %1699 }
  0xfc   : > { %10653 = vst [vmem:[#allocation27_spill] sm:$0xff] %v7678_v47 }
  0xfd   : > { %1816 = vrot.lane.b32.xlu2 %v7672_v29, %s6792_s9 }
  0xff   : > { %1814 = vrot.lane.b32.xlu1 %v7676_v39, %s6792_s9  ;;  %v7708_v27 = vpop.permute.xlu1 %1691 }
 0x102   : > { %1812 = vrot.lane.b32.xlu0 %v7686_v24, %s6792_s9 }
 0x105   : > { %1825 = vrot.lane.b32.xlu2 %v10655_v20, %s6793_s10  ;;  %v7696_v31 = vpop.permute.xlu2 %1753 }
 0x107   : > { %1823 = vrot.lane.b32.xlu1 %v10658_v6, %s6793_s10 }
 0x10a   : > { %1821 = vrot.lane.b32.xlu0 %v10659_v35, %s6793_s10 }
 0x10b   : > { %v7726_v56 = vpop.permute.xlu0 %1695 }
 0x10c   : > { %10669 = vst [vmem:[#allocation9_spill] sm:$0xff] %v7726_v56 }
 0x10d   : > { %1831 = vrot.lane.b32.xlu2 %v10660_v8, %s6793_s10 }
 0x10f   : > { %1829 = vrot.lane.b32.xlu1 %v10661_v2, %s6793_s10  ;;  %v7710_v48 = vpop.permute.xlu2 %1759 }
 0x110   : > { %10662 = vst [vmem:[#allocation7_spill] sm:$0xff] %v7710_v48 }
 0x112   : > { %1827 = vrot.lane.b32.xlu0 %v10663_v33, %s6793_s10 }
 0x115   : > { %1837 = vrot.lane.b32.xlu2 %v10664_v26, %s6793_s10 }
 0x117   : > { %1835 = vrot.lane.b32.xlu1 %v10665_v51, %s6793_s10  ;;  %v7720_v62 = vpop.permute.xlu2 %1765 }
 0x118   : > { %10666 = vst [vmem:[#allocation8_spill] sm:$0xff] %v7720_v62  ;;  %v10670_v62 = vld [vmem:[#allocation16_spill] sm:$0xff] }
 0x119   : > { %v7722_v55 = vpop.permute.xlu1 %1697 }
 0x11a   : > { %10667 = vst [vmem:[#allocation11_spill] sm:$0xff] %v7722_v55  ;;  %1833 = vrot.lane.b32.xlu0 %v10668_v61, %s6793_s10 }
 0x11d   : > { %1891 = vrot.lane.b32.xlu2 %v7619_v9, %s6794_s11 }
 0x11f   : > { %1856 = vrot.lane.b32.xlu1 %v7442_v12, %s6795_s12  ;;  %v7732_v35 = vpop.permute.xlu2 %1771 }
 0x121   : > { %v7734_v38 = vpop.permute.xlu1 %1751 }
 0x122   : > { %1839 = vrot.lane.b32.xlu0 %v10670_v62, %s6793_s10 }
 0x124   : > { %v7738_v41 = vpop.permute.xlu0 %1701 }
 0x125   : > { %10671 = vst [vmem:[#allocation6_spill] sm:$0xff] %v7738_v41  ;;  %1872 = vrot.lane.b32.xlu2 %v7542_v45, %s6795_s12 }
 0x127   : > { %1961 = vrot.lane.b32.xlu1 %v7486_v16, %s6796_s13  ;;  %v7744_v47 = vpop.permute.xlu2 %1777 }
 0x128   : > { %10672 = vst [vmem:[#allocation14_spill] sm:$0xff] %v7744_v47 }
 0x129   : > { %v7746_v44 = vpop.permute.xlu1 %1757 }
 0x12a   : > { %1926 = vrot.lane.b32.xlu0 %v10658_v6, %s6797_s14 }
 0x12c   : > { %v7750_v12 = vpop.permute.xlu0 %1755 }
 0x12d   : > { %1977 = vrot.lane.b32.xlu2 %v7534_v17, %s6796_s13 }
 0x12f   : > { %1942 = vrot.lane.b32.xlu1 %v10670_v62, %s6797_s14  ;;  %v7756_v41 = vpop.permute.xlu2 %1786 }
 0x131   : > { %v7758_v55 = vpop.permute.xlu1 %1763 }
 0x132   : > { %10673 = vst [vmem:[#allocation12_spill] sm:$0xff] %v7758_v55  ;;  %1907 = vrot.lane.b32.xlu0 %v7642_v50, %s6794_s11 }
 0x134   : > { %v7762_v47 = vpop.permute.xlu0 %1761 }
 0x135   : > { %10674 = vst [vmem:[#allocation13_spill] sm:$0xff] %v7762_v47  ;;  %1928 = vrot.lane.b32.xlu2 %v10655_v20, %s6797_s14 }
 0x137   : > { %1893 = vrot.lane.b32.xlu1 %v7610_v42, %s6794_s11  ;;  %v7768_v6 = vpop.permute.xlu2 %1792 }
 0x139   : > { %v7770_v36 = vpop.permute.xlu1 %1769 }
 0x13a   : > { %1858 = vrot.lane.b32.xlu0 %v7486_v16, %s6795_s12 }
 0x13c   : > { %v7774_v62 = vpop.permute.xlu0 %1767 }
 0x13d   : > { %1909 = vrot.lane.b32.xlu2 %v7668_v34, %s6794_s11 }
 0x13f   : > { %1874 = vrot.lane.b32.xlu1 %v7534_v17, %s6795_s12  ;;  %v7780_v55 = vpop.permute.xlu2 %1798  ;;  %v10678_v17 = vld [vmem:[#allocation15_spill] sm:$0xff] }
 0x140   : > { %10675 = vst [vmem:[#allocation16_spill] sm:$0xff] %v7780_v55 }
 0x141   : > { %v7782_v20 = vpop.permute.xlu1 %1775 }
 0x142   : > { %10676 = vst [vmem:[#allocation30_spill] sm:$0xff] %v7782_v20  ;;  %1963 = vrot.lane.b32.xlu0 %v7468_v37, %s6796_s13 }
 0x144   : > { %v7786_v47 = vpop.permute.xlu0 %1773 }
 0x145   : > { %1860 = vrot.lane.b32.xlu2 %v7468_v37, %s6795_s12 }
 0x147   : > { %1979 = vrot.lane.b32.xlu1 %v7580_v25, %s6796_s13  ;;  %v7792_v16 = vpop.permute.xlu2 %1804 }
 0x149   : > { %v7794_v56 = vpop.permute.xlu1 %1781 }
 0x14a   : > { %10677 = vst [vmem:[#allocation31_spill] sm:$0xff] %v7794_v56  ;;  %1944 = vrot.lane.b32.xlu0 %v10678_v17, %s6797_s14 }
 0x14c   : > { %v7798_v55 = vpop.permute.xlu0 %1779 }
 0x14d   : > { %10679 = vst [vmem:[#allocation15_spill] sm:$0xff] %v7798_v55  ;;  %1841 = vrot.lane.b32.xlu2 %v10678_v17, %s6793_s10 }
 0x14f   : > { %1930 = vrot.lane.b32.xlu1 %v10663_v33, %s6797_s14  ;;  %v7804_v20 = vpop.permute.xlu2 %1810 }
 0x150   : > { %10680 = vst [vmem:[#allocation32_spill] sm:$0xff] %v7804_v20 }
 0x151   : > { %v7806_v37 = vpop.permute.xlu1 %1790 }
 0x152   : > { %1895 = vrot.lane.b32.xlu0 %v7606_v3, %s6794_s11 }
 0x154   : > { %v7810_v48 = vpop.permute.xlu0 %1788 }
 0x155   : > { %1911 = vrot.lane.b32.xlu2 %v7664_v19, %s6794_s11  ;;  %v2281_v19 = vld [vmem:[%s10566_s1 + $0x20] sm:$0xf] }
 0x157   : > { %1876 = vrot.lane.b32.xlu1 %v7580_v25, %s6795_s12  ;;  %v7816_v56 = vpop.permute.xlu2 %1816  ;;  %v10684_v25 = vld [vmem:[#allocation17_spill] sm:$0xff] }
 0x158   : > { %10681 = vst [vmem:[#allocation33_spill] sm:$0xff] %v7816_v56 }
 0x159   : > { %v7818_v17 = vpop.permute.xlu1 %1796 }
 0x15a   : > { %10682 = vst [vmem:[#allocation34_spill] sm:$0xff] %v7818_v17  ;;  %1965 = vrot.lane.b32.xlu0 %v7473_v54, %s6796_s13 }
 0x15c   : > { %v7822_v33 = vpop.permute.xlu0 %1794 }
 0x15d   : > { %10683 = vst [vmem:[#allocation35_spill] sm:$0xff] %v7822_v33  ;;  %1862 = vrot.lane.b32.xlu2 %v7473_v54, %s6795_s12 }
 0x15f   : > { %1981 = vrot.lane.b32.xlu1 %v7570_v58, %s6796_s13  ;;  %v7828_v55 = vpop.permute.xlu2 %1825 }
 0x161   : > { %v7830_v20 = vpop.permute.xlu1 %1802 }
 0x162   : > { %1946 = vrot.lane.b32.xlu0 %v10684_v25, %s6797_s14 }
 0x164   : > { %v7834_v56 = vpop.permute.xlu0 %1800 }
 0x165   : > { %10685 = vst [vmem:[#allocation17_spill] sm:$0xff] %v7834_v56  ;;  %1843 = vrot.lane.b32.xlu2 %v10684_v25, %s6793_s10  ;;  %v2299_v25 = vunpack.c.l.b16 %v2281_v19 }
 0x167   : > { %1932 = vrot.lane.b32.xlu1 %v10661_v2, %s6797_s14  ;;  %v7840_v17 = vpop.permute.xlu2 %1831  ;;  %v2304_v56 = vpack.c.b16 %v2299_v25, %v2299_v25  ;;  %v10690_v25 = vld [vmem:[#allocation19_spill] sm:$0xff] }
 0x168   : > { %10686 = vst [vmem:[#allocation36_spill] sm:$0xff] %v7840_v17 }
 0x169   : > { %v7842_v54 = vpop.permute.xlu1 %1808 }
 0x16a   : > { %10687 = vst [vmem:[#allocation37_spill] sm:$0xff] %v7842_v54  ;;  %1897 = vrot.lane.b32.xlu0 %v7636_v28, %s6794_s11  ;;  %v2344_v28 = vsel %vm2342_vm0, %v2304_v56, 0  ;;  %vm2240_vm0 = vcmask 523264  }
 0x16b   : > { %2349 = vmatpush.bf16.msra.mxu0 %v2344_v28  ;;  %6426 = vmatpush.bf16.msra.mxu2 %v2344_v28 }
 0x16c   : > { %v7849_v33 = vpop.permute.xlu0 %1806 }
 0x16d   : > { %1913 = vrot.lane.b32.xlu2 %v7654_v32, %s6794_s11  ;;  %v6405_v32 = vld [vmem:[%s10566_s1 + $0x18] sm:$0xff] }
 0x16f   : > { %1878 = vrot.lane.b32.xlu1 %v7570_v58, %s6795_s12  ;;  %v7855_v2 = vpop.permute.xlu2 %1837  ;;  %2350 = vmatpush.bf16.msra.mxu0 %v6405_v32  ;;  %v6404_v58 = vld [vmem:[%s10566_s1 + $0x10] sm:$0xff] }
 0x170   : > { %6427 = vmatpush.bf16.msra.mxu2 %v6405_v32  ;;  %v6402_v32 = vld [vmem:[%s10566_s1] sm:$0xff] }
 0x171   : > { %v7857_v17 = vpop.permute.xlu1 %1814 }
 0x172   : > { %10688 = vst [vmem:[#allocation38_spill] sm:$0xff] %v7857_v17  ;;  %1967 = vrot.lane.b32.xlu0 %v7517_v60, %s6796_s13 }
 0x173   : > { %2351 = vmatpush.bf16.msra.mxu0 %v6404_v58 }
 0x174   : > { %v7864_v19 = vpop.permute.xlu0 %1812  ;;  %6428 = vmatpush.bf16.msra.mxu2 %v6404_v58 }
 0x175   : > { %10689 = vst [vmem:[#allocation39_spill] sm:$0xff] %v7864_v19  ;;  %1864 = vrot.lane.b32.xlu2 %v7517_v60, %s6795_s12  ;;  %v6403_v60 = vld [vmem:[%s10566_s1 + $0x8] sm:$0xff] }
 0x177   : > { %1983 = vrot.lane.b32.xlu1 %v7566_v63, %s6796_s13  ;;  %v1892_v28 = vpop.permute.xlu2 %1891  ;;  %2352 = vmatpush.bf16.msra.mxu0 %v6403_v60 }
 0x178   : > { %6429 = vmatpush.bf16.msra.mxu2 %v6403_v60 }
 0x179   : > { %v7873_v56 = vpop.permute.xlu1 %1823 }
 0x17a   : > { %1948 = vrot.lane.b32.xlu0 %v10690_v25, %s6797_s14 }
 0x17b   : > { %2353 = vmatpush.bf16.msra.mxu0 %v6402_v32 }
 0x17c   : > { %v1822_v17 = vpop.permute.xlu0 %1821  ;;  %6430 = vmatpush.bf16.msra.mxu2 %v6402_v32  ;;  %v739_v32 = vrot.slane %v7612_v21, 4  ;;  %v10695_v21 = vld [vmem:[#allocation18_spill] sm:$0xff] }
 0x17d   : > { %1845 = vrot.lane.b32.xlu2 %v10690_v25, %s6793_s10 }
 0x17f   : > { %1934 = vrot.lane.b32.xlu1 %v10660_v8, %s6797_s14  ;;  %v7887_v58 = vpop.permute.xlu2 %1872  ;;  %v428_v8 = vld [vmem:[#allocation2 + $0xc8] sm:$0x1] }
 0x180   : > { %v429_v30 = vsel %vm6864_vm5, 0, %v428_v8 }
 0x181   : > { %v7889_v19 = vpop.permute.xlu1 %1829  ;;  %430 = vst [vmem:[#allocation2 + $0xc8] sm:$0x1] %v429_v30 }
 0x182   : > { %10691 = vst [vmem:[#allocation19_spill] sm:$0xff] %v7889_v19  ;;  %1899 = vrot.lane.b32.xlu0 %v7632_v59, %s6794_s11 }
 0x184   : > { %v7893_v3 = vpop.permute.xlu0 %1827 }
 0x185   : > { %1915 = vrot.lane.b32.xlu2 %v7686_v24, %s6794_s11  ;;  %v6384_v24 = vld [vmem:[#allocation2] sm:$0xff] }
 0x187   : > { %1880 = vrot.lane.b32.xlu1 %v7566_v63, %s6795_s12  ;;  %v7899_v25 = vpop.permute.xlu2 %1977 }
 0x188   : > { %v900_v8 = vld [vmem:[#allocation2 + $0xc8] sm:$0x1] }
 0x189   : > { %v7903_v19 = vpop.permute.xlu1 %1835  ;;  %v901_v30 = vsel %vm6856_vm4, %v739_v32, %v900_v8 }
 0x18a   : > { %10693 = vst [vmem:[#allocation4_spill] sm:$0xff] %v7903_v19  ;;  %1969 = vrot.lane.b32.xlu0 %v7507_v43, %s6796_s13 }
 0x18b   : > { %902 = vst [vmem:[#allocation2 + $0xc8] sm:$0x1] %v901_v30 }
 0x18c   : > { %v7908_v59 = vpop.permute.xlu0 %1833 }
 0x18d   : > { %10694 = vst [vmem:[#allocation40_spill] sm:$0xff] %v7908_v59  ;;  %1866 = vrot.lane.b32.xlu2 %v7507_v43, %s6795_s12  ;;  %v1996_v43 = vsel %vm10616_vm1, %v6384_v24, %v7662_v15 }
 0x18e   : > { %v2044_v59 = vsel %vm10615_vm8, %v1996_v43, %v7734_v38 }
 0x18f   : > { %1985 = vrot.lane.b32.xlu1 %v7602_v14, %s6796_s13  ;;  %v7914_v63 = vpop.permute.xlu2 %1928  ;;  %v2077_v32 = vsel %vm10614_vm7, %v2044_v59, %v7756_v41 }
 0x190   : > { %v2110_v8 = vsel %vm10613_vm9, %v2077_v32, %v1822_v17  ;;  %v951_v32 = vld [vmem:[#allocation2 + $0xc0] sm:$0xf] }
 0x191   : > { %v1857_v19 = vpop.permute.xlu1 %1856 }
 0x192   : > { %1950 = vrot.lane.b32.xlu0 %v10695_v21, %s6797_s14  ;;  %v2143_v24 = vsel %vm2141_vm11, %v2110_v8, %v1857_v19  ;;  %v2020_v19 = vsel %vm10616_vm1, %v7650_v7, %v7640_v57  ;;  %v952_v8 = vld [vmem:[#allocation2 + $0xc4] sm:$0xf] }
 0x193   : > { %v2176_v30 = vsel %vm2174_vm13, %v2143_v24, %v1892_v28  ;;  %v375_v24 = vld [vmem:[#allocation2 + $0xcc] sm:$0x1] }
 0x194   : > { %v7924_v54 = vpop.permute.xlu0 %1839 }
 0x195   : > { %1847 = vrot.lane.b32.xlu2 %v10695_v21, %s6793_s10  ;;  %v2060_v21 = vsel %vm10615_vm8, %v2020_v19, %v7774_v62  ;;  %v376_v62 = vsel %vm6856_vm4, 0, %v375_v24  ;;  %v431_v19 = vld [vmem:[#allocation2 + $0xd4] sm:$0x1]  ;;  %vm3150_vm4 = vcmask 24576  }
 0x196   : > { %v2093_v43 = vsel %vm10614_vm7, %v2060_v21, %v7830_v20  ;;  %377 = vst [vmem:[#allocation2 + $0xcc] sm:$0x1] %v376_v62  ;;  %v432_v21 = vsel %vm6864_vm5, 0, %v431_v19  ;;  %v1536_v62 = vrot.slane %v952_v8, 5  ;;  %vm8177_vm5 = vmand %vm3150_vm4, %vm322_vm2  ;;  %vm10725_vm2 = vcmask 261120  }
 0x197   : > { %1936 = vrot.lane.b32.xlu1 %v10668_v61, %s6797_s14  ;;  %v7933_v15 = vpop.permute.xlu2 %1909  ;;  %433 = vst [vmem:[#allocation2 + $0xd4] sm:$0x1] %v432_v21 }
 0x199   : > { %v1962_v38 = vpop.permute.xlu1 %1961 }
 0x19a   : > { %1901 = vrot.lane.b32.xlu0 %v7627_v22, %s6794_s11 }
 0x19c   : > { %v1927_v59 = vpop.permute.xlu0 %1926 }
 0x19d   : > { %1917 = vrot.lane.b32.xlu2 %v7676_v39, %s6794_s11  ;;  %v2209_v41 = vsel %vm2207_vm14, %v2176_v30, %v1927_v59  ;;  %v1508_v30 = vshrl.u32 %v951_v32, 16 }
 0x19e   : > { %v2242_v61 = vsel %vm2240_vm0, %v2209_v41, %v1962_v38  ;;  %v1511_v41 = vshll.u32 %v951_v32, 16 }
 0x19f   : > { %1882 = vrot.lane.b32.xlu1 %v7602_v14, %s6795_s12  ;;  %v7945_v17 = vpop.permute.xlu2 %1860  ;;  %6186 = vmatmul.msk.bf16.vlgmr.msra.gmra.mxu0 %vm10617_vm6, %v2242_v61  ;;  %v2126_v14 = vsel %vm10613_vm9, %v2093_v43, %v7855_v2  ;;  %v1521_v61 = vshrl.u32 %v952_v8, 16  ;;  %v1510_v43 = vrot.slane %v1508_v30, 4 }
 0x1a0   : > { %v2159_v38 = vsel %vm2141_vm11, %v2126_v14, %v7887_v58  ;;  %v1517_v58 = vshll.u32 %v952_v8, 16  ;;  %v1513_v14 = vrot.slane %v1511_v41, 5 }
 0x1a1   : > { %v1943_v28 = vpop.permute.xlu1 %1942 }
 0x1a2   : > { %1971 = vrot.lane.b32.xlu0 %v7509_v49, %s6796_s13  ;;  %v1519_v24 = vrot.slane %v1517_v58, 5  ;;  %v1538_v58 = vrot.slane %v1536_v62, 4 }
 0x1a4   : > { %v1908_v57 = vpop.permute.xlu0 %1907 }
 0x1a5   : > { %1868 = vrot.lane.b32.xlu2 %v7509_v49, %s6795_s12  ;;  %v2192_v20 = vsel %vm2174_vm13, %v2159_v38, %v1908_v57  ;;  %v1523_v38 = vrot.slane %v1521_v61, 4  ;;  %v953_v57 = vld [vmem:[#allocation2 + $0xc8] sm:$0x1] }
 0x1a6   : > { %v2225_v59 = vsel %vm2207_vm14, %v2192_v20, %v1943_v28  ;;  %v1999_v28 = vsel %vm10616_vm1, %v7588_v5, %v7682_v40  ;;  %v1527_v8 = vshll.u32 %v953_v57, 16  ;;  %v1539_v61 = vrot.slane %v953_v57, 5 }
 0x1a7   : > { %1987 = vrot.lane.b32.xlu1 %v7592_v18, %s6796_s13  ;;  %v7969_v2 = vpop.permute.xlu2 %1841  ;;  %v2258_v49 = vsel %vm2240_vm0, %v2225_v59, %v7899_v25  ;;  %v2046_v25 = vsel %vm10615_vm8, %v1999_v28, %v7696_v31  ;;  %v1514_v31 = vor.u32 %v1513_v14, %v1510_v43  ;;  %v1524_v59 = vor.u32 %v1523_v38, %v1519_v24 }
 0x1a8   : > { %6194 = vmatmul.msk.bf16.vlgmr.msra.gmra.mxu2 %vm10617_vm6, %v2258_v49  ;;  %v2079_v60 = vsel %vm10614_vm7, %v2046_v25, %v7810_v48  ;;  %v6096_v48 = vrot.slane %v951_v32, 9  ;;  %v1529_v21 = vrot.slane %v1527_v8, 5  ;;  %v1540_v32 = vsel %vm7407_vm15, %v1538_v58, %v1539_v61 }
 0x1a9   : > { %v1894_v1 = vpop.permute.xlu1 %1893  ;;  %v2112_v5 = vsel %vm10613_vm9, %v2079_v60, %v7873_v56  ;;  %v1515_v56 = vrot.slane %v1514_v31, 4  ;;  %v1525_v19 = vrot.slane %v1524_v59, 4  ;;  %v1854_v38 = vunpack.c.l.b16 %v1540_v32 }
 0x1aa   : > { %1952 = vrot.lane.b32.xlu0 %v7466_v52, %s6797_s14 }
 0x1ac   : > { %v1859_v20 = vpop.permute.xlu0 %1858 }
 0x1ad   : > { %1849 = vrot.lane.b32.xlu2 %v7466_v52, %s6793_s10  ;;  %v2145_v40 = vsel %vm2141_vm11, %v2112_v5, %v1859_v20  ;;  %v2023_v52 = vsel %vm10616_vm1, %v7646_v4, %v7712_v23  ;;  %v954_v20 = vld [vmem:[#allocation2 + $0xcc] sm:$0xf] }
 0x1ae   : > { %v2178_v41 = vsel %vm2174_vm13, %v2145_v40, %v1894_v1  ;;  %v1537_v1 = vsel %vm7407_vm15, %v6096_v48, %v1536_v62  ;;  %v2062_v28 = vsel %vm10615_vm8, %v2023_v52, %v7770_v36  ;;  %v955_v40 = vld [vmem:[#allocation2 + $0xd0] sm:$0xf]  ;;  %v2002_v52 = vsel %vm10616_vm1, %v7619_v9, %v7658_v46 }
 0x1af   : > { %1938 = vrot.lane.b32.xlu1 %v10665_v51, %s6797_s14  ;;  %v7992_v30 = vpop.permute.xlu2 %1911  ;;  %v2211_v51 = vsel %vm2207_vm14, %v2178_v41, %v7914_v63  ;;  %v1853_v36 = vunpack.c.l.b16 %v1537_v1  ;;  %v1542_v41 = vshrl.u32 %v954_v20, 16  ;;  %v1551_v48 = vshll.u32 %v955_v40, 16 }
 0x1b0   : > { %v1555_v58 = vshrl.u32 %v955_v40, 16  ;;  %v2048_v1 = vsel %vm10615_vm8, %v2002_v52, %v7750_v12 }
 0x1b1   : > { %v1875_v49 = vpop.permute.xlu1 %1874  ;;  %v1855_v60 = vpack.c.b16 %v1854_v38, %v1853_v36 }
 0x1b2   : > { %1903 = vrot.lane.b32.xlu0 %v7650_v7, %s6794_s11  ;;  %v2095_v7 = vsel %vm10614_vm7, %v2062_v28, %v7792_v16  ;;  %v1530_v16 = vsel %vm6937_vm12, %v1525_v19, %v1529_v21  ;;  %v1557_v19 = vrot.slane %v1555_v58, 4  ;;  %v1570_v21 = vrot.slane %v955_v40, 5 }
 0x1b3   : > { %v2128_v63 = vsel %vm10613_vm9, %v2095_v7, %v7924_v54  ;;  %v1819_v62 = vunpack.c.l.b16 %v1530_v16  ;;  %v2081_v28 = vsel %vm10614_vm7, %v2048_v1, %v7806_v37 }
 0x1b4   : > { %v1964_v43 = vpop.permute.xlu0 %1963  ;;  %v2161_v25 = vsel %vm2141_vm11, %v2128_v63, %v1875_v49  ;;  %v6097_v63 = vrot.slane %v954_v20, 9  ;;  %v1572_v36 = vrot.slane %v1570_v21, 4 }
 0x1b5   : > { %1919 = vrot.lane.b32.xlu2 %v7672_v29, %s6794_s11  ;;  %v2244_v23 = vsel %vm2240_vm0, %v2211_v51, %v1964_v43  ;;  %v1520_v29 = vsel %vm6937_vm12, %v1515_v56, %v1519_v24  ;;  %v2194_v54 = vsel %vm2174_vm13, %v2161_v25, %v7933_v15  ;;  %v1545_v15 = vshll.u32 %v954_v20, 16  ;;  %v956_v51 = vld [vmem:[#allocation2 + $0xd4] sm:$0x1]  ;;  %v6401_v20 = vld [vmem:[#allocation2 + $0xcc] sm:$0xff] }
 0x1b6   : > { %6187 = vmatmul.msk.bf16.gmra.mxu0 %vm10617_vm6, %v2244_v23  ;;  %v1553_v56 = vrot.slane %v1551_v48, 5  ;;  %v2114_v43 = vsel %vm10613_vm9, %v2081_v28, %v7828_v55  ;;  %v1561_v46 = vshll.u32 %v956_v51, 16  ;;  %v1573_v12 = vrot.slane %v956_v51, 5 }
 0x1b7   : > { %1884 = vrot.lane.b32.xlu1 %v7592_v18, %s6795_s12  ;;  %v8018_v14 = vpop.permute.xlu2 %1862  ;;  %v1818_v18 = vunpack.c.l.b16 %v1520_v29  ;;  %v1547_v49 = vrot.slane %v1545_v15, 5  ;;  %v2147_v38 = vsel %vm2141_vm11, %v2114_v43, %v7945_v17  ;;  %v2026_v55 = vsel %vm10616_vm1, %v7642_v50, %v7708_v27 }
 0x1b8   : > { %v1558_v23 = vor.u32 %v1557_v19, %v1553_v56  ;;  %v1574_v17 = vsel %vm7407_vm15, %v1572_v36, %v1573_v12 }
 0x1b9   : > { %v1980_v57 = vpop.permute.xlu1 %1979  ;;  %v1820_v31 = vpack.c.b16 %v1819_v62, %v1818_v18  ;;  %v2064_v18 = vsel %vm10615_vm8, %v2026_v55, %v7732_v35  ;;  %v1959_v40 = vunpack.c.l.b16 %v1574_v17  ;;  %v10699_v55 = vld [vmem:[#allocation7_spill] sm:$0xff] }
 0x1ba   : > { %1973 = vrot.lane.b32.xlu0 %v7554_v0, %s6796_s13  ;;  %v1559_v16 = vrot.slane %v1558_v23, 4  ;;  %v2097_v50 = vsel %vm10614_vm7, %v2064_v18, %v7849_v33 }
 0x1bc   : > { %v1945_v5 = vpop.permute.xlu0 %1944 }
 0x1bd   : > { %1870 = vrot.lane.b32.xlu2 %v7554_v0, %s6795_s12  ;;  %v2227_v24 = vsel %vm2207_vm14, %v2194_v54, %v1945_v5  ;;  %v1544_v0 = vrot.slane %v1542_v41, 4  ;;  %v1571_v54 = vsel %vm7407_vm15, %v6097_v63, %v1570_v21 }
 0x1be   : > { %v2260_v59 = vsel %vm2240_vm0, %v2227_v24, %v1980_v57  ;;  %v1563_v57 = vrot.slane %v1561_v46, 5  ;;  %v1958_v5 = vunpack.c.l.b16 %v1571_v54 }
 0x1bf   : > { %1989 = vrot.lane.b32.xlu1 %v1855_v60, %s6796_s13  ;;  %v8034_v8 = vpop.permute.xlu2 %1843  ;;  %6195 = vmatmul.msk.bf16.gmra.mxu2 %vm10617_vm6, %v2260_v59  ;;  %v1548_v9 = vor.u32 %v1547_v49, %v1544_v0 }
 0x1c0   : > { %v1564_v33 = vsel %vm6937_vm12, %v1559_v16, %v1563_v57  ;;  %v1960_v15 = vpack.c.b16 %v1959_v40, %v1958_v5  ;;  %v10701_v16 = vld [vmem:[#allocation19_spill] sm:$0xff]  ;;  %v10704_v5 = vld [vmem:[#allocation30_spill] sm:$0xff] }
 0x1c1   : > { %v1931_v61 = vpop.permute.xlu1 %1930  ;;  %v1549_v29 = vrot.slane %v1548_v9, 4  ;;  %v1924_v41 = vunpack.c.l.b16 %v1564_v33 }
 0x1c2   : > { %1954 = vrot.lane.b32.xlu0 %v1820_v31, %s6797_s14 }
 0x1c3   : > { %v1554_v35 = vsel %vm6937_vm12, %v1549_v29, %v1553_v56  ;;  %v10700_v29 = vld [vmem:[#allocation35_spill] sm:$0xff] }
 0x1c4   : > { %v1896_v32 = vpop.permute.xlu0 %1895 }
 0x1c5   : > { %1851 = vrot.lane.b32.xlu2 %v1820_v31, %s6793_s10  ;;  %v2180_v37 = vsel %vm2174_vm13, %v2147_v38, %v1896_v32  ;;  %v10697_v38 = vld [vmem:[#allocation20_spill] sm:$0xff] }
 0x1c7   : > { %1940 = vrot.lane.b32.xlu1 %v10664_v26, %s6797_s14  ;;  %v8050_v7 = vpop.permute.xlu2 %1913  ;;  %v2213_v26 = vsel %vm2207_vm14, %v2180_v37, %v1931_v61 }
 0x1c9   : > { %v1877_v25 = vpop.permute.xlu1 %1876 }
 0x1ca   : > { %1905 = vrot.lane.b32.xlu0 %v7646_v4, %s6794_s11  ;;  %v2130_v4 = vsel %vm10613_vm9, %v2097_v50, %v7969_v2 }
 0x1cb   : > { %v2163_v24 = vsel %vm2141_vm11, %v2130_v4, %v1877_v25  ;;  %v10698_v25 = vld [vmem:[#allocation21_spill] sm:$0xff] }
 0x1cc   : > { %v1966_v62 = vpop.permute.xlu0 %1965  ;;  %v2196_v2 = vsel %vm2174_vm13, %v2163_v24, %v7992_v30  ;;  %v2005_v30 = vsel %vm10616_vm1, %v7610_v42, %v7680_v53  ;;  %v2029_v42 = vsel %vm10616_vm1, %v7668_v34, %v7656_v10 }
 0x1cd   : > { %v2246_v27 = vsel %vm2240_vm0, %v2213_v26, %v1966_v62  ;;  %1921 = vrot.lane.b32.xlu2 %v6401_v20, %s6794_s11  ;;  %v2050_v51 = vsel %vm10615_vm8, %v2005_v30, %v7746_v44  ;;  %v2066_v53 = vsel %vm10615_vm8, %v2029_v42, %v7786_v47  ;;  %v10703_v20 = vld [vmem:[#allocation26_spill] sm:$0xff]  ;;  %v10707_v30 = vld [vmem:[#allocation24_spill] sm:$0xff] }
 0x1ce   : > { %6188 = vmatmul.msk.bf16.gmra.mxu0 %vm10617_vm6, %v2246_v27  ;;  %v2083_v56 = vsel %vm10614_vm7, %v2050_v51, %v7768_v6  ;;  %v10696_v6 = vld [vmem:[#allocation37_spill] sm:$0xff] }
 0x1cf   : > { %1886 = vrot.lane.b32.xlu1 %v1855_v60, %s6795_s12  ;;  %v1865_v59 = vpop.permute.xlu2 %1864  ;;  %v1923_v60 = vunpack.c.l.b16 %v1554_v35  ;;  %v2116_v19 = vsel %vm10613_vm9, %v2083_v56, %v7893_v3  ;;  %v2099_v43 = vsel %vm10614_vm7, %v2066_v53, %v10696_v6  ;;  %v10702_v27 = vld [vmem:[#allocation9_spill] sm:$0xff]  ;;  %v10705_v35 = vld [vmem:[#allocation32_spill] sm:$0xff]  ;;  %s10060_s12 = scalar_lea.vmem %s10572_s7, %s6382_s26 }
 0x1d0   : > { %v2149_v21 = vsel %vm2141_vm11, %v2116_v19, %v8018_v14  ;;  %v2132_v14 = vsel %vm10613_vm9, %v2099_v43, %v8034_v8  ;;  %v2008_v8 = vsel %vm10616_vm1, %v10698_v25, %v10697_v38  ;;  %v2032_v4 = vsel %vm10616_vm1, %v10703_v20, %v10702_v27  ;;  %v10708_v51 = vld [vmem:[#allocation13_spill] sm:$0xff]  ;;  %v3161_v27 = vld [vmem:[#allocation3 + $0xc] sm:$0x1] }
 0x1d1   : > { %v1982_v31 = vpop.permute.xlu1 %1981  ;;  %v1925_v61 = vpack.c.b16 %v1924_v41, %v1923_v60  ;;  %v2052_v26 = vsel %vm10615_vm8, %v2008_v8, %v10699_v55  ;;  %v2068_v40 = vsel %vm10615_vm8, %v2032_v4, %v10704_v5  ;;  %v3162_v20 = vsel %vm8177_vm5, 0, %v3161_v27 }
 0x1d2   : > { %1975 = vrot.lane.b32.xlu0 %v7542_v45, %s6796_s13  ;;  %v2101_v33 = vsel %vm10614_vm7, %v2068_v40, %v10705_v35  ;;  %3163 = vst [vmem:[#allocation3 + $0xc] sm:$0x1] %v3162_v20 }
 0x1d4   : > { %v1947_v48 = vpop.permute.xlu0 %1946 }
 0x1d5   : > { %v2229_v58 = vsel %vm2207_vm14, %v2196_v2, %v1947_v48 }
 0x1d6   : > { %v2262_v0 = vsel %vm2240_vm0, %v2229_v58, %v1982_v31 }
 0x1d7   : > { %1991 = vrot.lane.b32.xlu1 %v1960_v15, %s6796_s13  ;;  %6196 = vmatmul.msk.bf16.gmra.mxu2 %vm10617_vm6, %v2262_v0  ;;  %v1846_v45 = vpop.permute.xlu2 %1845 }
 0x1d9   : > { %v1933_v49 = vpop.permute.xlu1 %1932 }
 0x1da   : > { %1956 = vrot.lane.b32.xlu0 %v1925_v61, %s6797_s14  ;;  %s6798_s14 = smov 4  }
 0x1dc   : > { %v1898_v52 = vpop.permute.xlu0 %1897 }
 0x1dd   : > { %v2182_v32 = vsel %vm2174_vm13, %v2149_v21, %v1898_v52  ;;  %v10709_v21 = vmov 0  }
 0x1de   : > { %v2215_v28 = vsel %vm2207_vm14, %v2182_v32, %v1933_v49  ;;  %v10706_v49 = vld [vmem:[#allocation22_spill] sm:$0xff]  ;;  %3151 = vst.msk [vmem:[#allocation3 + $0x8] sm:$0x1] %vm3150_vm4, %v10709_v21 }
 0x1df   : > { %v1916_v9 = vpop.permute.xlu2 %1915  ;;  %3155 = vst.msk [vmem:[#allocation3 + $0xd4] sm:$0x1] %vm3150_vm4, %v10709_v21  ;;  %v10724_v21 = vld [vmem:[#allocation40_spill] sm:$0xff] }
 0x1e1   : > { %v1879_v1 = vpop.permute.xlu1 %1878 }
 0x1e2   : > { %v2165_v46 = vsel %vm2141_vm11, %v2132_v14, %v1879_v1  ;;  %v10710_v1 = vld [vmem:[#allocation34_spill] sm:$0xff] }
 0x1e3   : > { %v2198_v10 = vsel %vm2174_vm13, %v2165_v46, %v8050_v7  ;;  %v2085_v7 = vsel %vm10614_vm7, %v2052_v26, %v10700_v29  ;;  %v10714_v46 = vld [vmem:[#allocation14_spill] sm:$0xff] }
 0x1e4   : > { %v1968_v44 = vpop.permute.xlu0 %1967  ;;  %v2118_v57 = vsel %vm10613_vm9, %v2085_v7, %v10701_v16  ;;  %v8196_v29 = vld [vmem:[%s10568_s3] ss:$0 sm:$0xff]  ;;  %v3158_v7 = vld [vmem:[#allocation3] sm:$0x1] }
 0x1e5   : > { %v2248_v3 = vsel %vm2240_vm0, %v2215_v28, %v1968_v44  ;;  %v2151_v54 = vsel %vm2141_vm11, %v2118_v57, %v1865_v59  ;;  %v2134_v59 = vsel %vm10613_vm9, %v2101_v33, %v1846_v45  ;;  %v2011_v45 = vsel %vm10616_vm1, %v10707_v30, %v10706_v49  ;;  %v10711_v28 = vld [vmem:[#allocation36_spill] sm:$0xff]  ;;  %v3213_v16 = vld [vmem:[#allocation3 + $0x8] sm:$0x1]  ;;  %v8212_v33 = vld [vmem:[#allocation3 + $0x4] sm:$0xf] }
 0x1e6   : > { %6189 = vmatmul.msk.bf16.gmra.mxu0 %vm10617_vm6, %v2248_v3  ;;  %v2054_v56 = vsel %vm10615_vm8, %v2011_v45, %v10708_v51  ;;  %v10712_v3 = vld [vmem:[#allocation11_spill] sm:$0xff] }
 0x1e7   : > { %v1867_v36 = vpop.permute.xlu2 %1866  ;;  %v2087_v32 = vsel %vm10614_vm7, %v2054_v56, %v10710_v1 }
 0x1e8   : > { %v2120_v42 = vsel %vm10613_vm9, %v2087_v32, %v10711_v28 }
 0x1e9   : > { %v1984_v23 = vpop.permute.xlu1 %1983  ;;  %v2153_v53 = vsel %vm2141_vm11, %v2120_v42, %v1867_v36 }
 0x1ec   : > { %v1949_v34 = vpop.permute.xlu0 %1948 }
 0x1ed   : > { %v2231_v47 = vsel %vm2207_vm14, %v2198_v10, %v1949_v34  ;;  %v10715_v34 = vld [vmem:[#allocation39_spill] sm:$0xff] }
 0x1ee   : > { %v2264_v63 = vsel %vm2240_vm0, %v2231_v47, %v1984_v23 }
 0x1ef   : > { %6197 = vmatmul.msk.bf16.gmra.mxu2 %vm10617_vm6, %v2264_v63  ;;  %v1848_v62 = vpop.permute.xlu2 %1847 }
 0x1f1   : > { %v1935_v12 = vpop.permute.xlu1 %1934 }
 0x1f4   : > { %v1900_v37 = vpop.permute.xlu0 %1899 }
 0x1f5   : > { %v2184_v18 = vsel %vm2174_vm13, %v2151_v54, %v1900_v37  ;;  %v8184_v37 = vld [vmem:[%s10567_s2] ss:$0 sm:$0xff] }
 0x1f6   : > { %v2217_v50 = vsel %vm2207_vm14, %v2184_v18, %v1935_v12 }
 0x1f7   : > { %v1918_v15 = vpop.permute.xlu2 %1917 }
 0x1f9   : > { %v1881_v17 = vpop.permute.xlu1 %1880 }
 0x1fa   : > { %v2167_v2 = vsel %vm2141_vm11, %v2134_v59, %v1881_v17  ;;  %v3159_v17 = vsel %vm8177_vm5, 0, %v3158_v7  ;;  %v10720_v59 = vld [vmem:[#allocation29_spill] sm:$0xff] }
 0x1fb   : > { %v2200_v41 = vsel %vm2174_vm13, %v2167_v2, %v1916_v9  ;;  %v10713_v9 = vld [vmem:[#allocation25_spill] sm:$0xff]  ;;  %3160 = vst [vmem:[#allocation3] sm:$0x1] %v3159_v17  ;;  %v10721_v2 = vld [vmem:[#allocation23_spill] sm:$0xff] }
 0x1fc   : > { %v1970_v24 = vpop.permute.xlu0 %1969  ;;  %v2035_v14 = vsel %vm10616_vm1, %v10713_v9, %v10712_v3 }
 0x1fd   : > { %v2250_v31 = vsel %vm2240_vm0, %v2217_v50, %v1970_v24  ;;  %v2070_v23 = vsel %vm10615_vm8, %v2035_v14, %v10714_v46 }
 0x1fe   : > { %6190 = vmatmul.msk.bf16.gmra.mxu0 %vm10617_vm6, %v2250_v31  ;;  %v2103_v47 = vsel %vm10614_vm7, %v2070_v23, %v10715_v34  ;;  %v4222_v31 = vrot.slane %v8212_v33, 5  ;;  %v10726_v34 = vld [vmem:[#allocation27_spill] sm:$0xff] }
 0x1ff   : > { %v1869_v19 = vpop.permute.xlu2 %1868  ;;  %v2136_v36 = vsel %vm10613_vm9, %v2103_v47, %v1848_v62  ;;  %vm8188_vm9 = vmand %vm3150_vm4, %vm378_vm3  ;;  %v10727_v47 = vld [vmem:[#allocation28_spill] sm:$0xff] }
 0x200   : > { %v3214_v18 = vsel %vm8188_vm9, 0, %v3213_v16  ;;  %v4224_v45 = vrot.slane %v4222_v31, 4  ;;  %vm10730_vm4 = vmmov %vm10725_vm2 }
 0x201   : > { %v1986_v60 = vpop.permute.xlu1 %1985  ;;  %3215 = vst [vmem:[#allocation3 + $0x8] sm:$0x1] %v3214_v18 }
 0x204   : > { %v1951_v48 = vpop.permute.xlu0 %1950 }
 0x205   : > { %v2233_v58 = vsel %vm2207_vm14, %v2200_v41, %v1951_v48  ;;  %v8218_v48 = vld [vmem:[#allocation3] sm:$0xf] }
 0x206   : > { %v2266_v61 = vsel %vm2240_vm0, %v2233_v58, %v1986_v60  ;;  %v2014_v60 = vsel %vm10616_vm1, %v10721_v2, %v10720_v59  ;;  %v10722_v58 = vld [vmem:[#allocation12_spill] sm:$0xff]  ;;  %v6234_v30 = vrot.slane %v8218_v48, 9  ;;  %v3185_v59 = vld [vmem:[#allocation3 + $0x6c] sm:$0x1] }
 0x207   : > { %6198 = vmatmul.msk.bf16.gmra.mxu2 %vm10617_vm6, %v2266_v61  ;;  %v8172_v12 = vpop.permute.xlu2 %1849  ;;  %v2056_v61 = vsel %vm10615_vm8, %v2014_v60, %v10722_v58  ;;  %v10732_v60 = vld [vmem:[#allocation6_spill] sm:$0xff] }
 0x208   : > { %v8223_v49 = vld [vmem:[#allocation3 + $0x8] sm:$0x1]  ;;  %v4223_v28 = vsel %vm7407_vm15, %v6234_v30, %v4222_v31  ;;  %v10734_v30 = vld [vmem:[#allocation31_spill] sm:$0xff] }
 0x209   : > { %v1937_v0 = vpop.permute.xlu1 %1936  ;;  %v4225_v56 = vrot.slane %v8223_v49, 5 }
 0x20c   : > { %v1902_v52 = vpop.permute.xlu0 %1901 }
 0x20d   : > { %v2186_v6 = vsel %vm2174_vm13, %v2153_v53, %v1902_v52  ;;  %v10723_v52 = vld [vmem:[#allocation16_spill] sm:$0xff]  ;;  %v3216_v53 = vld [vmem:[#allocation3 + $0x14] sm:$0x1] }
 0x20e   : > { %v2219_v43 = vsel %vm2207_vm14, %v2186_v6, %v1937_v0  ;;  %v2089_v51 = vsel %vm10614_vm7, %v2056_v61, %v10723_v52  ;;  %v4226_v6 = vsel %vm7407_vm15, %v4224_v45, %v4225_v56  ;;  %v3217_v46 = vsel %vm8188_vm9, 0, %v3216_v53  ;;  %v10733_v61 = vld [vmem:[#allocation8_spill] sm:$0xff] }
 0x20f   : > { %v1920_v24 = vpop.permute.xlu2 %1919  ;;  %v2122_v1 = vsel %vm10725_vm2, %v2089_v51, %v10724_v21  ;;  %v4529_v23 = vunpack.c.l.b16 %v4226_v6  ;;  %3218 = vst [vmem:[#allocation3 + $0x14] sm:$0x1] %v3217_v46  ;;  %v10736_v21 = vld [vmem:[#allocation17_spill] sm:$0xff] }
 0x210   : > { %v2155_v42 = vsel %vm2141_vm11, %v2122_v1, %v1869_v19 }
 0x211   : > { %v1883_v44 = vpop.permute.xlu1 %1882 }
 0x212   : > { %v2169_v38 = vsel %vm2141_vm11, %v2136_v36, %v1883_v44 }
 0x213   : > { %v2202_v26 = vsel %vm2174_vm13, %v2169_v38, %v1918_v15 }
 0x214   : > { %v1972_v10 = vpop.permute.xlu0 %1971 }
 0x215   : > { %v2252_v63 = vsel %vm2240_vm0, %v2219_v43, %v1972_v10  ;;  %v4528_v43 = vunpack.c.l.b16 %v4223_v28 }
 0x216   : > { %6191 = vmatmul.msk.bf16.gmra.mxu0 %vm10617_vm6, %v2252_v63  ;;  %v2038_v63 = vsel %vm10616_vm1, %v10727_v47, %v10726_v34  ;;  %v3164_v47 = vld [vmem:[#allocation3 + $0x18] sm:$0x1] }
 0x217   : > { %v1871_v36 = vpop.permute.xlu2 %1870 }
 0x219   : > { %v1988_v8 = vpop.permute.xlu1 %1987 }
 0x21c   : > { %v1953_v57 = vpop.permute.xlu0 %1952  ;;  %v2355_v54 = vpop.f32.mrf.mxu0 }
 0x21d   : > { %v2235_v62 = vsel %vm2207_vm14, %v2202_v26, %v1953_v57  ;;  %v2439_v50 = vmul.f32 %v8184_v37, %v2355_v54  ;;  %v10728_v26 = vld [vmem:[#allocation15_spill] sm:$0xff]  ;;  %v10729_v57 = vld [vmem:[#allocation38_spill] sm:$0xff] }
 0x21e   : > { %v2268_v4 = vsel %vm2240_vm0, %v2235_v62, %v1988_v8  ;;  %v4560_v8 = vpack.c.b16 %v4529_v23, %v4528_v43  ;;  %v2072_v7 = vsel %vm10615_vm8, %v2038_v63, %v10728_v26 }
 0x21f   : > { %v8208_v5 = vadd.f32 %v8196_v29, %v2439_v50  ;;  %6199 = vmatmul.msk.bf16.gmra.mxu2 %vm10617_vm6, %v2268_v4  ;;  %v2105_v54 = vsel %vm10614_vm7, %v2072_v7, %v10729_v57  ;;  %v1852_v53 = vpop.permute.xlu2 %1851  ;;  %v3165_v7 = vsel %vm8177_vm5, 0, %v3164_v47 }
 0x220   : > { %4576 = vrot.lane.b32.xlu1 %v4560_v8, %s6790_s30  ;;  %v2138_v62 = vsel %vm10730_vm4, %v2105_v54, %v8172_v12  ;;  %v2041_v12 = vsel %vm10616_vm1, %v7676_v39, %v10732_v60  ;;  %v10735_v39 = vld [vmem:[#allocation33_spill] sm:$0xff]  ;;  %3166 = vst [vmem:[#allocation3 + $0x18] sm:$0x1] %v3165_v7  ;;  %v3240_v60 = vld [vmem:[#allocation3 + $0x74] sm:$0x1] }
 0x221   : > { %v1939_v40 = vpop.permute.xlu1 %1938  ;;  %v6202_v35 = vmul.f32 -1.442695, %v8208_v5  ;;  %v3622_v7 = vld [vmem:[#allocation3 + $0xc] sm:$0xf] }
 0x223   : > { %6459 = vpow2.f32 %v6202_v35 }
 0x224   : > { %v1904_v41 = vpop.permute.xlu0 %1903  ;;  %v2357_v15 = vpop.f32.mrf.mxu0 }
 0x225   : > { %v2440_v0 = vmul.f32 %v8184_v37, %v2357_v15  ;;  %v2188_v9 = vsel %vm2174_vm13, %v2155_v42, %v1904_v41  ;;  %v3186_v15 = vsel %vm8177_vm5, 0, %v3185_v59 }
 0x226   : > { %v2221_v19 = vsel %vm2207_vm14, %v2188_v9, %v1939_v40  ;;  %v10731_v40 = vld [vmem:[#allocation10_spill] sm:$0xff]  ;;  %3187 = vst [vmem:[#allocation3 + $0x6c] sm:$0x1] %v3186_v15 }
 0x227   : > { %v8232_v32 = vadd.f32 %v8196_v29, %v2440_v0  ;;  %v2017_v35 = vsel %vm10616_vm1, %v7627_v22, %v10731_v40  ;;  %v2074_v22 = vsel %vm10615_vm8, %v2041_v12, %v10734_v30  ;;  %v3792_v12 = vshll.u32 %v8218_v48, 16 }
 0x228   : > { %v2058_v0 = vsel %vm10615_vm8, %v2017_v35, %v10733_v61  ;;  %v2107_v56 = vsel %vm10614_vm7, %v2074_v22, %v10735_v39 }
 0x229   : > { %v1885_v44 = vpop.permute.xlu1 %1884  ;;  %v6460_v3 = vpop.eup %6459  ;;  %v6203_v14 = vmul.f32 -1.442695, %v8232_v32  ;;  %v2091_v1 = vsel %vm10614_vm7, %v2058_v0, %v10736_v21  ;;  %v8308_v26 = vsel %vm10725_vm2, %v2107_v56, %v1852_v53  ;;  %v3802_v0 = vshrl.u32 %v8212_v33, 16 }
 0x22a   : > { %v8243_v10 = vadd.f32 1.0, %v6460_v3  ;;  %v2171_v27 = vsel %vm2141_vm11, %v2138_v62, %v1885_v44  ;;  %v10737_v3 = vld [vmem:[#allocation4_spill] sm:$0xff]  ;;  %v3794_v21 = vrot.slane %v3792_v12, 5 }
 0x22b   : > { %6461 = vpow2.f32 %v6203_v14  ;;  %v2395_v38 = vpop.f32.mrf.mxu2  ;;  %v2204_v58 = vsel %vm2174_vm13, %v2171_v27, %v1920_v24  ;;  %v2124_v9 = vsel %vm10725_vm2, %v2091_v1, %v10737_v3 }
 0x22c   : > { %6463 = vrcp.f32 %v8243_v10  ;;  %v1974_v16 = vpop.permute.xlu0 %1973  ;;  %v2455_v18 = vmul.f32 %v8184_v37, %v2395_v38  ;;  %v2644_v24 = vand.u32 2147483647, %v8243_v10  ;;  %v2646_v14 = vand.u32 2147483648, %v8243_v10 }
 0x22d   : > { %v2254_v17 = vsel %vm2240_vm0, %v2221_v19, %v1974_v16  ;;  %v2157_v8 = vsel %vm2141_vm11, %v2124_v9, %v1871_v36  ;;  %vm2640_vm8 = vweird.f32 %v8243_v10 }
 0x22e   : > { %6192 = vmatmul.msk.bf16.gmra.mxu0 %vm10617_vm6, %v2254_v17  ;;  %v8261_v50 = vadd.f32 %v8196_v29, %v2455_v18  ;;  %vm8302_vm7 = vcmp.eq.f32.partialorder %v2644_v24, 8.507059e+37  ;;  %v2647_v36 = vor.u32 1.1754944e-38, %v2646_v14 }
 0x230   : > { %v6218_v31 = vmul.f32 -1.442695, %v8261_v50 }
 0x231   : > { %v1990_v20 = vpop.permute.xlu1 %1989  ;;  %v6462_v4 = vpop.eup %6461 }
 0x232   : > { %v6464_v2 = vpop.eup %6463  ;;  %v8271_v41 = vadd.f32 1.0, %v6462_v4  ;;  %6465 = vpow2.f32 %v6218_v31  ;;  %v3789_v31 = vshrl.u32 %v8218_v48, 16 }
 0x233   : > { %v2636_v45 = vmul.f32 %v6464_v2, %v8243_v10  ;;  %v2360_v52 = vpop.f32.mrf.mxu0  ;;  %v2397_v51 = vpop.f32.mrf.mxu2  ;;  %vm2641_vm4 = vweird.f32 %v6464_v2 }
 0x234   : > { %6467 = vrcp.f32 %v8271_v41  ;;  %v1955_v28 = vpop.permute.xlu0 %1954  ;;  %v2441_v44 = vmul.f32 %v8184_v37, %v2360_v52  ;;  %v2456_v43 = vmul.f32 %v8184_v37, %v2397_v51  ;;  %v2659_v19 = vand.u32 2147483647, %v8271_v41  ;;  %vm2642_vm1 = vmor %vm2640_vm8, %vm2641_vm4 }
 0x235   : > { %v2637_v42 = vsub.f32 1.0, %v2636_v45  ;;  %v2237_v6 = vsel %vm2207_vm14, %v2204_v58, %v1955_v28  ;;  %vm2655_vm2 = vweird.f32 %v8271_v41  ;;  %v2661_v27 = vand.u32 2147483648, %v8271_v41 }
 0x236   : > { %v2270_v46 = vsel %vm2240_vm0, %v2237_v6, %v1990_v20  ;;  %v8296_v34 = vadd.f32 %v8196_v29, %v2441_v44  ;;  %v8299_v63 = vadd.f32 %v8196_v29, %v2456_v43  ;;  %v3241_v45 = vsel %vm8188_vm9, 0, %v3240_v60 }
 0x237   : > { %v2638_v23 = vmul.f32 %v6464_v2, %v2637_v42  ;;  %6200 = vmatmul.msk.bf16.gmra.mxu2 %vm10617_vm6, %v2270_v46  ;;  %vm8323_vm6 = vcmp.eq.f32.partialorder %v2659_v19, 8.507059e+37  ;;  %v2662_v30 = vor.u32 1.1754944e-38, %v2661_v27  ;;  %3242 = vst [vmem:[#allocation3 + $0x74] sm:$0x1] %v3241_v45  ;;  %v3791_v56 = vrot.slane %v3789_v31, 4 }
 0x238   : > { %v6466_v57 = vpop.eup %6465  ;;  %v6204_v17 = vmul.f32 -1.442695, %v8296_v34  ;;  %v6219_v18 = vmul.f32 -1.442695, %v8299_v63  ;;  %v8346_v42 = vrot.slane %v3802_v0, 4 }
 0x239   : > { %v8312_v16 = vpop.permute.xlu1 %1940  ;;  %v2639_v54 = vadd.f32 %v6464_v2, %v2638_v23  ;;  %v8320_v20 = vadd.f32 1.0, %v6466_v57  ;;  %v3219_v57 = vld [vmem:[#allocation3 + $0x20] sm:$0x1] }
 0x23a   : > { %v6468_v62 = vpop.eup %6467  ;;  %6469 = vpow2.f32 %v6204_v17  ;;  %v3795_v17 = vor.u32 %v3794_v21, %v3791_v56 }
 0x23b   : > { %v2643_v4 = vsel %vm2642_vm1, %v6464_v2, %v2639_v54  ;;  %v2651_v40 = vmul.f32 %v6468_v62, %v8271_v41  ;;  %v2362_v35 = vpop.f32.mrf.mxu0  ;;  %6471 = vrcp.f32 %v8320_v20  ;;  %v3798_v2 = vshll.u32 %v8212_v33, 16  ;;  %v6424_v41 = vld [vmem:[%s10569_s4] sm:$0xff] }
 0x23c   : > { %v2648_v59 = vsel %vm8302_vm7, %v2647_v36, %v2643_v4  ;;  %6473 = vpow2.f32 %v6219_v18  ;;  %v1906_v61 = vpop.permute.xlu0 %1905  ;;  %v2886_v22 = vand.u32 2147483648, %v8320_v20  ;;  %v2442_v52 = vmul.f32 %v8184_v37, %v2362_v35  ;;  %v1922_v4 = vpop.permute.xlu2 %1921 }
 0x23d   : > { %v3115_v15 = vmul.f32 %v2648_v59, %v8208_v5  ;;  %v2652_v58 = vsub.f32 1.0, %v2651_v40  ;;  %vm2656_vm1 = vweird.f32 %v6468_v62  ;;  %v2884_v48 = vand.u32 2147483647, %v8320_v20 }
 0x23e   : > { %v8341_v5 = vadd.f32 %v8196_v29, %v2442_v52  ;;  %v8343_v33 = vrot.slane %v3798_v2, 5  ;;  %vm2880_vm7 = vweird.f32 %v8320_v20  ;;  %vm2657_vm8 = vmor %vm2655_vm2, %vm2656_vm1  ;;  %v2887_v44 = vor.u32 1.1754944e-38, %v2886_v22 }
 0x23f   : > { %v3267_v51 = vpack.c.bf16 %v3115_v15, %v3115_v15  ;;  %v2653_v39 = vmul.f32 %v6468_v62, %v2652_v58  ;;  %v2190_v3 = vsel %vm2174_vm13, %v2157_v8, %v1906_v61  ;;  %vm8357_vm4 = vcmp.eq.f32.partialorder %v2884_v48, 8.507059e+37 }
 0x240   : > { %v6470_v1 = vpop.eup %6469  ;;  %v6205_v43 = vmul.f32 -1.442695, %v8341_v5  ;;  %vm10744_vm2 = vcmask 27648   ;;  %v2223_v54 = vsel %vm2207_vm14, %v2190_v3, %v8312_v16  ;;  %v3805_v10 = vor.u32 %v8346_v42, %v8343_v33 }
 0x241   : > { %v3300_v24 = vshrl.u32 %v3267_v51, 16  ;;  %v2654_v28 = vadd.f32 %v6468_v62, %v2653_v39  ;;  %v6472_v53 = vpop.eup %6471  ;;  %v8350_v6 = vadd.f32 1.0, %v6470_v1  ;;  %v1887_v9 = vpop.permute.xlu1 %1886  ;;  %v3303_v23 = vshll.u32 %v3267_v51, 16  ;;  %vm8363_vm1 = vmand %vm10744_vm2, %vm378_vm3 }
 0x242   : > { %v6474_v14 = vpop.eup %6473  ;;  %v2876_v47 = vmul.f32 %v6472_v53, %v8320_v20  ;;  %v2173_v27 = vsel %vm2141_vm11, %v8308_v26, %v1887_v9  ;;  %vm2881_vm3 = vweird.f32 %v6472_v53  ;;  %v2400_v60 = vpop.f32.mrf.mxu2  ;;  %v8388_v12 = vrot.slane %v3795_v17, 4 }
 0x243   : > { %v8354_v46 = vrot.slane %v3300_v24, 7  ;;  %v2658_v19 = vsel %vm2657_vm8, %v6468_v62, %v2654_v28  ;;  %6475 = vrcp.f32 %v8350_v6  ;;  %v8376_v40 = vadd.f32 1.0, %v6474_v14  ;;  %vm2882_vm11 = vmor %vm2880_vm7, %vm2881_vm3  ;;  %v3626_v28 = vld [vmem:[#allocation3 + $0x14] sm:$0x1] }
 0x244   : > { %v2663_v8 = vsel %vm8323_vm6, %v2662_v30, %v2658_v19  ;;  %v2877_v36 = vsub.f32 1.0, %v2876_v47  ;;  %6477 = vpow2.f32 %v6205_v43  ;;  %v1976_v59 = vpop.permute.xlu0 %1975  ;;  %v8386_v26 = vsel %vm2174_vm13, %v2173_v27, %v1922_v4  ;;  %vm10749_vm8 = vmmov %vm10744_vm2 }
 0x245   : > { %v3305_v18 = vor.u32 %v3303_v23, %v8354_v46  ;;  %v3116_v62 = vmul.f32 %v2663_v8, %v8232_v32  ;;  %v3220_v32 = vsel %vm8188_vm9, 0, %v3219_v57  ;;  %6479 = vrcp.f32 %v8376_v40  ;;  %v3188_v23 = vld [vmem:[#allocation3 + $0x78] sm:$0x1] }
 0x246   : > { %v2878_v31 = vmul.f32 %v6472_v53, %v2877_v36  ;;  %v3808_v2 = vshll.u32 %v8223_v49, 16  ;;  %v3306_v15 = vrot.slane %v8354_v46, 4  ;;  %vm2670_vm6 = vweird.f32 %v8350_v6  ;;  %3221 = vst [vmem:[#allocation3 + $0x20] sm:$0x1] %v3220_v32 }
 0x247   : > { %v3623_v16 = vsel %vm8363_vm1, %v3305_v18, %v3622_v7  ;;  %v3268_v35 = vpack.c.bf16 %v3116_v62, %v3116_v62  ;;  %v2674_v0 = vand.u32 2147483647, %v8350_v6  ;;  %v2676_v22 = vand.u32 2147483648, %v8350_v6 }
 0x248   : > { %3624 = vst [vmem:[#allocation3 + $0xc] sm:$0xf] %v3623_v16  ;;  %v2879_v61 = vadd.f32 %v6472_v53, %v2878_v31  ;;  %v2899_v45 = vand.u32 2147483647, %v8376_v40  ;;  %v2256_v52 = vsel %vm2240_vm0, %v2223_v54, %v1976_v59  ;;  %v2457_v51 = vmul.f32 %v8184_v37, %v2400_v60 }
 0x249   : > { %v3308_v58 = vshrl.u32 %v3268_v35, 16  ;;  %v6476_v30 = vpop.eup %6475  ;;  %v3311_v48 = vshll.u32 %v3268_v35, 16  ;;  %vm10747_vm13 = vcmask 588800   ;;  %v2677_v62 = vor.u32 1.1754944e-38, %v2676_v22  ;;  %v3629_v35 = vld [vmem:[#allocation3 + $0x18] sm:$0xf] }
 0x24a   : > { %v2883_v56 = vsel %vm2882_vm11, %v6472_v53, %v2879_v61  ;;  %v2666_v21 = vmul.f32 %v6476_v30, %v8350_v6  ;;  %6193 = vmatmul.msk.bf16.gmra.mxu0 %vm10747_vm13, %v2256_v52  ;;  %v6478_v24 = vpop.eup %6477  ;;  %vm2671_vm7 = vweird.f32 %v6476_v30  ;;  %v8406_v43 = vadd.f32 %v8196_v29, %v2457_v51  ;;  %v2402_v22 = vpop.f32.mrf.mxu2  ;;  %v3678_v51 = vld [vmem:[#allocation3 + $0x6c] sm:$0xf] }
 0x24b   : > { %v3310_v39 = vrot.slane %v3308_v58, 7  ;;  %v2365_v1 = vpop.f32.mrf.mxu0  ;;  %v2888_v20 = vsel %vm8357_vm4, %v2887_v44, %v2883_v56  ;;  %v8410_v19 = vpop.eup %6479  ;;  %v8412_v47 = vadd.f32 1.0, %v6478_v24  ;;  %v3189_v44 = vsel %vm8177_vm5, 0, %v3188_v23  ;;  %vm8437_vm3 = vmor %vm2670_vm6, %vm2671_vm7 }
 0x24c   : > { %v2443_v3 = vmul.f32 %v8184_v37, %v2365_v1  ;;  %v3131_v53 = vmul.f32 %v2888_v20, %v8261_v50  ;;  %v2667_v46 = vsub.f32 1.0, %v2666_v21  ;;  %v6220_v7 = vmul.f32 -1.442695, %v8406_v43  ;;  %3190 = vst [vmem:[#allocation3 + $0x78] sm:$0x1] %v3189_v44  ;;  %v1957_v60 = vpop.permute.xlu0 %1956 }
 0x24d   : > { %v3313_v9 = vor.u32 %v3311_v48, %v3310_v39  ;;  %v3315_v14 = vrot.slane %v3310_v39, 4  ;;  %vm8425_vm4 = vcmp.eq.f32.partialorder %v2674_v0, 8.507059e+37  ;;  %v2891_v36 = vmul.f32 %v8410_v19, %v8376_v40  ;;  %v3167_v0 = vld [vmem:[#allocation3 + $0x24] sm:$0x1] }
 0x24e   : > { %v8418_v38 = vadd.f32 %v8196_v29, %v2443_v3  ;;  %v3283_v54 = vpack.c.bf16 %v3131_v53, %v3131_v53  ;;  %v2668_v17 = vmul.f32 %v6476_v30, %v2667_v46  ;;  %6481 = vrcp.f32 %v8412_v47 }
 0x24f   : > { %v3314_v57 = vsel %vm6914_vm10, %v3306_v15, %v3313_v9  ;;  %v3627_v50 = vsel %vm8177_vm5, %v3315_v14, %v3626_v28  ;;  %vm2895_vm2 = vweird.f32 %v8376_v40  ;;  %v2901_v16 = vand.u32 2147483648, %v8376_v40  ;;  %v1992_v15 = vpop.permute.xlu1 %1991 }
 0x250   : > { %3625 = vst.msk [vmem:[#allocation3 + $0x10] sm:$0xf] %vm10749_vm8, %v3314_v57  ;;  %v3436_v27 = vshrl.u32 %v3283_v54, 16  ;;  %v2669_v4 = vadd.f32 %v6476_v30, %v2668_v17  ;;  %v2892_v31 = vsub.f32 1.0, %v2891_v36  ;;  %vm8441_vm11 = vcmp.eq.f32.partialorder %v2899_v45, 8.507059e+37 }
 0x251   : > { %3628 = vst [vmem:[#allocation3 + $0x14] sm:$0x1] %v3627_v50  ;;  %6483 = vpow2.f32 %v6220_v7  ;;  %v6206_v59 = vmul.f32 -1.442695, %v8418_v38  ;;  %v3439_v61 = vshll.u32 %v3283_v54, 16  ;;  %v3801_v45 = vsel %vm6937_vm12, %v8388_v12, %v8343_v33 }
 0x252   : > { %v8446_v58 = vrot.slane %v3436_v27, 7  ;;  %v2673_v6 = vsel %vm8437_vm3, %v6476_v30, %v2669_v4  ;;  %v2893_v48 = vmul.f32 %v8410_v19, %v2892_v31  ;;  %vm2896_vm6 = vweird.f32 %v8410_v19  ;;  %v3633_v12 = vld [vmem:[#allocation3 + $0x20] sm:$0x1] }
 0x253   : > { %v2367_v52 = vpop.f32.mrf.mxu0  ;;  %v2678_v39 = vsel %vm8425_vm4, %v2677_v62, %v2673_v6  ;;  %6485 = vpow2.f32 %v6206_v59  ;;  %v3168_v21 = vsel %vm8177_vm5, 0, %v3167_v0  ;;  %v2239_v1 = vsel %vm2207_vm14, %v8386_v26, %v1957_v60  ;;  %vm2897_vm13 = vmor %vm2895_vm2, %vm2896_vm6 }
 0x254   : > { %v3441_v56 = vor.u32 %v3439_v61, %v8446_v58  ;;  %v3117_v30 = vmul.f32 %v2678_v39, %v8296_v34  ;;  %v6482_v24 = vpop.eup %6481  ;;  %v2894_v28 = vadd.f32 %v8410_v19, %v2893_v48  ;;  %3169 = vst [vmem:[#allocation3 + $0x24] sm:$0x1] %v3168_v21  ;;  %v2458_v20 = vmul.f32 %v8184_v37, %v2402_v22  ;;  %v3243_v22 = vld [vmem:[#allocation3 + $0x80] sm:$0x1] }
 0x255   : > { %v2444_v3 = vmul.f32 %v8184_v37, %v2367_v52  ;;  %v2272_v9 = vsel %vm2240_vm0, %v2239_v1, %v1992_v15  ;;  %v2902_v53 = vor.u32 1.1754944e-38, %v2901_v16  ;;  %v2681_v26 = vmul.f32 %v6482_v24, %v8412_v47  ;;  %v3682_v1 = vld [vmem:[#allocation3 + $0x74] sm:$0x1] }
 0x256   : > { %v3679_v14 = vsel %vm8363_vm1, %v3441_v56, %v3678_v51  ;;  %v3269_v34 = vpack.c.bf16 %v3117_v30, %v3117_v30  ;;  %vm10756_vm14 = vcmask 588800   ;;  %v2898_v23 = vsel %vm2897_vm13, %v8410_v19, %v2894_v28 }
 0x257   : > { %6201 = vmatmul.msk.bf16.gmra.mxu2 %vm10756_vm14, %v2272_v9  ;;  %v6484_v46 = vpop.eup %6483  ;;  %3680 = vst [vmem:[#allocation3 + $0x6c] sm:$0xf] %v3679_v14  ;;  %vm2685_vm7 = vweird.f32 %v8412_v47  ;;  %v2689_v7 = vand.u32 2147483647, %v8412_v47  ;;  %v2691_v44 = vand.u32 2147483648, %v8412_v47  ;;  %v2903_v40 = vsel %vm8441_vm11, %v2902_v53, %v2898_v23 }
 0x258   : > { %v3317_v57 = vshrl.u32 %v3269_v34, 16  ;;  %v2682_v50 = vsub.f32 1.0, %v2681_v26  ;;  %v8481_v54 = vadd.f32 %v8196_v29, %v2458_v20  ;;  %v3132_v18 = vmul.f32 %v2903_v40, %v8299_v63 }
 0x259   : > { %v6486_v17 = vpop.eup %6485  ;;  %vm2686_vm0 = vweird.f32 %v6482_v24  ;;  %v8484_v62 = vadd.f32 1.0, %v6484_v46  ;;  %v8487_v19 = vadd.f32 %v8196_v29, %v2444_v3  ;;  %v3320_v27 = vshll.u32 %v3269_v34, 16 }
 0x25a   : > { %v8489_v36 = vrot.slane %v3317_v57, 7  ;;  %v2683_v4 = vmul.f32 %v6482_v24, %v2682_v50  ;;  %v8491_v16 = vadd.f32 1.0, %v6486_v17  ;;  %v3284_v31 = vpack.c.bf16 %v3132_v18, %v3132_v18  ;;  %vm2687_vm4 = vmor %vm2685_vm7, %vm2686_vm0  ;;  %v2405_v26 = vpop.f32.mrf.mxu2 }
 0x25b   : > { %vm8493_vm8 = vcmp.eq.f32.partialorder %v2689_v7, 8.507059e+37  ;;  %v2692_v59 = vor.u32 1.1754944e-38, %v2691_v44  ;;  %6487 = vrcp.f32 %v8484_v62  ;;  %v6221_v15 = vmul.f32 -1.442695, %v8481_v54 }
 0x25c   : > { %v3322_v63 = vor.u32 %v3320_v27, %v8489_v36  ;;  %v2684_v60 = vadd.f32 %v6482_v24, %v2683_v4  ;;  %v3806_v61 = vrot.slane %v3805_v10, 4  ;;  %v3444_v6 = vshrl.u32 %v3284_v31, 16 }
 0x25d   : > { %v2916_v0 = vand.u32 2147483648, %v8484_v62  ;;  %6489 = vrcp.f32 %v8491_v16  ;;  %v6207_v52 = vmul.f32 -1.442695, %v8487_v19  ;;  %v2914_v48 = vand.u32 2147483647, %v8484_v62 }
 0x25e   : > { %v3630_v51 = vsel %vm8363_vm1, %v3322_v63, %v3629_v35  ;;  %v2688_v39 = vsel %vm2687_vm4, %v6482_v24, %v2684_v60  ;;  %v3810_v42 = vrot.slane %v3808_v2, 5  ;;  %v3442_v10 = vrot.slane %v8446_v58, 4  ;;  %v3222_v2 = vld [vmem:[#allocation3 + $0x2c] sm:$0x1] }
 0x25f   : > { %3631 = vst [vmem:[#allocation3 + $0x18] sm:$0xf] %v3630_v51  ;;  %v3446_v47 = vrot.slane %v3444_v6, 7  ;;  %v3447_v56 = vshll.u32 %v3284_v31, 16  ;;  %v2693_v30 = vsel %vm8493_vm8, %v2692_v59, %v2688_v39  ;;  %v3323_v21 = vrot.slane %v8489_v36, 4 }
 0x260   : > { %v3118_v28 = vmul.f32 %v2693_v30, %v8341_v5  ;;  %vm2910_vm2 = vweird.f32 %v8484_v62  ;;  %6491 = vpow2.f32 %v6221_v15  ;;  %v3244_v49 = vsel %vm8188_vm9, 0, %v3243_v22 }
 0x261   : > { %v6488_v24 = vpop.eup %6487  ;;  %v3449_v58 = vor.u32 %v3447_v56, %v3446_v47  ;;  %v3451_v20 = vrot.slane %v3446_v47, 4  ;;  %v2917_v3 = vor.u32 1.1754944e-38, %v2916_v0  ;;  %v2704_v9 = vand.u32 2147483647, %v8491_v16  ;;  %3245 = vst [vmem:[#allocation3 + $0x80] sm:$0x1] %v3244_v49 }
 0x262   : > { %v3270_v14 = vpack.c.bf16 %v3118_v28, %v3118_v28  ;;  %v2906_v34 = vmul.f32 %v6488_v24, %v8484_v62  ;;  %vm8524_vm3 = vcmp.eq.f32.partialorder %v2914_v48, 8.507059e+37  ;;  %6493 = vpow2.f32 %v6207_v52  ;;  %v8565_v47 = vld [vmem:[#allocation3 + $0xc] sm:$0xf] }
 0x263   : > { %v3811_v5 = vsel %vm6937_vm12, %v3806_v61, %v3810_v42  ;;  %v6490_v46 = vpop.eup %6489  ;;  %v3450_v23 = vsel %vm6914_vm10, %v3442_v10, %v3449_v58  ;;  %v3683_v7 = vsel %vm8177_vm5, %v3451_v20, %v3682_v1  ;;  %v3223_v44 = vsel %vm8188_vm9, 0, %v3222_v2  ;;  %v2370_v36 = vpop.f32.mrf.mxu0  ;;  %v3191_v2 = vld [vmem:[#allocation3 + $0x84] sm:$0x1]  ;;  %v6407_v20 = vld [vmem:[#allocation3 + $0xc] sm:$0xff] }
 0x264   : > { %v4448_v57 = vunpack.c.l.b16 %v3801_v45  ;;  %vm10761_vm11 = vcmask 27648   ;;  %v3325_v40 = vshrl.u32 %v3270_v14, 16  ;;  %v2907_v50 = vsub.f32 1.0, %v2906_v34  ;;  %3684 = vst [vmem:[#allocation3 + $0x74] sm:$0x1] %v3683_v7 }
 0x265   : > { %3681 = vst.msk [vmem:[#allocation3 + $0x70] sm:$0xf] %vm10761_vm11, %v3450_v23  ;;  %v2696_v17 = vmul.f32 %v6490_v46, %v8491_v16  ;;  %v2706_v18 = vand.u32 2147483648, %v8491_v16  ;;  %v3328_v27 = vshll.u32 %v3270_v14, 16  ;;  %vm2911_vm6 = vweird.f32 %v6488_v24  ;;  %vm10764_vm8 = vmmov %vm10761_vm11  ;;  %v8584_v14 = vld [vmem:[#allocation3 + $0x10] sm:$0xf] }
 0x266   : > { %v4449_v4 = vunpack.c.l.b16 %v3811_v5  ;;  %v2459_v35 = vmul.f32 %v8184_v37, %v2405_v26  ;;  %v6492_v31 = vpop.eup %6491  ;;  %v3327_v32 = vrot.slane %v3325_v40, 7  ;;  %v2908_v59 = vmul.f32 %v6488_v24, %v2907_v50  ;;  %3224 = vst [vmem:[#allocation3 + $0x2c] sm:$0x1] %v3223_v44  ;;  %vm2912_vm14 = vmor %vm2910_vm2, %vm2911_vm6  ;;  %v2407_v44 = vpop.f32.mrf.mxu2 }
 0x267   : > { %v2697_v33 = vsub.f32 1.0, %v2696_v17  ;;  %vm2701_vm13 = vweird.f32 %v6490_v46  ;;  %v8545_v45 = vadd.f32 1.0, %v6492_v31  ;;  %v2445_v15 = vmul.f32 %v8184_v37, %v2370_v36 }
 0x268   : > { %v4480_v63 = vpack.c.b16 %v4449_v4, %v4448_v57  ;;  %v8548_v60 = vadd.f32 %v8196_v29, %v2459_v35  ;;  %v6494_v61 = vpop.eup %6493  ;;  %v3330_v6 = vor.u32 %v3328_v27, %v3327_v32  ;;  %v3332_v0 = vrot.slane %v3327_v32, 4  ;;  %v3685_v35 = vld [vmem:[#allocation3 + $0x78] sm:$0xf]  ;;  %v3170_v32 = vld [vmem:[#allocation3 + $0x30] sm:$0x1] }
 0x269   : > { %v2909_v22 = vadd.f32 %v6488_v24, %v2908_v59  ;;  %v2698_v52 = vmul.f32 %v6490_v46, %v2697_v33  ;;  %vm2700_vm7 = vweird.f32 %v8491_v16  ;;  %vm8555_vm0 = vcmp.eq.f32.partialorder %v2704_v9, 8.507059e+37 }
 0x26a   : > { %v2707_v39 = vor.u32 1.1754944e-38, %v2706_v18  ;;  %6495 = vrcp.f32 %v8545_v45  ;;  %4496 = vrot.lane.b32.xlu2 %v4480_v63, %s6798_s14  ;;  %v3331_v48 = vsel %vm6914_vm10, %v3323_v21, %v3330_v6  ;;  %v3634_v42 = vsel %vm8177_vm5, %v3332_v0, %v3633_v12  ;;  %vm2702_vm4 = vmor %vm2700_vm7, %vm2701_vm13  ;;  %v8609_v6 = vld [vmem:[#allocation3 + $0x14] sm:$0x1]  ;;  %v3636_v0 = vld [vmem:[#allocation3 + $0x24] sm:$0xf] }
 0x26b   : > { %v2913_v62 = vsel %vm2912_vm14, %v6488_v24, %v2909_v22  ;;  %v2699_v10 = vadd.f32 %v6490_v46, %v2698_v52  ;;  %3632 = vst.msk [vmem:[#allocation3 + $0x1c] sm:$0xf] %vm10764_vm8, %v3331_v48  ;;  %v2929_v56 = vand.u32 2147483647, %v8545_v45  ;;  %v8572_v30 = vadd.f32 1.0, %v6494_v61 }
 0x26c   : > { %v2918_v16 = vsel %vm8524_vm3, %v2917_v3, %v2913_v62  ;;  %v8575_v21 = vadd.f32 %v8196_v29, %v2445_v15  ;;  %3635 = vst [vmem:[#allocation3 + $0x20] sm:$0x1] %v3634_v42  ;;  %v6222_v49 = vmul.f32 -1.442695, %v8548_v60  ;;  %v2931_v58 = vand.u32 2147483648, %v8545_v45 }
 0x26d   : > { %v3133_v1 = vmul.f32 %v2918_v16, %v8406_v43  ;;  %v2703_v28 = vsel %vm2702_vm4, %v6490_v46, %v2699_v10  ;;  %6497 = vrcp.f32 %v8572_v30  ;;  %v6235_v43 = vrot.slane %v8565_v47, 9 }
 0x26e   : > { %v2708_v24 = vsel %vm8555_vm0, %v2707_v39, %v2703_v28  ;;  %6499 = vpow2.f32 %v6222_v49  ;;  %vm2925_vm2 = vweird.f32 %v8545_v45  ;;  %v2721_v53 = vand.u32 2147483648, %v8572_v30 }
 0x26f   : > { %v3285_v3 = vpack.c.bf16 %v3133_v1, %v3133_v1  ;;  %v3119_v9 = vmul.f32 %v2708_v24, %v8418_v38  ;;  %v3192_v5 = vsel %vm8177_vm5, 0, %v3191_v2  ;;  %v6208_v26 = vmul.f32 -1.442695, %v8575_v21 }
 0x270   : > { %v6496_v34 = vpop.eup %6495  ;;  %vm8593_vm3 = vcmp.eq.f32.partialorder %v2929_v56, 8.507059e+37  ;;  %3193 = vst [vmem:[#allocation3 + $0x84] sm:$0x1] %v3192_v5  ;;  %v2932_v57 = vor.u32 1.1754944e-38, %v2931_v58  ;;  %v2719_v40 = vand.u32 2147483647, %v8572_v30  ;;  %vm2715_vm6 = vweird.f32 %v8572_v30 }
 0x271   : > { %v3453_v46 = vshrl.u32 %v3285_v3, 16  ;;  %v3271_v23 = vpack.c.bf16 %v3119_v9, %v3119_v9  ;;  %v2921_v7 = vmul.f32 %v6496_v34, %v8545_v45  ;;  %6501 = vpow2.f32 %v6208_v26 }
 0x272   : > { %4611 = vrot.lane.b32.xlu2 %v6407_v20, %s6799_s15  ;;  %v4229_v50 = vrot.slane %v8584_v14, 5  ;;  %v3456_v18 = vshll.u32 %v3285_v3, 16  ;;  %vm2926_vm11 = vweird.f32 %v6496_v34  ;;  %v2722_v31 = vor.u32 1.1754944e-38, %v2721_v53  ;;  %v3246_v3 = vld [vmem:[#allocation3 + $0x8c] sm:$0x1]  ;;  %v8648_v53 = vld [vmem:[#allocation3 + $0x18] sm:$0xff] }
 0x273   : > { %v8600_v17 = vrot.slane %v3453_v46, 7  ;;  %v3334_v36 = vshrl.u32 %v3271_v23, 16  ;;  %v2922_v27 = vsub.f32 1.0, %v2921_v7  ;;  %v8602_v4 = vpop.eup %6497  ;;  %v2460_v59 = vmul.f32 %v8184_v37, %v2407_v44  ;;  %vm2927_vm14 = vmor %vm2925_vm2, %vm2926_vm11 }
 0x274   : > { %v6500_v33 = vpop.eup %6499  ;;  %v3337_v15 = vshll.u32 %v3271_v23, 16  ;;  %v2711_v22 = vmul.f32 %v8602_v4, %v8572_v30  ;;  %vm8613_vm13 = vcmp.eq.f32.partialorder %v2719_v40, 8.507059e+37  ;;  %v3171_v37 = vsel %vm8177_vm5, 0, %v3170_v32 }
 0x275   : > { %v3458_v12 = vor.u32 %v3456_v18, %v8600_v17  ;;  %v8607_v63 = vrot.slane %v3334_v36, 7  ;;  %v2923_v61 = vmul.f32 %v6496_v34, %v2922_v27  ;;  %v8617_v51 = vadd.f32 1.0, %v6500_v33  ;;  %3172 = vst [vmem:[#allocation3 + $0x30] sm:$0x1] %v3171_v37 }
 0x276   : > { %v4231_v39 = vrot.slane %v4229_v50, 4  ;;  %v4230_v10 = vsel %vm7407_vm15, %v6235_v43, %v4229_v50  ;;  %v2712_v56 = vsub.f32 1.0, %v2711_v22  ;;  %v4232_v1 = vrot.slane %v8609_v6, 5 }
 0x277   : > { %v3686_v48 = vsel %vm8363_vm1, %v3458_v12, %v3685_v35  ;;  %v3339_v42 = vor.u32 %v3337_v15, %v8607_v63  ;;  %v2924_v62 = vadd.f32 %v6496_v34, %v2923_v61  ;;  %v6502_v16 = vpop.eup %6501  ;;  %6503 = vrcp.f32 %v8617_v51  ;;  %v2410_v35 = vpop.f32.mrf.mxu2 }
 0x278   : > { %3687 = vst [vmem:[#allocation3 + $0x78] sm:$0xf] %v3686_v48  ;;  %v8632_v28 = vadd.f32 %v8196_v29, %v2460_v59  ;;  %vm2716_vm7 = vweird.f32 %v8602_v4  ;;  %v8637_v24 = vadd.f32 1.0, %v6502_v16  ;;  %v2713_v58 = vmul.f32 %v8602_v4, %v2712_v56 }
 0x279   : > { %v3637_v49 = vsel %vm8363_vm1, %v3339_v42, %v3636_v0  ;;  %v2928_v2 = vsel %vm2927_vm14, %v6496_v34, %v2924_v62  ;;  %v2946_v20 = vand.u32 2147483648, %v8617_v51  ;;  %v4233_v29 = vsel %vm7407_vm15, %v4231_v39, %v4232_v1  ;;  %vm2717_vm0 = vmor %vm2715_vm6, %vm2716_vm7  ;;  %v3689_v0 = vld [vmem:[#allocation3 + $0x80] sm:$0x1] }
 0x27a   : > { %3638 = vst [vmem:[#allocation3 + $0x24] sm:$0xf] %v3637_v49  ;;  %v2933_v45 = vsel %vm8593_vm3, %v2932_v57, %v2928_v2  ;;  %v2944_v43 = vand.u32 2147483647, %v8617_v51  ;;  %6505 = vrcp.f32 %v8637_v24  ;;  %v4530_v34 = vunpack.c.l.b16 %v4230_v10  ;;  %4716 = vrot.lane.b32.xlu2 %v8648_v53, %s6792_s9  ;;  %v3640_v2 = vld [vmem:[#allocation3 + $0x2c] sm:$0x1] }
 0x27b   : > { %v3134_v9 = vmul.f32 %v2933_v45, %v8481_v54  ;;  %v3459_v5 = vrot.slane %v8600_v17, 4  ;;  %v3340_v26 = vrot.slane %v8607_v63, 4  ;;  %v2714_v46 = vadd.f32 %v8602_v4, %v2713_v58 }
 0x27c   : > { %v4531_v23 = vunpack.c.l.b16 %v4233_v29  ;;  %vm2940_vm8 = vweird.f32 %v8617_v51  ;;  %v6223_v54 = vmul.f32 -1.442695, %v8632_v28  ;;  %v3247_v38 = vsel %vm8188_vm9, 0, %v3246_v3 }
 0x27d   : > { %v3286_v7 = vpack.c.bf16 %v3134_v9, %v3134_v9  ;;  %v3813_v44 = vshrl.u32 %v8565_v47, 16  ;;  %v6504_v57 = vpop.eup %6503  ;;  %v2718_v40 = vsel %vm2717_vm0, %v8602_v4, %v2714_v46  ;;  %v2947_v50 = vor.u32 1.1754944e-38, %v2946_v20  ;;  %3248 = vst [vmem:[#allocation3 + $0x8c] sm:$0x1] %v3247_v38 }
 0x27e   : > { %v2734_v17 = vand.u32 2147483647, %v8637_v24  ;;  %v8666_v30 = vpack.c.b16 %v4531_v23, %v4530_v34  ;;  %v2723_v36 = vsel %vm8613_vm13, %v2722_v31, %v2718_v40  ;;  %v2936_v27 = vmul.f32 %v6504_v57, %v8617_v51 }
 0x27f   : > { %v3461_v18 = vshrl.u32 %v3286_v7, 16  ;;  %vm8671_vm4 = vcmp.eq.f32.partialorder %v2944_v43, 8.507059e+37  ;;  %v2736_v32 = vand.u32 2147483648, %v8637_v24  ;;  %v3464_v59 = vshll.u32 %v3286_v7, 16  ;;  %v2372_v43 = vpop.f32.mrf.mxu0 }
 0x280   : > { %v3120_v4 = vmul.f32 %v2723_v36, %v8487_v19  ;;  %vm2941_vm2 = vweird.f32 %v6504_v57  ;;  %vm2730_vm3 = vweird.f32 %v8637_v24  ;;  %4681 = vrot.lane.b32.xlu1 %v8666_v30, %s6800_s16  ;;  %6507 = vpow2.f32 %v6223_v54  ;;  %v6506_v31 = vpop.eup %6505  ;;  %v8742_v19 = vld [vmem:[#allocation3 + $0x6c] sm:$0xf] }
 0x281   : > { %v3463_v33 = vrot.slane %v3461_v18, 7  ;;  %v2937_v12 = vsub.f32 1.0, %v2936_v27  ;;  %v3815_v15 = vrot.slane %v3813_v44, 4  ;;  %v3816_v61 = vshll.u32 %v8565_v47, 16  ;;  %vm2942_vm14 = vmor %vm2940_vm8, %vm2941_vm2  ;;  %v3225_v27 = vld [vmem:[#allocation3 + $0x38] sm:$0x1] }
 0x282   : > { %v3272_v22 = vpack.c.bf16 %v3120_v4, %v3120_v4  ;;  %v2726_v52 = vmul.f32 %v6506_v31, %v8637_v24  ;;  %vm8682_vm11 = vcmp.eq.f32.partialorder %v2734_v17, 8.507059e+37  ;;  %v3822_v37 = vshll.u32 %v8584_v14, 16 }
 0x283   : > { %v3826_v39 = vshrl.u32 %v8584_v14, 16  ;;  %v3466_v48 = vor.u32 %v3464_v59, %v3463_v33  ;;  %v3468_v42 = vrot.slane %v3463_v33, 4  ;;  %v2938_v62 = vmul.f32 %v6504_v57, %v2937_v12  ;;  %v8731_v12 = vld [vmem:[%s10568_s3] ss:$0 sm:$0xff] }
 0x284   : > { %v3818_v10 = vrot.slane %v3816_v61, 5  ;;  %v3342_v16 = vshrl.u32 %v3272_v22, 16  ;;  %v2727_v56 = vsub.f32 1.0, %v2726_v52  ;;  %vm2731_vm6 = vweird.f32 %v6506_v31  ;;  %v8736_v61 = vld [vmem:[#allocation3 + $0x18] sm:$0xf] }
 0x285   : > { %v2737_v47 = vor.u32 1.1754944e-38, %v2736_v32  ;;  %v3467_v1 = vsel %vm6914_vm10, %v3459_v5, %v3466_v48  ;;  %v3690_v49 = vsel %vm8177_vm5, %v3468_v42, %v3689_v0  ;;  %v2939_v45 = vadd.f32 %v6504_v57, %v2938_v62  ;;  %vm2732_vm7 = vmor %vm2730_vm3, %vm2731_vm6 }
 0x286   : > { %v3819_v58 = vor.u32 %v3818_v10, %v3815_v15  ;;  %v6508_v20 = vpop.eup %6507  ;;  %vm10773_vm13 = vcmask 27648   ;;  %v3344_v14 = vrot.slane %v3342_v16, 7  ;;  %v3345_v29 = vshll.u32 %v3272_v22, 16  ;;  %3691 = vst [vmem:[#allocation3 + $0x80] sm:$0x1] %v3690_v49 }
 0x287   : > { %3688 = vst.msk [vmem:[#allocation3 + $0x7c] sm:$0xf] %vm10773_vm13, %v3467_v1  ;;  %v2728_v3 = vmul.f32 %v6506_v31, %v2727_v56  ;;  %v3824_v9 = vrot.slane %v3822_v37, 5  ;;  %v2943_v34 = vsel %vm2942_vm14, %v6504_v57, %v2939_v45  ;;  %v8696_v5 = vadd.f32 1.0, %v6508_v20  ;;  %v8709_v57 = vld [vmem:[%s10567_s2] ss:$0 sm:$0xff]  ;;  %vm10774_vm0 = vmmov %vm10773_vm13  ;;  %v2375_v37 = vpop.f32.mrf.mxu0 }
 0x288   : > { %v3828_v46 = vrot.slane %v3826_v39, 4  ;;  %v3832_v23 = vshll.u32 %v8609_v6, 16  ;;  %v3347_v7 = vor.u32 %v3345_v29, %v3344_v14  ;;  %v3349_v54 = vrot.slane %v3344_v14, 4  ;;  %v3692_v16 = vld [vmem:[#allocation3 + $0x84] sm:$0xf]  ;;  %vm10779_vm14 = vmmov %vm10774_vm0 }
 0x289   : > { %v2948_v38 = vsel %vm8671_vm4, %v2947_v50, %v2943_v34  ;;  %v2729_v44 = vadd.f32 %v6506_v31, %v2728_v3  ;;  %6509 = vrcp.f32 %v8696_v5  ;;  %v3820_v51 = vrot.slane %v3819_v58, 4  ;;  %v8752_v49 = vld [vmem:[#allocation3 + $0x1c] sm:$0xf]  ;;  %v8759_v29 = vld [vmem:[#allocation3 + $0x20] sm:$0x1] }
 0x28a   : > { %v3135_v40 = vmul.f32 %v2948_v38, %v8548_v60  ;;  %v2446_v6 = vmul.f32 %v8709_v57, %v2372_v43  ;;  %v3348_v50 = vsel %vm6914_vm10, %v3340_v26, %v3347_v7  ;;  %v3641_v60 = vsel %vm8177_vm5, %v3349_v54, %v3640_v2 }
 0x28b   : > { %v2733_v24 = vsel %vm2732_vm7, %v6506_v31, %v2729_v44  ;;  %v2961_v17 = vand.u32 2147483648, %v8696_v5  ;;  %3639 = vst.msk [vmem:[#allocation3 + $0x28] sm:$0xf] %vm10774_vm0, %v3348_v50  ;;  %v2959_v32 = vand.u32 2147483647, %v8696_v5  ;;  %v3825_v26 = vsel %vm6937_vm12, %v3820_v51, %v3824_v9 }
 0x28c   : > { %v3287_v18 = vpack.c.bf16 %v3135_v40, %v3135_v40  ;;  %v2738_v36 = vsel %vm8682_vm11, %v2737_v47, %v2733_v24  ;;  %3642 = vst [vmem:[#allocation3 + $0x2c] sm:$0x1] %v3641_v60  ;;  %v3829_v59 = vor.u32 %v3828_v46, %v3824_v9  ;;  %v3834_v33 = vrot.slane %v3832_v23, 5  ;;  %v3643_v23 = vld [vmem:[#allocation3 + $0x30] sm:$0xf] }
 0x28d   : > { %v3121_v63 = vmul.f32 %v2738_v36, %v8575_v21  ;;  %v8726_v31 = vor.u32 1.1754944e-38, %v2961_v17  ;;  %v8734_v15 = vadd.f32 %v8731_v12, %v2446_v6  ;;  %vm2955_vm8 = vweird.f32 %v8696_v5  ;;  %v8772_v6 = vld [vmem:[#allocation3 + $0x70] sm:$0xf] }
 0x28e   : > { %v3470_v4 = vshrl.u32 %v3287_v18, 16  ;;  %v3830_v0 = vrot.slane %v3829_v59, 4  ;;  %v3226_v22 = vsel %vm8188_vm9, 0, %v3225_v27  ;;  %v2461_v52 = vmul.f32 %v8709_v57, %v2410_v35 }
 0x28f   : > { %v3273_v21 = vpack.c.bf16 %v3121_v63, %v3121_v63  ;;  %v6510_v39 = vpop.eup %6509  ;;  %v3473_v42 = vshll.u32 %v3287_v18, 16  ;;  %v4450_v62 = vunpack.c.l.b16 %v3825_v26  ;;  %v6209_v10 = vmul.f32 -1.442695, %v8734_v15  ;;  %3227 = vst [vmem:[#allocation3 + $0x38] sm:$0x1] %v3226_v22 }
 0x290   : > { %v8744_v48 = vrot.slane %v3470_v4, 7  ;;  %v2951_v47 = vmul.f32 %v6510_v39, %v8696_v5  ;;  %vm8748_vm4 = vcmp.eq.f32.partialorder %v2959_v32, 8.507059e+37  ;;  %v6236_v2 = vrot.slane %v8736_v61, 9  ;;  %v3194_v32 = vld [vmem:[#allocation3 + $0x90] sm:$0x1] }
 0x291   : > { %v3351_v56 = vshrl.u32 %v3273_v21, 16  ;;  %v2447_v45 = vmul.f32 %v8709_v57, %v2375_v37  ;;  %v3354_v20 = vshll.u32 %v3273_v21, 16  ;;  %v3835_v14 = vsel %vm6937_vm12, %v3830_v0, %v3834_v33 }
 0x292   : > { %v3475_v58 = vor.u32 %v3473_v42, %v8744_v48  ;;  %6511 = vpow2.f32 %v6209_v10  ;;  %v2952_v9 = vsub.f32 1.0, %v2951_v47  ;;  %v4451_v43 = vunpack.c.l.b16 %v3835_v14 }
 0x293   : > { %v8761_v3 = vrot.slane %v3351_v56, 7  ;;  %v8764_v34 = vadd.f32 %v8731_v12, %v2461_v52  ;;  %vm2956_vm2 = vweird.f32 %v6510_v39  ;;  %v4236_v7 = vrot.slane %v8752_v49, 5  ;;  %v8792_v52 = vld [vmem:[#allocation3 + $0x74] sm:$0x1] }
 0x294   : > { %v3693_v46 = vsel %vm8363_vm1, %v3475_v58, %v3692_v16  ;;  %v4005_v54 = vshrl.u32 %v8742_v19, 16  ;;  %v2953_v44 = vmul.f32 %v6510_v39, %v2952_v9  ;;  %v4481_v40 = vpack.c.b16 %v4451_v43, %v4450_v62  ;;  %vm2957_vm3 = vmor %vm2955_vm8, %vm2956_vm2  ;;  %v2412_v9 = vpop.f32.mrf.mxu2 }
 0x295   : > { %3694 = vst [vmem:[#allocation3 + $0x84] sm:$0xf] %v3693_v46  ;;  %v3356_v38 = vor.u32 %v3354_v20, %v8761_v3  ;;  %v4239_v51 = vrot.slane %v8759_v29, 5  ;;  %v6224_v50 = vmul.f32 -1.442695, %v8764_v34  ;;  %v4237_v60 = vsel %vm7407_vm15, %v6236_v2, %v4236_v7 }
 0x296   : > { %v4238_v24 = vrot.slane %v4236_v7, 4  ;;  %v4007_v17 = vrot.slane %v4005_v54, 4  ;;  %v2954_v36 = vadd.f32 %v6510_v39, %v2953_v44  ;;  %4498 = vrot.lane.b32.xlu0 %v4481_v40, %s6798_s14  ;;  %v4532_v27 = vunpack.c.l.b16 %v4237_v60  ;;  %v3173_v7 = vld [vmem:[#allocation3 + $0x3c] sm:$0x1] }
 0x297   : > { %v3644_v18 = vsel %vm8363_vm1, %v3356_v38, %v3643_v23  ;;  %v4008_v35 = vshll.u32 %v8742_v19, 16  ;;  %6513 = vpow2.f32 %v6224_v50  ;;  %v4014_v59 = vshll.u32 %v8772_v6, 16 }
 0x298   : > { %v6512_v63 = vpop.eup %6511  ;;  %3645 = vst [vmem:[#allocation3 + $0x30] sm:$0xf] %v3644_v18  ;;  %v4240_v26 = vsel %vm7407_vm15, %v4238_v24, %v4239_v51  ;;  %v4018_v4 = vshrl.u32 %v8772_v6, 16  ;;  %v2958_v33 = vsel %vm2957_vm3, %v6510_v39, %v2954_v36  ;;  %v3195_v0 = vsel %vm8177_vm5, 0, %v3194_v32  ;;  %v3696_v24 = vld [vmem:[#allocation3 + $0x8c] sm:$0x1] }
 0x299   : > { %v8788_v21 = vadd.f32 1.0, %v6512_v63  ;;  %v4533_v22 = vunpack.c.l.b16 %v4240_v26  ;;  %v2963_v5 = vsel %vm8748_vm4, %v8726_v31, %v2958_v33  ;;  %3196 = vst [vmem:[#allocation3 + $0x90] sm:$0x1] %v3195_v0  ;;  %v4010_v37 = vrot.slane %v4008_v35, 5  ;;  %v2377_v33 = vpop.f32.mrf.mxu0 }
 0x29a   : > { %v4016_v42 = vrot.slane %v4014_v59, 5  ;;  %v4020_v62 = vrot.slane %v4018_v4, 4  ;;  %v3136_v10 = vmul.f32 %v2963_v5, %v8632_v28  ;;  %v3476_v47 = vrot.slane %v8744_v48, 4 }
 0x29b   : > { %6515 = vrcp.f32 %v8788_v21  ;;  %v8799_v39 = vpack.c.b16 %v4533_v22, %v4532_v27  ;;  %v4011_v16 = vor.u32 %v4010_v37, %v4007_v17  ;;  %v4024_v58 = vshll.u32 %v8792_v52, 16 }
 0x29c   : > { %v4021_v56 = vor.u32 %v4020_v62, %v4016_v42  ;;  %v3288_v2 = vpack.c.bf16 %v3136_v10, %v3136_v10  ;;  %v2749_v31 = vand.u32 2147483647, %v8788_v21  ;;  %v2751_v1 = vand.u32 2147483648, %v8788_v21 }
 0x29d   : > { %v6514_v20 = vpop.eup %6513  ;;  %4786 = vrot.lane.b32.xlu1 %v8799_v39, %s6793_s10  ;;  %v8808_v14 = vadd.f32 %v8731_v12, %v2447_v45  ;;  %v3357_v43 = vrot.slane %v8761_v3, 4  ;;  %v4012_v23 = vrot.slane %v4011_v16, 4  ;;  %vm2745_vm11 = vweird.f32 %v8788_v21 }
 0x29e   : > { %v4022_v28 = vrot.slane %v4021_v56, 4  ;;  %v3478_v46 = vshrl.u32 %v3288_v2, 16  ;;  %4646 = vrot.lane.b32.xlu0 %v4481_v40, %s6791_s8  ;;  %v8812_v48 = vadd.f32 1.0, %v6514_v20  ;;  %v3481_v54 = vshll.u32 %v3288_v2, 16 }
 0x29f   : > { %v4026_v38 = vrot.slane %v4024_v58, 5  ;;  %v6210_v44 = vmul.f32 -1.442695, %v8808_v14  ;;  %v3174_v45 = vsel %vm8177_vm5, 0, %v3173_v7  ;;  %v4017_v40 = vsel %vm6937_vm12, %v4012_v23, %v4016_v42 }
 0x2a0   : > { %v3480_v50 = vrot.slane %v3478_v46, 7  ;;  %6517 = vrcp.f32 %v8812_v48  ;;  %v2462_v60 = vmul.f32 %v8709_v57, %v2412_v9  ;;  %vm8823_vm6 = vcmp.eq.f32.partialorder %v2749_v31, 8.507059e+37  ;;  %3175 = vst [vmem:[#allocation3 + $0x3c] sm:$0x1] %v3174_v45 }
 0x2a1   : > { %v6516_v51 = vpop.eup %6515  ;;  %v2752_v36 = vor.u32 1.1754944e-38, %v2751_v1  ;;  %v4027_v27 = vsel %vm6937_vm12, %v4022_v28, %v4026_v38  ;;  %v2974_v32 = vand.u32 2147483647, %v8812_v48  ;;  %v4466_v59 = vunpack.c.l.b16 %v4017_v40 }
 0x2a2   : > { %v2741_v17 = vmul.f32 %v6516_v51, %v8788_v21  ;;  %v3483_v35 = vor.u32 %v3481_v54, %v3480_v50  ;;  %v3485_v63 = vrot.slane %v3480_v50, 4  ;;  %vm2746_vm13 = vweird.f32 %v6516_v51  ;;  %v3249_v54 = vld [vmem:[#allocation3 + $0x98] sm:$0x1] }
 0x2a3   : > { %v4467_v4 = vunpack.c.l.b16 %v4027_v27  ;;  %6519 = vpow2.f32 %v6210_v44  ;;  %v8835_v5 = vadd.f32 %v8731_v12, %v2462_v60  ;;  %v3837_v37 = vshrl.u32 %v8736_v61, 16  ;;  %vm2747_vm7 = vmor %vm2745_vm11, %vm2746_vm13 }
 0x2a4   : > { %v2742_v26 = vsub.f32 1.0, %v2741_v17  ;;  %v3484_v0 = vsel %vm6914_vm10, %v3476_v47, %v3483_v35  ;;  %v3697_v22 = vsel %vm8177_vm5, %v3485_v63, %v3696_v24  ;;  %v3840_v10 = vshll.u32 %v8736_v61, 16 }
 0x2a5   : > { %3695 = vst.msk [vmem:[#allocation3 + $0x88] sm:$0xf] %vm10779_vm14, %v3484_v0  ;;  %v8839_v62 = vpack.c.b16 %v4467_v4, %v4466_v59  ;;  %v3846_v16 = vshll.u32 %v8752_v49, 16  ;;  %v6225_v47 = vmul.f32 -1.442695, %v8835_v5  ;;  %v3839_v2 = vrot.slane %v3837_v37, 4  ;;  %v2415_v0 = vpop.f32.mrf.mxu2 }
 0x2a6   : > { %v2743_v42 = vmul.f32 %v6516_v51, %v2742_v26  ;;  %v6518_v56 = vpop.eup %6517  ;;  %3698 = vst [vmem:[#allocation3 + $0x8c] sm:$0x1] %v3697_v22  ;;  %4613 = vrot.lane.b32.xlu0 %v8648_v53, %s6799_s15  ;;  %v3850_v58 = vshrl.u32 %v8752_v49, 16  ;;  %v2448_v20 = vmul.f32 %v8709_v57, %v2377_v33  ;;  %v2976_v28 = vand.u32 2147483648, %v8812_v48  ;;  %v3228_v26 = vld [vmem:[#allocation3 + $0x44] sm:$0x1] }
 0x2a7   : > { %v2966_v1 = vmul.f32 %v6518_v56, %v8812_v48  ;;  %4514 = vrot.lane.b32.xlu2 %v8839_v62, %s6798_s14  ;;  %v3842_v61 = vrot.slane %v3840_v10, 5  ;;  %6521 = vpow2.f32 %v6225_v47  ;;  %v3848_v53 = vrot.slane %v3846_v16, 5 }
 0x2a8   : > { %v2744_v31 = vadd.f32 %v6516_v51, %v2743_v42  ;;  %v3852_v9 = vrot.slane %v3850_v58, 4  ;;  %v3856_v49 = vshll.u32 %v8759_v29, 16  ;;  %v8857_v44 = vadd.f32 %v8731_v12, %v2448_v20 }
 0x2a9   : > { %v6520_v46 = vpop.eup %6519  ;;  %v2967_v7 = vsub.f32 1.0, %v2966_v1  ;;  %v3843_v38 = vor.u32 %v3842_v61, %v3839_v2  ;;  %v3250_v21 = vsel %vm8188_vm9, 0, %v3249_v54  ;;  %vm2970_vm0 = vweird.f32 %v8812_v48 }
 0x2aa   : > { %v2748_v23 = vsel %vm2747_vm7, %v6516_v51, %v2744_v31  ;;  %v8861_v50 = vadd.f32 1.0, %v6520_v46  ;;  %v3853_v40 = vor.u32 %v3852_v9, %v3848_v53  ;;  %vm2971_vm8 = vweird.f32 %v6518_v56  ;;  %3251 = vst [vmem:[#allocation3 + $0x98] sm:$0x1] %v3250_v21 }
 0x2ab   : > { %v2753_v45 = vsel %vm8823_vm6, %v2752_v36, %v2748_v23  ;;  %v2968_v29 = vmul.f32 %v6518_v56, %v2967_v7  ;;  %vm8867_vm4 = vcmp.eq.f32.partialorder %v2974_v32, 8.507059e+37  ;;  %v2977_v24 = vor.u32 1.1754944e-38, %v2976_v28  ;;  %vm2972_vm2 = vmor %vm2970_vm0, %vm2971_vm8 }
 0x2ac   : > { %v3122_v60 = vmul.f32 %v2753_v45, %v8734_v15  ;;  %6523 = vrcp.f32 %v8861_v50  ;;  %v3844_v17 = vrot.slane %v3843_v38, 4  ;;  %v3854_v27 = vrot.slane %v3853_v40, 4  ;;  %vm10784_vm6 = vmmov %vm10779_vm14 }
 0x2ad   : > { %v2969_v36 = vadd.f32 %v6518_v56, %v2968_v29  ;;  %v3858_v35 = vrot.slane %v3856_v49, 5  ;;  %v6522_v63 = vpop.eup %6521  ;;  %v2764_v15 = vand.u32 2147483647, %v8861_v50  ;;  %v6211_v48 = vmul.f32 -1.442695, %v8857_v44 }
 0x2ae   : > { %v3274_v18 = vpack.c.bf16 %v3122_v60, %v3122_v60  ;;  %v8874_v4 = vadd.f32 1.0, %v6522_v63  ;;  %v3849_v33 = vsel %vm6937_vm12, %v3844_v17, %v3848_v53  ;;  %v3229_v42 = vsel %vm8188_vm9, 0, %v3228_v26  ;;  %v8893_v49 = vld [vmem:[#allocation3 + $0x78] sm:$0xf]  ;;  %v3699_v17 = vld [vmem:[#allocation3 + $0x90] sm:$0xf] }
 0x2af   : > { %v2973_v32 = vsel %vm2972_vm2, %v6518_v56, %v2969_v36  ;;  %4578 = vrot.lane.b32.xlu2 %v8666_v30, %s6790_s30  ;;  %v3859_v37 = vsel %vm6937_vm12, %v3854_v27, %v3858_v35  ;;  %6525 = vpow2.f32 %v6211_v48  ;;  %3230 = vst [vmem:[#allocation3 + $0x44] sm:$0x1] %v3229_v42  ;;  %v3647_v30 = vld [vmem:[#allocation3 + $0x38] sm:$0x1]  ;;  %v2766_v2 = vand.u32 2147483648, %v8861_v50  ;;  %v2380_v48 = vpop.f32.mrf.mxu0 }
 0x2b0   : > { %v3359_v59 = vshrl.u32 %v3274_v18, 16  ;;  %v2978_v22 = vsel %vm8867_vm4, %v2977_v24, %v2973_v32  ;;  %v3362_v16 = vshll.u32 %v3274_v18, 16  ;;  %6527 = vrcp.f32 %v8874_v4  ;;  %v3197_v35 = vld [vmem:[#allocation3 + $0x9c] sm:$0x1] }
 0x2b1   : > { %v3137_v56 = vmul.f32 %v2978_v22, %v8764_v34  ;;  %v4452_v58 = vunpack.c.l.b16 %v3849_v33  ;;  %v4453_v20 = vunpack.c.l.b16 %v3859_v37  ;;  %v2463_v31 = vmul.f32 %v8709_v57, %v2415_v0  ;;  %v8930_v0 = vld [vmem:[#allocation3 + $0x7c] sm:$0xf] }
 0x2b2   : > { %v3361_v10 = vrot.slane %v3359_v59, 7  ;;  %v6524_v47 = vpop.eup %6523  ;;  %v4288_v9 = vrot.slane %v8792_v52, 5  ;;  %vm2760_vm3 = vweird.f32 %v8861_v50  ;;  %vm8901_vm11 = vcmp.eq.f32.partialorder %v2764_v15, 8.507059e+37  ;;  %v3650_v32 = vld [vmem:[#allocation3 + $0x3c] sm:$0xf] }
 0x2b3   : > { %v3289_v61 = vpack.c.bf16 %v3137_v56, %v3137_v56  ;;  %v2756_v53 = vmul.f32 %v6524_v47, %v8861_v50  ;;  %v4482_v34 = vpack.c.b16 %v4453_v20, %v4452_v58  ;;  %v2767_v21 = vor.u32 1.1754944e-38, %v2766_v2 }
 0x2b4   : > { %v3364_v1 = vor.u32 %v3362_v16, %v3361_v10  ;;  %v3366_v28 = vrot.slane %v3361_v10, 4  ;;  %v2989_v40 = vand.u32 2147483647, %v8874_v4  ;;  %v8910_v3 = vadd.f32 %v8731_v12, %v2463_v31 }
 0x2b5   : > { %v3487_v7 = vshrl.u32 %v3289_v61, 16  ;;  %v6526_v38 = vpop.eup %6525  ;;  %v2757_v45 = vsub.f32 1.0, %v2756_v53  ;;  %4500 = vrot.lane.b32.xlu1 %v4482_v34, %s6798_s14  ;;  %4751 = vrot.lane.b32.xlu0 %v4482_v34, %s6801_s21  ;;  %v3490_v29 = vshll.u32 %v3289_v61, 16  ;;  %v4029_v24 = vshrl.u32 %v8893_v49, 16 }
 0x2b6   : > { %v3365_v46 = vsel %vm6914_vm10, %v3357_v43, %v3364_v1  ;;  %v3648_v23 = vsel %vm8177_vm5, %v3366_v28, %v3647_v30  ;;  %v6528_v43 = vpop.eup %6527  ;;  %v8914_v51 = vadd.f32 1.0, %v6526_v38  ;;  %vm2761_vm13 = vweird.f32 %v6524_v47 }
 0x2b7   : > { %3646 = vst.msk [vmem:[#allocation3 + $0x34] sm:$0xf] %vm10784_vm6, %v3365_v46  ;;  %v8912_v60 = vrot.slane %v3487_v7, 7  ;;  %4683 = vrot.lane.b32.xlu2 %v8799_v39, %s6800_s16  ;;  %v2758_v18 = vmul.f32 %v6524_v47, %v2757_v45  ;;  %v2981_v36 = vmul.f32 %v6528_v43, %v8874_v4  ;;  %v6226_v27 = vmul.f32 -1.442695, %v8910_v3  ;;  %vm2762_vm0 = vmor %vm2760_vm3, %vm2761_vm13 }
 0x2b8   : > { %3649 = vst [vmem:[#allocation3 + $0x38] sm:$0x1] %v3648_v23  ;;  %vm2985_vm14 = vweird.f32 %v8874_v4  ;;  %6529 = vrcp.f32 %v8914_v51  ;;  %v4032_v15 = vshll.u32 %v8893_v49, 16  ;;  %vm8925_vm7 = vcmp.eq.f32.partialorder %v2989_v40, 8.507059e+37 }
 0x2b9   : > { %v3492_v63 = vor.u32 %v3490_v29, %v8912_v60  ;;  %v2759_v26 = vadd.f32 %v6524_v47, %v2758_v18  ;;  %v2982_v59 = vsub.f32 1.0, %v2981_v36  ;;  %v2991_v33 = vand.u32 2147483648, %v8874_v4 }
 0x2ba   : > { %6531 = vpow2.f32 %v6226_v27  ;;  %v3198_v37 = vsel %vm8177_vm5, 0, %v3197_v35  ;;  %v4031_v42 = vrot.slane %v4029_v24, 4  ;;  %vm2986_vm8 = vweird.f32 %v6528_v43 }
 0x2bb   : > { %v3700_v22 = vsel %vm8363_vm1, %v3492_v63, %v3699_v17  ;;  %v2763_v10 = vsel %vm2762_vm0, %v6524_v47, %v2759_v26  ;;  %v2983_v16 = vmul.f32 %v6528_v43, %v2982_v59  ;;  %v2449_v56 = vmul.f32 %v8709_v57, %v2380_v48  ;;  %3199 = vst [vmem:[#allocation3 + $0x9c] sm:$0x1] %v3198_v37  ;;  %v8947_v47 = vld [vmem:[#allocation3 + $0x80] sm:$0x1]  ;;  %vm2987_vm4 = vmor %vm2985_vm14, %vm2986_vm8 }
 0x2bc   : > { %3701 = vst [vmem:[#allocation3 + $0x90] sm:$0xf] %v3700_v22  ;;  %v2768_v30 = vsel %vm8901_vm11, %v2767_v21, %v2763_v10  ;;  %v4034_v2 = vrot.slane %v4032_v15, 5  ;;  %v4038_v58 = vshll.u32 %v8930_v0, 16  ;;  %v4042_v50 = vshrl.u32 %v8930_v0, 16 }
 0x2bd   : > { %v3493_v20 = vrot.slane %v8912_v60, 4  ;;  %v3123_v31 = vmul.f32 %v2768_v30, %v8808_v14  ;;  %v2984_v1 = vadd.f32 %v6528_v43, %v2983_v16  ;;  %v2992_v28 = vor.u32 1.1754944e-38, %v2991_v33  ;;  %4648 = vrot.lane.b32.xlu1 %v4482_v34, %s6791_s8  ;;  %v3176_v16 = vld [vmem:[#allocation3 + $0x48] sm:$0x1] }
 0x2be   : > { %v6530_v61 = vpop.eup %6529  ;;  %vm2775_vm2 = vweird.f32 %v8914_v51  ;;  %v2779_v53 = vand.u32 2147483647, %v8914_v51  ;;  %v4035_v46 = vor.u32 %v4034_v2, %v4031_v42  ;;  %v4040_v23 = vrot.slane %v4038_v58, 5 }
 0x2bf   : > { %v4044_v7 = vrot.slane %v4042_v50, 4  ;;  %v3275_v54 = vpack.c.bf16 %v3123_v31, %v3123_v31  ;;  %v2988_v38 = vsel %vm2987_vm4, %v6528_v43, %v2984_v1  ;;  %v2771_v14 = vmul.f32 %v6530_v61, %v8914_v51 }
 0x2c0   : > { %v8955_v45 = vadd.f32 %v8731_v12, %v2449_v56  ;;  %v6532_v34 = vpop.eup %6531  ;;  %v2993_v21 = vsel %vm8925_vm7, %v2992_v28, %v2988_v38  ;;  %v4036_v4 = vrot.slane %v4035_v46, 4  ;;  %v4048_v29 = vshll.u32 %v8947_v47, 16  ;;  %v8975_v56 = vld [vmem:[#allocation3 + $0x24] sm:$0xf]  ;;  %v3703_v28 = vld [vmem:[#allocation3 + $0x98] sm:$0x1] }
 0x2c1   : > { %v4045_v40 = vor.u32 %v4044_v7, %v4040_v23  ;;  %v3368_v24 = vshrl.u32 %v3275_v54, 16  ;;  %v3138_v17 = vmul.f32 %v2993_v21, %v8835_v5  ;;  %v2772_v18 = vsub.f32 1.0, %v2771_v14  ;;  %v8985_v46 = vld [vmem:[#allocation3 + $0x28] sm:$0xf] }
 0x2c2   : > { %v2781_v36 = vand.u32 2147483648, %v8914_v51  ;;  %v3371_v43 = vshll.u32 %v3275_v54, 16  ;;  %v8962_v27 = vadd.f32 1.0, %v6532_v34  ;;  %v4041_v35 = vsel %vm6937_vm12, %v4036_v4, %v4040_v23 }
 0x2c3   : > { %v4046_v63 = vrot.slane %v4045_v40, 4  ;;  %v8966_v15 = vrot.slane %v3368_v24, 7  ;;  %v3290_v48 = vpack.c.bf16 %v3138_v17, %v3138_v17  ;;  %v2773_v26 = vmul.f32 %v6530_v61, %v2772_v18  ;;  %v2417_v17 = vpop.f32.mrf.mxu2 }
 0x2c4   : > { %v6212_v59 = vmul.f32 -1.442695, %v8955_v45  ;;  %vm2776_vm3 = vweird.f32 %v6530_v61  ;;  %vm8969_vm11 = vcmp.eq.f32.partialorder %v2779_v53, 8.507059e+37  ;;  %6533 = vrcp.f32 %v8962_v27 }
 0x2c5   : > { %v4050_v33 = vrot.slane %v4048_v29, 5  ;;  %v3373_v22 = vor.u32 %v3371_v43, %v8966_v15  ;;  %v3495_v37 = vshrl.u32 %v3290_v48, 16  ;;  %v2782_v42 = vor.u32 1.1754944e-38, %v2781_v36  ;;  %vm2777_vm6 = vmor %vm2775_vm2, %vm2776_vm3 }
 0x2c6   : > { %v4468_v10 = vunpack.c.l.b16 %v4041_v35  ;;  %v3498_v30 = vshll.u32 %v3290_v48, 16  ;;  %v2774_v2 = vadd.f32 %v6530_v61, %v2773_v26  ;;  %v3004_v58 = vand.u32 2147483647, %v8962_v27 }
 0x2c7   : > { %v4051_v50 = vsel %vm6937_vm12, %v4046_v63, %v4050_v33  ;;  %v3651_v31 = vsel %vm8363_vm1, %v3373_v22, %v3650_v32  ;;  %v3497_v1 = vrot.slane %v3495_v37, 7  ;;  %6535 = vpow2.f32 %v6212_v59 }
 0x2c8   : > { %v4469_v53 = vunpack.c.l.b16 %v4051_v50  ;;  %3652 = vst [vmem:[#allocation3 + $0x3c] sm:$0xf] %v3651_v31  ;;  %v2778_v23 = vsel %vm2777_vm6, %v6530_v61, %v2774_v2  ;;  %v3177_v7 = vsel %vm8177_vm5, 0, %v3176_v16  ;;  %v3861_v54 = vshrl.u32 %v8975_v56, 16  ;;  %v9025_v31 = vld [vmem:[#allocation3 + $0x24] sm:$0xff] }
 0x2c9   : > { %v3864_v38 = vshll.u32 %v8975_v56, 16  ;;  %v3500_v14 = vor.u32 %v3498_v30, %v3497_v1  ;;  %v3502_v34 = vrot.slane %v3497_v1, 4  ;;  %v2783_v21 = vsel %vm8969_vm11, %v2782_v42, %v2778_v23  ;;  %3178 = vst [vmem:[#allocation3 + $0x48] sm:$0x1] %v3177_v7  ;;  %v3252_v7 = vld [vmem:[#allocation3 + $0xa4] sm:$0x1] }
 0x2ca   : > { %v8993_v51 = vpack.c.b16 %v4469_v53, %v4468_v10  ;;  %v6534_v4 = vpop.eup %6533  ;;  %v3124_v40 = vmul.f32 %v2783_v21, %v8857_v44  ;;  %v3863_v29 = vrot.slane %v3861_v54, 4  ;;  %v3870_v24 = vshll.u32 %v8985_v46, 16  ;;  %v9007_v44 = vld [vmem:[#allocation3 + $0x2c] sm:$0x1]  ;;  %v2382_v21 = vpop.f32.mrf.mxu0 }
 0x2cb   : > { %v3866_v61 = vrot.slane %v3864_v38, 5  ;;  %v3501_v18 = vsel %vm6914_vm10, %v3493_v20, %v3500_v14  ;;  %v3704_v36 = vsel %vm8177_vm5, %v3502_v34, %v3703_v28  ;;  %v2996_v43 = vmul.f32 %v6534_v4, %v8962_v27 }
 0x2cc   : > { %vm3000_vm13 = vweird.f32 %v8962_v27  ;;  %4516 = vrot.lane.b32.xlu0 %v8993_v51, %s6798_s14  ;;  %v3374_v35 = vrot.slane %v8966_v15, 4  ;;  %vm10789_vm14 = vcmask 27648   ;;  %v3276_v60 = vpack.c.bf16 %v3124_v40, %v3124_v40  ;;  %3705 = vst [vmem:[#allocation3 + $0x98] sm:$0x1] %v3704_v36 }
 0x2cd   : > { %3702 = vst.msk [vmem:[#allocation3 + $0x94] sm:$0xf] %vm10789_vm14, %v3501_v18  ;;  %v3006_v63 = vand.u32 2147483648, %v8962_v27  ;;  %v3874_v20 = vshrl.u32 %v8985_v46, 16  ;;  %v6536_v48 = vpop.eup %6535  ;;  %v2997_v26 = vsub.f32 1.0, %v2996_v43  ;;  %v3867_v59 = vor.u32 %v3866_v61, %v3863_v29  ;;  %vm10792_vm4 = vmmov %vm10789_vm14 }
 0x2ce   : > { %v3872_v32 = vrot.slane %v3870_v24, 5  ;;  %v2464_v5 = vmul.f32 %v8709_v57, %v2417_v17  ;;  %v3376_v33 = vshrl.u32 %v3276_v60, 16  ;;  %vm9014_vm7 = vcmp.eq.f32.partialorder %v3004_v58, 8.507059e+37  ;;  %v3654_v58 = vld [vmem:[#allocation3 + $0x44] sm:$0x1] }
 0x2cf   : > { %v9018_v15 = vadd.f32 1.0, %v6536_v48  ;;  %v3880_v37 = vshll.u32 %v9007_v44, 16  ;;  %v2998_v42 = vmul.f32 %v6534_v4, %v2997_v26  ;;  %vm3001_vm0 = vweird.f32 %v6534_v4 }
 0x2d0   : > { %v3876_v10 = vrot.slane %v3874_v20, 4  ;;  %v9022_v16 = vadd.f32 %v8731_v12, %v2464_v5  ;;  %v3378_v30 = vrot.slane %v3376_v33, 7  ;;  %v3379_v2 = vshll.u32 %v3276_v60, 16  ;;  %vm3002_vm8 = vmor %vm3000_vm13, %vm3001_vm0 }
 0x2d1   : > { %v3007_v50 = vor.u32 1.1754944e-38, %v3006_v63  ;;  %6537 = vrcp.f32 %v9018_v15  ;;  %v2999_v1 = vadd.f32 %v6534_v4, %v2998_v42  ;;  %v3868_v28 = vrot.slane %v3867_v59, 4 }
 0x2d2   : > { %v3877_v53 = vor.u32 %v3876_v10, %v3872_v32  ;;  %v4246_v23 = vrot.slane %v9007_v44, 5  ;;  %v3381_v54 = vor.u32 %v3379_v2, %v3378_v30  ;;  %v3383_v38 = vrot.slane %v3378_v30, 4 }
 0x2d3   : > { %v2794_v14 = vand.u32 2147483647, %v9018_v15  ;;  %v3882_v34 = vrot.slane %v3880_v37, 5  ;;  %v3003_v40 = vsel %vm3002_vm8, %v6534_v4, %v2999_v1  ;;  %v3873_v29 = vsel %vm6937_vm12, %v3868_v28, %v3872_v32  ;;  %v3231_v1 = vld [vmem:[#allocation3 + $0x50] sm:$0x1] }
 0x2d4   : > { %v3878_v61 = vrot.slane %v3877_v53, 4  ;;  %v6227_v24 = vmul.f32 -1.442695, %v9022_v16  ;;  %4718 = vrot.lane.b32.xlu0 %v9025_v31, %s6792_s9  ;;  %v3382_v17 = vsel %vm6914_vm10, %v3374_v35, %v3381_v54  ;;  %v3655_v27 = vsel %vm8177_vm5, %v3383_v38, %v3654_v58  ;;  %v3706_v53 = vld [vmem:[#allocation3 + $0x9c] sm:$0xf] }
 0x2d5   : > { %v3008_v18 = vsel %vm9014_vm7, %v3007_v50, %v3003_v40  ;;  %v3253_v4 = vsel %vm8188_vm9, 0, %v3252_v7  ;;  %3653 = vst.msk [vmem:[#allocation3 + $0x40] sm:$0xf] %vm10792_vm4, %v3382_v17  ;;  %v2450_v44 = vmul.f32 %v8709_v57, %v2382_v21  ;;  %v2796_v60 = vand.u32 2147483648, %v9018_v15 }
 0x2d6   : > { %v3139_v36 = vmul.f32 %v3008_v18, %v8910_v3  ;;  %v3883_v43 = vsel %vm6937_vm12, %v3878_v61, %v3882_v34  ;;  %6539 = vpow2.f32 %v6227_v24  ;;  %3656 = vst [vmem:[#allocation3 + $0x44] sm:$0x1] %v3655_v27  ;;  %v4454_v63 = vunpack.c.l.b16 %v3873_v29 }
 0x2d7   : > { %v6538_v35 = vpop.eup %6537  ;;  %v4455_v20 = vunpack.c.l.b16 %v3883_v43  ;;  %v4243_v48 = vrot.slane %v8985_v46, 5  ;;  %3254 = vst [vmem:[#allocation3 + $0xa4] sm:$0x1] %v3253_v4  ;;  %v9054_v3 = vadd.f32 %v8731_v12, %v2450_v44  ;;  %v6237_v32 = vrot.slane %v8975_v56, 9  ;;  %v2420_v43 = vpop.f32.mrf.mxu2 }
 0x2d8   : > { %v3291_v26 = vpack.c.bf16 %v3139_v36, %v3139_v36  ;;  %v2786_v59 = vmul.f32 %v6538_v35, %v9018_v15  ;;  %v6243_v22 = vrot.slane %v8742_v19, 9  ;;  %v4285_v37 = vrot.slane %v8772_v6, 5 }
 0x2d9   : > { %v9057_v5 = vpack.c.b16 %v4455_v20, %v4454_v63  ;;  %v4245_v33 = vrot.slane %v4243_v48, 4  ;;  %vm2791_vm2 = vweird.f32 %v6538_v35  ;;  %v6213_v46 = vmul.f32 -1.442695, %v9054_v3 }
 0x2da   : > { %v3504_v42 = vshrl.u32 %v3291_v26, 16  ;;  %v2787_v10 = vsub.f32 1.0, %v2786_v59  ;;  %v3507_v30 = vshll.u32 %v3291_v26, 16  ;;  %v4244_v56 = vsel %vm7407_vm15, %v6237_v32, %v4243_v48  ;;  %v9111_v59 = vld [vmem:[#allocation3 + $0x84] sm:$0xf] }
 0x2db   : > { %4753 = vrot.lane.b32.xlu1 %v9057_v5, %s6801_s21  ;;  %4502 = vrot.lane.b32.xlu2 %v9057_v5, %s6798_s14  ;;  %v4247_v19 = vsel %vm7407_vm15, %v4245_v33, %v4246_v23  ;;  %v4287_v2 = vrot.slane %v4285_v37, 4  ;;  %6541 = vpow2.f32 %v6213_v46  ;;  %v4286_v28 = vsel %vm7407_vm15, %v6243_v22, %v4285_v37  ;;  %v3657_v33 = vld [vmem:[#allocation3 + $0x48] sm:$0xf] }
 0x2dc   : > { %v6540_v6 = vpop.eup %6539  ;;  %v9070_v50 = vrot.slane %v3504_v42, 7  ;;  %v2788_v58 = vmul.f32 %v6538_v35, %v2787_v10  ;;  %v3232_v54 = vsel %vm8188_vm9, 0, %v3231_v1  ;;  %v4535_v38 = vunpack.c.l.b16 %v4247_v19 }
 0x2dd   : > { %v9074_v7 = vadd.f32 1.0, %v6540_v6  ;;  %v4289_v23 = vsel %vm7407_vm15, %v4287_v2, %v4288_v9  ;;  %vm2790_vm3 = vweird.f32 %v9018_v15  ;;  %3233 = vst [vmem:[#allocation3 + $0x50] sm:$0x1] %v3232_v54  ;;  %vm2795_vm6 = vcmp.eq.f32.partialorder %v2794_v14, 8.507059e+37 }
 0x2de   : > { %v3509_v34 = vor.u32 %v3507_v30, %v9070_v50  ;;  %v2789_v21 = vadd.f32 %v6538_v35, %v2788_v58  ;;  %vm2792_vm11 = vmor %vm2790_vm3, %vm2791_vm2  ;;  %v2797_v40 = vor.u32 1.1754944e-38, %v2796_v60  ;;  %v4534_v29 = vunpack.c.l.b16 %v4244_v56 }
 0x2df   : > { %6543 = vrcp.f32 %v9074_v7  ;;  %v4546_v24 = vunpack.c.l.b16 %v4286_v28  ;;  %v4547_v17 = vunpack.c.l.b16 %v4289_v23  ;;  %v6244_v15 = vrot.slane %v8893_v49, 9 }
 0x2e0   : > { %v3707_v61 = vsel %vm8363_vm1, %v3509_v34, %v3706_v53  ;;  %v2793_v52 = vsel %vm2792_vm11, %v6538_v35, %v2789_v21  ;;  %v9088_v27 = vpack.c.b16 %v4535_v38, %v4534_v29  ;;  %v4292_v18 = vrot.slane %v8930_v0, 5 }
 0x2e1   : > { %3708 = vst [vmem:[#allocation3 + $0x9c] sm:$0xf] %v3707_v61  ;;  %v2798_v9 = vsel %vm2795_vm6, %v2797_v40, %v2793_v52  ;;  %v6542_v4 = vpop.eup %6541  ;;  %v9093_v36 = vpack.c.b16 %v4547_v17, %v4546_v24  ;;  %v2465_v35 = vmul.f32 %v8709_v57, %v2420_v43  ;;  %v4295_v20 = vrot.slane %v8947_v47, 5  ;;  %v3200_v57 = vld [vmem:[#allocation3 + $0xa8] sm:$0x1] }
 0x2e2   : > { %v3125_v14 = vmul.f32 %v2798_v9, %v8955_v45  ;;  %v9095_v44 = vadd.f32 1.0, %v6542_v4  ;;  %v9102_v60 = vsel %vm7407_vm15, %v6244_v15, %v4292_v18  ;;  %v3019_v45 = vand.u32 2147483647, %v9074_v7  ;;  %v9139_v40 = vld [vmem:[#allocation3 + $0x30] sm:$0xf] }
 0x2e3   : > { %4788 = vrot.lane.b32.xlu2 %v9088_v27, %s6793_s10  ;;  %4594 = vrot.lane.b32.xlu0 %v9093_v36, %s6790_s30  ;;  %v4294_v63 = vrot.slane %v4292_v18, 4  ;;  %vm3015_vm13 = vweird.f32 %v9074_v7  ;;  %v3021_v22 = vand.u32 2147483648, %v9074_v7  ;;  %v9115_v37 = vadd.f32 %v8731_v12, %v2465_v35  ;;  %v9148_v52 = vld [vmem:[#allocation3 + $0x88] sm:$0xf]  ;;  %v9150_v18 = vld [vmem:[#allocation3 + $0x8c] sm:$0x1] }
 0x2e4   : > { %v3277_v49 = vpack.c.bf16 %v3125_v14, %v3125_v14  ;;  %6545 = vrcp.f32 %v9095_v44  ;;  %v3201_v42 = vsel %vm8177_vm5, 0, %v3200_v57  ;;  %v4053_v46 = vshrl.u32 %v9111_v59, 16  ;;  %v9163_v57 = vld [vmem:[%s10567_s2] ss:$0 sm:$0xff] }
 0x2e5   : > { %v6544_v0 = vpop.eup %6543  ;;  %3202 = vst [vmem:[#allocation3 + $0xa8] sm:$0x1] %v3201_v42  ;;  %v4056_v30 = vshll.u32 %v9111_v59, 16  ;;  %vm9123_vm14 = vcmp.eq.f32.partialorder %v3019_v45, 8.507059e+37  ;;  %v2809_v19 = vand.u32 2147483647, %v9095_v44  ;;  %v4296_v2 = vsel %vm7407_vm15, %v4294_v63, %v4295_v20  ;;  %v2385_v63 = vpop.f32.mrf.mxu0 }
 0x2e6   : > { %v3385_v48 = vshrl.u32 %v3277_v49, 16  ;;  %v3011_v26 = vmul.f32 %v6544_v0, %v9074_v7  ;;  %v3388_v32 = vshll.u32 %v3277_v49, 16  ;;  %v6228_v12 = vmul.f32 -1.442695, %v9115_v37 }
 0x2e7   : > { %vm3016_vm7 = vweird.f32 %v6544_v0  ;;  %v4055_v1 = vrot.slane %v4053_v46, 4  ;;  %v3022_v53 = vor.u32 1.1754944e-38, %v3021_v22  ;;  %v4058_v54 = vrot.slane %v4056_v30, 5  ;;  %v9176_v30 = vld [vmem:[%s10568_s3] ss:$0 sm:$0xff] }
 0x2e8   : > { %v9119_v10 = vrot.slane %v3385_v48, 7  ;;  %v3012_v47 = vsub.f32 1.0, %v3011_v26  ;;  %6547 = vpow2.f32 %v6228_v12  ;;  %v4548_v38 = vunpack.c.l.b16 %v9102_v60  ;;  %vm3017_vm8 = vmor %vm3015_vm13, %vm3016_vm7 }
 0x2e9   : > { %vm2805_vm0 = vweird.f32 %v9095_v44  ;;  %vm9143_vm4 = vcmp.eq.f32.partialorder %v2809_v19, 8.507059e+37  ;;  %v2811_v61 = vand.u32 2147483648, %v9095_v44  ;;  %v4059_v24 = vor.u32 %v4058_v54, %v4055_v1 }
 0x2ea   : > { %v3390_v6 = vor.u32 %v3388_v32, %v9119_v10  ;;  %v3013_v58 = vmul.f32 %v6544_v0, %v3012_v47  ;;  %v6546_v28 = vpop.eup %6545  ;;  %v4549_v17 = vunpack.c.l.b16 %v4296_v2  ;;  %v4062_v4 = vshll.u32 %v9148_v52, 16 }
 0x2eb   : > { %4664 = vrot.lane.b32.xlu2 %v8993_v51, %s6791_s8  ;;  %v2801_v21 = vmul.f32 %v6546_v28, %v9095_v44  ;;  %v4066_v14 = vshrl.u32 %v9148_v52, 16  ;;  %vm2806_vm2 = vweird.f32 %v6546_v28  ;;  %v3885_v43 = vshrl.u32 %v9139_v40, 16  ;;  %v3179_v44 = vld [vmem:[#allocation3 + $0x54] sm:$0x1] }
 0x2ec   : > { %v3658_v23 = vsel %vm8363_vm1, %v3390_v6, %v3657_v33  ;;  %v3014_v34 = vadd.f32 %v6544_v0, %v3013_v58  ;;  %v3888_v35 = vshll.u32 %v9139_v40, 16  ;;  %v4064_v45 = vrot.slane %v4062_v4, 5  ;;  %vm2807_vm3 = vmor %vm2805_vm0, %vm2806_vm2 }
 0x2ed   : > { %3659 = vst [vmem:[#allocation3 + $0x48] sm:$0xf] %v3658_v23  ;;  %v2802_v15 = vsub.f32 1.0, %v2801_v21  ;;  %v2812_v48 = vor.u32 1.1754944e-38, %v2811_v61  ;;  %v4072_v26 = vshll.u32 %v9150_v18, 16  ;;  %v2451_v32 = vmul.f32 %v9163_v57, %v2385_v63 }
 0x2ee   : > { %v3018_v9 = vsel %vm3017_vm8, %v6544_v0, %v3014_v34  ;;  %v4068_v0 = vrot.slane %v4066_v14, 4  ;;  %v6548_v20 = vpop.eup %6547  ;;  %v9166_v33 = vpack.c.b16 %v4549_v17, %v4548_v38  ;;  %v4060_v47 = vrot.slane %v4059_v24, 4  ;;  %v9188_v61 = vld [vmem:[#allocation3 + $0x34] sm:$0xf]  ;;  %v3710_v24 = vld [vmem:[#allocation3 + $0xa4] sm:$0x1] }
 0x2ef   : > { %v3023_v7 = vsel %vm9123_vm14, %v3022_v53, %v3018_v9  ;;  %v2803_v49 = vmul.f32 %v6546_v28, %v2802_v15  ;;  %v9179_v56 = vadd.f32 %v9176_v30, %v2451_v32  ;;  %v3887_v19 = vrot.slane %v3885_v43, 4 }
 0x2f0   : > { %v3140_v60 = vmul.f32 %v3023_v7, %v9022_v16  ;;  %v9168_v16 = vadd.f32 1.0, %v6548_v20  ;;  %v4069_v46 = vor.u32 %v4068_v0, %v4064_v45  ;;  %v3890_v12 = vrot.slane %v3888_v35, 5  ;;  %v9201_v0 = vld [vmem:[#allocation3 + $0x38] sm:$0x1]  ;;  %v3661_v20 = vld [vmem:[#allocation3 + $0x50] sm:$0x1] }
 0x2f1   : > { %v2804_v42 = vadd.f32 %v6546_v28, %v2803_v49  ;;  %v4065_v58 = vsel %vm6937_vm12, %v4060_v47, %v4064_v45  ;;  %v4074_v54 = vrot.slane %v4072_v26, 5  ;;  %v6214_v21 = vmul.f32 -1.442695, %v9179_v56 }
 0x2f2   : > { %v3292_v22 = vpack.c.bf16 %v3140_v60, %v3140_v60  ;;  %6549 = vrcp.f32 %v9168_v16  ;;  %v4070_v34 = vrot.slane %v4069_v46, 4  ;;  %v4470_v17 = vunpack.c.l.b16 %v4065_v58 }
 0x2f3   : > { %v2808_v6 = vsel %vm2807_vm3, %v6546_v28, %v2804_v42  ;;  %v3510_v28 = vrot.slane %v9070_v50, 4  ;;  %v3180_v9 = vsel %vm8177_vm5, 0, %v3179_v44  ;;  %v3891_v15 = vor.u32 %v3890_v12, %v3887_v19 }
 0x2f4   : > { %v3512_v2 = vshrl.u32 %v3292_v22, 16  ;;  %v3515_v1 = vshll.u32 %v3292_v22, 16  ;;  %v2813_v53 = vsel %vm9143_vm4, %v2812_v48, %v2808_v6  ;;  %v4075_v7 = vsel %vm6937_vm12, %v4070_v34, %v4074_v54  ;;  %3181 = vst [vmem:[#allocation3 + $0x54] sm:$0x1] %v3180_v9  ;;  %v3255_v34 = vld [vmem:[#allocation3 + $0xb0] sm:$0x1] }
 0x2f5   : > { %v3126_v23 = vmul.f32 %v2813_v53, %v9054_v3  ;;  %v4471_v3 = vunpack.c.l.b16 %v4075_v7  ;;  %6551 = vpow2.f32 %v6214_v21  ;;  %v3894_v43 = vshll.u32 %v9188_v61, 16  ;;  %v3770_v21 = vld [vmem:[#allocation3 + $0x90] sm:$0xf] }
 0x2f6   : > { %v3514_v38 = vrot.slane %v3512_v2, 7  ;;  %v3898_v35 = vshrl.u32 %v9188_v61, 16  ;;  %v3391_v63 = vrot.slane %v9119_v10, 4  ;;  %vm10797_vm11 = vcmask 27648  }
 0x2f7   : > { %v3278_v14 = vpack.c.bf16 %v3126_v23, %v3126_v23  ;;  %v9206_v26 = vpack.c.b16 %v4471_v3, %v4470_v17  ;;  %v3896_v32 = vrot.slane %v3894_v43, 5  ;;  %vm3030_vm6 = vweird.f32 %v9168_v16  ;;  %vm10798_vm14 = vmmov %vm10797_vm11 }
 0x2f8   : > { %v3517_v4 = vor.u32 %v3515_v1, %v3514_v38  ;;  %v3519_v29 = vrot.slane %v3514_v38, 4  ;;  %v6550_v50 = vpop.eup %6549  ;;  %v3900_v47 = vrot.slane %v3898_v35, 4  ;;  %v3034_v19 = vand.u32 2147483647, %v9168_v16  ;;  %v2422_v1 = vpop.f32.mrf.mxu2 }
 0x2f9   : > { %v3393_v45 = vshrl.u32 %v3278_v14, 16  ;;  %v3026_v48 = vmul.f32 %v6550_v50, %v9168_v16  ;;  %v3396_v42 = vshll.u32 %v3278_v14, 16  ;;  %4518 = vrot.lane.b32.xlu1 %v9206_v26, %s6798_s14  ;;  %v3892_v10 = vrot.slane %v3891_v15, 4 }
 0x2fa   : > { %v3518_v60 = vsel %vm6914_vm10, %v3510_v28, %v3517_v4  ;;  %v3711_v49 = vsel %vm8177_vm5, %v3519_v29, %v3710_v24  ;;  %v3904_v12 = vshll.u32 %v9201_v0, 16  ;;  %v3036_v58 = vand.u32 2147483648, %v9168_v16 }
 0x2fb   : > { %3709 = vst.msk [vmem:[#allocation3 + $0xa0] sm:$0xf] %vm10797_vm11, %v3518_v60  ;;  %v3395_v22 = vrot.slane %v3393_v45, 7  ;;  %v3027_v46 = vsub.f32 1.0, %v3026_v48  ;;  %v3901_v44 = vor.u32 %v3900_v47, %v3896_v32  ;;  %v6552_v53 = vpop.eup %6551  ;;  %vm3031_vm13 = vweird.f32 %v6550_v50 }
 0x2fc   : > { %3712 = vst [vmem:[#allocation3 + $0xa4] sm:$0x1] %v3711_v49  ;;  %v3897_v38 = vsel %vm6937_vm12, %v3892_v10, %v3896_v32  ;;  %v2466_v23 = vmul.f32 %v9163_v57, %v2422_v1  ;;  %v9221_v17 = vadd.f32 1.0, %v6552_v53  ;;  %v3906_v4 = vrot.slane %v3904_v12, 5  ;;  %vm3032_vm7 = vmor %vm3030_vm6, %vm3031_vm13  ;;  %v6416_v49 = vld [vmem:[#allocation3 + $0x78] sm:$0xff] }
 0x2fd   : > { %v3398_v2 = vor.u32 %v3396_v42, %v3395_v22  ;;  %v3400_v6 = vrot.slane %v3395_v22, 4  ;;  %v3028_v54 = vmul.f32 %v6550_v50, %v3027_v46  ;;  %v3902_v9 = vrot.slane %v3901_v44, 4  ;;  %v3771_v32 = vld [vmem:[#allocation3 + $0x94] sm:$0xf]  ;;  %v3772_v10 = vld [vmem:[#allocation3 + $0x98] sm:$0x1] }
 0x2fe   : > { %v9225_v29 = vadd.f32 %v9176_v30, %v2466_v23  ;;  %v3256_v14 = vsel %vm8188_vm9, 0, %v3255_v34  ;;  %vm3035_vm0 = vcmp.eq.f32.partialorder %v3034_v19, 8.507059e+37  ;;  %v3037_v7 = vor.u32 1.1754944e-38, %v3036_v58 }
 0x2ff   : > { %v3399_v28 = vsel %vm6914_vm10, %v3391_v63, %v3398_v2  ;;  %v3662_v24 = vsel %vm8177_vm5, %v3400_v6, %v3661_v20  ;;  %v3029_v15 = vadd.f32 %v6550_v50, %v3028_v54  ;;  %6553 = vrcp.f32 %v9221_v17  ;;  %3257 = vst [vmem:[#allocation3 + $0xb0] sm:$0x1] %v3256_v14 }
 0x300   : > { %3660 = vst.msk [vmem:[#allocation3 + $0x4c] sm:$0xf] %vm10798_vm14, %v3399_v28  ;;  %v4077_v3 = vshrl.u32 %v3770_v21, 16  ;;  %v3907_v35 = vsel %vm6937_vm12, %v3902_v9, %v3906_v4  ;;  %v6229_v60 = vmul.f32 -1.442695, %v9225_v29  ;;  %v4080_v45 = vshll.u32 %v3770_v21, 16 }
 0x301   : > { %3663 = vst [vmem:[#allocation3 + $0x50] sm:$0x1] %v3662_v24  ;;  %v3033_v43 = vsel %vm3032_vm7, %v6550_v50, %v3029_v15  ;;  %v4456_v20 = vunpack.c.l.b16 %v3897_v38  ;;  %v4457_v48 = vunpack.c.l.b16 %v3907_v35  ;;  %4629 = vrot.lane.b32.xlu1 %v6416_v49, %s6799_s15  ;;  %v2387_v50 = vpop.f32.mrf.mxu0  ;;  %v4086_v42 = vshll.u32 %v3771_v32, 16  ;;  %v3749_v24 = vld [vmem:[#allocation3 + $0x3c] sm:$0xf] }
 0x302   : > { %v3038_v63 = vsel %vm3035_vm0, %v3037_v7, %v3033_v43  ;;  %6555 = vpow2.f32 %v6229_v60  ;;  %v4090_v47 = vshrl.u32 %v3771_v32, 16  ;;  %v2452_v19 = vmul.f32 %v9163_v57, %v2387_v50  ;;  %v3234_v7 = vld [vmem:[#allocation3 + $0x5c] sm:$0x1]  ;;  %v3713_v35 = vld [vmem:[#allocation3 + $0xa8] sm:$0xf] }
 0x303   : > { %v3141_v16 = vmul.f32 %v3038_v63, %v9115_v37  ;;  %v9238_v22 = vpack.c.b16 %v4457_v48, %v4456_v20  ;;  %v4079_v12 = vrot.slane %v4077_v3, 4  ;;  %v4082_v2 = vrot.slane %v4080_v45, 5  ;;  %v6417_v3 = vld [vmem:[#allocation3 + $0x84] sm:$0xff]  ;;  %v3750_v50 = vld [vmem:[#allocation3 + $0x40] sm:$0xf] }
 0x304   : > { %v9243_v37 = vrot.slane %v4086_v42, 5  ;;  %v4092_v58 = vrot.slane %v4090_v47, 4  ;;  %v6245_v44 = vrot.slane %v9111_v59, 9  ;;  %v4299_v54 = vrot.slane %v9148_v52, 5 }
 0x305   : > { %v3293_v46 = vpack.c.bf16 %v3141_v16, %v3141_v16  ;;  %v6554_v6 = vpop.eup %6553  ;;  %4504 = vrot.lane.b32.xlu0 %v9238_v22, %s6798_s14  ;;  %v4302_v38 = vrot.slane %v9150_v18, 5  ;;  %v2824_v23 = vand.u32 2147483647, %v9221_v17  ;;  %v2826_v34 = vand.u32 2147483648, %v9221_v17 }
 0x306   : > { %v2816_v53 = vmul.f32 %v6554_v6, %v9221_v17  ;;  %v9252_v21 = vadd.f32 %v9176_v30, %v2452_v19  ;;  %v4096_v28 = vshll.u32 %v3772_v10, 16  ;;  %v4083_v43 = vor.u32 %v4082_v2, %v4079_v12 }
 0x307   : > { %v3521_v1 = vshrl.u32 %v3293_v46, 16  ;;  %v3524_v4 = vshll.u32 %v3293_v46, 16  ;;  %v3235_v45 = vsel %vm8188_vm9, 0, %v3234_v7  ;;  %v4093_v63 = vor.u32 %v4092_v58, %v9243_v37 }
 0x308   : > { %v6556_v9 = vpop.eup %6555  ;;  %v2817_v14 = vsub.f32 1.0, %v2816_v53  ;;  %v6215_v49 = vmul.f32 -1.442695, %v9252_v21  ;;  %vm2821_vm8 = vweird.f32 %v6554_v6  ;;  %3236 = vst [vmem:[#allocation3 + $0x5c] sm:$0x1] %v3235_v45  ;;  %v3909_v16 = vshrl.u32 %v3749_v24, 16 }
 0x309   : > { %v9254_v15 = vrot.slane %v3521_v1, 7  ;;  %v9256_v60 = vadd.f32 1.0, %v6556_v9  ;;  %4734 = vrot.lane.b32.xlu1 %v6417_v3, %s6792_s9  ;;  %vm2820_vm4 = vweird.f32 %v9221_v17  ;;  %vm9265_vm2 = vcmp.eq.f32.partialorder %v2824_v23, 8.507059e+37  ;;  %v3751_v53 = vld [vmem:[#allocation3 + $0x44] sm:$0x1] }
 0x30a   : > { %v2818_v48 = vmul.f32 %v6554_v6, %v2817_v14  ;;  %v6238_v42 = vrot.slane %v9139_v40, 9  ;;  %v4084_v19 = vrot.slane %v4083_v43, 4  ;;  %vm2822_vm3 = vmor %vm2820_vm4, %vm2821_vm8  ;;  %v2827_v10 = vor.u32 1.1754944e-38, %v2826_v34  ;;  %v2425_v34 = vpop.f32.mrf.mxu2 }
 0x30b   : > { %v3526_v20 = vor.u32 %v3524_v4, %v9254_v15  ;;  %6557 = vrcp.f32 %v9256_v60  ;;  %v4094_v17 = vrot.slane %v4093_v63, 4  ;;  %v4098_v12 = vrot.slane %v4096_v28, 5 }
 0x30c   : > { %v2819_v46 = vadd.f32 %v6554_v6, %v2818_v48  ;;  %6559 = vpow2.f32 %v6215_v49  ;;  %v3912_v2 = vshll.u32 %v3749_v24, 16  ;;  %v4089_v1 = vsel %vm6937_vm12, %v4084_v19, %v9243_v37 }
 0x30d   : > { %v3714_v47 = vsel %vm8363_vm1, %v3526_v20, %v3713_v35  ;;  %4699 = vrot.lane.b32.xlu0 %v9166_v33, %s6800_s16  ;;  %v3911_v23 = vrot.slane %v3909_v16, 4  ;;  %v3918_v9 = vshll.u32 %v3750_v50, 16  ;;  %v3527_v4 = vrot.slane %v9254_v15, 4  ;;  %v9405_v15 = vld [vmem:[#allocation3 + $0xa0] sm:$0xf] }
 0x30e   : > { %3715 = vst [vmem:[#allocation3 + $0xa8] sm:$0xf] %v3714_v47  ;;  %v2823_v58 = vsel %vm2822_vm3, %v6554_v6, %v2819_v46  ;;  %v4099_v7 = vsel %vm6937_vm12, %v4094_v17, %v4098_v12  ;;  %v3922_v3 = vshrl.u32 %v3750_v50, 16  ;;  %vm3045_vm11 = vweird.f32 %v9256_v60 }
 0x30f   : > { %v2828_v14 = vsel %vm9265_vm2, %v2827_v10, %v2823_v58  ;;  %v3049_v6 = vand.u32 2147483647, %v9256_v60  ;;  %v2467_v37 = vmul.f32 %v9163_v57, %v2425_v34  ;;  %v4473_v24 = vunpack.c.l.b16 %v4099_v7  ;;  %v2390_v10 = vpop.f32.mrf.mxu0 }
 0x310   : > { %v3127_v28 = vmul.f32 %v2828_v14, %v9179_v56  ;;  %v3051_v35 = vand.u32 2147483648, %v9256_v60  ;;  %v4472_v49 = vunpack.c.l.b16 %v4089_v1  ;;  %v3914_v45 = vrot.slane %v3912_v2, 5  ;;  %v3203_v56 = vld [vmem:[#allocation3 + $0xb4] sm:$0x1] }
 0x311   : > { %v6558_v43 = vpop.eup %6557  ;;  %v3928_v63 = vshll.u32 %v3751_v53, 16  ;;  %v9290_v32 = vadd.f32 %v9176_v30, %v2467_v37  ;;  %v3920_v50 = vrot.slane %v3918_v9, 5  ;;  %v3204_v46 = vsel %vm8177_vm5, 0, %v3203_v56 }
 0x312   : > { %v6560_v20 = vpop.eup %6559  ;;  %v3279_v48 = vpack.c.bf16 %v3127_v28, %v3127_v28  ;;  %v3041_v16 = vmul.f32 %v6558_v43, %v9256_v60  ;;  %v9296_v19 = vpack.c.b16 %v4473_v24, %v4472_v49  ;;  %v3924_v17 = vrot.slane %v3922_v3, 4  ;;  %3205 = vst [vmem:[#allocation3 + $0xb4] sm:$0x1] %v3204_v46  ;;  %v3664_v3 = vld [vmem:[#allocation3 + $0x54] sm:$0xf]  ;;  %v2427_v24 = vpop.f32.mrf.mxu2 }
 0x313   : > { %v9292_v47 = vadd.f32 1.0, %v6560_v20  ;;  %vm9298_vm6 = vcmp.eq.f32.partialorder %v3049_v6, 8.507059e+37  ;;  %v6230_v1 = vmul.f32 -1.442695, %v9290_v32  ;;  %vm3046_vm13 = vweird.f32 %v6558_v43  ;;  %v3182_v60 = vld [vmem:[#allocation3 + $0x60] sm:$0x1] }
 0x314   : > { %v3402_v12 = vshrl.u32 %v3279_v48, 16  ;;  %v3042_v2 = vsub.f32 1.0, %v3041_v16  ;;  %v3405_v53 = vshll.u32 %v3279_v48, 16  ;;  %4520 = vrot.lane.b32.xlu2 %v9296_v19, %s6798_s14  ;;  %v3915_v9 = vor.u32 %v3914_v45, %v3911_v23  ;;  %vm3047_vm14 = vmor %vm3045_vm11, %vm3046_vm13 }
 0x315   : > { %6561 = vrcp.f32 %v9292_v47  ;;  %4580 = vrot.lane.b32.xlu0 %v8799_v39, %s6790_s30  ;;  %v2453_v7 = vmul.f32 %v9163_v57, %v2390_v10  ;;  %v3052_v28 = vor.u32 1.1754944e-38, %v3051_v35  ;;  %v3925_v6 = vor.u32 %v3924_v17, %v3920_v50 }
 0x316   : > { %v9308_v14 = vrot.slane %v3402_v12, 7  ;;  %v3043_v34 = vmul.f32 %v6558_v43, %v3042_v2  ;;  %6563 = vpow2.f32 %v6230_v1  ;;  %v3930_v37 = vrot.slane %v3928_v63, 5 }
 0x317   : > { %v9317_v39 = vsel %vm7407_vm15, %v6245_v44, %v4299_v54  ;;  %v9321_v45 = vadd.f32 %v9176_v30, %v2453_v7  ;;  %v4301_v35 = vrot.slane %v4299_v54, 4  ;;  %v2839_v63 = vand.u32 2147483647, %v9292_v47 }
 0x318   : > { %v3407_v23 = vor.u32 %v3405_v53, %v9308_v14  ;;  %v3044_v49 = vadd.f32 %v6558_v43, %v3043_v34  ;;  %v3916_v59 = vrot.slane %v3915_v9, 4  ;;  %v3926_v20 = vrot.slane %v3925_v6, 4 }
 0x319   : > { %v2468_v44 = vmul.f32 %v9163_v57, %v2427_v24  ;;  %v2841_v56 = vand.u32 2147483648, %v9292_v47  ;;  %v6216_v46 = vmul.f32 -1.442695, %v9321_v45  ;;  %vm2835_vm7 = vweird.f32 %v9292_v47 }
 0x31a   : > { %v3665_v48 = vsel %vm8363_vm1, %v3407_v23, %v3664_v3  ;;  %v3048_v16 = vsel %vm3047_vm14, %v6558_v43, %v3044_v49  ;;  %v3921_v10 = vsel %vm6937_vm12, %v3916_v59, %v3920_v50  ;;  %v3931_v17 = vsel %vm6937_vm12, %v3926_v20, %v3930_v37  ;;  %v2392_v43 = vpop.f32.mrf.mxu0 }
 0x31b   : > { %v6562_v52 = vpop.eup %6561  ;;  %3666 = vst [vmem:[#allocation3 + $0x54] sm:$0xf] %v3665_v48  ;;  %v3053_v54 = vsel %vm9298_vm6, %v3052_v28, %v3048_v16  ;;  %v9341_v12 = vadd.f32 %v9176_v30, %v2468_v44  ;;  %6565 = vpow2.f32 %v6216_v46  ;;  %v3183_v50 = vsel %vm8177_vm5, 0, %v3182_v60  ;;  %v3717_v44 = vld [vmem:[#allocation3 + $0xb0] sm:$0x1] }
 0x31c   : > { %v6564_v2 = vpop.eup %6563  ;;  %v3142_v1 = vmul.f32 %v3053_v54, %v9225_v29  ;;  %v2831_v53 = vmul.f32 %v6562_v52, %v9292_v47  ;;  %v4459_v9 = vunpack.c.l.b16 %v3931_v17  ;;  %4769 = vrot.lane.b32.xlu2 %v9206_v26, %s6801_s21  ;;  %3184 = vst [vmem:[#allocation3 + $0x60] sm:$0x1] %v3183_v50  ;;  %v4458_v29 = vunpack.c.l.b16 %v3921_v10  ;;  %v3258_v48 = vld [vmem:[#allocation3 + $0xbc] sm:$0x1] }
 0x31d   : > { %v9346_v58 = vadd.f32 1.0, %v6564_v2  ;;  %v6231_v34 = vmul.f32 -1.442695, %v9341_v12  ;;  %v2454_v28 = vmul.f32 %v9163_v57, %v2392_v43  ;;  %vm9354_vm0 = vcmp.eq.f32.partialorder %v2839_v63, 8.507059e+37 }
 0x31e   : > { %v3294_v7 = vpack.c.bf16 %v3142_v1, %v3142_v1  ;;  %v2832_v3 = vsub.f32 1.0, %v2831_v53  ;;  %v2842_v37 = vor.u32 1.1754944e-38, %v2841_v56  ;;  %v4303_v24 = vsel %vm7407_vm15, %v4301_v35, %v4302_v38  ;;  %v9374_v35 = vld [vmem:[#allocation3 + $0x9c] sm:$0xf]  ;;  %v9383_v53 = vpop.permute.xlu2 %4496 }
 0x31f   : > { %6567 = vrcp.f32 %v9346_v58  ;;  %vm2836_vm8 = vweird.f32 %v6562_v52  ;;  %v9363_v59 = vpack.c.b16 %v4459_v9, %v4458_v29  ;;  %v3408_v20 = vrot.slane %v9308_v14, 4 }
 0x320   : > { %v3529_v23 = vshrl.u32 %v3294_v7, 16  ;;  %v2833_v49 = vmul.f32 %v6562_v52, %v2832_v3  ;;  %v3064_v63 = vand.u32 2147483647, %v9346_v58  ;;  %6569 = vpow2.f32 %v6231_v34  ;;  %vm2837_vm4 = vmor %vm2835_vm7, %vm2836_vm8 }
 0x321   : > { %v9368_v16 = vadd.f32 %v9176_v30, %v2454_v28  ;;  %v6566_v56 = vpop.eup %6565  ;;  %v3532_v46 = vshll.u32 %v3294_v7, 16  ;;  %4506 = vrot.lane.b32.xlu1 %v9363_v59, %s6798_s14  ;;  %v3259_v38 = vsel %vm8188_vm9, 0, %v3258_v48  ;;  %v4550_v17 = vunpack.c.l.b16 %v9317_v39 }
 0x322   : > { %v3531_v18 = vrot.slane %v3529_v23, 7  ;;  %v2834_v54 = vadd.f32 %v6562_v52, %v2833_v49  ;;  %v9379_v60 = vadd.f32 1.0, %v6566_v56  ;;  %3260 = vst [vmem:[#allocation3 + $0xbc] sm:$0x1] %v3259_v38  ;;  %v4551_v43 = vunpack.c.l.b16 %v4303_v24 }
 0x323   : > { %v6217_v10 = vmul.f32 -1.442695, %v9368_v16  ;;  %v3066_v9 = vand.u32 2147483648, %v9346_v58  ;;  %v4101_v7 = vshrl.u32 %v9374_v35, 16  ;;  %v4104_v39 = vshll.u32 %v9374_v35, 16 }
 0x324   : > { %v3534_v2 = vor.u32 %v3532_v46, %v3531_v18  ;;  %v3536_v1 = vrot.slane %v3531_v18, 4  ;;  %v2838_v50 = vsel %vm2837_vm4, %v6562_v52, %v2834_v54  ;;  %6571 = vrcp.f32 %v9379_v60  ;;  %4615 = vrot.lane.b32.xlu2 %v9025_v31, %s6799_s15  ;;  %v3237_v31 = vld [vmem:[#allocation3 + $0x68] sm:$0x1] }
 0x325   : > { %v6568_v34 = vpop.eup %6567  ;;  %v2843_v47 = vsel %vm9354_vm0, %v2842_v37, %v2838_v50  ;;  %vm10805_vm2 = vcmask 27648   ;;  %vm3060_vm3 = vweird.f32 %v9346_v58  ;;  %6573 = vpow2.f32 %v6217_v10 }
 0x326   : > { %v3535_v52 = vsel %vm6914_vm10, %v3527_v4, %v3534_v2  ;;  %v3718_v3 = vsel %vm8177_vm5, %v3536_v1, %v3717_v44  ;;  %v3128_v29 = vmul.f32 %v2843_v47, %v9252_v21  ;;  %v3056_v28 = vmul.f32 %v6568_v34, %v9346_v58  ;;  %v6570_v6 = vpop.eup %6569  ;;  %v3668_v47 = vld [vmem:[#allocation3 + $0x5c] sm:$0x1]  ;;  %vm10808_vm0 = vmmov %vm10805_vm2 }
 0x327   : > { %3716 = vst.msk [vmem:[#allocation3 + $0xac] sm:$0xf] %vm10805_vm2, %v3535_v52  ;;  %v9403_v37 = vpack.c.b16 %v4551_v43, %v4550_v17  ;;  %v9407_v23 = vadd.f32 1.0, %v6570_v6  ;;  %v3238_v21 = vsel %vm8188_vm9, 0, %v3237_v31  ;;  %vm9411_vm11 = vcmp.eq.f32.partialorder %v3064_v63, 8.507059e+37 }
 0x328   : > { %3719 = vst [vmem:[#allocation3 + $0xb0] sm:$0x1] %v3718_v3  ;;  %v3280_v4 = vpack.c.bf16 %v3128_v29, %v3128_v29  ;;  %v3057_v24 = vsub.f32 1.0, %v3056_v28  ;;  %v3067_v44 = vor.u32 1.1754944e-38, %v3066_v9  ;;  %v4103_v48 = vrot.slane %v4101_v7, 4  ;;  %v9429_v28 = vpop.permute.xlu2 %4611 }
 0x329   : > { %3239 = vst [vmem:[#allocation3 + $0x68] sm:$0x1] %v3238_v21  ;;  %v4106_v56 = vrot.slane %v4104_v39, 5  ;;  %vm3061_vm6 = vweird.f32 %v6568_v34  ;;  %vm2850_vm13 = vweird.f32 %v9379_v60  ;;  %6575 = vrcp.f32 %v9407_v23  ;;  %4804 = vrot.lane.b32.xlu1 %v9403_v37, %s6793_s10 }
 0x32a   : > { %v3410_v18 = vshrl.u32 %v3280_v4, 16  ;;  %v3058_v46 = vmul.f32 %v6568_v34, %v3057_v24  ;;  %v6572_v54 = vpop.eup %6571  ;;  %v2854_v63 = vand.u32 2147483647, %v9379_v60  ;;  %v2856_v38 = vand.u32 2147483648, %v9379_v60  ;;  %vm3062_vm14 = vmor %vm3060_vm3, %vm3061_vm6 }
 0x32b   : > { %v4110_v10 = vshll.u32 %v9405_v15, 16  ;;  %v4114_v17 = vshrl.u32 %v9405_v15, 16  ;;  %v3413_v2 = vshll.u32 %v3280_v4, 16  ;;  %v2846_v50 = vmul.f32 %v6572_v54, %v9379_v60  ;;  %v6574_v9 = vpop.eup %6573 }
 0x32c   : > { %v3412_v43 = vrot.slane %v3410_v18, 7  ;;  %v3059_v1 = vadd.f32 %v6568_v34, %v3058_v46  ;;  %vm2851_vm7 = vweird.f32 %v6572_v54  ;;  %v3079_v7 = vand.u32 2147483647, %v9407_v23 }
 0x32d   : > { %v3081_v39 = vand.u32 2147483648, %v9407_v23  ;;  %v4107_v52 = vor.u32 %v4106_v56, %v4103_v48  ;;  %v2847_v31 = vsub.f32 1.0, %v2846_v50  ;;  %v9433_v24 = vadd.f32 1.0, %v6574_v9  ;;  %vm2852_vm2 = vmor %vm2850_vm13, %vm2851_vm7 }
 0x32e   : > { %v3415_v3 = vor.u32 %v3413_v2, %v3412_v43  ;;  %v3417_v29 = vrot.slane %v3412_v43, 4  ;;  %v3063_v6 = vsel %vm3062_vm14, %v6568_v34, %v3059_v1  ;;  %v4112_v21 = vrot.slane %v4110_v10, 5  ;;  %v2430_v43 = vpop.f32.mrf.mxu2  ;;  %v3206_v2 = vld [vmem:[#allocation3 + $0xc0] sm:$0x1] }
 0x32f   : > { %v3068_v4 = vsel %vm9411_vm11, %v3067_v44, %v3063_v6  ;;  %v4116_v58 = vrot.slane %v4114_v17, 4  ;;  %v6576_v18 = vpop.eup %6575  ;;  %v2848_v34 = vmul.f32 %v6572_v54, %v2847_v31  ;;  %vm9443_vm8 = vcmp.eq.f32.partialorder %v2854_v63, 8.507059e+37 }
 0x330   : > { %v3416_v46 = vsel %vm6914_vm10, %v3408_v20, %v3415_v3  ;;  %v3669_v48 = vsel %vm8177_vm5, %v3417_v29, %v3668_v47  ;;  %v3143_v56 = vmul.f32 %v3068_v4, %v9290_v32  ;;  %v2857_v44 = vor.u32 1.1754944e-38, %v2856_v38  ;;  %v9460_v3 = vld [vmem:[#allocation3 + $0xa4] sm:$0x1]  ;;  %v3720_v4 = vld [vmem:[#allocation3 + $0xb4] sm:$0xf] }
 0x331   : > { %3667 = vst.msk [vmem:[#allocation3 + $0x58] sm:$0xf] %vm10808_vm0, %v3416_v46  ;;  %v3071_v10 = vmul.f32 %v6576_v18, %v9407_v23  ;;  %6577 = vrcp.f32 %v9433_v24  ;;  %v2849_v20 = vadd.f32 %v6572_v54, %v2848_v34  ;;  %vm3075_vm4 = vweird.f32 %v9407_v23  ;;  %4685 = vrot.lane.b32.xlu1 %v9088_v27, %s6800_s16 }
 0x332   : > { %3670 = vst [vmem:[#allocation3 + $0x5c] sm:$0x1] %v3669_v48  ;;  %v3295_v14 = vpack.c.bf16 %v3143_v56, %v3143_v56  ;;  %v4108_v32 = vrot.slane %v4107_v52, 4  ;;  %vm9455_vm3 = vcmp.eq.f32.partialorder %v3079_v7, 8.507059e+37  ;;  %v2469_v17 = vmul.f32 %v9163_v57, %v2430_v43 }
 0x333   : > { %v3072_v63 = vsub.f32 1.0, %v3071_v10  ;;  %v4117_v1 = vor.u32 %v4116_v58, %v4112_v21  ;;  %v2853_v9 = vsel %vm2852_vm2, %v6572_v54, %v2849_v20  ;;  %v3082_v47 = vor.u32 1.1754944e-38, %v3081_v39  ;;  %v9472_v39 = vpop.permute.xlu2 %4716 }
 0x334   : > { %v3538_v50 = vshrl.u32 %v3295_v14, 16  ;;  %v4113_v52 = vsel %vm6937_vm12, %v4108_v32, %v4112_v21  ;;  %v2858_v60 = vsel %vm9443_vm8, %v2857_v44, %v2853_v9  ;;  %vm3076_vm11 = vweird.f32 %v6576_v18 }
 0x335   : > { %v3073_v29 = vmul.f32 %v6576_v18, %v3072_v63  ;;  %v9467_v7 = vadd.f32 %v9176_v30, %v2469_v17  ;;  %v3541_v31 = vshll.u32 %v3295_v14, 16  ;;  %v3129_v54 = vmul.f32 %v2858_v60, %v9321_v45  ;;  %vm3077_vm13 = vmor %vm3075_vm4, %vm3076_vm11 }
 0x336   : > { %v9469_v6 = vrot.slane %v3538_v50, 7  ;;  %v3207_v58 = vsel %vm8177_vm5, 0, %v3206_v2  ;;  %vm2865_vm6 = vweird.f32 %v9433_v24  ;;  %v4118_v56 = vrot.slane %v4117_v1, 4 }
 0x337   : > { %v6578_v21 = vpop.eup %6577  ;;  %v3074_v46 = vadd.f32 %v6576_v18, %v3073_v29  ;;  %v6232_v48 = vmul.f32 -1.442695, %v9467_v7  ;;  %3208 = vst [vmem:[#allocation3 + $0xc0] sm:$0x1] %v3207_v58  ;;  %v4120_v34 = vshll.u32 %v9460_v3, 16  ;;  %v3281_v49 = vpack.c.bf16 %v3129_v54, %v3129_v54 }
 0x338   : > { %v3543_v43 = vor.u32 %v3541_v31, %v9469_v6  ;;  %v2861_v45 = vmul.f32 %v6578_v21, %v9433_v24  ;;  %v2869_v44 = vand.u32 2147483647, %v9433_v24  ;;  %v2871_v14 = vand.u32 2147483648, %v9433_v24  ;;  %v3671_v31 = vld [vmem:[#allocation3 + $0x60] sm:$0xf] }
 0x339   : > { %v3078_v10 = vsel %vm3077_vm13, %v6576_v18, %v3074_v46  ;;  %6579 = vpow2.f32 %v6232_v48  ;;  %v4122_v20 = vrot.slane %v4120_v34, 5  ;;  %v3419_v63 = vshrl.u32 %v3281_v49, 16 }
 0x33a   : > { %v3721_v32 = vsel %vm8363_vm1, %v3543_v43, %v3720_v4  ;;  %v3083_v17 = vsel %vm9455_vm3, %v3082_v47, %v3078_v10  ;;  %v4474_v2 = vunpack.c.l.b16 %v4113_v52  ;;  %v2862_v1 = vsub.f32 1.0, %v2861_v45 }
 0x33b   : > { %3722 = vst [vmem:[#allocation3 + $0xb4] sm:$0xf] %v3721_v32  ;;  %v3144_v23 = vmul.f32 %v3083_v17, %v9341_v12  ;;  %v4123_v50 = vsel %vm6937_vm12, %v4118_v56, %v4122_v20  ;;  %v4250_v18 = vrot.slane %v9188_v61, 5  ;;  %v9494_v9 = vrot.slane %v3419_v63, 7  ;;  %v9504_v61 = vld [vmem:[#allocation3 + $0x48] sm:$0xf] }
 0x33c   : > { %v3422_v60 = vshll.u32 %v3281_v49, 16  ;;  %vm2866_vm14 = vweird.f32 %v6578_v21  ;;  %v4475_v29 = vunpack.c.l.b16 %v4123_v50  ;;  %v2863_v54 = vmul.f32 %v6578_v21, %v2862_v1  ;;  %v9512_v49 = vld [vmem:[#allocation3 + $0x4c] sm:$0xf]  ;;  %v3724_v17 = vld [vmem:[#allocation3 + $0xbc] sm:$0x1] }
 0x33d   : > { %v3296_v4 = vpack.c.bf16 %v3144_v23, %v3144_v23  ;;  %v4252_v38 = vrot.slane %v4250_v18, 4  ;;  %v4253_v47 = vrot.slane %v9201_v0, 5  ;;  %vm9498_vm7 = vcmp.eq.f32.partialorder %v2869_v44, 8.507059e+37  ;;  %vm2867_vm0 = vmor %vm2865_vm6, %vm2866_vm14  ;;  %v9519_v44 = vpop.permute.xlu2 %4514  ;;  %v9541_v12 = vld [vmem:[#allocation3 + $0x50] sm:$0x1] }
 0x33e   : > { %v3424_v52 = vor.u32 %v3422_v60, %v9494_v9  ;;  %v2872_v58 = vor.u32 1.1754944e-38, %v2871_v14  ;;  %v9502_v46 = vpack.c.b16 %v4475_v29, %v4474_v2  ;;  %v2864_v34 = vadd.f32 %v6578_v21, %v2863_v54  ;;  %v9535_v54 = vpop.permute.xlu1 %4576 }
 0x33f   : > { %v6580_v48 = vpop.eup %6579  ;;  %v3546_v56 = vshrl.u32 %v3296_v4, 16  ;;  %v4251_v43 = vsel %vm7407_vm15, %v6238_v42, %v4250_v18  ;;  %v4254_v0 = vsel %vm7407_vm15, %v4252_v38, %v4253_v47  ;;  %v3933_v42 = vshrl.u32 %v9504_v61, 16 }
 0x340   : > { %v3672_v45 = vsel %vm8363_vm1, %v3424_v52, %v3671_v31  ;;  %v9521_v10 = vadd.f32 1.0, %v6580_v48  ;;  %4522 = vrot.lane.b32.xlu0 %v9502_v46, %s6798_s14  ;;  %v4537_v40 = vunpack.c.l.b16 %v4254_v0  ;;  %v3549_v20 = vshll.u32 %v3296_v4, 16  ;;  %v2432_v4 = vpop.f32.mrf.mxu2 }
 0x341   : > { %3673 = vst [vmem:[#allocation3 + $0x60] sm:$0xf] %v3672_v45  ;;  %v3548_v14 = vrot.slane %v3546_v56, 7  ;;  %v2868_v32 = vsel %vm2867_vm0, %v6578_v21, %v2864_v34  ;;  %v3936_v63 = vshll.u32 %v9504_v61, 16  ;;  %v4536_v2 = vunpack.c.l.b16 %v4251_v43 }
 0x342   : > { %v2873_v24 = vsel %vm9498_vm7, %v2872_v58, %v2868_v32  ;;  %6581 = vrcp.f32 %v9521_v10  ;;  %v3942_v23 = vshll.u32 %v9512_v49, 16  ;;  %v3544_v1 = vrot.slane %v9469_v6, 4 }
 0x343   : > { %v3551_v50 = vor.u32 %v3549_v20, %v3548_v14  ;;  %v3553_v18 = vrot.slane %v3548_v14, 4  ;;  %v3130_v60 = vmul.f32 %v2873_v24, %v9368_v16  ;;  %v9533_v29 = vpack.c.b16 %v4537_v40, %v4536_v2  ;;  %v3261_v40 = vld [vmem:[#allocation3 + $0xc8] sm:$0x1]  ;;  %v9559_v2 = vpop.permute.xlu0 %4498 }
 0x344   : > { %v3935_v21 = vrot.slane %v3933_v42, 4  ;;  %v3938_v31 = vrot.slane %v3936_v63, 5  ;;  %vm10815_vm8 = vcmask 27648   ;;  %v3944_v6 = vrot.slane %v3942_v23, 5  ;;  %v3675_v63 = vld [vmem:[#allocation3 + $0x68] sm:$0x1] }
 0x345   : > { %v3552_v38 = vsel %vm6914_vm10, %v3544_v1, %v3551_v50  ;;  %v3725_v47 = vsel %vm8177_vm5, %v3553_v18, %v3724_v17  ;;  %v3282_v52 = vpack.c.bf16 %v3130_v60, %v3130_v60  ;;  %4790 = vrot.lane.b32.xlu1 %v9533_v29, %s6793_s10  ;;  %v3946_v58 = vshrl.u32 %v9512_v49, 16  ;;  %v9557_v17 = vpop.permute.xlu2 %4578  ;;  %vm10816_vm3 = vmmov %vm10815_vm8 }
 0x346   : > { %3723 = vst.msk [vmem:[#allocation3 + $0xb8] sm:$0xf] %vm10815_vm8, %v3552_v38  ;;  %v3939_v16 = vor.u32 %v3938_v31, %v3935_v21  ;;  %v2470_v56 = vmul.f32 %v9163_v57, %v2432_v4  ;;  %v3425_v43 = vrot.slane %v9494_v9, 4  ;;  %v3952_v45 = vshll.u32 %v9541_v12, 16  ;;  %v6406_v4 = vld [vmem:[#allocation3] sm:$0xff] }
 0x347   : > { %3726 = vst [vmem:[#allocation3 + $0xbc] sm:$0x1] %v3725_v47  ;;  %v3427_v48 = vshrl.u32 %v3282_v52, 16  ;;  %v3948_v0 = vrot.slane %v3946_v58, 4  ;;  %v3430_v14 = vshll.u32 %v3282_v52, 16  ;;  %v3262_v23 = vsel %vm8188_vm9, 0, %v3261_v40 }
 0x348   : > { %v6582_v34 = vpop.eup %6581  ;;  %4650 = vrot.lane.b32.xlu0 %v9057_v5, %s6791_s8  ;;  %v9554_v32 = vadd.f32 %v9176_v30, %v2470_v56  ;;  %v3094_v57 = vand.u32 2147483647, %v9521_v10  ;;  %v3940_v9 = vrot.slane %v3939_v16, 4  ;;  %v3096_v18 = vand.u32 2147483648, %v9521_v10  ;;  %3263 = vst [vmem:[#allocation3 + $0xc8] sm:$0x1] %v3262_v23  ;;  %v9571_v16 = vpop.permute.xlu1 %4681 }
 0x349   : > { %v3429_v42 = vrot.slane %v3427_v48, 7  ;;  %v3086_v20 = vmul.f32 %v6582_v34, %v9521_v10  ;;  %v3949_v24 = vor.u32 %v3948_v0, %v3944_v6  ;;  %v3954_v21 = vrot.slane %v3952_v45, 5  ;;  %v9605_v23 = vld [vmem:[#allocation3 + $0x54] sm:$0xf] }
 0x34a   : > { %v3945_v30 = vsel %vm6937_vm12, %v3940_v9, %v3944_v6  ;;  %v6233_v31 = vmul.f32 -1.442695, %v9554_v32  ;;  %vm3091_vm4 = vweird.f32 %v6582_v34  ;;  %vm4818_vm2 = vcmask 31744  }
 0x34b   : > { %v3432_v5 = vor.u32 %v3430_v14, %v3429_v42  ;;  %v3434_v1 = vrot.slane %v3429_v42, 4  ;;  %v3087_v50 = vsub.f32 1.0, %v3086_v20  ;;  %v3950_v60 = vrot.slane %v3949_v24, 4 }
 0x34c   : > { %6583 = vpow2.f32 %v6233_v31  ;;  %vm3090_vm11 = vweird.f32 %v9521_v10  ;;  %v4460_v48 = vunpack.c.l.b16 %v3945_v30  ;;  %v6247_v0 = vrot.slane %v9374_v35, 9  ;;  %v9618_v31 = vld [vmem:[#allocation3 + $0x5c] sm:$0x1] }
 0x34d   : > { %v3433_v38 = vsel %vm6914_vm10, %v3425_v43, %v3432_v5  ;;  %v3676_v47 = vsel %vm8177_vm5, %v3434_v1, %v3675_v63  ;;  %v3088_v52 = vmul.f32 %v6582_v34, %v3087_v50  ;;  %v3955_v6 = vsel %vm6937_vm12, %v3950_v60, %v3954_v21  ;;  %4666 = vrot.lane.b32.xlu1 %v9206_v26, %s6791_s8  ;;  %vm3092_vm6 = vmor %vm3090_vm11, %vm3091_vm4  ;;  %v5098_v63 = vld [vmem:[%s10569_s4 + $0x10] sm:$0x3] }
 0x34e   : > { %3674 = vst.msk [vmem:[#allocation3 + $0x64] sm:$0xf] %vm10816_vm3, %v3433_v38  ;;  %v4461_v56 = vunpack.c.l.b16 %v3955_v6  ;;  %v3097_v43 = vor.u32 1.1754944e-38, %v3096_v18  ;;  %v4313_v45 = vrot.slane %v9405_v15, 5  ;;  %v4821_v40 = vsel %vm4818_vm2, %v6406_v4, %v9383_v53  ;;  %v9596_v53 = vpop.permute.xlu2 %4683  ;;  %v9607_v5 = vld [vmem:[#allocation3 + $0x58] sm:$0xf] }
 0x34f   : > { %3677 = vst [vmem:[#allocation3 + $0x68] sm:$0x1] %v3676_v47  ;;  %v3089_v58 = vadd.f32 %v6582_v34, %v3088_v52  ;;  %vm3095_vm13 = vcmp.eq.f32.partialorder %v3094_v57, 8.507059e+37  ;;  %vm10817_vm14 = vcmask 64512   ;;  %vm4899_vm7 = vcmask 97280   ;;  %v9622_v52 = vld [vmem:[#allocation3 + $0x30] sm:$0xff] }
 0x350   : > { %4755 = vrot.lane.b32.xlu0 %v9238_v22, %s6801_s21  ;;  %v9585_v26 = vpack.c.b16 %v4461_v56, %v4460_v48  ;;  %v9589_v10 = vsel %vm7407_vm15, %v6247_v0, %v4313_v45  ;;  %v4868_v15 = vsel %vm10817_vm14, %v4821_v40, %v9535_v54  ;;  %v9603_v24 = vpop.permute.xlu1 %4786  ;;  %v3957_v54 = vshrl.u32 %v9605_v23, 16  ;;  %v6425_v40 = vld [vmem:[%s10569_s4 + $0x8] sm:$0xff] }
 0x351   : > { %v3093_v42 = vsel %vm3092_vm6, %v6582_v34, %v3089_v58  ;;  %v4647_v34 = vpop.permute.xlu0 %4646  ;;  %v3960_v1 = vshll.u32 %v9605_v23, 16  ;;  %v3966_v50 = vshll.u32 %v9607_v5, 16  ;;  %v4901_v18 = vsel %vm4899_vm7, %v4868_v15, %v9429_v28  ;;  %v3727_v28 = vld [vmem:[#allocation3 + $0xc0] sm:$0xf] }
 0x352   : > { %v3098_v14 = vsel %vm3095_vm13, %v3097_v43, %v3093_v42  ;;  %4508 = vrot.lane.b32.xlu2 %v9585_v26, %s6798_s14  ;;  %v6584_v35 = vpop.eup %6583  ;;  %vm5147_vm0 = vcmask 1041408   ;;  %vm4964_vm8 = vcmask 162816   ;;  %vm10818_vm4 = vcmask 130048  }
 0x353   : > { %v3145_v20 = vmul.f32 %v3098_v14, %v9467_v7  ;;  %v9601_v9 = vadd.f32 1.0, %v6584_v35  ;;  %v5108_v7 = vunpack.c.l.b16 %v5098_v63  ;;  %v4933_v60 = vsel %vm10818_vm4, %v4901_v18, %v4647_v34 }
 0x354   : > { %v3959_v4 = vrot.slane %v3957_v54, 4  ;;  %v3962_v6 = vrot.slane %v3960_v1, 5  ;;  %v3970_v58 = vshrl.u32 %v9607_v5, 16  ;;  %v3968_v56 = vrot.slane %v3966_v50, 5 }
 0x355   : > { %v3297_v57 = vpack.c.bf16 %v3145_v20, %v3145_v20  ;;  %4771 = vrot.lane.b32.xlu1 %v9296_v19, %s6801_s21  ;;  %6585 = vrcp.f32 %v9601_v9  ;;  %v5111_v21 = vpack.c.b16 %v5108_v7, %v5108_v7  ;;  %v4315_v43 = vrot.slane %v4313_v45, 4 }
 0x356   : > { %v3963_v42 = vor.u32 %v3962_v6, %v3959_v4  ;;  %v3972_v14 = vrot.slane %v3970_v58, 4  ;;  %v3976_v20 = vshll.u32 %v9618_v31, 16  ;;  %v4966_v35 = vsel %vm4964_vm8, %v4933_v60, %v9571_v16  ;;  %v9636_v45 = vpop.permute.xlu2 %4502 }
 0x357   : > { %v3555_v30 = vshrl.u32 %v3297_v57, 16  ;;  %v3558_v47 = vshll.u32 %v3297_v57, 16  ;;  %v5149_v48 = vsel %vm5147_vm0, %v5111_v21, 0  ;;  %v4316_v34 = vrot.slane %v9460_v3, 5 }
 0x358   : > { %5156 = vmatpush.bf16.msra.mxu1 %v5149_v48  ;;  %v4554_v63 = vunpack.c.l.b16 %v9589_v10  ;;  %6431 = vmatpush.bf16.msra.mxu3 %v5149_v48  ;;  %vm3105_vm3 = vweird.f32 %v9601_v9  ;;  %v3109_v54 = vand.u32 2147483647, %v9601_v9  ;;  %v6240_v1 = vrot.slane %v9504_v61, 9  ;;  %v9647_v18 = vpop.permute.xlu1 %4500 }
 0x359   : > { %v9620_v38 = vrot.slane %v3555_v30, 7  ;;  %v9634_v15 = vpop.permute.xlu0 %4613  ;;  %v3111_v50 = vand.u32 2147483648, %v9601_v9  ;;  %v3964_v3 = vrot.slane %v3963_v42, 4  ;;  %v3973_v10 = vor.u32 %v3972_v14, %v3968_v56  ;;  %v9668_v42 = vld [vmem:[#allocation3 + $0x60] sm:$0xf] }
 0x35a   : > { %4720 = vrot.lane.b32.xlu2 %v9622_v52, %s6792_s9  ;;  %v3978_v30 = vrot.slane %v3976_v20, 5  ;;  %v4317_v61 = vsel %vm7407_vm15, %v4315_v43, %v4316_v34  ;;  %v4264_v21 = vrot.slane %v9512_v49, 5  ;;  %vm5029_vm11 = vcmask 228352   ;;  %v9670_v14 = vld [vmem:[#allocation3 + $0x64] sm:$0xf] }
 0x35b   : > { %v3560_v0 = vor.u32 %v3558_v47, %v9620_v38  ;;  %v6586_v57 = vpop.eup %6585  ;;  %v3969_v47 = vsel %vm6937_vm12, %v3964_v3, %v3968_v56  ;;  %v3974_v6 = vrot.slane %v3973_v10, 4  ;;  %v4555_v58 = vunpack.c.l.b16 %v4317_v61 }
 0x35c   : > { %v3101_v16 = vmul.f32 %v6586_v57, %v9601_v9  ;;  %5157 = vmatpush.bf16.msra.mxu1 %v6425_v40  ;;  %6432 = vmatpush.bf16.msra.mxu3 %v6425_v40  ;;  %v4266_v48 = vrot.slane %v4264_v21, 4  ;;  %vm3106_vm6 = vweird.f32 %v6586_v57  ;;  %v4462_v56 = vunpack.c.l.b16 %v3969_v47 }
 0x35d   : > { %v3728_v7 = vsel %vm8363_vm1, %v3560_v0, %v3727_v28  ;;  %vm10819_vm1 = vcmask 195584   ;;  %v4265_v28 = vsel %vm7407_vm15, %v6240_v1, %v4264_v21  ;;  %v4267_v0 = vrot.slane %v9541_v12, 5  ;;  %vm3107_vm14 = vmor %vm3105_vm3, %vm3106_vm6 }
 0x35e   : > { %3729 = vst [vmem:[#allocation3 + $0xc0] sm:$0xf] %v3728_v7  ;;  %v4998_v60 = vsel %vm10819_vm1, %v4966_v35, %v9472_v39  ;;  %v3102_v4 = vsub.f32 1.0, %v3101_v16  ;;  %v3979_v43 = vsel %vm6937_vm12, %v3974_v6, %v3978_v30  ;;  %v9664_v49 = vpack.c.b16 %v4555_v58, %v4554_v63  ;;  %v9674_v34 = vpop.permute.xlu2 %4788  ;;  %v9685_v30 = vld [vmem:[#allocation3 + $0x68] sm:$0x1] }
 0x35f   : > { %v4463_v40 = vunpack.c.l.b16 %v3979_v43  ;;  %vm5114_vm13 = vcmask 293888   ;;  %v4268_v12 = vsel %vm7407_vm15, %v4266_v48, %v4267_v0  ;;  %v3981_v63 = vshrl.u32 %v9668_v42, 16 }
 0x360   : > { %v3103_v39 = vmul.f32 %v6586_v57, %v3102_v4  ;;  %5158 = vmatpush.bf16.msra.mxu1 %v6424_v41  ;;  %v3984_v7 = vshll.u32 %v9668_v42, 16  ;;  %v3990_v1 = vshll.u32 %v9670_v14, 16  ;;  %6433 = vmatpush.bf16.msra.mxu3 %v6424_v41  ;;  %v3112_v16 = vor.u32 1.1754944e-38, %v3111_v50  ;;  %v4649_v58 = vpop.permute.xlu1 %4648 }
 0x361   : > { %v4752_v35 = vpop.permute.xlu0 %4751  ;;  %v9682_v3 = vpack.c.b16 %v4463_v40, %v4462_v56  ;;  %v3994_v61 = vshrl.u32 %v9670_v14, 16  ;;  %vm3110_vm0 = vcmp.eq.f32.partialorder %v3109_v54, 8.507059e+37  ;;  %vm10820_vm4 = vcmask 261120   ;;  %v6734_v40 = vld [vmem:[#allocation3 + $0xc] sm:$0xff] }
 0x362   : > { %4596 = vrot.lane.b32.xlu2 %v9166_v33, %s6790_s30  ;;  %v3104_v20 = vadd.f32 %v6586_v57, %v3103_v39  ;;  %v5031_v10 = vsel %vm5029_vm11, %v4998_v60, %v4752_v35  ;;  %v3983_v47 = vrot.slane %v3981_v63, 4  ;;  %v3986_v9 = vrot.slane %v3984_v7, 5 }
 0x363   : > { %v5063_v4 = vsel %vm10820_vm4, %v5031_v10, %v9603_v24  ;;  %4510 = vrot.lane.b32.xlu0 %v9682_v3, %s6798_s14  ;;  %v3992_v50 = vrot.slane %v3990_v1, 5  ;;  %v4540_v6 = vunpack.c.l.b16 %v4265_v28  ;;  %v3996_v48 = vrot.slane %v3994_v61, 4  ;;  %v6735_v10 = vld [vmem:[#allocation3 + $0x94] sm:$0xf] }
 0x364   : > { %v3108_v21 = vsel %vm3107_vm14, %v6586_v57, %v3104_v20  ;;  %6332 = vmatmul.msk.bf16.vlgmr.msra.gmra.mxu1 %vm5114_vm13, %v5063_v4  ;;  %v4000_v57 = vshll.u32 %v9685_v30, 16  ;;  %v4541_v54 = vunpack.c.l.b16 %v4268_v12  ;;  %v3987_v0 = vor.u32 %v3986_v9, %v3983_v47  ;;  %v3731_v4 = vld [vmem:[#allocation3 + $0xc8] sm:$0x1]  ;;  %vm10825_vm14 = vmmov %vm10820_vm4 }
 0x365   : > { %v3113_v41 = vsel %vm3110_vm0, %v3112_v16, %v3108_v21  ;;  %v3997_v24 = vor.u32 %v3996_v48, %v3992_v50  ;;  %v4824_v28 = vsel %vm4818_vm2, %v6734_v40, %v9559_v2  ;;  %v4306_v61 = vrot.slane %v6735_v10, 5  ;;  %v9711_v47 = vld [vmem:[#allocation3 + $0x84] sm:$0xff] }
 0x366   : > { %v3146_v60 = vmul.f32 %v3113_v41, %v9554_v32  ;;  %v9695_v43 = vpack.c.b16 %v4541_v54, %v4540_v6  ;;  %v3988_v56 = vrot.slane %v3987_v0, 4  ;;  %v9701_v32 = vpop.permute.xlu2 %4664  ;;  %v4002_v12 = vrot.slane %v4000_v57, 5 }
 0x367   : > { %v3998_v63 = vrot.slane %v3997_v24, 4  ;;  %vm10821_vm3 = vcmask 64512   ;;  %vm10822_vm1 = vcmask 130048   ;;  %v4308_v24 = vrot.slane %v4306_v61, 4 }
 0x368   : > { %v3298_v39 = vpack.c.bf16 %v3146_v60, %v3146_v60  ;;  %v3993_v7 = vsel %vm6937_vm12, %v3988_v56, %v3992_v50  ;;  %v4870_v2 = vsel %vm10821_vm3, %v4824_v28, %v9557_v17  ;;  %v3561_v50 = vrot.slane %v9620_v38, 4  ;;  %v4754_v57 = vpop.permute.xlu1 %4753  ;;  %v6418_v38 = vld [vmem:[#allocation3 + $0x90] sm:$0xff]  ;;  %v6737_v56 = vld [vmem:[#allocation3 + $0x98] sm:$0x1]  ;;  %vm10826_vm0 = vmmov %vm10821_vm3 }
 0x369   : > { %v9703_v35 = vpop.permute.xlu0 %4516  ;;  %v4003_v21 = vsel %vm6937_vm12, %v3998_v63, %v4002_v12  ;;  %v4464_v41 = vunpack.c.l.b16 %v3993_v7  ;;  %v4903_v48 = vsel %vm4899_vm7, %v4870_v2, %v9634_v15  ;;  %vm10823_vm6 = vcmask 27648   ;;  %v6738_v12 = vld [vmem:[#allocation3 + $0x90] sm:$0xf]  ;;  %vm10827_vm4 = vmmov %vm10822_vm1 }
 0x36a   : > { %4701 = vrot.lane.b32.xlu2 %v9403_v37, %s6800_s16  ;;  %v3563_v20 = vshrl.u32 %v3298_v39, 16  ;;  %v3566_v16 = vshll.u32 %v3298_v39, 16  ;;  %v4465_v9 = vunpack.c.l.b16 %v4003_v21  ;;  %v4935_v54 = vsel %vm10822_vm1, %v4903_v48, %v4649_v58  ;;  %vm10829_vm1 = vmmov %vm10825_vm14 }
 0x36b   : > { %4631 = vrot.lane.b32.xlu0 %v9711_v47, %s6799_s15  ;;  %v4271_v15 = vrot.slane %v9607_v5, 5  ;;  %v4968_v8 = vsel %vm4964_vm8, %v4935_v54, %v9596_v53  ;;  %v4309_v40 = vrot.slane %v6737_v56, 5  ;;  %v6246_v7 = vrot.slane %v6738_v12, 9 }
 0x36c   : > { %v3565_v1 = vrot.slane %v3563_v20, 7  ;;  %v9719_v0 = vpack.c.b16 %v4465_v9, %v4464_v41  ;;  %v6241_v20 = vrot.slane %v9605_v23, 9  ;;  %v4274_v10 = vrot.slane %v9618_v31, 5 }
 0x36d   : > { %v4310_v5 = vsel %vm7407_vm15, %v4308_v24, %v4309_v40  ;;  %v4307_v21 = vsel %vm7407_vm15, %v6246_v7, %v4306_v61  ;;  %v6740_v24 = vld [vmem:[#allocation3 + $0x44] sm:$0x1]  ;;  %v4281_v40 = vrot.slane %v9685_v30, 5 }
 0x36e   : > { %v3568_v6 = vor.u32 %v3566_v16, %v3565_v1  ;;  %v3570_v60 = vrot.slane %v3565_v1, 4  ;;  %4512 = vrot.lane.b32.xlu1 %v9719_v0, %s6798_s14  ;;  %v4521_v28 = vpop.permute.xlu2 %4520  ;;  %v4272_v53 = vsel %vm7407_vm15, %v6241_v20, %v4271_v15  ;;  %v4273_v16 = vrot.slane %v4271_v15, 4 }
 0x36f   : > { %v4553_v2 = vunpack.c.l.b16 %v4310_v5  ;;  %v4542_v9 = vunpack.c.l.b16 %v4272_v53  ;;  %v4260_v15 = vrot.slane %v6740_v24, 5 }
 0x370   : > { %v3569_v17 = vsel %vm6914_vm10, %v3561_v50, %v3568_v6  ;;  %v3732_v39 = vsel %vm8177_vm5, %v3570_v60, %v3731_v4  ;;  %vm10824_vm10 = vcmask 195584   ;;  %v9750_v4 = vpop.permute.xlu1 %4518  ;;  %v4275_v41 = vsel %vm7407_vm15, %v4273_v16, %v4274_v10  ;;  %v6739_v60 = vld [vmem:[#allocation3 + $0x40] sm:$0xf]  ;;  %v9793_v16 = vld [vmem:[#allocation3 + $0x6c] sm:$0xff] }
 0x371   : > { %3730 = vst.msk [vmem:[#allocation3 + $0xc4] sm:$0xf] %vm10823_vm6, %v3569_v17  ;;  %v4719_v58 = vpop.permute.xlu0 %4718  ;;  %v4543_v50 = vunpack.c.l.b16 %v4275_v41  ;;  %v4257_v48 = vrot.slane %v6739_v60, 5  ;;  %v6419_v10 = vld [vmem:[#allocation3 + $0x9c] sm:$0xff]  ;;  %vm10828_vm3 = vmmov %vm10824_vm10 }
 0x372   : > { %4582 = vrot.lane.b32.xlu2 %v9088_v27, %s6790_s30  ;;  %3733 = vst [vmem:[#allocation3 + $0xc8] sm:$0x1] %v3732_v39  ;;  %v5000_v63 = vsel %vm10824_vm10, %v4968_v8, %v4719_v58  ;;  %v9736_v27 = vsel %vm4818_vm2, %v6418_v38, %v4521_v28  ;;  %v6242_v39 = vrot.slane %v9668_v42, 9  ;;  %v6741_v42 = vld [vmem:[#allocation3 + $0x3c] sm:$0xf]  ;;  %vm10830_vm6 = vmmov %vm10826_vm0 }
 0x373   : > { %v5033_v1 = vsel %vm5029_vm11, %v5000_v63, %v4754_v57  ;;  %4736 = vrot.lane.b32.xlu0 %v6418_v38, %s6792_s9  ;;  %v9758_v6 = vpack.c.b16 %v4543_v50, %v4542_v9  ;;  %v6411_v57 = vld [vmem:[#allocation3 + $0x3c] sm:$0xff]  ;;  %v4259_v54 = vrot.slane %v4257_v48, 4  ;;  %vm10831_vm10 = vmmov %vm10827_vm4 }
 0x374   : > { %v5065_v23 = vsel %vm10825_vm14, %v5033_v1, %v9674_v34  ;;  %v4552_v34 = vunpack.c.l.b16 %v4307_v21  ;;  %v4848_v21 = vsel %vm4818_vm2, %v9793_v16, %v9519_v44  ;;  %vm10832_vm14 = vmmov %vm10828_vm3 }
 0x375   : > { %6333 = vmatmul.msk.bf16.gmra.mxu1 %vm5114_vm13, %v5065_v23  ;;  %v4261_v20 = vsel %vm7407_vm15, %v4259_v54, %v4260_v15 }
 0x376   : > { %4617 = vrot.lane.b32.xlu1 %v9622_v52, %s6799_s15  ;;  %v9760_v61 = vpack.c.b16 %v4553_v2, %v4552_v34  ;;  %v4539_v5 = vunpack.c.l.b16 %v4261_v20 }
 0x378   : > { %v4630_v17 = vpop.permute.xlu1 %4629 }
 0x379   : > { %v4595_v31 = vpop.permute.xlu0 %4594 }
 0x37a   : > { %4652 = vrot.lane.b32.xlu2 %v9238_v22, %s6791_s8  ;;  %v4278_v22 = vrot.slane %v9670_v14, 5  ;;  %v6239_v14 = vrot.slane %v6741_v42, 9  ;;  %v4886_v2 = vsel %vm10826_vm0, %v4848_v21, %v4595_v31  ;;  %v4770_v31 = vpop.permute.xlu2 %4769  ;;  %vm10833_vm0 = vmmov %vm10829_vm1 }
 0x37b   : > { %4806 = vrot.lane.b32.xlu0 %v9760_v61, %s6793_s10 }
 0x37c   : > { %v4279_v58 = vsel %vm7407_vm15, %v6242_v39, %v4278_v22  ;;  %v4280_v56 = vrot.slane %v4278_v22, 4  ;;  %v4258_v30 = vsel %vm7407_vm15, %v6239_v14, %v4257_v48 }
 0x37d   : > { %v4544_v12 = vunpack.c.l.b16 %v4279_v58  ;;  %v3778_v58 = vld [vmem:[#allocation3 + $0xb0] sm:$0x1] }
 0x37e   : > { %4722 = vrot.lane.b32.xlu1 %v6411_v57, %s6792_s9  ;;  %v4282_v63 = vsel %vm7407_vm15, %v4280_v56, %v4281_v40  ;;  %v4144_v20 = vshll.u32 %v3778_v58, 16 }
 0x37f   : > { %v4545_v7 = vunpack.c.l.b16 %v4282_v63 }
 0x380   : > { %v4735_v53 = vpop.permute.xlu1 %4734 }
 0x381   : > { %v4505_v8 = vpop.permute.xlu0 %4504  ;;  %v9784_v1 = vpack.c.b16 %v4545_v7, %v4544_v12 }
 0x382   : > { %4757 = vrot.lane.b32.xlu2 %v9363_v59, %s6801_s21  ;;  %v9774_v28 = vsel %vm4818_vm2, %v9622_v52, %v4505_v8  ;;  %v4538_v52 = vunpack.c.l.b16 %v4258_v30  ;;  %v4616_v39 = vpop.permute.xlu2 %4615 }
 0x383   : > { %4687 = vrot.lane.b32.xlu0 %v9533_v29, %s6800_s16 }
 0x384   : > { %v9789_v23 = vpack.c.b16 %v4539_v5, %v4538_v52 }
 0x386   : > { %4598 = vrot.lane.b32.xlu1 %v9403_v37, %s6790_s30  ;;  %v4919_v37 = vsel %vm4899_vm7, %v4886_v2, %v4630_v17 }
 0x387   : > { %v4951_v44 = vsel %vm10827_vm4, %v4919_v37, %v9701_v32  ;;  %vm10834_vm4 = vmmov %vm10830_vm6 }
 0x389   : > { %v4700_v41 = vpop.permute.xlu0 %4699 }
 0x38a   : > { %4633 = vrot.lane.b32.xlu2 %v6418_v38, %s6799_s15  ;;  %v4984_v50 = vsel %vm4964_vm8, %v4951_v44, %v4700_v41 }
 0x38b   : > { %4792 = vrot.lane.b32.xlu0 %v9789_v23, %s6793_s10  ;;  %v5016_v34 = vsel %vm10828_vm3, %v4984_v50, %v4735_v53  ;;  %v6742_v50 = vld [vmem:[#allocation3 + $0x18] sm:$0xff]  ;;  %vm10835_vm3 = vmmov %vm10831_vm10 }
 0x38c   : > { %v5049_v48 = vsel %vm5029_vm11, %v5016_v34, %v4770_v31  ;;  %v4827_v34 = vsel %vm4818_vm2, %v6742_v50, %v9647_v18 }
 0x38e   : > { %4703 = vrot.lane.b32.xlu1 %v9760_v61, %s6800_s16 }
 0x391   : > { %v4581_v56 = vpop.permute.xlu0 %4580 }
 0x392   : > { %4738 = vrot.lane.b32.xlu2 %v6419_v10, %s6792_s9 }
 0x393   : > { %v4507_v38 = vpop.permute.xlu1 %4506  ;;  %4668 = vrot.lane.b32.xlu0 %v9296_v19, %s6791_s8  ;;  %v3777_v19 = vld [vmem:[#allocation3 + $0xac] sm:$0xf] }
 0x394   : > { %v9804_v9 = vsel %vm4818_vm2, %v6411_v57, %v4507_v38  ;;  %v4134_v32 = vshll.u32 %v3777_v19, 16  ;;  %v4138_v17 = vshrl.u32 %v3777_v19, 16  ;;  %v4320_v21 = vrot.slane %v3777_v19, 5 }
 0x396   : > { %4584 = vrot.lane.b32.xlu1 %v9533_v29, %s6790_s30  ;;  %v3776_v29 = vld [vmem:[#allocation3 + $0xa8] sm:$0xf]  ;;  %v4136_v15 = vrot.slane %v4134_v32, 5  ;;  %v4140_v8 = vrot.slane %v4138_v17, 4  ;;  %v4322_v44 = vrot.slane %v4320_v21, 4 }
 0x397   : > { %v4125_v22 = vshrl.u32 %v3776_v29, 16  ;;  %v4128_v24 = vshll.u32 %v3776_v29, 16  ;;  %v6248_v32 = vrot.slane %v3776_v29, 9 }
 0x398   : > { %v4141_v14 = vor.u32 %v4140_v8, %v4136_v15 }
 0x399   : > { %v4127_v40 = vrot.slane %v4125_v22, 4  ;;  %v4130_v42 = vrot.slane %v4128_v24, 5  ;;  %v4321_v22 = vsel %vm7407_vm15, %v6248_v32, %v4320_v21 }
 0x39a   : > { %4808 = vrot.lane.b32.xlu2 %v9664_v49, %s6793_s10  ;;  %v4142_v30 = vrot.slane %v4141_v14, 4  ;;  %v4556_v8 = vunpack.c.l.b16 %v4321_v22 }
 0x39b   : > { %v4805_v60 = vpop.permute.xlu1 %4804  ;;  %4773 = vrot.lane.b32.xlu0 %v9502_v46, %s6801_s21  ;;  %v4131_v7 = vor.u32 %v4130_v42, %v4127_v40 }
 0x39c   : > { %v5081_v54 = vsel %vm10829_vm1, %v5049_v48, %v4805_v60  ;;  %v4323_v60 = vrot.slane %v3778_v58, 5  ;;  %vm10836_vm1 = vmmov %vm10832_vm14 }
 0x39d   : > { %6341 = vmatmul.msk.bf16.vlgmr.msra.gmra.mxu3 %vm5114_vm13, %v5081_v54  ;;  %v4132_v5 = vrot.slane %v4131_v7, 4  ;;  %v6420_v54 = vld [vmem:[#allocation3 + $0xa8] sm:$0xff]  ;;  %v9878_v7 = vld [vmem:[#allocation3 + $0x54] sm:$0xff] }
 0x39e   : > { %4654 = vrot.lane.b32.xlu1 %v9363_v59, %s6791_s8  ;;  %v6412_v59 = vld [vmem:[#allocation3 + $0x48] sm:$0xff]  ;;  %v4324_v17 = vsel %vm7407_vm15, %v4322_v44, %v4323_v60 }
 0x39f   : > { %v4137_v37 = vsel %vm6937_vm12, %v4132_v5, %v4136_v15  ;;  %v4557_v15 = vunpack.c.l.b16 %v4324_v17 }
 0x3a0   : > { %v4476_v31 = vunpack.c.l.b16 %v4137_v37 }
 0x3a1   : > { %v9865_v58 = vpack.c.b16 %v4557_v15, %v4556_v8  ;;  %v9914_v8 = vld [vmem:[%s10570_s5] ss:$0 sm:$0xff] }
 0x3a2   : > { %4689 = vrot.lane.b32.xlu2 %v9789_v23, %s6800_s16 }
 0x3a3   : > { %4619 = vrot.lane.b32.xlu0 %v6411_v57, %s6799_s15  ;;  %v4146_v57 = vrot.slane %v4144_v20, 5 }
 0x3a5   : > { %v4147_v52 = vsel %vm6937_vm12, %v4142_v30, %v4146_v57  ;;  %v3779_v57 = vld [vmem:[#allocation3 + $0xb4] sm:$0xf] }
 0x3a6   : > { %4759 = vrot.lane.b32.xlu1 %v9585_v26, %s6801_s21  ;;  %v4477_v41 = vunpack.c.l.b16 %v4147_v52  ;;  %v4149_v52 = vshrl.u32 %v3779_v57, 16 }
 0x3a8   : > { %v9849_v48 = vpack.c.b16 %v4477_v41, %v4476_v31 }
 0x3aa   : > { %4794 = vrot.lane.b32.xlu2 %v9695_v43, %s6793_s10 }
 0x3ab   : > { %4724 = vrot.lane.b32.xlu0 %v6412_v59, %s6792_s9 }
 0x3ac   : > { %v4509_v63 = vpop.permute.xlu2 %4508 }
 0x3ad   : > { %v9831_v12 = vsel %vm4818_vm2, %v6412_v59, %v4509_v63  ;;  %v3780_v63 = vld [vmem:[#allocation3 + $0xb8] sm:$0xf] }
 0x3ae   : > { %4635 = vrot.lane.b32.xlu1 %v6419_v10, %s6799_s15  ;;  %v4158_v30 = vshll.u32 %v3780_v63, 16 }
 0x3b0   : > { %v4160_v21 = vrot.slane %v4158_v30, 5 }
 0x3b2   : > { %v4523_v53 = vpop.permute.xlu0 %4522  ;;  %4670 = vrot.lane.b32.xlu2 %v9502_v46, %s6791_s8  ;;  %v4872_v46 = vsel %vm10830_vm6, %v4827_v34, %v4581_v56  ;;  %vm10837_vm6 = vmmov %vm10833_vm0 }
 0x3b3   : > { %v9839_v2 = vsel %vm4818_vm2, %v6419_v10, %v4523_v53  ;;  %4600 = vrot.lane.b32.xlu0 %v9760_v61, %s6790_s30  ;;  %v4686_v10 = vpop.permute.xlu1 %4685  ;;  %v4905_v18 = vsel %vm4899_vm7, %v4872_v46, %v4616_v39  ;;  %v4152_v53 = vshll.u32 %v3779_v57, 16 }
 0x3b4   : > { %v4721_v38 = vpop.permute.xlu2 %4720 }
 0x3b5   : > { %v4154_v41 = vrot.slane %v4152_v53, 5  ;;  %v6249_v53 = vrot.slane %v3779_v57, 9 }
 0x3b6   : > { %4740 = vrot.lane.b32.xlu1 %v6420_v54, %s6792_s9 }
 0x3ba   : > { %v4651_v19 = vpop.permute.xlu0 %4650  ;;  %4775 = vrot.lane.b32.xlu2 %v9849_v48, %s6801_s21 }
 0x3bb   : > { %v4937_v61 = vsel %vm10831_vm10, %v4905_v18, %v4651_v19  ;;  %4705 = vrot.lane.b32.xlu0 %v9664_v49, %s6800_s16  ;;  %v4791_v40 = vpop.permute.xlu1 %4790  ;;  %vm10838_vm10 = vmmov %vm10834_vm4 }
 0x3bc   : > { %v9860_v24 = vpop.permute.xlu2 %4596  ;;  %v4970_v29 = vsel %vm4964_vm8, %v4937_v61, %v4686_v10  ;;  %v4327_v61 = vrot.slane %v3780_v63, 5 }
 0x3bd   : > { %v5002_v39 = vsel %vm10832_vm14, %v4970_v29, %v4721_v38  ;;  %v4151_v38 = vrot.slane %v4149_v52, 4  ;;  %vm10839_vm14 = vmmov %vm10835_vm3 }
 0x3be   : > { %4810 = vrot.lane.b32.xlu1 %v9865_v58, %s6793_s10 }
 0x3bf   : > { %v4155_v31 = vor.u32 %v4154_v41, %v4151_v38 }
 0x3c1   : > { %v4156_v19 = vrot.slane %v4155_v31, 4 }
 0x3c2   : > { %v4756_v56 = vpop.permute.xlu0 %4755  ;;  %4621 = vrot.lane.b32.xlu2 %v6412_v59, %s6799_s15  ;;  %v4162_v59 = vshrl.u32 %v3780_v63, 16 }
 0x3c3   : > { %v5035_v42 = vsel %vm5029_vm11, %v5002_v39, %v4756_v56  ;;  %4586 = vrot.lane.b32.xlu0 %v9789_v23, %s6790_s30  ;;  %v3781_v23 = vld [vmem:[#allocation3 + $0xbc] sm:$0x1]  ;;  %v4161_v32 = vsel %vm6937_vm12, %v4156_v19, %v4160_v21  ;;  %v4667_v22 = vpop.permute.xlu1 %4666  ;;  %v4329_v56 = vrot.slane %v4327_v61, 4 }
 0x3c4   : > { %v5067_v14 = vsel %vm10833_vm0, %v5035_v42, %v4791_v40  ;;  %v9873_v20 = vpop.permute.xlu2 %4701  ;;  %v4164_v37 = vrot.slane %v4162_v59, 4  ;;  %v4168_v50 = vshll.u32 %v3781_v23, 16  ;;  %v4478_v15 = vunpack.c.l.b16 %v4161_v32  ;;  %v9923_v40 = vld [vmem:[%s10571_s6] ss:$0 sm:$0xff]  ;;  %v9934_v59 = vld [vmem:[#allocation3 + $0xb4] sm:$0xff] }
 0x3c5   : > { %6334 = vmatmul.msk.bf16.gmra.mxu1 %vm5114_vm13, %v5067_v14  ;;  %v4330_v42 = vrot.slane %v3781_v23, 5  ;;  %v9927_v14 = vld [vmem:[#allocation3 + $0x78] sm:$0xff]  ;;  %v4328_v23 = vsel %vm7407_vm15, %v6249_v53, %v4327_v61  ;;  %v9963_v32 = vld [vmem:[#allocation3 + $0xc4] sm:$0xf] }
 0x3c6   : > { %4691 = vrot.lane.b32.xlu1 %v9695_v43, %s6800_s16  ;;  %v4165_v44 = vor.u32 %v4164_v37, %v4160_v21  ;;  %v4170_v60 = vrot.slane %v4168_v50, 5  ;;  %v4851_v63 = vsel %vm4818_vm2, %v9927_v14, %v9703_v35  ;;  %v4558_v50 = vunpack.c.l.b16 %v4328_v23 }
 0x3c7   : > { %v4888_v52 = vsel %vm10834_vm4, %v4851_v63, %v9860_v24  ;;  %v4331_v21 = vsel %vm7407_vm15, %v4329_v56, %v4330_v42  ;;  %v9982_v63 = vld [vmem:[#allocation3 + $0xc0] sm:$0xf] }
 0x3c8   : > { %v4166_v46 = vrot.slane %v4165_v44, 4  ;;  %v4559_v24 = vunpack.c.l.b16 %v4331_v21  ;;  %v4333_v53 = vshrl.u32 %v9982_v63, 16  ;;  %v4336_v21 = vshll.u32 %v9982_v63, 16 }
 0x3ca   : > { %4726 = vrot.lane.b32.xlu2 %v9878_v7, %s6792_s9 }
 0x3cb   : > { %4656 = vrot.lane.b32.xlu0 %v9585_v26, %s6791_s8  ;;  %v4772_v38 = vpop.permute.xlu1 %4771 }
 0x3cc   : > { %v9884_v5 = vpop.permute.xlu2 %4582 }
 0x3ce   : > { %4796 = vrot.lane.b32.xlu1 %v9758_v6, %s6793_s10 }
 0x3d2   : > { %4602 = vrot.lane.b32.xlu2 %v9664_v49, %s6790_s30  ;;  %v4171_v49 = vsel %vm6937_vm12, %v4166_v46, %v4170_v60 }
 0x3d3   : > { %4761 = vrot.lane.b32.xlu0 %v9682_v3, %s6801_s21  ;;  %v4479_v18 = vunpack.c.l.b16 %v4171_v49 }
 0x3d4   : > { %v9892_v34 = vpop.permute.xlu2 %4652 }
 0x3d5   : > { %v4511_v26 = vpop.permute.xlu0 %4510  ;;  %v9916_v39 = vpack.c.b16 %v4479_v18, %v4478_v15 }
 0x3d6   : > { %v9898_v10 = vsel %vm4818_vm2, %v9878_v7, %v4511_v26  ;;  %4672 = vrot.lane.b32.xlu1 %v9849_v48, %s6791_s8  ;;  %v9959_v26 = vpack.c.b16 %v4559_v24, %v4558_v50 }
 0x3da   : > { %4707 = vrot.lane.b32.xlu2 %v9865_v58, %s6800_s16 }
 0x3db   : > { %4637 = vrot.lane.b32.xlu0 %v6420_v54, %s6799_s15 }
 0x3dc   : > { %v9908_v17 = vpop.permute.xlu2 %4757 }
 0x3dd   : > { %v4632_v29 = vpop.permute.xlu0 %4631 }
 0x3de   : > { %4777 = vrot.lane.b32.xlu1 %v9916_v39, %s6801_s21  ;;  %v4921_v37 = vsel %vm4899_vm7, %v4888_v52, %v4632_v29  ;;  %v4342_v29 = vshll.u32 %v9963_v32, 16 }
 0x3df   : > { %v4953_v57 = vsel %vm10835_vm3, %v4921_v37, %v4667_v22 }
 0x3e0   : > { %v4986_v60 = vsel %vm4964_vm8, %v4953_v57, %v9873_v20  ;;  %v4513_v20 = vpop.permute.xlu1 %4512  ;;  %v6744_v57 = vld [vmem:[#allocation3 + $0x24] sm:$0xff] }
 0x3e1   : > { %v5160_v54 = vpop.f32.mrf.mxu1  ;;  %v4830_v50 = vsel %vm4818_vm2, %v6744_v57, %v9636_v45 }
 0x3e2   : > { %4588 = vrot.lane.b32.xlu2 %v9695_v43, %s6790_s30  ;;  %v5244_v43 = vmul.f32 %v9914_v8, %v5160_v54 }
 0x3e3   : > { %4742 = vrot.lane.b32.xlu0 %v9934_v59, %s6792_s9 }
 0x3e4   : > { %v9932_v30 = vpop.permute.xlu2 %4633  ;;  %v9945_v35 = vadd.f32 %v9923_v40, %v5244_v43  ;;  %v4346_v43 = vshrl.u32 %v9963_v32, 16 }
 0x3e5   : > { %v4737_v44 = vpop.permute.xlu0 %4736 }
 0x3e6   : > { %v6348_v41 = vmul.f32 -1.442695, %v9945_v35  ;;  %4623 = vrot.lane.b32.xlu1 %v9878_v7, %s6799_s15  ;;  %v5018_v49 = vsel %vm10836_vm1, %v4986_v60, %v4737_v44  ;;  %v9970_v7 = vld [vmem:[#allocation3 + $0x60] sm:$0xff] }
 0x3e7   : > { %v5051_v15 = vsel %vm5029_vm11, %v5018_v49, %v4772_v38  ;;  %v9979_v54 = vsel %vm4818_vm2, %v9970_v7, %v4513_v20  ;;  %v9996_v38 = vrot.slane %v4342_v29, 5  ;;  %v4335_v49 = vrot.slane %v4333_v53, 4 }
 0x3e8   : > { %6587 = vpow2.f32 %v6348_v41  ;;  %v4348_v41 = vrot.slane %v4346_v43, 4  ;;  %v4874_v20 = vsel %vm10838_vm10, %v4830_v50, %v9884_v5  ;;  %vm10840_vm10 = vcmask 261120  }
 0x3e9   : > { %v5162_v31 = vpop.f32.mrf.mxu1 }
 0x3ea   : > { %4658 = vrot.lane.b32.xlu2 %v9682_v3, %s6791_s8  ;;  %v5245_v19 = vmul.f32 %v9914_v8, %v5162_v31  ;;  %v4618_v31 = vpop.permute.xlu1 %4617  ;;  %v4349_v29 = vor.u32 %v4348_v41, %v9996_v38 }
 0x3eb   : > { %4812 = vrot.lane.b32.xlu0 %v9959_v26, %s6793_s10  ;;  %v4907_v45 = vsel %vm4899_vm7, %v4874_v20, %v4618_v31 }
 0x3ec   : > { %v9955_v46 = vpop.permute.xlu2 %4738  ;;  %v9968_v3 = vadd.f32 %v9923_v40, %v5245_v19  ;;  %v10005_v19 = vld [vmem:[#allocation3 + $0xc8] sm:$0x1]  ;;  %v4350_v41 = vrot.slane %v4349_v29, 4 }
 0x3ed   : > { %v4807_v22 = vpop.permute.xlu0 %4806  ;;  %v4352_v5 = vshll.u32 %v10005_v19, 16 }
 0x3ee   : > { %v6588_v18 = vpop.eup %6587  ;;  %v6349_v61 = vmul.f32 -1.442695, %v9968_v3  ;;  %v5083_v42 = vsel %vm10837_vm6, %v5051_v15, %v4807_v22  ;;  %4728 = vrot.lane.b32.xlu1 %v9970_v7, %s6792_s9 }
 0x3ef   : > { %v9975_v56 = vadd.f32 1.0, %v6588_v18  ;;  %6342 = vmatmul.msk.bf16.gmra.mxu3 %vm5114_vm13, %v5083_v42  ;;  %v4338_v18 = vrot.slane %v4336_v21, 5  ;;  %v4354_v31 = vrot.slane %v4352_v5, 5 }
 0x3f0   : > { %6589 = vpow2.f32 %v6349_v61 }
 0x3f1   : > { %6591 = vrcp.f32 %v9975_v56  ;;  %v4339_v53 = vor.u32 %v4338_v18, %v4335_v49  ;;  %v5451_v21 = vand.u32 2147483648, %v9975_v56  ;;  %v5449_v57 = vand.u32 2147483647, %v9975_v56 }
 0x3f2   : > { %4763 = vrot.lane.b32.xlu2 %v9719_v0, %s6801_s21  ;;  %v5165_v52 = vpop.f32.mrf.mxu1  ;;  %vm5445_vm4 = vweird.f32 %v9975_v56  ;;  %v4723_v18 = vpop.permute.xlu1 %4722 }
 0x3f3   : > { %v5246_v23 = vmul.f32 %v9914_v8, %v5165_v52  ;;  %4693 = vrot.lane.b32.xlu0 %v9758_v6, %s6800_s16  ;;  %vm5450_vm6 = vcmp.eq.f32.partialorder %v5449_v57, 8.507059e+37 }
 0x3f4   : > { %v9993_v37 = vpop.permute.xlu2 %4808 }
 0x3f5   : > { %v10001_v44 = vadd.f32 %v9923_v40, %v5246_v23  ;;  %v4688_v60 = vpop.permute.xlu0 %4687  ;;  %v4939_v23 = vsel %vm10839_vm14, %v4907_v45, %v9892_v34 }
 0x3f6   : > { %v6590_v24 = vpop.eup %6589  ;;  %4524 = vrot.lane.b32.xlu1 %v9849_v48, %s6798_s14  ;;  %v4972_v34 = vsel %vm4964_vm8, %v4939_v23, %v4688_v60 }
 0x3f7   : > { %v6592_v61 = vpop.eup %6591  ;;  %v10009_v22 = vadd.f32 1.0, %v6590_v24  ;;  %v6350_v15 = vmul.f32 -1.442695, %v10001_v44  ;;  %v5004_v45 = vsel %vm10836_vm1, %v4972_v34, %v4723_v18 }
 0x3f8   : > { %v5441_v42 = vmul.f32 %v6592_v61, %v9975_v56  ;;  %vm5446_vm0 = vweird.f32 %v6592_v61  ;;  %v5037_v60 = vsel %vm5029_vm11, %v5004_v45, %v9908_v17 }
 0x3f9   : > { %6593 = vrcp.f32 %v10009_v22  ;;  %vm5447_vm3 = vmor %vm5445_vm4, %vm5446_vm0  ;;  %v5466_v57 = vand.u32 2147483648, %v10009_v22  ;;  %vm10841_vm0 = vcmask 64512   ;;  %vm5460_vm4 = vweird.f32 %v10009_v22 }
 0x3fa   : > { %4604 = vrot.lane.b32.xlu2 %v9865_v58, %s6790_s30  ;;  %v5442_v43 = vsub.f32 1.0, %v5441_v42  ;;  %6595 = vpow2.f32 %v6350_v15  ;;  %v5167_v52 = vpop.f32.mrf.mxu1  ;;  %v4340_v15 = vrot.slane %v4339_v53, 4  ;;  %v5452_v42 = vor.u32 1.1754944e-38, %v5451_v21 }
 0x3fb   : > { %v5247_v58 = vmul.f32 %v9914_v8, %v5167_v52  ;;  %4798 = vrot.lane.b32.xlu0 %v9784_v1, %s6793_s10  ;;  %v4355_v52 = vsel %vm6937_vm12, %v4350_v41, %v4354_v31  ;;  %v6745_v31 = vld [vmem:[%s6888_s29] sm:$0xff] }
 0x3fc   : > { %v5443_v24 = vmul.f32 %v6592_v61, %v5442_v43  ;;  %v10028_v48 = vpop.permute.xlu2 %4689  ;;  %v4345_v17 = vsel %vm6937_vm12, %v4340_v15, %v9996_v38 }
 0x3fd   : > { %v10031_v50 = vadd.f32 %v9923_v40, %v5247_v58  ;;  %v4793_v20 = vpop.permute.xlu0 %4792  ;;  %v4643_v38 = vunpack.c.l.b16 %v4345_v17 }
 0x3fe   : > { %v5444_v49 = vadd.f32 %v6592_v61, %v5443_v24  ;;  %v5069_v23 = vsel %vm10840_vm10, %v5037_v60, %v4793_v20  ;;  %4674 = vrot.lane.b32.xlu1 %v9916_v39, %s6791_s8  ;;  %v4361_v24 = vrot.slane %v9963_v32, 5  ;;  %v5464_v32 = vand.u32 2147483647, %v10009_v22  ;;  %v4599_v20 = vpop.permute.xlu1 %4598  ;;  %vm10843_vm10 = vmmov %vm10841_vm0 }
 0x3ff   : > { %v6594_v29 = vpop.eup %6593  ;;  %v6351_v43 = vmul.f32 -1.442695, %v10031_v50  ;;  %6335 = vmatmul.msk.bf16.gmra.mxu1 %vm5114_vm13, %v5069_v23 }
 0x400   : > { %v6596_v58 = vpop.eup %6595  ;;  %v5448_v5 = vsel %vm5447_vm3, %v6592_v61, %v5444_v49  ;;  %v5456_v56 = vmul.f32 %v6594_v29, %v10009_v22  ;;  %vm5461_vm14 = vweird.f32 %v6594_v29  ;;  %vm5465_vm1 = vcmp.eq.f32.partialorder %v5464_v32, 8.507059e+37 }
 0x401   : > { %v5453_v53 = vsel %vm5450_vm6, %v5452_v42, %v5448_v5  ;;  %v10044_v21 = vadd.f32 1.0, %v6596_v58  ;;  %6597 = vpow2.f32 %v6351_v43  ;;  %v4363_v42 = vrot.slane %v4361_v24, 4  ;;  %vm5462_vm3 = vmor %vm5460_vm4, %vm5461_vm14 }
 0x402   : > { %4709 = vrot.lane.b32.xlu2 %v9959_v26, %s6800_s16  ;;  %v5920_v61 = vmul.f32 %v5453_v53, %v9945_v35  ;;  %v5457_v41 = vsub.f32 1.0, %v5456_v56  ;;  %v4644_v35 = vunpack.c.l.b16 %v4355_v52  ;;  %v4854_v43 = vsel %vm4818_vm2, %v9711_v47, %v9750_v4  ;;  %vm10842_vm6 = vmmov %vm10841_vm0 }
 0x403   : > { %6599 = vrcp.f32 %v10044_v21  ;;  %4639 = vrot.lane.b32.xlu0 %v9934_v59, %s6799_s15  ;;  %v5467_v52 = vor.u32 1.1754944e-38, %v5466_v57  ;;  %v4364_v59 = vrot.slane %v10005_v19, 5  ;;  %v4890_v60 = vsel %vm10842_vm6, %v4854_v43, %v4599_v20 }
 0x404   : > { %v5952_v49 = vadd.f32 %v6745_v31, %v5920_v61  ;;  %v5458_v34 = vmul.f32 %v6594_v29, %v5457_v41  ;;  %v10074_v58 = vpop.permute.xlu2 %4794  ;;  %v10077_v5 = vpack.c.b16 %v4644_v35, %v4643_v38  ;;  %v6250_v61 = vrot.slane %v9982_v63, 9  ;;  %v6746_v41 = vld [vmem:[%s6888_s29 + $0x8] sm:$0xff] }
 0x405   : > { %v4669_v15 = vpop.permute.xlu0 %4668  ;;  %v4365_v23 = vsel %vm7407_vm15, %v4363_v42, %v4364_v59  ;;  %vm5475_vm4 = vweird.f32 %v10044_v21 }
 0x406   : > { %5984 = vst.msk [vmem:[%s10060_s12] sm:$0xff] %vm10841_vm0, %v5952_v49  ;;  %v5459_v18 = vadd.f32 %v6594_v29, %v5458_v34  ;;  %4779 = vrot.lane.b32.xlu1 %v10077_v5, %s6801_s21  ;;  %v4362_v35 = vsel %vm7407_vm15, %v6250_v61, %v4361_v24  ;;  %v4679_v31 = vunpack.c.l.b16 %v4365_v23  ;;  %vm10844_vm0 = vcmask 130048   ;;  %v4704_v34 = vpop.permute.xlu1 %4703 }
 0x407   : > { %v6598_v45 = vpop.eup %6597  ;;  %v4678_v42 = vunpack.c.l.b16 %v4362_v35 }
 0x408   : > { %v5463_v56 = vsel %vm5462_vm3, %v6594_v29, %v5459_v18  ;;  %v10079_v22 = vadd.f32 1.0, %v6598_v45  ;;  %v10089_v29 = vld [vmem:[#allocation3 + $0xc0] sm:$0xff]  ;;  %vm10845_vm3 = vcmask 195584  }
 0x409   : > { %v6600_v53 = vpop.eup %6599  ;;  %v5468_v47 = vsel %vm5465_vm1, %v5467_v52, %v5463_v56  ;;  %v4680_v59 = vpack.c.b16 %v4679_v31, %v4678_v42 }
 0x40a   : > { %4590 = vrot.lane.b32.xlu2 %v9758_v6, %s6790_s30  ;;  %v5921_v4 = vmul.f32 %v5468_v47, %v9968_v3  ;;  %v5471_v19 = vmul.f32 %v6600_v53, %v10044_v21  ;;  %6601 = vrcp.f32 %v10079_v22  ;;  %v4923_v6 = vsel %vm4899_vm7, %v4890_v60, %v9932_v30 }
 0x40b   : > { %4744 = vrot.lane.b32.xlu0 %v10089_v29, %s6792_s9  ;;  %v5481_v3 = vand.u32 2147483648, %v10044_v21  ;;  %vm5476_vm14 = vweird.f32 %v6600_v53  ;;  %v5479_v30 = vand.u32 2147483647, %v10044_v21  ;;  %v4955_v63 = vsel %vm10844_vm0, %v4923_v6, %v4669_v15 }
 0x40c   : > { %v5953_v17 = vadd.f32 %v6746_v41, %v5921_v4  ;;  %v5472_v57 = vsub.f32 1.0, %v5471_v19  ;;  %v4988_v38 = vsel %vm4964_vm8, %v4955_v63, %v4704_v34  ;;  %vm5477_vm1 = vmor %vm5475_vm4, %vm5476_vm14  ;;  %v10113_v15 = vpop.permute.xlu2 %4670  ;;  %v5496_v47 = vand.u32 2147483648, %v10079_v22 }
 0x40d   : > { %v4774_v32 = vpop.permute.xlu0 %4773  ;;  %v5020_v24 = vsel %vm10845_vm3, %v4988_v38, %v9955_v46  ;;  %v5482_v45 = vor.u32 1.1754944e-38, %v5481_v3  ;;  %vm5480_vm6 = vcmp.eq.f32.partialorder %v5479_v30, 8.507059e+37  ;;  %vm5490_vm0 = vweird.f32 %v10079_v22  ;;  %v6748_v3 = vld [vmem:[%s6888_s29 + $0x18] sm:$0xff] }
 0x40e   : > { %5985 = vst.msk [vmem:[%s10060_s12 + $0x8] sm:$0xff] %vm10843_vm10, %v5953_v17  ;;  %v5473_v49 = vmul.f32 %v6600_v53, %v5472_v57  ;;  %v5053_v52 = vsel %vm5029_vm11, %v5020_v24, %v4774_v32  ;;  %4625 = vrot.lane.b32.xlu1 %v9970_v7, %s6799_s15  ;;  %vm10846_vm10 = vcmask 261120   ;;  %v5494_v7 = vand.u32 2147483647, %v10079_v22  ;;  %v4585_v23 = vpop.permute.xlu1 %4584 }
 0x40f   : > { %vm10847_vm4 = vcmask 64512  }
 0x410   : > { %v6602_v18 = vpop.eup %6601  ;;  %v5474_v20 = vadd.f32 %v6600_v53, %v5473_v49 }
 0x411   : > { %v5486_v43 = vmul.f32 %v6602_v18, %v10079_v22  ;;  %vm5491_vm14 = vweird.f32 %v6602_v18 }
 0x412   : > { %4660 = vrot.lane.b32.xlu2 %v9719_v0, %s6791_s8  ;;  %v5478_v21 = vsel %vm5477_vm1, %v6600_v53, %v5474_v20  ;;  %v5085_v0 = vsel %vm10846_vm10, %v5053_v52, %v9993_v37  ;;  %v6747_v53 = vld [vmem:[%s6888_s29 + $0x10] sm:$0xff]  ;;  %vm5492_vm3 = vmor %vm5490_vm0, %vm5491_vm14  ;;  %vm5495_vm1 = vcmp.eq.f32.partialorder %v5494_v7, 8.507059e+37  ;;  %vm10850_vm14 = vcmask 130048  }
 0x413   : > { %v5483_v46 = vsel %vm5480_vm6, %v5482_v45, %v5478_v21  ;;  %v5487_v56 = vsub.f32 1.0, %v5486_v43  ;;  %6343 = vmatmul.msk.bf16.gmra.mxu3 %vm5114_vm13, %v5085_v0  ;;  %4814 = vrot.lane.b32.xlu0 %v4680_v59, %s6793_s10  ;;  %vm10848_vm6 = vmmov %vm10847_vm4  ;;  %vm10851_vm0 = vcmask 195584  }
 0x414   : > { %v5922_v60 = vmul.f32 %v5483_v46, %v10001_v44  ;;  %v5497_v44 = vor.u32 1.1754944e-38, %v5496_v47  ;;  %v10134_v57 = vpop.permute.xlu2 %4775  ;;  %v4876_v22 = vsel %vm10848_vm6, %v9774_v28, %v4585_v23  ;;  %vm10849_vm10 = vmmov %vm10847_vm4 }
 0x415   : > { %v5488_v4 = vmul.f32 %v6602_v18, %v5487_v56  ;;  %v4620_v37 = vpop.permute.xlu0 %4619 }
 0x416   : > { %v5954_v19 = vadd.f32 %v6747_v53, %v5922_v60  ;;  %4730 = vrot.lane.b32.xlu1 %v9793_v16, %s6792_s9  ;;  %v4655_v31 = vpop.permute.xlu1 %4654  ;;  %v4909_v30 = vsel %vm4899_vm7, %v4876_v22, %v4620_v37 }
 0x417   : > { %v5489_v6 = vadd.f32 %v6602_v18, %v5488_v4 }
 0x418   : > { %5986 = vst.msk [vmem:[%s10060_s12 + $0x10] sm:$0xff] %vm10847_vm4, %v5954_v19  ;;  %vm10852_vm4 = vcmask 261120  }
 0x419   : > { %v5493_v61 = vsel %vm5492_vm3, %v6602_v18, %v5489_v6  ;;  %v3209_v18 = vld [vmem:[#allocation3 + $0xcc] sm:$0x1] }
 0x41a   : > { %4765 = vrot.lane.b32.xlu2 %v8839_v62, %s6801_s21  ;;  %v5498_v41 = vsel %vm5495_vm1, %v5497_v44, %v5493_v61  ;;  %v3210_v20 = vsel %vm8177_vm5, 0, %v3209_v18  ;;  %vm10854_vm5 = vmmov %vm10850_vm14 }
 0x41b   : > { %v5923_v17 = vmul.f32 %v5498_v41, %v10031_v50  ;;  %4695 = vrot.lane.b32.xlu0 %v9784_v1, %s6800_s16  ;;  %v4941_v50 = vsel %vm10850_vm14, %v4909_v30, %v4655_v31  ;;  %3211 = vst [vmem:[#allocation3 + $0xcc] sm:$0x1] %v3210_v20  ;;  %vm10855_vm1 = vmmov %vm10851_vm0 }
 0x41c   : > { %v4974_v32 = vsel %vm4964_vm8, %v4941_v50, %v10028_v48  ;;  %vm10856_vm14 = vmmov %vm10852_vm4 }
 0x41d   : > { %v5955_v35 = vadd.f32 %v6748_v3, %v5923_v17  ;;  %v4725_v49 = vpop.permute.xlu0 %4724 }
 0x41e   : > { %4526 = vrot.lane.b32.xlu1 %v9916_v39, %s6798_s14  ;;  %v5006_v24 = vsel %vm10851_vm0, %v4974_v32, %v4725_v49  ;;  %v4760_v39 = vpop.permute.xlu1 %4759 }
 0x41f   : > { %5987 = vst.msk [vmem:[%s10060_s12 + $0x18] sm:$0xff] %vm10849_vm10, %v5955_v35  ;;  %v5039_v45 = vsel %vm5029_vm11, %v5006_v24, %v4760_v39 }
 0x420   : > { %v5205_v63 = vpop.f32.mrf.mxu3  ;;  %v5071_v43 = vsel %vm10852_vm4, %v5039_v45, %v10074_v58 }
 0x421   : > { %v5262_v34 = vmul.f32 %v9914_v8, %v5205_v63  ;;  %6336 = vmatmul.msk.bf16.gmra.mxu1 %vm5114_vm13, %v5071_v43 }
 0x422   : > { %4606 = vrot.lane.b32.xlu2 %v9959_v26, %s6790_s30  ;;  %v10158_v26 = vpop.permute.xlu2 %4621  ;;  %v3785_v56 = vld [vmem:[#allocation3 + $0xcc] sm:$0xf] }
 0x423   : > { %v10151_v28 = vadd.f32 %v9923_v40, %v5262_v34  ;;  %4800 = vrot.lane.b32.xlu0 %v9093_v36, %s6793_s10  ;;  %v4370_v4 = vshll.u32 %v3785_v56, 16  ;;  %v6423_v53 = vld [vmem:[#allocation3 + $0xcc] sm:$0xff]  ;;  %v6251_v19 = vrot.slane %v3785_v56, 9 }
 0x425   : > { %v6366_v38 = vmul.f32 -1.442695, %v10151_v28  ;;  %v4601_v42 = vpop.permute.xlu0 %4600  ;;  %v4372_v37 = vrot.slane %v4370_v4, 5 }
 0x426   : > { %4676 = vrot.lane.b32.xlu1 %v10077_v5, %s6791_s8  ;;  %v4636_v60 = vpop.permute.xlu1 %4635  ;;  %v4367_v5 = vshrl.u32 %v3785_v56, 16 }
 0x427   : > { %6603 = vpow2.f32 %v6366_v38 }
 0x428   : > { %v5207_v48 = vpop.f32.mrf.mxu3  ;;  %v4369_v55 = vrot.slane %v4367_v5, 4 }
 0x429   : > { %v5263_v52 = vmul.f32 %v9914_v8, %v5207_v48 }
 0x42a   : > { %4711 = vrot.lane.b32.xlu2 %v4680_v59, %s6800_s16  ;;  %v3264_v59 = vld [vmem:[#allocation3 + $0xd4] sm:$0x1]  ;;  %v10181_v7 = vpop.permute.xlu2 %4726 }
 0x42b   : > { %v10172_v25 = vadd.f32 %v9923_v40, %v5263_v52  ;;  %4641 = vrot.lane.b32.xlu0 %v10089_v29, %s6799_s15  ;;  %v3265_v58 = vsel %vm8188_vm9, 0, %v3264_v59  ;;  %v3786_v29 = vld [vmem:[#allocation3 + $0xd0] sm:$0xf]  ;;  %vm10853_vm9 = vmmov %vm10848_vm6 }
 0x42c   : > { %3266 = vst [vmem:[#allocation3 + $0xd4] sm:$0x1] %v3265_v58  ;;  %v4395_v23 = vrot.slane %v3786_v29, 5  ;;  %v4376_v6 = vshll.u32 %v3786_v29, 16  ;;  %v4380_v44 = vshrl.u32 %v3786_v29, 16  ;;  %v4892_v61 = vsel %vm10853_vm9, %v9736_v27, %v4601_v42  ;;  %vm10857_vm0 = vmmov %vm10853_vm9 }
 0x42d   : > { %v6604_v21 = vpop.eup %6603  ;;  %v6367_v0 = vmul.f32 -1.442695, %v10172_v25  ;;  %v4706_v47 = vpop.permute.xlu0 %4705  ;;  %v4925_v17 = vsel %vm4899_vm7, %v4892_v61, %v4636_v60  ;;  %vm10858_vm4 = vmmov %vm10857_vm0 }
 0x42e   : > { %v10177_v46 = vadd.f32 1.0, %v6604_v21  ;;  %v4396_v22 = vsel %vm7407_vm15, %v6251_v19, %v4395_v23  ;;  %v4397_v3 = vrot.slane %v4395_v23, 4  ;;  %v4378_v30 = vrot.slane %v4376_v6, 5  ;;  %v4741_v34 = vpop.permute.xlu1 %4740 }
 0x42f   : > { %6605 = vpow2.f32 %v6367_v0  ;;  %v4382_v63 = vrot.slane %v4380_v44, 4  ;;  %v4957_v18 = vsel %vm10854_vm5, %v4925_v17, %v10113_v15  ;;  %v4783_v20 = vunpack.c.l.b16 %v4396_v22 }
 0x430   : > { %6607 = vrcp.f32 %v10177_v46  ;;  %v5719_v39 = vand.u32 2147483647, %v10177_v46  ;;  %v5721_v42 = vand.u32 2147483648, %v10177_v46  ;;  %v4990_v0 = vsel %vm4964_vm8, %v4957_v18, %v4706_v47 }
 0x431   : > { %v4383_v52 = vor.u32 %v4382_v63, %v4378_v30  ;;  %v5022_v58 = vsel %vm10855_vm1, %v4990_v0, %v4741_v34  ;;  %vm10859_vm1 = vcmask 130048  }
 0x432   : > { %4592 = vrot.lane.b32.xlu2 %v9784_v1, %s6790_s30  ;;  %v4373_v1 = vor.u32 %v4372_v37, %v4369_v55  ;;  %v10204_v48 = vpop.permute.xlu2 %4602  ;;  %vm5720_vm10 = vcmp.eq.f32.partialorder %v5719_v39, 8.507059e+37  ;;  %v5722_v29 = vor.u32 1.1754944e-38, %v5721_v42 }
 0x433   : > { %4746 = vrot.lane.b32.xlu0 %v6423_v53, %s6792_s9  ;;  %v3787_v49 = vld [vmem:[#allocation3 + $0xd4] sm:$0x1]  ;;  %v4384_v60 = vrot.slane %v4383_v52, 4 }
 0x434   : > { %v4398_v32 = vrot.slane %v3787_v49, 5  ;;  %v4374_v38 = vrot.slane %v4373_v1, 4  ;;  %v4386_v21 = vshll.u32 %v3787_v49, 16  ;;  %v6749_v1 = vld [vmem:[%s6888_s29 + $0x90] sm:$0xff] }
 0x435   : > { %v6606_v41 = vpop.eup %6605  ;;  %v4587_v27 = vpop.permute.xlu0 %4586 }
 0x436   : > { %v6608_v35 = vpop.eup %6607  ;;  %v10192_v31 = vadd.f32 1.0, %v6606_v41  ;;  %v4399_v45 = vsel %vm7407_vm15, %v4397_v3, %v4398_v32  ;;  %v4379_v15 = vsel %vm6937_vm12, %v4374_v38, %v4378_v30  ;;  %vm5715_vm15 = vweird.f32 %v10177_v46  ;;  %v4811_v55 = vpop.permute.xlu1 %4810 }
 0x437   : > { %v5711_v50 = vmul.f32 %v6608_v35, %v10177_v46  ;;  %v4784_v43 = vunpack.c.l.b16 %v4399_v45  ;;  %vm5716_vm3 = vweird.f32 %v6608_v35  ;;  %v4748_v13 = vunpack.c.l.b16 %v4379_v15 }
 0x438   : > { %6609 = vrcp.f32 %v10192_v31  ;;  %vm5717_vm6 = vmor %vm5715_vm15, %vm5716_vm3  ;;  %v5055_v46 = vsel %vm5029_vm11, %v5022_v58, %v10134_v57  ;;  %v5734_v3 = vand.u32 2147483647, %v10192_v31  ;;  %v5736_v57 = vand.u32 2147483648, %v10192_v31 }
 0x439   : > { %v5712_v24 = vsub.f32 1.0, %v5711_v50  ;;  %v4785_v56 = vpack.c.b16 %v4784_v43, %v4783_v20  ;;  %v5087_v44 = vsel %vm10856_vm14, %v5055_v46, %v4811_v55  ;;  %vm5730_vm9 = vweird.f32 %v10192_v31  ;;  %vm10860_vm15 = vmmov %vm10857_vm0 }
 0x43a   : > { %4662 = vrot.lane.b32.xlu2 %v8839_v62, %s6791_s8  ;;  %v4388_v62 = vrot.slane %v4386_v21, 5  ;;  %6344 = vmatmul.msk.bf16.gmra.mxu3 %vm5114_vm13, %v5087_v44  ;;  %v4708_v30 = vpop.permute.xlu2 %4707  ;;  %v5737_v34 = vor.u32 1.1754944e-38, %v5736_v57  ;;  %vm5735_vm3 = vcmp.eq.f32.partialorder %v5734_v3, 8.507059e+37 }
 0x43b   : > { %v5713_v59 = vmul.f32 %v6608_v35, %v5712_v24  ;;  %4816 = vrot.lane.b32.xlu0 %v4785_v56, %s6793_s10 }
 0x43c   : > { %v4389_v47 = vsel %vm6937_vm12, %v4384_v60, %v4388_v62 }
 0x43d   : > { %v5714_v5 = vadd.f32 %v6608_v35, %v5713_v59  ;;  %v4749_v23 = vunpack.c.l.b16 %v4389_v47  ;;  %v4657_v37 = vpop.permute.xlu0 %4656 }
 0x43e   : > { %v6610_v4 = vpop.eup %6609  ;;  %v4692_v38 = vpop.permute.xlu1 %4691 }
 0x43f   : > { %v5718_v53 = vsel %vm5717_vm6, %v6608_v35, %v5714_v5  ;;  %v5726_v19 = vmul.f32 %v6610_v4, %v10192_v31  ;;  %v4750_v11 = vpack.c.b16 %v4749_v23, %v4748_v13  ;;  %vm5731_vm12 = vweird.f32 %v6610_v4 }
 0x440   : > { %v5723_v6 = vsel %vm5720_vm10, %v5722_v29, %v5718_v53  ;;  %vm5732_vm5 = vmor %vm5730_vm9, %vm5731_vm12  ;;  %vm10861_vm6 = vcmask 195584  }
 0x441   : > { %v5938_v41 = vmul.f32 %v5723_v6, %v10151_v28  ;;  %v5727_v17 = vsub.f32 1.0, %v5726_v19  ;;  %4781 = vrot.lane.b32.xlu1 %v4750_v11, %s6801_s21  ;;  %vm10862_vm10 = vmmov %vm10856_vm14 }
 0x442   : > { %v5170_v61 = vpop.f32.mrf.mxu1  ;;  %4767 = vrot.lane.b32.xlu2 %v8993_v51, %s6801_s21  ;;  %v4878_v51 = vsel %vm10858_vm4, %v9804_v9, %v4587_v27  ;;  %v4589_v52 = vpop.permute.xlu2 %4588  ;;  %vm10863_vm14 = vmmov %vm10857_vm0 }
 0x443   : > { %v5248_v22 = vmul.f32 %v9914_v8, %v5170_v61  ;;  %v5970_v35 = vadd.f32 %v6749_v1, %v5938_v41  ;;  %v5728_v49 = vmul.f32 %v6610_v4, %v5727_v17  ;;  %4697 = vrot.lane.b32.xlu0 %v9093_v36, %s6800_s16  ;;  %v4911_v9 = vsel %vm4899_vm7, %v4878_v51, %v10158_v26  ;;  %v6750_v36 = vld [vmem:[%s6888_s29 + $0x98] sm:$0xff]  ;;  %vm10864_vm12 = vmmov %vm10859_vm1 }
 0x444   : > { %v4943_v24 = vsel %vm10859_vm1, %v4911_v9, %v4657_v37  ;;  %vm10866_vm1 = vmmov %vm10862_vm10 }
 0x445   : > { %v10228_v28 = vadd.f32 %v9923_v40, %v5248_v22  ;;  %6002 = vst.msk [vmem:[%s10060_s12 + $0x90] sm:$0xff] %vm10857_vm0, %v5970_v35  ;;  %v5729_v63 = vadd.f32 %v6610_v4, %v5728_v49  ;;  %v4762_v18 = vpop.permute.xlu0 %4761  ;;  %v4976_v42 = vsel %vm4964_vm8, %v4943_v24, %v4692_v38  ;;  %v6751_v49 = vld [vmem:[%s6888_s29 + $0x20] sm:$0xff] }
 0x446   : > { %v5008_v26 = vsel %vm10861_vm6, %v4976_v42, %v10181_v7  ;;  %v4797_v0 = vpop.permute.xlu1 %4796 }
 0x447   : > { %v6352_v50 = vmul.f32 -1.442695, %v10228_v28  ;;  %v5733_v32 = vsel %vm5732_vm5, %v6610_v4, %v5729_v63 }
 0x448   : > { %v5738_v20 = vsel %vm5735_vm3, %v5737_v34, %v5733_v32  ;;  %vm10865_vm3 = vmmov %vm10861_vm6 }
 0x449   : > { %6611 = vpow2.f32 %v6352_v50  ;;  %v5939_v31 = vmul.f32 %v5738_v20, %v10172_v25  ;;  %4627 = vrot.lane.b32.xlu1 %v9793_v16, %s6799_s15  ;;  %v5041_v16 = vsel %vm5029_vm11, %v5008_v26, %v4762_v18  ;;  %vm10867_vm6 = vmmov %vm10863_vm14 }
 0x44a   : > { %v5172_v27 = vpop.f32.mrf.mxu1  ;;  %v5073_v58 = vsel %vm10862_vm10, %v5041_v16, %v4797_v0  ;;  %v4659_v4 = vpop.permute.xlu2 %4658 }
 0x44b   : > { %v5249_v39 = vmul.f32 %v9914_v8, %v5172_v27  ;;  %v5971_v45 = vadd.f32 %v6750_v36, %v5939_v31  ;;  %4802 = vrot.lane.b32.xlu0 %v9166_v33, %s6793_s10  ;;  %6337 = vmatmul.msk.bf16.gmra.mxu1 %vm5114_vm13, %v5073_v58  ;;  %v4894_v33 = vsel %vm10863_vm14, %v9839_v2, %v10204_v48  ;;  %v6752_v31 = vld [vmem:[%s6888_s29 + $0x28] sm:$0xff] }
 0x44d   : > { %v10248_v43 = vadd.f32 %v9923_v40, %v5249_v39  ;;  %6003 = vst.msk [vmem:[%s10060_s12 + $0x98] sm:$0xff] %vm10860_vm15, %v5971_v45  ;;  %v4638_v59 = vpop.permute.xlu0 %4637 }
 0x44e   : > { %v4673_v5 = vpop.permute.xlu1 %4672  ;;  %v4927_v29 = vsel %vm4899_vm7, %v4894_v33, %v4638_v59 }
 0x44f   : > { %v6612_v15 = vpop.eup %6611  ;;  %v6353_v25 = vmul.f32 -1.442695, %v10248_v43  ;;  %v4959_v53 = vsel %vm10864_vm12, %v4927_v29, %v4673_v5 }
 0x450   : > { %v5412_v21 = vadd.f32 1.0, %v6612_v15  ;;  %v4992_v55 = vsel %vm4964_vm8, %v4959_v53, %v4708_v30 }
 0x451   : > { %6613 = vpow2.f32 %v6353_v25  ;;  %4732 = vrot.lane.b32.xlu1 %v9927_v14, %s6792_s9 }
 0x452   : > { %6615 = vrcp.f32 %v5412_v21  ;;  %v5511_v19 = vand.u32 2147483648, %v5412_v21  ;;  %v5509_v14 = vand.u32 2147483647, %v5412_v21  ;;  %vm5505_vm4 = vweird.f32 %v5412_v21  ;;  %v4764_v1 = vpop.permute.xlu2 %4763 }
 0x454   : > { %v5512_v2 = vor.u32 1.1754944e-38, %v5511_v19  ;;  %vm5510_vm5 = vcmp.eq.f32.partialorder %v5509_v14, 8.507059e+37 }
 0x455   : > { %v4743_v13 = vpop.permute.xlu0 %4742 }
 0x456   : > { %v5024_v44 = vsel %vm10865_vm3, %v4992_v55, %v4743_v13  ;;  %v4778_v61 = vpop.permute.xlu1 %4777 }
 0x457   : > { %v6614_v7 = vpop.eup %6613  ;;  %v5057_v11 = vsel %vm5029_vm11, %v5024_v44, %v4778_v61 }
 0x458   : > { %v6616_v56 = vpop.eup %6615  ;;  %v5413_v60 = vadd.f32 1.0, %v6614_v7 }
 0x459   : > { %v5501_v62 = vmul.f32 %v6616_v56, %v5412_v21  ;;  %vm5506_vm0 = vweird.f32 %v6616_v56 }
 0x45a   : > { %6617 = vrcp.f32 %v5413_v60  ;;  %vm5507_vm9 = vmor %vm5505_vm4, %vm5506_vm0  ;;  %v5526_v35 = vand.u32 2147483648, %v5413_v60  ;;  %v5524_v63 = vand.u32 2147483647, %v5413_v60  ;;  %vm5520_vm10 = vweird.f32 %v5413_v60  ;;  %v4605_v39 = vpop.permute.xlu2 %4604 }
 0x45b   : > { %v5502_v47 = vsub.f32 1.0, %v5501_v62  ;;  %vm10868_vm0 = vmmov %vm10867_vm6  ;;  %vm10869_vm4 = vcmask 130048  }
 0x45c   : > { %vm5525_vm12 = vcmp.eq.f32.partialorder %v5524_v63, 8.507059e+37  ;;  %v4880_v18 = vsel %vm10868_vm0, %v9831_v12, %v4589_v52 }
 0x45d   : > { %v5503_v23 = vmul.f32 %v6616_v56, %v5502_v47  ;;  %v4813_v41 = vpop.permute.xlu0 %4812 }
 0x45e   : > { %v5089_v57 = vsel %vm10866_vm1, %v5057_v11, %v4813_v41  ;;  %v4624_v32 = vpop.permute.xlu1 %4623 }
 0x45f   : > { %v5504_v37 = vadd.f32 %v6616_v56, %v5503_v23  ;;  %6345 = vmatmul.msk.bf16.gmra.mxu3 %vm5114_vm13, %v5089_v57  ;;  %v4913_v27 = vsel %vm4899_vm7, %v4880_v18, %v4624_v32 }
 0x460   : > { %v6618_v46 = vpop.eup %6617  ;;  %v4945_v42 = vsel %vm10869_vm4, %v4913_v27, %v4659_v4 }
 0x461   : > { %v5508_v48 = vsel %vm5507_vm9, %v6616_v56, %v5504_v37  ;;  %v5516_v6 = vmul.f32 %v6618_v46, %v5413_v60  ;;  %vm5521_vm15 = vweird.f32 %v6618_v46  ;;  %vm10870_vm9 = vmmov %vm10868_vm0  ;;  %v6753_v60 = vld [vmem:[#allocation3 + $0xa8] sm:$0xff] }
 0x462   : > { %v5513_v17 = vsel %vm5510_vm5, %v5512_v2, %v5508_v48  ;;  %vm5522_vm14 = vmor %vm5520_vm10, %vm5521_vm15  ;;  %v4710_v21 = vpop.permute.xlu2 %4709 }
 0x463   : > { %v5924_v22 = vmul.f32 %v5513_v17, %v10228_v28  ;;  %v5517_v3 = vsub.f32 1.0, %v5516_v6  ;;  %v5527_v28 = vor.u32 1.1754944e-38, %v5526_v35  ;;  %vm10871_vm5 = vmmov %vm10865_vm3 }
 0x464   : > { %vm10872_vm3 = vmmov %vm10866_vm1 }
 0x465   : > { %v5956_v30 = vadd.f32 %v6751_v49, %v5924_v22  ;;  %v5518_v51 = vmul.f32 %v6618_v46, %v5517_v3  ;;  %v4694_v38 = vpop.permute.xlu0 %4693  ;;  %vm10873_vm1 = vmmov %vm10868_vm0 }
 0x466   : > { %v4978_v36 = vsel %vm4964_vm8, %v4945_v42, %v4694_v38  ;;  %v4729_v45 = vpop.permute.xlu1 %4728  ;;  %vm10874_vm15 = vmmov %vm10869_vm4 }
 0x467   : > { %5988 = vst.msk [vmem:[%s10060_s12 + $0x20] sm:$0xff] %vm10867_vm6, %v5956_v30  ;;  %v5519_v50 = vadd.f32 %v6618_v46, %v5518_v51  ;;  %v5010_v26 = vsel %vm10871_vm5, %v4978_v36, %v4729_v45  ;;  %vm10875_vm6 = vmmov %vm10871_vm5 }
 0x468   : > { %v5043_v12 = vsel %vm5029_vm11, %v5010_v26, %v4764_v1  ;;  %vm10877_vm4 = vmmov %vm10873_vm1 }
 0x469   : > { %v5523_v34 = vsel %vm5522_vm14, %v6618_v46, %v5519_v50  ;;  %vm10876_vm14 = vmmov %vm10872_vm3 }
 0x46a   : > { %v5528_v20 = vsel %vm5525_vm12, %v5527_v28, %v5523_v34  ;;  %v4591_v5 = vpop.permute.xlu2 %4590 }
 0x46b   : > { %v5925_v9 = vmul.f32 %v5528_v20, %v10248_v43 }
 0x46d   : > { %v5957_v24 = vadd.f32 %v6752_v31, %v5925_v9  ;;  %v4799_v15 = vpop.permute.xlu0 %4798  ;;  %v4882_v9 = vsel %vm10877_vm4, %v9898_v10, %v4591_v5 }
 0x46e   : > { %v5075_v25 = vsel %vm10872_vm3, %v5043_v12, %v4799_v15  ;;  %v4525_v16 = vpop.permute.xlu1 %4524  ;;  %vm10878_vm3 = vmmov %vm10874_vm15 }
 0x46f   : > { %5989 = vst.msk [vmem:[%s10060_s12 + $0x28] sm:$0xff] %vm10870_vm9, %v5957_v24  ;;  %6338 = vmatmul.msk.bf16.gmra.mxu1 %vm5114_vm13, %v5075_v25  ;;  %v4863_v33 = vsel %vm4818_vm2, %v6753_v60, %v4525_v16 }
 0x470   : > { %v4896_v4 = vsel %vm10873_vm1, %v4863_v33, %v4605_v39 }
 0x472   : > { %v5210_v43 = vpop.f32.mrf.mxu3  ;;  %v4661_v17 = vpop.permute.xlu2 %4660 }
 0x473   : > { %v5264_v52 = vmul.f32 %v9914_v8, %v5210_v43  ;;  %v6754_v43 = vld [vmem:[%s6888_s29 + $0xa0] sm:$0xff] }
 0x475   : > { %v10291_v0 = vadd.f32 %v9923_v40, %v5264_v52  ;;  %v4640_v58 = vpop.permute.xlu0 %4639 }
 0x476   : > { %v4675_v47 = vpop.permute.xlu1 %4674  ;;  %v4929_v55 = vsel %vm4899_vm7, %v4896_v4, %v4640_v58 }
 0x477   : > { %v6368_v59 = vmul.f32 -1.442695, %v10291_v0  ;;  %v4961_v37 = vsel %vm10874_vm15, %v4929_v55, %v4675_v47 }
 0x478   : > { %v4994_v48 = vsel %vm4964_vm8, %v4961_v37, %v4710_v21 }
 0x479   : > { %6619 = vpow2.f32 %v6368_v59 }
 0x47a   : > { %v5212_v7 = vpop.f32.mrf.mxu3  ;;  %v4766_v39 = vpop.permute.xlu2 %4765 }
 0x47b   : > { %v5265_v56 = vmul.f32 %v9914_v8, %v5212_v7  ;;  %v10332_v7 = vld [vmem:[%s10570_s5] ss:$0 sm:$0xff] }
 0x47c   : > { %v5175_v23 = vpop.f32.mrf.mxu1 }
 0x47d   : > { %v10297_v62 = vadd.f32 %v9923_v40, %v5265_v56  ;;  %v4745_v53 = vpop.permute.xlu0 %4744  ;;  %v5250_v14 = vmul.f32 %v9914_v8, %v5175_v23 }
 0x47e   : > { %v4780_v44 = vpop.permute.xlu1 %4779  ;;  %v5026_v57 = vsel %vm10875_vm6, %v4994_v48, %v4745_v53  ;;  %v10344_v53 = vld [vmem:[%s10571_s6] ss:$0 sm:$0xff] }
 0x47f   : > { %v6620_v13 = vpop.eup %6619  ;;  %v6369_v29 = vmul.f32 -1.442695, %v10297_v62  ;;  %v10305_v46 = vadd.f32 %v9923_v40, %v5250_v14  ;;  %v5059_v35 = vsel %vm5029_vm11, %v5026_v57, %v4780_v44 }
 0x480   : > { %v5428_v19 = vadd.f32 1.0, %v6620_v13 }
 0x481   : > { %6621 = vpow2.f32 %v6369_v29  ;;  %v6354_v2 = vmul.f32 -1.442695, %v10305_v46 }
 0x482   : > { %6623 = vrcp.f32 %v5428_v19  ;;  %v5749_v51 = vand.u32 2147483647, %v5428_v19  ;;  %v5751_v63 = vand.u32 2147483648, %v5428_v19  ;;  %vm5745_vm12 = vweird.f32 %v5428_v19 }
 0x483   : > { %6625 = vpow2.f32 %v6354_v2 }
 0x484   : > { %v5177_v22 = vpop.f32.mrf.mxu1  ;;  %vm5750_vm9 = vcmp.eq.f32.partialorder %v5749_v51, 8.507059e+37 }
 0x485   : > { %v4815_v61 = vpop.permute.xlu0 %4814  ;;  %v5251_v1 = vmul.f32 %v9914_v8, %v5177_v22 }
 0x486   : > { %v5091_v32 = vsel %vm10876_vm14, %v5059_v35, %v4815_v61  ;;  %v4626_v18 = vpop.permute.xlu1 %4625  ;;  %vm10879_vm14 = vcmask 195584   ;;  %v4607_v61 = vpop.permute.xlu2 %4606 }
 0x487   : > { %v6622_v6 = vpop.eup %6621  ;;  %v10313_v30 = vadd.f32 %v9923_v40, %v5251_v1  ;;  %6346 = vmatmul.msk.bf16.gmra.mxu3 %vm5114_vm13, %v5091_v32  ;;  %v5752_v40 = vor.u32 1.1754944e-38, %v5751_v63  ;;  %v4915_v36 = vsel %vm4899_vm7, %v4882_v9, %v4626_v18  ;;  %v6758_v18 = vld [vmem:[%s6888_s29 + $0x30] sm:$0xff] }
 0x488   : > { %v6624_v41 = vpop.eup %6623  ;;  %v5429_v11 = vadd.f32 1.0, %v6622_v6  ;;  %v4947_v10 = vsel %vm10878_vm3, %v4915_v36, %v4661_v17  ;;  %v6757_v17 = vld [vmem:[%s6888_s29 + $0xa8] sm:$0xff] }
 0x489   : > { %v5741_v3 = vmul.f32 %v6624_v41, %v5428_v19  ;;  %v6626_v50 = vpop.eup %6625  ;;  %vm5746_vm10 = vweird.f32 %v6624_v41  ;;  %v6355_v34 = vmul.f32 -1.442695, %v10313_v30  ;;  %v6759_v36 = vld [vmem:[#allocation3 + $0xb4] sm:$0xff] }
 0x48a   : > { %6627 = vrcp.f32 %v5429_v11  ;;  %v10317_v38 = vadd.f32 1.0, %v6626_v50  ;;  %vm5747_vm0 = vmor %vm5745_vm12, %vm5746_vm10  ;;  %v5764_v26 = vand.u32 2147483647, %v5429_v11  ;;  %v5766_v12 = vand.u32 2147483648, %v5429_v11 }
 0x48b   : > { %v5742_v49 = vsub.f32 1.0, %v5741_v3  ;;  %6629 = vpow2.f32 %v6355_v34  ;;  %vm5760_vm15 = vweird.f32 %v5429_v11 }
 0x48c   : > { %6631 = vrcp.f32 %v10317_v38  ;;  %vm5765_vm10 = vcmp.eq.f32.partialorder %v5764_v26, 8.507059e+37  ;;  %v5767_v5 = vor.u32 1.1754944e-38, %v5766_v12  ;;  %v5539_v14 = vand.u32 2147483647, %v10317_v38 }
 0x48d   : > { %v5743_v28 = vmul.f32 %v6624_v41, %v5742_v49  ;;  %v4696_v24 = vpop.permute.xlu0 %4695  ;;  %v5541_v55 = vand.u32 2147483648, %v10317_v38  ;;  %vm5535_vm4 = vweird.f32 %v10317_v38 }
 0x48e   : > { %v4731_v33 = vpop.permute.xlu1 %4730  ;;  %v4980_v13 = vsel %vm4964_vm8, %v4947_v10, %v4696_v24  ;;  %vm5540_vm3 = vcmp.eq.f32.partialorder %v5539_v14, 8.507059e+37 }
 0x48f   : > { %v5744_v8 = vadd.f32 %v6624_v41, %v5743_v28  ;;  %v5012_v47 = vsel %vm10879_vm14, %v4980_v13, %v4731_v33  ;;  %v5542_v57 = vor.u32 1.1754944e-38, %v5541_v55 }
 0x490   : > { %v6628_v20 = vpop.eup %6627  ;;  %v5045_v44 = vsel %vm5029_vm11, %v5012_v47, %v4766_v39  ;;  %v4712_v39 = vpop.permute.xlu2 %4711 }
 0x491   : > { %v5748_v27 = vsel %vm5747_vm0, %v6624_v41, %v5744_v8  ;;  %v5756_v31 = vmul.f32 %v6628_v20, %v5429_v11  ;;  %v6630_v25 = vpop.eup %6629  ;;  %vm5761_vm5 = vweird.f32 %v6628_v20  ;;  %vm10880_vm0 = vcmask 261120  }
 0x492   : > { %v5753_v42 = vsel %vm5750_vm9, %v5752_v40, %v5748_v27  ;;  %v6632_v16 = vpop.eup %6631  ;;  %v10327_v58 = vadd.f32 1.0, %v6630_v25  ;;  %vm5762_vm6 = vmor %vm5760_vm15, %vm5761_vm5 }
 0x493   : > { %v5940_v45 = vmul.f32 %v5753_v42, %v10291_v0  ;;  %v5757_v15 = vsub.f32 1.0, %v5756_v31  ;;  %v5531_v60 = vmul.f32 %v6632_v16, %v10317_v38  ;;  %vm5536_vm12 = vweird.f32 %v6632_v16  ;;  %vm10881_vm5 = vmmov %vm10873_vm1 }
 0x494   : > { %6633 = vrcp.f32 %v10327_v58  ;;  %vm5537_vm9 = vmor %vm5535_vm4, %vm5536_vm12  ;;  %v5556_v32 = vand.u32 2147483648, %v10327_v58  ;;  %v5554_v9 = vand.u32 2147483647, %v10327_v58 }
 0x495   : > { %v5972_v52 = vadd.f32 %v6754_v43, %v5940_v45  ;;  %v5758_v21 = vmul.f32 %v6628_v20, %v5757_v15  ;;  %v5532_v29 = vsub.f32 1.0, %v5531_v60  ;;  %v4801_v6 = vpop.permute.xlu0 %4800  ;;  %vm10882_vm15 = vmmov %vm10881_vm5 }
 0x496   : > { %v5215_v59 = vpop.f32.mrf.mxu3  ;;  %v5077_v41 = vsel %vm10880_vm0, %v5045_v44, %v4801_v6  ;;  %v4527_v51 = vpop.permute.xlu1 %4526  ;;  %v5557_v42 = vor.u32 1.1754944e-38, %v5556_v32  ;;  %vm5555_vm14 = vcmp.eq.f32.partialorder %v5554_v9, 8.507059e+37  ;;  %vm10883_vm12 = vmmov %vm10881_vm5  ;;  %vm10885_vm0 = vcmask 130048  }
 0x497   : > { %v5266_v0 = vmul.f32 %v10332_v7, %v5215_v59  ;;  %6004 = vst.msk [vmem:[%s10060_s12 + $0xa0] sm:$0xff] %vm10873_vm1, %v5972_v52  ;;  %v5759_v56 = vadd.f32 %v6628_v20, %v5758_v21  ;;  %v5533_v2 = vmul.f32 %v6632_v16, %v5532_v29  ;;  %6339 = vmatmul.msk.bf16.gmra.mxu1 %vm5114_vm13, %v5077_v41  ;;  %v6760_v59 = vld [vmem:[%s6888_s29 + $0x38] sm:$0xff] }
 0x498   : > { %v4866_v45 = vsel %vm4818_vm2, %v6759_v36, %v4527_v51  ;;  %vm10884_vm2 = vmmov %vm10881_vm5  ;;  %v4593_v47 = vpop.permute.xlu2 %4592 }
 0x499   : > { %v5763_v4 = vsel %vm5762_vm6, %v6628_v20, %v5759_v56  ;;  %v10347_v19 = vadd.f32 %v10344_v53, %v5266_v0  ;;  %v5534_v22 = vadd.f32 %v6632_v16, %v5533_v2  ;;  %vm5550_vm6 = vweird.f32 %v10327_v58 }
 0x49a   : > { %v5768_v23 = vsel %vm5765_vm10, %v5767_v5, %v5763_v4  ;;  %v4898_v43 = vsel %vm10883_vm12, %v4866_v45, %v4607_v61 }
 0x49b   : > { %v5941_v37 = vmul.f32 %v5768_v23, %v10297_v62  ;;  %v6370_v48 = vmul.f32 -1.442695, %v10347_v19  ;;  %v6634_v62 = vpop.eup %6633  ;;  %v5538_v35 = vsel %vm5537_vm9, %v6632_v16, %v5534_v22 }
 0x49c   : > { %v5546_v49 = vmul.f32 %v6634_v62, %v10327_v58  ;;  %v5543_v63 = vsel %vm5540_vm3, %v5542_v57, %v5538_v35  ;;  %vm5551_vm1 = vweird.f32 %v6634_v62 }
 0x49d   : > { %v5973_v11 = vadd.f32 %v6757_v17, %v5941_v37  ;;  %6635 = vpow2.f32 %v6370_v48  ;;  %v5926_v28 = vmul.f32 %v5543_v63, %v10305_v46  ;;  %v4642_v27 = vpop.permute.xlu0 %4641  ;;  %vm5552_vm10 = vmor %vm5550_vm6, %vm5551_vm1 }
 0x49e   : > { %v5217_v3 = vpop.f32.mrf.mxu3  ;;  %v5547_v34 = vsub.f32 1.0, %v5546_v49  ;;  %v5180_v46 = vpop.f32.mrf.mxu1  ;;  %v4931_v60 = vsel %vm4899_vm7, %v4898_v43, %v4642_v27 }
 0x49f   : > { %v5267_v1 = vmul.f32 %v10332_v7, %v5217_v3  ;;  %6005 = vst.msk [vmem:[%s10060_s12 + $0xa8] sm:$0xff] %vm10881_vm5, %v5973_v11  ;;  %v5958_v20 = vadd.f32 %v6758_v18, %v5926_v28  ;;  %v5252_v26 = vmul.f32 %v10332_v7, %v5180_v46  ;;  %v4677_v52 = vpop.permute.xlu1 %4676  ;;  %vm10886_vm5 = vcmask 195584  }
 0x4a0   : > { %v5548_v40 = vmul.f32 %v6634_v62, %v5547_v34  ;;  %v4663_v18 = vpop.permute.xlu2 %4662 }
 0x4a1   : > { %v10364_v50 = vadd.f32 %v10344_v53, %v5267_v1  ;;  %5990 = vst.msk [vmem:[%s10060_s12 + $0x30] sm:$0xff] %vm10882_vm15, %v5958_v20  ;;  %v10379_v21 = vadd.f32 %v10344_v53, %v5252_v26  ;;  %vm10887_vm15 = vcmask 261120   ;;  %v6762_v26 = vld [vmem:[%s6888_s29 + $0xb8] sm:$0xff] }
 0x4a2   : > { %v5549_v24 = vadd.f32 %v6634_v62, %v5548_v40 }
 0x4a3   : > { %v6371_v38 = vmul.f32 -1.442695, %v10364_v50  ;;  %v6636_v8 = vpop.eup %6635  ;;  %v6356_v0 = vmul.f32 -1.442695, %v10379_v21 }
 0x4a4   : > { %v5430_v31 = vadd.f32 1.0, %v6636_v8  ;;  %v5553_v15 = vsel %vm5552_vm10, %v6634_v62, %v5549_v24 }
 0x4a5   : > { %6637 = vpow2.f32 %v6371_v38  ;;  %v5558_v12 = vsel %vm5555_vm14, %v5557_v42, %v5553_v15  ;;  %v4747_v33 = vpop.permute.xlu0 %4746  ;;  %v6761_v38 = vld [vmem:[%s6888_s29 + $0xb0] sm:$0xff]  ;;  %vm10888_vm14 = vmmov %vm10884_vm2 }
 0x4a6   : > { %6639 = vrcp.f32 %v5430_v31  ;;  %v5927_v25 = vmul.f32 %v5558_v12, %v10313_v30  ;;  %v4963_v30 = vsel %vm10885_vm0, %v4931_v60, %v4677_v52  ;;  %v5182_v13 = vpop.f32.mrf.mxu1  ;;  %v5779_v23 = vand.u32 2147483647, %v5430_v31 }
 0x4a7   : > { %v5253_v29 = vmul.f32 %v10332_v7, %v5182_v13  ;;  %v5781_v14 = vand.u32 2147483648, %v5430_v31  ;;  %v4996_v55 = vsel %vm4964_vm8, %v4963_v30, %v4712_v39  ;;  %vm5775_vm9 = vweird.f32 %v5430_v31 }
 0x4a8   : > { %v5959_v16 = vadd.f32 %v6760_v59, %v5927_v25  ;;  %v5028_v44 = vsel %vm10886_vm5, %v4996_v55, %v4747_v33  ;;  %vm5780_vm1 = vcmp.eq.f32.partialorder %v5779_v23, 8.507059e+37 }
 0x4a9   : > { %v10390_v2 = vadd.f32 %v10344_v53, %v5253_v29  ;;  %v5782_v11 = vor.u32 1.1754944e-38, %v5781_v14 }
 0x4aa   : > { %5991 = vst.msk [vmem:[%s10060_s12 + $0x38] sm:$0xff] %vm10884_vm2, %v5959_v16 }
 0x4ab   : > { %v6638_v10 = vpop.eup %6637  ;;  %v6357_v41 = vmul.f32 -1.442695, %v10390_v2 }
 0x4ac   : > { %v5431_v58 = vadd.f32 1.0, %v6638_v10  ;;  %v6640_v56 = vpop.eup %6639 }
 0x4ad   : > { %v5771_v5 = vmul.f32 %v6640_v56, %v5430_v31  ;;  %vm5776_vm4 = vweird.f32 %v6640_v56  ;;  %v4817_v62 = vpop.permute.xlu0 %4816 }
 0x4ae   : > { %6641 = vrcp.f32 %v5431_v58  ;;  %vm5777_vm3 = vmor %vm5775_vm9, %vm5776_vm4  ;;  %v5796_v28 = vand.u32 2147483648, %v5431_v58  ;;  %v5794_v32 = vand.u32 2147483647, %v5431_v58  ;;  %vm5790_vm10 = vweird.f32 %v5431_v58 }
 0x4af   : > { %6643 = vpow2.f32 %v6356_v0  ;;  %v5772_v4 = vsub.f32 1.0, %v5771_v5  ;;  %vm10889_vm4 = vcmask 130048   ;;  %vm10890_vm9 = vmmov %vm10884_vm2 }
 0x4b0   : > { %6645 = vpow2.f32 %v6357_v41  ;;  %v5797_v9 = vor.u32 1.1754944e-38, %v5796_v28  ;;  %vm5795_vm0 = vcmp.eq.f32.partialorder %v5794_v32, 8.507059e+37  ;;  %v6763_v41 = vld [vmem:[%s6888_s29 + $0x40] sm:$0xff]  ;;  %v6764_v32 = vld [vmem:[%s6888_s29 + $0x48] sm:$0xff] }
 0x4b1   : > { %v5773_v37 = vmul.f32 %v6640_v56, %v5772_v4 }
 0x4b3   : > { %v5774_v6 = vadd.f32 %v6640_v56, %v5773_v37  ;;  %v4782_v61 = vpop.permute.xlu1 %4781 }
 0x4b4   : > { %v6642_v48 = vpop.eup %6641  ;;  %v5061_v3 = vsel %vm5029_vm11, %v5028_v44, %v4782_v61 }
 0x4b5   : > { %v6644_v17 = vpop.eup %6643  ;;  %v5786_v22 = vmul.f32 %v6642_v48, %v5431_v58  ;;  %v5778_v57 = vsel %vm5777_vm3, %v6640_v56, %v5774_v6  ;;  %v5093_v35 = vsel %vm10887_vm15, %v5061_v3, %v4817_v62  ;;  %vm5791_vm6 = vweird.f32 %v6642_v48  ;;  %v4698_v46 = vpop.permute.xlu0 %4697 }
 0x4b6   : > { %v5416_v1 = vadd.f32 1.0, %v6644_v17  ;;  %v5783_v49 = vsel %vm5780_vm1, %v5782_v11, %v5778_v57  ;;  %6347 = vmatmul.msk.bf16.gmra.mxu3 %vm5114_vm13, %v5093_v35  ;;  %v6646_v40 = vpop.eup %6645  ;;  %vm5792_vm12 = vmor %vm5790_vm10, %vm5791_vm6  ;;  %v4768_v56 = vpop.permute.xlu2 %4767  ;;  %vm10891_vm3 = vcmask 195584  }
 0x4b7   : > { %v5787_v51 = vsub.f32 1.0, %v5786_v22  ;;  %v5942_v63 = vmul.f32 %v5783_v49, %v10347_v19  ;;  %v4884_v19 = vsel %vm10884_vm2, %v9979_v54, %v4593_v47  ;;  %v5417_v24 = vadd.f32 1.0, %v6646_v40  ;;  %vm10892_vm10 = vmmov %vm10884_vm2 }
 0x4b8   : > { %6647 = vrcp.f32 %v5416_v1  ;;  %v5571_v52 = vand.u32 2147483648, %v5416_v1  ;;  %v5569_v10 = vand.u32 2147483647, %v5416_v1 }
 0x4b9   : > { %v5788_v34 = vmul.f32 %v6642_v48, %v5787_v51  ;;  %v5974_v8 = vadd.f32 %v6761_v38, %v5942_v63  ;;  %6649 = vrcp.f32 %v5417_v24  ;;  %v5586_v6 = vand.u32 2147483648, %v5417_v24 }
 0x4ba   : > { %v5572_v5 = vor.u32 1.1754944e-38, %v5571_v52  ;;  %v5584_v61 = vand.u32 2147483647, %v5417_v24 }
 0x4bb   : > { %v5789_v20 = vadd.f32 %v6642_v48, %v5788_v34  ;;  %6006 = vst.msk [vmem:[%s10060_s12 + $0xb0] sm:$0xff] %vm10888_vm14, %v5974_v8  ;;  %v4628_v27 = vpop.permute.xlu1 %4627  ;;  %v5587_v62 = vor.u32 1.1754944e-38, %v5586_v6 }
 0x4bc   : > { %v4917_v36 = vsel %vm4899_vm7, %v4884_v19, %v4628_v27  ;;  %vm5565_vm7 = vweird.f32 %v5416_v1  ;;  %vm5585_vm14 = vcmp.eq.f32.partialorder %v5584_v61, 8.507059e+37 }
 0x4bd   : > { %v5793_v31 = vsel %vm5792_vm12, %v6642_v48, %v5789_v20  ;;  %v4949_v43 = vsel %vm10889_vm4, %v4917_v36, %v4663_v18  ;;  %v5220_v59 = vpop.f32.mrf.mxu3  ;;  %v4803_v13 = vpop.permute.xlu0 %4802  ;;  %vm10893_vm12 = vmmov %vm10884_vm2 }
 0x4be   : > { %v6648_v39 = vpop.eup %6647  ;;  %v5798_v42 = vsel %vm5795_vm0, %v5797_v9, %v5793_v31  ;;  %v4982_v16 = vsel %vm4964_vm8, %v4949_v43, %v4698_v46  ;;  %v5268_v0 = vmul.f32 %v10332_v7, %v5220_v59  ;;  %vm5570_vm8 = vcmp.eq.f32.partialorder %v5569_v10, 8.507059e+37 }
 0x4bf   : > { %v5943_v45 = vmul.f32 %v5798_v42, %v10364_v50  ;;  %v5561_v15 = vmul.f32 %v6648_v39, %v5416_v1  ;;  %vm5566_vm5 = vweird.f32 %v6648_v39  ;;  %v6650_v50 = vpop.eup %6649 }
 0x4c0   : > { %vm5567_vm1 = vmor %vm5565_vm7, %vm5566_vm5  ;;  %v5576_v30 = vmul.f32 %v6650_v50, %v5417_v24  ;;  %v10414_v29 = vadd.f32 %v10344_v53, %v5268_v0  ;;  %vm5581_vm6 = vweird.f32 %v6650_v50 }
 0x4c1   : > { %v5975_v12 = vadd.f32 %v6762_v26, %v5943_v45  ;;  %v5562_v25 = vsub.f32 1.0, %v5561_v15  ;;  %vm10894_vm7 = vmmov %vm10892_vm10 }
 0x4c2   : > { %v5577_v55 = vsub.f32 1.0, %v5576_v30  ;;  %v6372_v37 = vmul.f32 -1.442695, %v10414_v29 }
 0x4c3   : > { %6007 = vst.msk [vmem:[%s10060_s12 + $0xb8] sm:$0xff] %vm10890_vm9, %v5975_v12  ;;  %v5563_v54 = vmul.f32 %v6648_v39, %v5562_v25  ;;  %v4733_v58 = vpop.permute.xlu1 %4732 }
 0x4c4   : > { %v5014_v33 = vsel %vm10891_vm3, %v4982_v16, %v4733_v58  ;;  %v5578_v44 = vmul.f32 %v6650_v50, %v5577_v55  ;;  %6651 = vpow2.f32 %v6372_v37 }
 0x4c5   : > { %v5564_v60 = vadd.f32 %v6648_v39, %v5563_v54  ;;  %v5047_v4 = vsel %vm5029_vm11, %v5014_v33, %v4768_v56  ;;  %v5222_v11 = vpop.f32.mrf.mxu3  ;;  %vm5580_vm11 = vweird.f32 %v5417_v24  ;;  %v6765_v56 = vld [vmem:[%s6888_s29 + $0xc0] sm:$0xff] }
 0x4c6   : > { %v5079_v23 = vsel %vm10887_vm15, %v5047_v4, %v4803_v13  ;;  %v5579_v22 = vadd.f32 %v6650_v50, %v5578_v44  ;;  %v5269_v3 = vmul.f32 %v10332_v7, %v5222_v11 }
 0x4c7   : > { %v5568_v47 = vsel %vm5567_vm1, %v6648_v39, %v5564_v60  ;;  %6340 = vmatmul.msk.bf16.gmra.mxu1 %vm5114_vm13, %v5079_v23  ;;  %vm5582_vm13 = vmor %vm5580_vm11, %vm5581_vm6 }
 0x4c8   : > { %v5573_v14 = vsel %vm5570_vm8, %v5572_v5, %v5568_v47  ;;  %v5583_v57 = vsel %vm5582_vm13, %v6650_v50, %v5579_v22  ;;  %v5185_v63 = vpop.f32.mrf.mxu1  ;;  %v6766_v22 = vld [vmem:[%s6888_s29 + $0xc8] sm:$0xff] }
 0x4c9   : > { %v5928_v48 = vmul.f32 %v5573_v14, %v10379_v21  ;;  %v10425_v21 = vadd.f32 %v10344_v53, %v5269_v3  ;;  %v5588_v1 = vsel %vm5585_vm14, %v5587_v62, %v5583_v57  ;;  %v5254_v34 = vmul.f32 %v10332_v7, %v5185_v63 }
 0x4ca   : > { %v6652_v35 = vpop.eup %6651  ;;  %v5929_v49 = vmul.f32 %v5588_v1, %v10390_v2 }
 0x4cb   : > { %v5960_v17 = vadd.f32 %v6763_v41, %v5928_v48  ;;  %v6373_v51 = vmul.f32 -1.442695, %v10425_v21  ;;  %v5432_v28 = vadd.f32 1.0, %v6652_v35  ;;  %v10434_v8 = vadd.f32 %v10344_v53, %v5254_v34 }
 0x4cc   : > { %v5961_v38 = vadd.f32 %v6764_v32, %v5929_v49 }
 0x4cd   : > { %5992 = vst.msk [vmem:[%s10060_s12 + $0x40] sm:$0xff] %vm10892_vm10, %v5960_v17  ;;  %6653 = vpow2.f32 %v6373_v51  ;;  %v6358_v18 = vmul.f32 -1.442695, %v10434_v8  ;;  %v5811_v46 = vand.u32 2147483648, %v5432_v28  ;;  %v5809_v36 = vand.u32 2147483647, %v5432_v28  ;;  %vm10895_vm10 = vmmov %vm10894_vm7 }
 0x4ce   : > { %6655 = vrcp.f32 %v5432_v28  ;;  %5993 = vst.msk [vmem:[%s10060_s12 + $0x48] sm:$0xff] %vm10893_vm12, %v5961_v38  ;;  %vm5805_vm0 = vweird.f32 %v5432_v28  ;;  %vm10896_vm12 = vmmov %vm10894_vm7 }
 0x4cf   : > { %6657 = vpow2.f32 %v6358_v18  ;;  %v5812_v25 = vor.u32 1.1754944e-38, %v5811_v46  ;;  %vm5810_vm9 = vcmp.eq.f32.partialorder %v5809_v36, 8.507059e+37 }
 0x4d0   : > { %v5187_v2 = vpop.f32.mrf.mxu1 }
 0x4d1   : > { %v5255_v27 = vmul.f32 %v10332_v7, %v5187_v2 }
 0x4d3   : > { %v6654_v20 = vpop.eup %6653  ;;  %v10439_v24 = vadd.f32 %v10344_v53, %v5255_v27 }
 0x4d4   : > { %v6656_v40 = vpop.eup %6655  ;;  %v5433_v9 = vadd.f32 1.0, %v6654_v20 }
 0x4d5   : > { %v5801_v19 = vmul.f32 %v6656_v40, %v5432_v28  ;;  %v6658_v39 = vpop.eup %6657  ;;  %vm5806_vm2 = vweird.f32 %v6656_v40  ;;  %v6359_v45 = vmul.f32 -1.442695, %v10439_v24 }
 0x4d6   : > { %6659 = vrcp.f32 %v5433_v9  ;;  %v5418_v15 = vadd.f32 1.0, %v6658_v39  ;;  %vm5807_vm4 = vmor %vm5805_vm0, %vm5806_vm2  ;;  %v5826_v58 = vand.u32 2147483648, %v5433_v9  ;;  %v5824_v5 = vand.u32 2147483647, %v5433_v9 }
 0x4d7   : > { %v5802_v31 = vsub.f32 1.0, %v5801_v19  ;;  %6661 = vpow2.f32 %v6359_v45  ;;  %vm5820_vm3 = vweird.f32 %v5433_v9 }
 0x4d8   : > { %6663 = vrcp.f32 %v5418_v15  ;;  %v5827_v23 = vor.u32 1.1754944e-38, %v5826_v58  ;;  %vm5825_vm8 = vcmp.eq.f32.partialorder %v5824_v5, 8.507059e+37  ;;  %v5599_v6 = vand.u32 2147483647, %v5418_v15 }
 0x4d9   : > { %v5803_v42 = vmul.f32 %v6656_v40, %v5802_v31  ;;  %v5601_v44 = vand.u32 2147483648, %v5418_v15  ;;  %vm5595_vm6 = vweird.f32 %v5418_v15 }
 0x4da   : > { %vm5600_vm13 = vcmp.eq.f32.partialorder %v5599_v6, 8.507059e+37 }
 0x4db   : > { %v5804_v26 = vadd.f32 %v6656_v40, %v5803_v42  ;;  %v5602_v1 = vor.u32 1.1754944e-38, %v5601_v44 }
 0x4dc   : > { %v6660_v12 = vpop.eup %6659 }
 0x4dd   : > { %v5808_v43 = vsel %vm5807_vm4, %v6656_v40, %v5804_v26  ;;  %v5816_v52 = vmul.f32 %v6660_v12, %v5433_v9  ;;  %v6662_v50 = vpop.eup %6661  ;;  %vm5821_vm5 = vweird.f32 %v6660_v12  ;;  %v6767_v9 = vld [vmem:[%s6888_s29 + $0x50] sm:$0xff] }
 0x4de   : > { %v5813_v54 = vsel %vm5810_vm9, %v5812_v25, %v5808_v43  ;;  %v6664_v30 = vpop.eup %6663  ;;  %v5419_v13 = vadd.f32 1.0, %v6662_v50  ;;  %vm5822_vm1 = vmor %vm5820_vm3, %vm5821_vm5 }
 0x4df   : > { %v5944_v10 = vmul.f32 %v5813_v54, %v10414_v29  ;;  %v5817_v59 = vsub.f32 1.0, %v5816_v52  ;;  %v5591_v29 = vmul.f32 %v6664_v30, %v5418_v15  ;;  %vm5596_vm15 = vweird.f32 %v6664_v30  ;;  %v6768_v52 = vld [vmem:[%s6888_s29 + $0x58] sm:$0xff]  ;;  %vm10897_vm9 = vmmov %vm10894_vm7 }
 0x4e0   : > { %6665 = vrcp.f32 %v5419_v13  ;;  %vm5597_vm11 = vmor %vm5595_vm6, %vm5596_vm15  ;;  %v5614_v20 = vand.u32 2147483647, %v5419_v13  ;;  %v5616_v2 = vand.u32 2147483648, %v5419_v13  ;;  %vm5610_vm2 = vweird.f32 %v5419_v13 }
 0x4e1   : > { %v5976_v60 = vadd.f32 %v6765_v56, %v5944_v10  ;;  %v5818_v33 = vmul.f32 %v6660_v12, %v5817_v59  ;;  %v5592_v55 = vsub.f32 1.0, %v5591_v29  ;;  %vm10898_vm6 = vmmov %vm10897_vm9 }
 0x4e2   : > { %v5225_v16 = vpop.f32.mrf.mxu3  ;;  %v5617_v39 = vor.u32 1.1754944e-38, %v5616_v2  ;;  %vm5615_vm4 = vcmp.eq.f32.partialorder %v5614_v20, 8.507059e+37 }
 0x4e3   : > { %v5270_v0 = vmul.f32 %v10332_v7, %v5225_v16  ;;  %6008 = vst.msk [vmem:[%s10060_s12 + $0xc0] sm:$0xff] %vm10894_vm7, %v5976_v60  ;;  %v5819_v47 = vadd.f32 %v6660_v12, %v5818_v33  ;;  %v5593_v41 = vmul.f32 %v6664_v30, %v5592_v55 }
 0x4e5   : > { %v10446_v4 = vadd.f32 %v10344_v53, %v5270_v0  ;;  %v5823_v14 = vsel %vm5822_vm1, %v6660_v12, %v5819_v47  ;;  %v5594_v62 = vadd.f32 %v6664_v30, %v5593_v41 }
 0x4e6   : > { %v5828_v48 = vsel %vm5825_vm8, %v5827_v23, %v5823_v14  ;;  %v6666_v57 = vpop.eup %6665 }
 0x4e7   : > { %v6374_v37 = vmul.f32 -1.442695, %v10446_v4  ;;  %v5945_v61 = vmul.f32 %v5828_v48, %v10425_v21  ;;  %v5598_v21 = vsel %vm5597_vm11, %v6664_v30, %v5594_v62  ;;  %v5606_v49 = vmul.f32 %v6666_v57, %v5419_v13 }
 0x4e8   : > { %v5603_v51 = vsel %vm5600_vm13, %v5602_v1, %v5598_v21  ;;  %vm5611_vm14 = vweird.f32 %v6666_v57 }
 0x4e9   : > { %6667 = vpow2.f32 %v6374_v37  ;;  %v5977_v3 = vadd.f32 %v6766_v22, %v5945_v61  ;;  %v5930_v32 = vmul.f32 %v5603_v51, %v10434_v8  ;;  %v5607_v38 = vsub.f32 1.0, %v5606_v49  ;;  %vm5612_vm0 = vmor %vm5610_vm2, %vm5611_vm14  ;;  %v6769_v61 = vld [vmem:[%s6888_s29 + $0xd0] sm:$0xff] }
 0x4ea   : > { %v5227_v17 = vpop.f32.mrf.mxu3 }
 0x4eb   : > { %v5271_v11 = vmul.f32 %v10332_v7, %v5227_v17  ;;  %6009 = vst.msk [vmem:[%s10060_s12 + $0xc8] sm:$0xff] %vm10895_vm10, %v5977_v3  ;;  %v5962_v27 = vadd.f32 %v6767_v9, %v5930_v32  ;;  %v5608_v19 = vmul.f32 %v6666_v57, %v5607_v38 }
 0x4ec   : > { %v5190_v28 = vpop.f32.mrf.mxu1 }
 0x4ed   : > { %v10455_v35 = vadd.f32 %v10344_v53, %v5271_v11  ;;  %v5256_v18 = vmul.f32 %v10332_v7, %v5190_v28  ;;  %5994 = vst.msk [vmem:[%s10060_s12 + $0x50] sm:$0xff] %vm10896_vm12, %v5962_v27  ;;  %v5609_v46 = vadd.f32 %v6666_v57, %v5608_v19  ;;  %v6770_v28 = vld [vmem:[%s6888_s29 + $0xd8] sm:$0xff]  ;;  %v6771_v27 = vld [vmem:[%s6888_s29 + $0x60] sm:$0xff] }
 0x4ef   : > { %v6375_v63 = vmul.f32 -1.442695, %v10455_v35  ;;  %v6668_v34 = vpop.eup %6667  ;;  %v10464_v31 = vadd.f32 %v10344_v53, %v5256_v18  ;;  %v5613_v42 = vsel %vm5612_vm0, %v6666_v57, %v5609_v46  ;;  %vm10899_vm0 = vmmov %vm10898_vm6 }
 0x4f0   : > { %v5434_v40 = vadd.f32 1.0, %v6668_v34  ;;  %v5618_v45 = vsel %vm5615_vm4, %v5617_v39, %v5613_v42  ;;  %vm10900_vm4 = vmmov %vm10899_vm0 }
 0x4f1   : > { %6669 = vpow2.f32 %v6375_v63  ;;  %v6360_v8 = vmul.f32 -1.442695, %v10464_v31  ;;  %v5931_v26 = vmul.f32 %v5618_v45, %v10439_v24 }
 0x4f2   : > { %6671 = vrcp.f32 %v5434_v40  ;;  %v5841_v0 = vand.u32 2147483648, %v5434_v40  ;;  %v5839_v60 = vand.u32 2147483647, %v5434_v40  ;;  %vm5835_vm7 = vweird.f32 %v5434_v40 }
 0x4f3   : > { %6673 = vpow2.f32 %v6360_v8  ;;  %v5963_v54 = vadd.f32 %v6768_v52, %v5931_v26 }
 0x4f4   : > { %v5192_v15 = vpop.f32.mrf.mxu1  ;;  %v5842_v30 = vor.u32 1.1754944e-38, %v5841_v0  ;;  %vm5840_vm1 = vcmp.eq.f32.partialorder %v5839_v60, 8.507059e+37 }
 0x4f5   : > { %v5257_v25 = vmul.f32 %v10332_v7, %v5192_v15  ;;  %5995 = vst.msk [vmem:[%s10060_s12 + $0x58] sm:$0xff] %vm10897_vm9, %v5963_v54 }
 0x4f7   : > { %v6670_v36 = vpop.eup %6669  ;;  %v10473_v59 = vadd.f32 %v10344_v53, %v5257_v25 }
 0x4f8   : > { %v5435_v12 = vadd.f32 1.0, %v6670_v36  ;;  %v6672_v43 = vpop.eup %6671 }
 0x4f9   : > { %v5831_v10 = vmul.f32 %v6672_v43, %v5434_v40  ;;  %v6674_v16 = vpop.eup %6673  ;;  %v6361_v56 = vmul.f32 -1.442695, %v10473_v59  ;;  %vm5836_vm5 = vweird.f32 %v6672_v43 }
 0x4fa   : > { %6675 = vrcp.f32 %v5435_v12  ;;  %v5420_v50 = vadd.f32 1.0, %v6674_v16  ;;  %vm5837_vm3 = vmor %vm5835_vm7, %vm5836_vm5  ;;  %v5856_v55 = vand.u32 2147483648, %v5435_v12  ;;  %v5854_v6 = vand.u32 2147483647, %v5435_v12 }
 0x4fb   : > { %v5832_v58 = vsub.f32 1.0, %v5831_v10  ;;  %vm5850_vm15 = vweird.f32 %v5435_v12  ;;  %v6772_v10 = vld [vmem:[%s6888_s29 + $0x68] sm:$0xff] }
 0x4fc   : > { %6677 = vrcp.f32 %v5420_v50  ;;  %v5857_v3 = vor.u32 1.1754944e-38, %v5856_v55  ;;  %vm5855_vm10 = vcmp.eq.f32.partialorder %v5854_v6, 8.507059e+37  ;;  %v5629_v49 = vand.u32 2147483647, %v5420_v50 }
 0x4fd   : > { %v5833_v24 = vmul.f32 %v6672_v43, %v5832_v58  ;;  %6679 = vpow2.f32 %v6361_v56  ;;  %vm5625_vm14 = vweird.f32 %v5420_v50 }
 0x4fe   : > { %vm5630_vm2 = vcmp.eq.f32.partialorder %v5629_v49, 8.507059e+37  ;;  %v6773_v49 = vld [vmem:[%s6888_s29 + $0xe0] sm:$0xff] }
 0x4ff   : > { %v5834_v5 = vadd.f32 %v6672_v43, %v5833_v24 }
 0x500   : > { %v6676_v33 = vpop.eup %6675 }
 0x501   : > { %v5846_v13 = vmul.f32 %v6676_v33, %v5435_v12  ;;  %v5838_v47 = vsel %vm5837_vm3, %v6672_v43, %v5834_v5  ;;  %vm5851_vm8 = vweird.f32 %v6676_v33 }
 0x502   : > { %v5843_v29 = vsel %vm5840_vm1, %v5842_v30, %v5838_v47  ;;  %v6678_v37 = vpop.eup %6677  ;;  %vm5852_vm11 = vmor %vm5850_vm15, %vm5851_vm8 }
 0x503   : > { %v5847_v23 = vsub.f32 1.0, %v5846_v13  ;;  %v5946_v14 = vmul.f32 %v5843_v29, %v10446_v4  ;;  %v6680_v44 = vpop.eup %6679  ;;  %v5621_v17 = vmul.f32 %v6678_v37, %v5420_v50  ;;  %v5631_v4 = vand.u32 2147483648, %v5420_v50  ;;  %vm10901_vm1 = vmmov %vm10899_vm0 }
 0x504   : > { %v5421_v22 = vadd.f32 1.0, %v6680_v44  ;;  %vm5626_vm13 = vweird.f32 %v6678_v37 }
 0x505   : > { %v5848_v48 = vmul.f32 %v6676_v33, %v5847_v23  ;;  %v5978_v41 = vadd.f32 %v6769_v61, %v5946_v14  ;;  %v5622_v62 = vsub.f32 1.0, %v5621_v17  ;;  %vm5627_vm12 = vmor %vm5625_vm14, %vm5626_vm13  ;;  %v5632_v32 = vor.u32 1.1754944e-38, %v5631_v4 }
 0x506   : > { %6681 = vrcp.f32 %v5421_v22  ;;  %v5646_v8 = vand.u32 2147483648, %v5421_v22  ;;  %v5644_v36 = vand.u32 2147483647, %v5421_v22  ;;  %vm5640_vm5 = vweird.f32 %v5421_v22  ;;  %vm10902_vm13 = vmmov %vm10899_vm0 }
 0x507   : > { %v5849_v11 = vadd.f32 %v6676_v33, %v5848_v48  ;;  %6010 = vst.msk [vmem:[%s10060_s12 + $0xd0] sm:$0xff] %vm10898_vm6, %v5978_v41  ;;  %v5623_v21 = vmul.f32 %v6678_v37, %v5622_v62 }
 0x508   : > { %vm5645_vm3 = vcmp.eq.f32.partialorder %v5644_v36, 8.507059e+37 }
 0x509   : > { %v5853_v57 = vsel %vm5852_vm11, %v6676_v33, %v5849_v11  ;;  %v5624_v63 = vadd.f32 %v6678_v37, %v5623_v21 }
 0x50a   : > { %v5858_v1 = vsel %vm5855_vm10, %v5857_v3, %v5853_v57  ;;  %v5230_v9 = vpop.f32.mrf.mxu3 }
 0x50b   : > { %v5947_v51 = vmul.f32 %v5858_v1, %v10455_v35  ;;  %v5628_v38 = vsel %vm5627_vm12, %v6678_v37, %v5624_v63  ;;  %v5272_v35 = vmul.f32 %v10332_v7, %v5230_v9 }
 0x50c   : > { %v6682_v18 = vpop.eup %6681  ;;  %v5633_v20 = vsel %vm5630_vm2, %v5632_v32, %v5628_v38 }
 0x50d   : > { %v5979_v34 = vadd.f32 %v6770_v28, %v5947_v51  ;;  %v5932_v2 = vmul.f32 %v5633_v20, %v10464_v31  ;;  %v5636_v40 = vmul.f32 %v6682_v18, %v5421_v22  ;;  %v5308_v39 = vadd.f32 %v10344_v53, %v5272_v35 }
 0x50e   : > { %vm5641_vm9 = vweird.f32 %v6682_v18  ;;  %v5647_v31 = vor.u32 1.1754944e-38, %v5646_v8 }
 0x50f   : > { %6011 = vst.msk [vmem:[%s10060_s12 + $0xd8] sm:$0xff] %vm10899_vm0, %v5979_v34  ;;  %v5964_v19 = vadd.f32 %v6771_v27, %v5932_v2  ;;  %v5637_v46 = vsub.f32 1.0, %v5636_v40  ;;  %v6376_v45 = vmul.f32 -1.442695, %v5308_v39  ;;  %vm5642_vm7 = vmor %vm5640_vm5, %vm5641_vm9 }
 0x510   : > { %vm10903_vm5 = vmmov %vm10901_vm1 }
 0x511   : > { %5996 = vst.msk [vmem:[%s10060_s12 + $0x60] sm:$0xff] %vm10900_vm4, %v5964_v19  ;;  %v5638_v42 = vmul.f32 %v6682_v18, %v5637_v46  ;;  %6683 = vpow2.f32 %v6376_v45 }
 0x512   : > { %v5232_v12 = vpop.f32.mrf.mxu3 }
 0x513   : > { %v5639_v15 = vadd.f32 %v6682_v18, %v5638_v42  ;;  %v5273_v43 = vmul.f32 %v10332_v7, %v5232_v12  ;;  %v6774_v42 = vld [vmem:[%s6888_s29 + $0xe8] sm:$0xff] }
 0x514   : > { %v5195_v50 = vpop.f32.mrf.mxu1 }
 0x515   : > { %v5643_v26 = vsel %vm5642_vm7, %v6682_v18, %v5639_v15  ;;  %v10495_v54 = vadd.f32 %v10344_v53, %v5273_v43  ;;  %v5258_v24 = vmul.f32 %v10332_v7, %v5195_v50  ;;  %v6775_v50 = vld [vmem:[%s6888_s29 + $0x70] sm:$0xff] }
 0x516   : > { %v5648_v25 = vsel %vm5645_vm3, %v5647_v31, %v5643_v26 }
 0x517   : > { %v5933_v52 = vmul.f32 %v5648_v25, %v10473_v59  ;;  %v6684_v58 = vpop.eup %6683  ;;  %v6377_v0 = vmul.f32 -1.442695, %v10495_v54  ;;  %v10503_v60 = vadd.f32 %v10344_v53, %v5258_v24 }
 0x518   : > { %v5436_v56 = vadd.f32 1.0, %v6684_v58 }
 0x519   : > { %v5965_v16 = vadd.f32 %v6772_v10, %v5933_v52  ;;  %6685 = vpow2.f32 %v6377_v0  ;;  %v6362_v59 = vmul.f32 -1.442695, %v10503_v60 }
 0x51a   : > { %6687 = vrcp.f32 %v5436_v56  ;;  %v5871_v55 = vand.u32 2147483648, %v5436_v56  ;;  %v5869_v6 = vand.u32 2147483647, %v5436_v56  ;;  %vm5865_vm15 = vweird.f32 %v5436_v56 }
 0x51b   : > { %5997 = vst.msk [vmem:[%s10060_s12 + $0x68] sm:$0xff] %vm10901_vm1, %v5965_v16  ;;  %6689 = vpow2.f32 %v6362_v59 }
 0x51c   : > { %v5197_v5 = vpop.f32.mrf.mxu1  ;;  %v5872_v11 = vor.u32 1.1754944e-38, %v5871_v55  ;;  %vm5870_vm11 = vcmp.eq.f32.partialorder %v5869_v6, 8.507059e+37  ;;  %v6776_v6 = vld [vmem:[%s6888_s29 + $0x78] sm:$0xff] }
 0x51d   : > { %v5259_v47 = vmul.f32 %v10332_v7, %v5197_v5 }
 0x51f   : > { %v6686_v33 = vpop.eup %6685  ;;  %v10508_v14 = vadd.f32 %v10344_v53, %v5259_v47 }
 0x520   : > { %v6688_v30 = vpop.eup %6687  ;;  %v5437_v13 = vadd.f32 1.0, %v6686_v33 }
 0x521   : > { %v5861_v29 = vmul.f32 %v6688_v30, %v5436_v56  ;;  %v6690_v37 = vpop.eup %6689  ;;  %vm5866_vm8 = vweird.f32 %v6688_v30  ;;  %v6363_v44 = vmul.f32 -1.442695, %v10508_v14 }
 0x522   : > { %6691 = vrcp.f32 %v5437_v13  ;;  %v5422_v61 = vadd.f32 1.0, %v6690_v37  ;;  %vm5867_vm6 = vmor %vm5865_vm15, %vm5866_vm8  ;;  %v5886_v1 = vand.u32 2147483648, %v5437_v13  ;;  %v5884_v28 = vand.u32 2147483647, %v5437_v13 }
 0x523   : > { %v5862_v23 = vsub.f32 1.0, %v5861_v29  ;;  %6693 = vpow2.f32 %v6363_v44  ;;  %vm5880_vm14 = vweird.f32 %v5437_v13 }
 0x524   : > { %6695 = vrcp.f32 %v5422_v61  ;;  %v5887_v20 = vor.u32 1.1754944e-38, %v5886_v1  ;;  %vm5885_vm2 = vcmp.eq.f32.partialorder %v5884_v28, 8.507059e+37  ;;  %v5659_v35 = vand.u32 2147483647, %v5422_v61 }
 0x525   : > { %v5863_v48 = vmul.f32 %v6688_v30, %v5862_v23  ;;  %v5661_v27 = vand.u32 2147483648, %v5422_v61  ;;  %vm5655_vm4 = vweird.f32 %v5422_v61 }
 0x526   : > { %vm5660_vm7 = vcmp.eq.f32.partialorder %v5659_v35, 8.507059e+37  ;;  %v6777_v35 = vld [vmem:[%s6888_s29 + $0xf0] sm:$0xff] }
 0x527   : > { %v5864_v41 = vadd.f32 %v6688_v30, %v5863_v48  ;;  %v5662_v26 = vor.u32 1.1754944e-38, %v5661_v27 }
 0x528   : > { %v6692_v17 = vpop.eup %6691 }
 0x529   : > { %v5868_v22 = vsel %vm5867_vm6, %v6688_v30, %v5864_v41  ;;  %v5876_v3 = vmul.f32 %v6692_v17, %v5437_v13  ;;  %v6694_v21 = vpop.eup %6693  ;;  %vm5881_vm10 = vweird.f32 %v6692_v17 }
 0x52a   : > { %v5873_v62 = vsel %vm5870_vm11, %v5872_v11, %v5868_v22  ;;  %v6696_v34 = vpop.eup %6695  ;;  %v5423_v32 = vadd.f32 1.0, %v6694_v21  ;;  %vm5882_vm12 = vmor %vm5880_vm14, %vm5881_vm10 }
 0x52b   : > { %v5948_v57 = vmul.f32 %v5873_v62, %v5308_v39  ;;  %v5877_v4 = vsub.f32 1.0, %v5876_v3  ;;  %v5651_v18 = vmul.f32 %v6696_v34, %v5422_v61  ;;  %vm5656_vm0 = vweird.f32 %v6696_v34  ;;  %vm10904_vm11 = vmmov %vm10901_vm1 }
 0x52c   : > { %6697 = vrcp.f32 %v5423_v32  ;;  %vm5657_vm9 = vmor %vm5655_vm4, %vm5656_vm0  ;;  %v5674_v16 = vand.u32 2147483647, %v5423_v32  ;;  %v5676_v58 = vand.u32 2147483648, %v5423_v32  ;;  %vm5670_vm8 = vweird.f32 %v5423_v32 }
 0x52d   : > { %v5980_v51 = vadd.f32 %v6773_v49, %v5948_v57  ;;  %v5878_v63 = vmul.f32 %v6692_v17, %v5877_v4  ;;  %v5652_v40 = vsub.f32 1.0, %v5651_v18  ;;  %vm10905_vm0 = vmmov %vm10901_vm1 }
 0x52e   : > { %vm5675_vm6 = vcmp.eq.f32.partialorder %v5674_v16, 8.507059e+37 }
 0x52f   : > { %6012 = vst.msk [vmem:[%s10060_s12 + $0xe0] sm:$0xff] %vm10902_vm13, %v5980_v51  ;;  %v5879_v38 = vadd.f32 %v6692_v17, %v5878_v63  ;;  %v5653_v8 = vmul.f32 %v6696_v34, %v5652_v40 }
 0x531   : > { %v5883_v2 = vsel %vm5882_vm12, %v6692_v17, %v5879_v38  ;;  %v5654_v45 = vadd.f32 %v6696_v34, %v5653_v8 }
 0x532   : > { %v5888_v9 = vsel %vm5885_vm2, %v5887_v20, %v5883_v2  ;;  %v6698_v31 = vpop.eup %6697 }
 0x533   : > { %v5949_v46 = vmul.f32 %v5888_v9, %v10495_v54  ;;  %v5658_v12 = vsel %vm5657_vm9, %v6696_v34, %v5654_v45  ;;  %v5666_v25 = vmul.f32 %v6698_v31, %v5423_v32  ;;  %vm5671_vm3 = vweird.f32 %v6698_v31 }
 0x534   : > { %v5663_v52 = vsel %vm5660_vm7, %v5662_v26, %v5658_v12  ;;  %vm5672_vm15 = vmor %vm5670_vm8, %vm5671_vm3 }
 0x535   : > { %v5981_v36 = vadd.f32 %v6774_v42, %v5949_v46  ;;  %v5934_v54 = vmul.f32 %v5663_v52, %v10503_v60  ;;  %v5667_v10 = vsub.f32 1.0, %v5666_v25  ;;  %v5677_v60 = vor.u32 1.1754944e-38, %v5676_v58  ;;  %vm10906_vm8 = vmmov %vm10905_vm0 }
 0x537   : > { %6013 = vst.msk [vmem:[%s10060_s12 + $0xe8] sm:$0xff] %vm10903_vm5, %v5981_v36  ;;  %v5966_v56 = vadd.f32 %v6775_v50, %v5934_v54  ;;  %v5668_v24 = vmul.f32 %v6698_v31, %v5667_v10  ;;  %v6778_v54 = vld [vmem:[%s6888_s29 + $0xf8] sm:$0xff] }
 0x539   : > { %v5235_v19 = vpop.f32.mrf.mxu3  ;;  %5998 = vst.msk [vmem:[%s10060_s12 + $0x70] sm:$0xff] %vm10901_vm1, %v5966_v56  ;;  %v5669_v33 = vadd.f32 %v6698_v31, %v5668_v24 }
 0x53a   : > { %v5274_v39 = vmul.f32 %v10332_v7, %v5235_v19 }
 0x53b   : > { %v5673_v13 = vsel %vm5672_vm15, %v6698_v31, %v5669_v33 }
 0x53c   : > { %v10518_v15 = vadd.f32 %v10344_v53, %v5274_v39  ;;  %v5678_v23 = vsel %vm5675_vm6, %v5677_v60, %v5673_v13  ;;  %v6779_v60 = vld [vmem:[%s6888_s29 + $0x80] sm:$0xff] }
 0x53d   : > { %v5935_v48 = vmul.f32 %v5678_v23, %v10508_v14 }
 0x53e   : > { %v6378_v43 = vmul.f32 -1.442695, %v10518_v15 }
 0x53f   : > { %v5967_v44 = vadd.f32 %v6776_v6, %v5935_v48  ;;  %v6780_v6 = vld [vmem:[%s6888_s29 + $0x88] sm:$0xff] }
 0x540   : > { %6699 = vpow2.f32 %v6378_v43 }
 0x541   : > { %v5237_v0 = vpop.f32.mrf.mxu3  ;;  %5999 = vst.msk [vmem:[%s10060_s12 + $0x78] sm:$0xff] %vm10904_vm11, %v5967_v44  ;;  %vm10907_vm11 = vmmov %vm10905_vm0 }
 0x542   : > { %v5275_v59 = vmul.f32 %v10332_v7, %v5237_v0 }
 0x544   : > { %v10529_v5 = vadd.f32 %v10344_v53, %v5275_v59  ;;  %v5200_v29 = vpop.f32.mrf.mxu1 }
 0x545   : > { %v5260_v37 = vmul.f32 %v10332_v7, %v5200_v29 }
 0x546   : > { %v6700_v30 = vpop.eup %6699  ;;  %v6379_v47 = vmul.f32 -1.442695, %v10529_v5 }
 0x547   : > { %v5438_v55 = vadd.f32 1.0, %v6700_v30  ;;  %v10536_v61 = vadd.f32 %v10344_v53, %v5260_v37 }
 0x548   : > { %6701 = vpow2.f32 %v6379_v47 }
 0x549   : > { %6703 = vrcp.f32 %v5438_v55  ;;  %v6364_v41 = vmul.f32 -1.442695, %v10536_v61  ;;  %v5901_v1 = vand.u32 2147483648, %v5438_v55  ;;  %v5899_v51 = vand.u32 2147483647, %v5438_v55 }
 0x54a   : > { %vm5895_vm13 = vweird.f32 %v5438_v55 }
 0x54b   : > { %6705 = vpow2.f32 %v6364_v41  ;;  %vm5900_vm12 = vcmp.eq.f32.partialorder %v5899_v51, 8.507059e+37 }
 0x54c   : > { %v5202_v11 = vpop.f32.mrf.mxu1 }
 0x54d   : > { %v5261_v62 = vmul.f32 %v10332_v7, %v5202_v11  ;;  %v5902_v7 = vor.u32 1.1754944e-38, %v5901_v1 }
 0x54e   : > { %v6702_v17 = vpop.eup %6701 }
 0x54f   : > { %v6704_v22 = vpop.eup %6703  ;;  %v5439_v3 = vadd.f32 1.0, %v6702_v17  ;;  %v10543_v4 = vadd.f32 %v10344_v53, %v5261_v62 }
 0x550   : > { %v5891_v57 = vmul.f32 %v6704_v22, %v5438_v55  ;;  %vm5896_vm10 = vweird.f32 %v6704_v22 }
 0x551   : > { %6707 = vrcp.f32 %v5439_v3  ;;  %v6706_v21 = vpop.eup %6705  ;;  %v6365_v63 = vmul.f32 -1.442695, %v10543_v4  ;;  %vm5897_vm14 = vmor %vm5895_vm13, %vm5896_vm10  ;;  %v5916_v40 = vand.u32 2147483648, %v5439_v3  ;;  %v5914_v46 = vand.u32 2147483647, %v5439_v3 }
 0x552   : > { %v5892_v14 = vsub.f32 1.0, %v5891_v57  ;;  %v5424_v28 = vadd.f32 1.0, %v6706_v21  ;;  %vm5910_vm4 = vweird.f32 %v5439_v3 }
 0x553   : > { %6709 = vpow2.f32 %v6365_v63  ;;  %v5917_v45 = vor.u32 1.1754944e-38, %v5916_v40  ;;  %vm5915_vm5 = vcmp.eq.f32.partialorder %v5914_v46, 8.507059e+37 }
 0x554   : > { %v5893_v49 = vmul.f32 %v6704_v22, %v5892_v14  ;;  %6711 = vrcp.f32 %v5424_v28  ;;  %v5691_v12 = vand.u32 2147483648, %v5424_v28  ;;  %v5689_v52 = vand.u32 2147483647, %v5424_v28 }
 0x555   : > { %vm5685_vm3 = vweird.f32 %v5424_v28 }
 0x556   : > { %v5894_v34 = vadd.f32 %v6704_v22, %v5893_v49  ;;  %v5692_v0 = vor.u32 1.1754944e-38, %v5691_v12  ;;  %vm5690_vm15 = vcmp.eq.f32.partialorder %v5689_v52, 8.507059e+37 }
 0x557   : > { %v6708_v32 = vpop.eup %6707 }
 0x558   : > { %v5898_v38 = vsel %vm5897_vm14, %v6704_v22, %v5894_v34  ;;  %v5906_v53 = vmul.f32 %v6708_v32, %v5439_v3  ;;  %vm5911_vm2 = vweird.f32 %v6708_v32 }
 0x559   : > { %v5903_v18 = vsel %vm5900_vm12, %v5902_v7, %v5898_v38  ;;  %v6710_v9 = vpop.eup %6709  ;;  %vm5912_vm9 = vmor %vm5910_vm4, %vm5911_vm2 }
 0x55a   : > { %v5950_v20 = vmul.f32 %v5903_v18, %v10518_v15  ;;  %v5907_v2 = vsub.f32 1.0, %v5906_v53  ;;  %v6712_v8 = vpop.eup %6711  ;;  %v5425_v39 = vadd.f32 1.0, %v6710_v9  ;;  %vm10908_vm12 = vmmov %vm10905_vm0 }
 0x55b   : > { %v5681_v36 = vmul.f32 %v6712_v8, %v5424_v28  ;;  %vm5686_vm7 = vweird.f32 %v6712_v8 }
 0x55c   : > { %v5982_v27 = vadd.f32 %v6777_v35, %v5950_v20  ;;  %v5908_v19 = vmul.f32 %v6708_v32, %v5907_v2  ;;  %6713 = vrcp.f32 %v5425_v39  ;;  %vm5687_vm1 = vmor %vm5685_vm3, %vm5686_vm7  ;;  %v5704_v47 = vand.u32 2147483647, %v5425_v39 }
 0x55d   : > { %v5682_v31 = vsub.f32 1.0, %v5681_v36  ;;  %vm5700_vm10 = vweird.f32 %v5425_v39 }
 0x55e   : > { %6014 = vst.msk [vmem:[%s10060_s12 + $0xf0] sm:$0xff] %vm10905_vm0, %v5982_v27  ;;  %v5909_v42 = vadd.f32 %v6708_v32, %v5908_v19  ;;  %vm5705_vm14 = vcmp.eq.f32.partialorder %v5704_v47, 8.507059e+37 }
 0x55f   : > { %v5683_v43 = vmul.f32 %v6712_v8, %v5682_v31 }
 0x560   : > { %v5913_v15 = vsel %vm5912_vm9, %v6708_v32, %v5909_v42 }
 0x561   : > { %v5918_v26 = vsel %vm5915_vm5, %v5917_v45, %v5913_v15  ;;  %v5684_v16 = vadd.f32 %v6712_v8, %v5683_v43 }
 0x562   : > { %v5951_v25 = vmul.f32 %v5918_v26, %v10529_v5  ;;  %v6714_v58 = vpop.eup %6713  ;;  %v5706_v5 = vand.u32 2147483648, %v5425_v39 }
 0x563   : > { %v5688_v50 = vsel %vm5687_vm1, %v6712_v8, %v5684_v16  ;;  %v5696_v56 = vmul.f32 %v6714_v58, %v5425_v39  ;;  %vm5701_vm6 = vweird.f32 %v6714_v58 }
 0x564   : > { %v5983_v10 = vadd.f32 %v6778_v54, %v5951_v25  ;;  %v5693_v24 = vsel %vm5690_vm15, %v5692_v0, %v5688_v50  ;;  %vm5702_vm13 = vmor %vm5700_vm10, %vm5701_vm6  ;;  %v5707_v23 = vor.u32 1.1754944e-38, %v5706_v5 }
 0x565   : > { %v5936_v59 = vmul.f32 %v5693_v24, %v10536_v61  ;;  %v5697_v33 = vsub.f32 1.0, %v5696_v56 }
 0x566   : > { %6015 = vst.msk [vmem:[%s10060_s12 + $0xf8] sm:$0xff] %vm10906_vm8, %v5983_v10 }
 0x567   : > { %v5968_v30 = vadd.f32 %v6779_v60, %v5936_v59  ;;  %v5698_v13 = vmul.f32 %v6714_v58, %v5697_v33 }
 0x569   : > { %6000 = vst.msk [vmem:[%s10060_s12 + $0x80] sm:$0xff] %vm10907_vm11, %v5968_v30  ;;  %v5699_v29 = vadd.f32 %v6714_v58, %v5698_v13 }
 0x56b   : > { %v5703_v55 = vsel %vm5702_vm13, %v6714_v58, %v5699_v29 }
 0x56c   : > { %v5708_v37 = vsel %vm5705_vm14, %v5707_v23, %v5703_v55 }
 0x56d   : > { %v5937_v48 = vmul.f32 %v5708_v37, %v10543_v4 }
 0x56f   : > { %v5969_v44 = vadd.f32 %v6780_v6, %v5937_v48 }
 0x571   : > { %6001 = vst.msk [vmem:[%s10060_s12 + $0x88] sm:$0xff] %vm10908_vm12, %v5969_v44 }
 0x572 PF: > { %s17_s24 = sadd.s32 1, %s6787_s24  }
 0x573   : > { %p14_p4 = scmp.ge.s32.totalorder %s17_s24, 4  }
 0x575   :  { %16 = sbr.rel (!%p14_p4) target bundleno = 1 (0x1), region = 82 }

</bundles_post_ra>
